<compile_context>
chip_gen: v6e
topology: v6e:2x2x1
jax: 0.10.0
libtpu: 0.0.40
codegen_flags: <defaults>
</compile_context>

<pallas_src>
import math

import jax
import jax.numpy as jnp
from jax.experimental import pallas as pl
from jax.experimental.pallas import tpu as pltpu

# ---- module constants (Time_GRU globals, small & documented) ----
D_RAW = 93            # input_length == hidden_length == 93
D = 128               # padded feature dim (lane-aligned)
TE_RAW = 4            # TIME_EMBED_SIZE
INPUT_LENGTH = 8
OUTPUT_LENGTH = 4
TOTAL_LENGTH = INPUT_LENGTH + OUTPUT_LENGTH

BB = 8                # sequences per grid step = M dimension of every dot


# ----------------------------------------------------------------------------
# Pallas kernel: full sequence for BB independent sequences per grid step
# ----------------------------------------------------------------------------
def seq_time_gru_kernel(x_ref, dt_ref,
                        wx1_ref, bx1_ref, wh1_ref, wtt1_ref,
                        wx2_ref, bx2_ref, wh2_ref, wtt2_ref,
                        wl_ref, bl_ref,
                        out_ref,
                        gx1_buf, gx2_buf, h1rows_buf, tt1_buf, tt2_buf, h2_buf):
    d = D
    bf16 = jnp.bfloat16

    # ---------------- Phase 0: batched, non-recurrent precompute -------------
    # Time-gate inner term sigmoid(delt @ Wtt) for every (step, sequence) of
    # both cells: two (96,128)x(128,128) bf16 matmuls.  No [r|z] zero padding.
    dt_bf = dt_ref[...].astype(bf16)                                  # (12*BB, 128)
    tt1_buf[...] = jax.nn.sigmoid(
        jnp.dot(dt_bf, wtt1_ref[...], preferred_element_type=jnp.float32))
    tt2_buf[...] = jax.nn.sigmoid(
        jnp.dot(dt_bf, wtt2_ref[...], preferred_element_type=jnp.float32))

    # Cell-1 x-gate pre-activations for the whole warm-up (x is not recurrent):
    # one (64,128)x(128,512) matmul, gate column layout [r|z|t|c], bias folded.
    gx1_buf[...] = (jnp.dot(x_ref[...].astype(bf16), wx1_ref[...],
                            preferred_element_type=jnp.float32)
                    + bx1_ref[...])

    # ---------------- Time_GRU cell ------------------------------------------
    # gx:   (BB, 4d) pre-activations [r|z|t|c] including all x/h biases
    # hdot: h @ wh with columns [r|z|ch] — only the gates h actually touches
    def cell_from_gx(gx, h, wh_ref, tt):
        hdot = jnp.dot(h.astype(bf16), wh_ref[...],
                       preferred_element_type=jnp.float32)            # (BB, 3d)
        rz = jax.nn.sigmoid(gx[:, :2 * d] + hdot[:, :2 * d])
        r = rz[:, 0:d]
        z = rz[:, d:2 * d]
        T = jax.nn.sigmoid(gx[:, 2 * d:3 * d] + tt)
        n = jnp.tanh(gx[:, 3 * d:4 * d] + r * hdot[:, 2 * d:3 * d]) * T
        return (1.0 - z) * n + z * h

    def cell_full(x, h, wx_ref, bx_ref, wh_ref, tt):
        gx = (jnp.dot(x.astype(bf16), wx_ref[...],
                      preferred_element_type=jnp.float32)
              + bx_ref[...])
        return cell_from_gx(gx, h, wh_ref, tt)

    h0 = jnp.zeros((BB, d), jnp.float32)

    # ---------------- warm-up, cell 1 only (de-serialized) -------------------
    def body_c1(i, h1):
        off = pl.multiple_of(i * BB, BB)
        h1 = cell_from_gx(gx1_buf[pl.ds(off, BB), :], h1, wh1_ref,
                          tt1_buf[pl.ds(off, BB), :])
        h1rows_buf[pl.ds(off, BB), :] = h1
        return h1

    h1 = jax.lax.fori_loop(0, INPUT_LENGTH, body_c1, h0, unroll=True)

    # Cell-2 warm-up x-gate pre-activations from the buffered h1 rows: ONE dot.
    gx2_buf[...] = (jnp.dot(h1rows_buf[...].astype(bf16), wx2_ref[...],
                            preferred_element_type=jnp.float32)
                    + bx2_ref[...])

    # ---------------- warm-up, cell 2 (only its h dot is on the chain) -------
    def body_c2(i, h2):
        off = pl.multiple_of(i * BB, BB)
        return cell_from_gx(gx2_buf[pl.ds(off, BB), :], h2, wh2_ref,
                            tt2_buf[pl.ds(off, BB), :])

    h2 = jax.lax.fori_loop(0, INPUT_LENGTH, body_c2, h0, unroll=True)

    # ---------------- autoregressive decode -----------------------------------
    def body_out(i, carry):
        h1, h2 = carry
        off = pl.multiple_of((INPUT_LENGTH + i) * BB, BB)
        tt1 = tt1_buf[pl.ds(off, BB), :]
        tt2 = tt2_buf[pl.ds(off, BB), :]
        h1 = cell_full(h2, h1, wx1_ref, bx1_ref, wh1_ref, tt1)
        h2 = cell_full(h1, h2, wx2_ref, bx2_ref, wh2_ref, tt2)
        ooff = pl.multiple_of(i * BB, BB)
        h2_buf[pl.ds(ooff, BB), :] = h2
        return (h1, h2)

    jax.lax.fori_loop(0, OUTPUT_LENGTH, body_out, (h1, h2), unroll=True)

    # Output Linear hoisted out of the decode loop: one (32,128)x(128,128)
    # matmul and one dense lane-aligned store.
    out_ref[...] = (jnp.dot(h2_buf[...].astype(bf16), wl_ref[...],
                            preferred_element_type=jnp.float32)
                    + bl_ref[...])


@jax.jit
def seq_time_gru_pallas(x_p, dt_p, params):
    NB = x_p.shape[0] // (INPUT_LENGTH * BB)   # number of batch blocks (grid)

    def rep(shape):
        # Weight / bias: full array, same block for every grid step.
        return pl.BlockSpec(shape, lambda nb: (0,) * len(shape))

    # Advisory cost estimate so XLA can schedule surrounding ops / DMAs.
    mm = lambda m, k, n: 2 * m * k * n
    flops = NB * (2 * mm(TOTAL_LENGTH * BB, D, D)                  # tt1, tt2
                  + 2 * mm(INPUT_LENGTH * BB, D, 4 * D)            # gx1, gx2
                  + 2 * INPUT_LENGTH * mm(BB, D, 3 * D)            # warm-up h dots
                  + OUTPUT_LENGTH * 2 * (mm(BB, D, 4 * D) + mm(BB, D, 3 * D))
                  + mm(OUTPUT_LENGTH * BB, D, D))                  # output linear
    trans = NB * (2 * TOTAL_LENGTH * BB * D                        # tt sigmoids
                  + 2 * TOTAL_LENGTH * BB * 4 * D)                 # gate sig/tanh
    weight_bytes = sum(int(p.size) * p.dtype.itemsize for p in params)
    act_bytes = (int(x_p.size) + int(dt_p.size)
                 + NB * OUTPUT_LENGTH * BB * D) * 4
    ce = pl.CostEstimate(flops=int(flops), transcendentals=int(trans),
                         bytes_accessed=int(weight_bytes + act_bytes))

    return pl.pallas_call(
        seq_time_gru_kernel,
        out_shape=jax.ShapeDtypeStruct((NB * OUTPUT_LENGTH * BB, D), jnp.float32),
        grid=(NB,),
        in_specs=[
            pl.BlockSpec((INPUT_LENGTH * BB, D), lambda nb: (nb, 0)),   # x
            pl.BlockSpec((TOTAL_LENGTH * BB, D), lambda nb: (nb, 0)),   # dt
            rep((D, 4 * D)), rep((1, 4 * D)), rep((D, 3 * D)), rep((D, D)),  # cell 1
            rep((D, 4 * D)), rep((1, 4 * D)), rep((D, 3 * D)), rep((D, D)),  # cell 2
            rep((D, D)), rep((1, D)),                                        # linear
        ],
        out_specs=pl.BlockSpec((OUTPUT_LENGTH * BB, D), lambda nb: (nb, 0)),
        scratch_shapes=[
            pltpu.VMEM((INPUT_LENGTH * BB, 4 * D), jnp.float32),   # gx1_buf
            pltpu.VMEM((INPUT_LENGTH * BB, 4 * D), jnp.float32),   # gx2_buf
            pltpu.VMEM((INPUT_LENGTH * BB, D), jnp.float32),       # h1rows_buf
            pltpu.VMEM((TOTAL_LENGTH * BB, D), jnp.float32),       # tt1_buf
            pltpu.VMEM((TOTAL_LENGTH * BB, D), jnp.float32),       # tt2_buf
            pltpu.VMEM((OUTPUT_LENGTH * BB, D), jnp.float32),      # h2_buf
        ],
        compiler_params=pltpu.CompilerParams(
            dimension_semantics=("parallel",)),   # v7x: blocks split over 2 TCs
        cost_estimate=ce,
    )(x_p, dt_p, *params)


# ----------------------------------------------------------------------------
# Deterministic parameter init (mirrors nn.Linear uniform(-1/sqrt(fan_in), ...))
# ----------------------------------------------------------------------------
def init_linear(key, fan_in, fan_out, bias=True):
    bound = 1.0 / math.sqrt(fan_in)
    kw, kb = jax.random.split(key)
    # Stored input-major (fan_in, fan_out): y = x @ W + b  (== torch x @ W.T + b)
    W = jax.random.uniform(kw, (fan_in, fan_out), jnp.float32, -bound, bound)
    if bias:
        b = jax.random.uniform(kb, (fan_out,), jnp.float32, -bound, bound)
    else:
        b = jnp.zeros((fan_out,), jnp.float32)
    return W, b


def init_time_gru(key):
    keys = jax.random.split(key, 8)
    p = {}
    p["Wrx"], p["brx"] = init_linear(keys[0], D_RAW, D_RAW, True)
    p["Wrh"], p["brh"] = init_linear(keys[1], D_RAW, D_RAW, True)
    p["Wzx"], p["bzx"] = init_linear(keys[2], D_RAW, D_RAW, True)
    p["Wzh"], p["bzh"] = init_linear(keys[3], D_RAW, D_RAW, True)
    p["Wcx"], p["bcx"] = init_linear(keys[4], D_RAW, D_RAW, True)
    p["Wch"], _        = init_linear(keys[5], D_RAW, D_RAW, False)
    p["Wtx"], p["btx"] = init_linear(keys[6], D_RAW, D_RAW, True)
    p["Wtt"], _        = init_linear(keys[7], TE_RAW, D_RAW, False)
    return p


def pad2(a, rows, cols):
    out = jnp.zeros((rows, cols), jnp.float32)
    return out.at[:a.shape[0], :a.shape[1]].set(a)


def pack_time_gru(p):
    """Pack one Time_GRU cell for the kernel.

    wx : (D, 4D) bf16, column blocks [r|z|t|c]   (x-side weights)
    bx : (1, 4D) f32 fused bias (x-bias + h-bias where both exist)
    wh : (D, 3D) bf16, column blocks [r|z|ch]    (only the gates h touches)
    wtt: (D, D)  bf16 time-embedding weight (rows >= TE_RAW are zero)

    INVARIANT: padded lanes (93..127) of every column block stay zero —
    especially the 'c' block of wx and 'ch' block of wh — so h's padded lanes
    remain exactly 0 through the recurrence.
    """
    d = D
    wx = jnp.zeros((d, 4 * d), jnp.float32)
    wx = wx.at[:D_RAW, 0 * d:0 * d + D_RAW].set(p["Wrx"])
    wx = wx.at[:D_RAW, 1 * d:1 * d + D_RAW].set(p["Wzx"])
    wx = wx.at[:D_RAW, 2 * d:2 * d + D_RAW].set(p["Wtx"])
    wx = wx.at[:D_RAW, 3 * d:3 * d + D_RAW].set(p["Wcx"])
    bx = jnp.zeros((1, 4 * d), jnp.float32)
    bx = bx.at[0, 0 * d:0 * d + D_RAW].set(p["brx"] + p["brh"])
    bx = bx.at[0, 1 * d:1 * d + D_RAW].set(p["bzx"] + p["bzh"])
    bx = bx.at[0, 2 * d:2 * d + D_RAW].set(p["btx"])
    bx = bx.at[0, 3 * d:3 * d + D_RAW].set(p["bcx"])
    wh = jnp.zeros((d, 3 * d), jnp.float32)
    wh = wh.at[:D_RAW, 0 * d:0 * d + D_RAW].set(p["Wrh"])
    wh = wh.at[:D_RAW, 1 * d:1 * d + D_RAW].set(p["Wzh"])
    wh = wh.at[:D_RAW, 2 * d:2 * d + D_RAW].set(p["Wch"])
    wtt = pad2(p["Wtt"], D, D)
    return (wx.astype(jnp.bfloat16), bx,
            wh.astype(jnp.bfloat16), wtt.astype(jnp.bfloat16))


# ----------------------------------------------------------------------------
# Pure-JAX per-sequence reference for verification.
#   mm_dtype=float32  -> exact original-module semantics
#   mm_dtype=bfloat16 -> same matmul-operand precision the kernel uses
# ----------------------------------------------------------------------------
def ref_cell(p, x, h, delt, dot):
    r = jax.nn.sigmoid(dot(x, p["Wrx"]) + p["brx"] + dot(h, p["Wrh"]) + p["brh"])
    z = jax.nn.sigmoid(dot(x, p["Wzx"]) + p["bzx"] + dot(h, p["Wzh"]) + p["bzh"])
    T = jax.nn.sigmoid(dot(x, p["Wtx"]) + p["btx"]
                       + jax.nn.sigmoid(dot(delt, p["Wtt"])))
    n = jnp.tanh(dot(x, p["Wcx"]) + p["bcx"] + r * dot(h, p["Wch"])) * T
    return (1.0 - z) * n + z * h


def reference_forward(x, t, ft, p1, p2, Wl, bl, mm_dtype):
    def dot(a, w):
        return jnp.dot(a.astype(mm_dtype), w.astype(mm_dtype),
                       preferred_element_type=jnp.float32)
    t = t / jnp.max(t)
    ft = ft / jnp.max(ft)
    h1 = jnp.zeros((1, D_RAW), jnp.float32)
    h2 = jnp.zeros((1, D_RAW), jnp.float32)
    for i in range(INPUT_LENGTH):
        h1 = ref_cell(p1, x[i], h1, t[i], dot)
        h2 = ref_cell(p2, h1, h2, t[i], dot)
    outs = []
    for i in range(OUTPUT_LENGTH):
        h1 = ref_cell(p1, h2, h1, ft[i], dot)
        h2 = ref_cell(p2, h1, h2, ft[i], dot)
        outs.append((dot(h2, Wl) + bl)[0])
    return jnp.stack(outs, 0)


# ----------------------------------------------------------------------------
if __name__ == "__main__":
    B = 16                      # independent sequences: 2 grid blocks x BB=8
    assert B % BB == 0
    NB = B // BB

    root = jax.random.PRNGKey(0)
    k_p1, k_p2, k_lin, k_x, k_t, k_ft = jax.random.split(root, 6)

    # Parameters (shared across all sequences, as in the module)
    p1 = init_time_gru(k_p1)
    p2 = init_time_gru(k_p2)
    Wl, bl_raw = init_linear(k_lin, D_RAW, D_RAW, True)

    # Inputs (torch shapes per sequence: x[i]->(1,93), t[i]/ft[i]->(1,TE))
    x = jax.random.normal(k_x, (B, INPUT_LENGTH, 1, D_RAW), jnp.float32)
    t = jax.random.uniform(k_t, (B, INPUT_LENGTH, 1, TE_RAW), jnp.float32, 0.1, 1.0)
    ft = jax.random.uniform(k_ft, (B, OUTPUT_LENGTH, 1, TE_RAW), jnp.float32, 0.1, 1.0)

    # --- glue: per-sequence max-normalization (as in forward), pad, interleave ---
    t_n = t / jnp.max(t, axis=(1, 2, 3), keepdims=True)
    ft_n = ft / jnp.max(ft, axis=(1, 2, 3), keepdims=True)

    def pad_last(a, width):
        return jnp.pad(a, [(0, 0)] * (a.ndim - 1) + [(0, width - a.shape[-1])])

    def pack_rows(a, steps):
        # (B, steps, D) -> (NB*steps*BB, D); row = ((nb*steps + step)*BB + seq)
        return (a.reshape(NB, BB, steps, D)
                 .transpose(0, 2, 1, 3)
                 .reshape(NB * steps * BB, D))

    x_p = pack_rows(pad_last(x[:, :, 0, :], D), INPUT_LENGTH)            # (NB*64,128)
    dt_all = jnp.concatenate([t_n[:, :, 0, :], ft_n[:, :, 0, :]], axis=1)  # (B,12,4)
    dt_p = pack_rows(pad_last(dt_all, D), TOTAL_LENGTH)                  # (NB*96,128)

    params = (*pack_time_gru(p1), *pack_time_gru(p2),
              pad2(Wl, D, D).astype(jnp.bfloat16), pad2(bl_raw[None, :], 1, D))

    out_flat = jax.block_until_ready(seq_time_gru_pallas(x_p, dt_p, params))
    out = (out_flat.reshape(NB, OUTPUT_LENGTH, BB, D)
           .transpose(0, 2, 1, 3)
           .reshape(B, OUTPUT_LENGTH, D)[:, :, :D_RAW])                  # (B, 4, 93)

    # --- verification: tight vs bf16-matmul reference, sanity vs f32 module ---
    ref_bf16 = jax.jit(lambda xs, ts, fs: reference_forward(
        xs, ts, fs, p1, p2, Wl, bl_raw, jnp.bfloat16))
    ref_f32 = jax.jit(lambda xs, ts, fs: reference_forward(
        xs, ts, fs, p1, p2, Wl, bl_raw, jnp.float32))

    for b in range(B):
        got = out[b]
        r_bf = ref_bf16(x[b], t[b], ft[b])
        r_fp = ref_f32(x[b], t[b], ft[b])
        assert got.shape == (OUTPUT_LENGTH, D_RAW)
        # kernel faithfully implements the bf16-operand computation
        err_bf = float(jnp.max(jnp.abs(got - r_bf)))
        assert jnp.allclose(got, r_bf, atol=3e-3, rtol=3e-3), (b, err_bf)
        # bf16 matmul operands stay close to the original f32 module semantics
        err_fp = float(jnp.max(jnp.abs(got - r_fp)))
        assert jnp.allclose(got, r_fp, atol=5e-2, rtol=0.0), (b, err_fp)

    print("KERNEL_OK")
</pallas_src>

<mosaic_0001>
module attributes {stable_mosaic.version = 11 : i64} {
  func.func @seq_time_gru_kernel(%arg0: i32, %arg1: memref<64x128xf32, #tpu.memory_space<vmem>>, %arg2: memref<96x128xf32, #tpu.memory_space<vmem>>, %arg3: memref<128x512xbf16, #tpu.memory_space<vmem>>, %arg4: memref<1x512xf32, #tpu.memory_space<vmem>>, %arg5: memref<128x384xbf16, #tpu.memory_space<vmem>>, %arg6: memref<128x128xbf16, #tpu.memory_space<vmem>>, %arg7: memref<128x512xbf16, #tpu.memory_space<vmem>>, %arg8: memref<1x512xf32, #tpu.memory_space<vmem>>, %arg9: memref<128x384xbf16, #tpu.memory_space<vmem>>, %arg10: memref<128x128xbf16, #tpu.memory_space<vmem>>, %arg11: memref<128x128xbf16, #tpu.memory_space<vmem>>, %arg12: memref<1x128xf32, #tpu.memory_space<vmem>>, %arg13: memref<32x128xf32, #tpu.memory_space<vmem>>, %arg14: memref<64x512xf32, #tpu.memory_space<vmem>>, %arg15: memref<64x512xf32, #tpu.memory_space<vmem>>, %arg16: memref<64x128xf32, #tpu.memory_space<vmem>>, %arg17: memref<96x128xf32, #tpu.memory_space<vmem>>, %arg18: memref<96x128xf32, #tpu.memory_space<vmem>>, %arg19: memref<32x128xf32, #tpu.memory_space<vmem>>) attributes {dimension_semantics = [#tpu.dimension_semantics<parallel>], iteration_bounds = array<i64: 2>, scalar_prefetch = 0 : i64, scratch_operands = 6 : i64, tpu.core_type = #tpu.core_type<tc>, window_params = [{transform_indices = @transform_0, window_bounds = array<i64: 64, 128>}, {transform_indices = @transform_1, window_bounds = array<i64: 96, 128>}, {pipeline_mode = #tpu.pipeline_mode<synchronous>, transform_indices = @transform_2, window_bounds = array<i64: 128, 512>}, {pipeline_mode = #tpu.pipeline_mode<synchronous>, transform_indices = @transform_3, window_bounds = array<i64: 1, 512>}, {pipeline_mode = #tpu.pipeline_mode<synchronous>, transform_indices = @transform_4, window_bounds = array<i64: 128, 384>}, {pipeline_mode = #tpu.pipeline_mode<synchronous>, transform_indices = @transform_5, window_bounds = array<i64: 128, 128>}, {pipeline_mode = #tpu.pipeline_mode<synchronous>, transform_indices = @transform_6, window_bounds = array<i64: 128, 512>}, {pipeline_mode = #tpu.pipeline_mode<synchronous>, transform_indices = @transform_7, window_bounds = array<i64: 1, 512>}, {pipeline_mode = #tpu.pipeline_mode<synchronous>, transform_indices = @transform_8, window_bounds = array<i64: 128, 384>}, {pipeline_mode = #tpu.pipeline_mode<synchronous>, transform_indices = @transform_9, window_bounds = array<i64: 128, 128>}, {pipeline_mode = #tpu.pipeline_mode<synchronous>, transform_indices = @transform_10, window_bounds = array<i64: 128, 128>}, {pipeline_mode = #tpu.pipeline_mode<synchronous>, transform_indices = @transform_11, window_bounds = array<i64: 1, 128>}, {transform_indices = @transform_12, window_bounds = array<i64: 32, 128>}]} {
    %c0 = arith.constant 0 : index
    %c0_0 = arith.constant 0 : index
    %0 = vector.load %arg2[%c0, %c0_0] : memref<96x128xf32, #tpu.memory_space<vmem>>, vector<96x128xf32>
    %1 = arith.truncf %0 : vector<96x128xf32> to vector<96x128xbf16>
    %c0_1 = arith.constant 0 : index
    %c0_2 = arith.constant 0 : index
    %2 = vector.load %arg6[%c0_1, %c0_2] : memref<128x128xbf16, #tpu.memory_space<vmem>>, vector<128x128xbf16>
    %cst = arith.constant dense<0.000000e+00> : vector<96x128xf32>
    %3 = tpu.matmul %1, %2, %cst {dimension_numbers = #tpu.dot_dimension_numbers<[1], [0], [0], [1], [0, 0, 1, 1], [], []>} : vector<96x128xbf16>, vector<128x128xbf16>, vector<96x128xf32> -> vector<96x128xf32>
    %4 = arith.negf %3 : vector<96x128xf32>
    %5 = math.exp %4 : vector<96x128xf32>
    %cst_3 = arith.constant 1.000000e+00 : f32
    %6 = vector.broadcast %cst_3 : f32 to vector<96x128xf32>
    %7 = arith.addf %6, %5 : vector<96x128xf32>
    %8 = arith.divf %6, %7 : vector<96x128xf32>
    %c0_4 = arith.constant 0 : index
    %c0_5 = arith.constant 0 : index
    %9 = vector.load %arg17[%c0_4, %c0_5] : memref<96x128xf32, #tpu.memory_space<vmem>>, vector<96x128xf32>
    tpu.vector_store %arg17[%c0_4, %c0_5], %8 {strides = array<i32>} : memref<96x128xf32, #tpu.memory_space<vmem>>, vector<96x128xf32>,
    %c0_6 = arith.constant 0 : index
    %c0_7 = arith.constant 0 : index
    %10 = vector.load %arg10[%c0_6, %c0_7] : memref<128x128xbf16, #tpu.memory_space<vmem>>, vector<128x128xbf16>
    %cst_8 = arith.constant dense<0.000000e+00> : vector<96x128xf32>
    %11 = tpu.matmul %1, %10, %cst_8 {dimension_numbers = #tpu.dot_dimension_numbers<[1], [0], [0], [1], [0, 0, 1, 1], [], []>} : vector<96x128xbf16>, vector<128x128xbf16>, vector<96x128xf32> -> vector<96x128xf32>
    %12 = arith.negf %11 : vector<96x128xf32>
    %13 = math.exp %12 : vector<96x128xf32>
    %cst_9 = arith.constant 1.000000e+00 : f32
    %14 = vector.broadcast %cst_9 : f32 to vector<96x128xf32>
    %15 = arith.addf %14, %13 : vector<96x128xf32>
    %16 = arith.divf %14, %15 : vector<96x128xf32>
    %c0_10 = arith.constant 0 : index
    %c0_11 = arith.constant 0 : index
    %17 = vector.load %arg18[%c0_10, %c0_11] : memref<96x128xf32, #tpu.memory_space<vmem>>, vector<96x128xf32>
    tpu.vector_store %arg18[%c0_10, %c0_11], %16 {strides = array<i32>} : memref<96x128xf32, #tpu.memory_space<vmem>>, vector<96x128xf32>,
    %c0_12 = arith.constant 0 : index
    %c0_13 = arith.constant 0 : index
    %18 = vector.load %arg1[%c0_12, %c0_13] : memref<64x128xf32, #tpu.memory_space<vmem>>, vector<64x128xf32>
    %19 = arith.truncf %18 : vector<64x128xf32> to vector<64x128xbf16>
    %c0_14 = arith.constant 0 : index
    %c0_15 = arith.constant 0 : index
    %20 = vector.load %arg3[%c0_14, %c0_15] : memref<128x512xbf16, #tpu.memory_space<vmem>>, vector<128x512xbf16>
    %cst_16 = arith.constant dense<0.000000e+00> : vector<64x512xf32>
    %21 = tpu.matmul %19, %20, %cst_16 {dimension_numbers = #tpu.dot_dimension_numbers<[1], [0], [0], [1], [0, 0, 1, 1], [], []>} : vector<64x128xbf16>, vector<128x512xbf16>, vector<64x512xf32> -> vector<64x512xf32>
    %c0_17 = arith.constant 0 : index
    %c0_18 = arith.constant 0 : index
    %22 = vector.load %arg4[%c0_17, %c0_18] : memref<1x512xf32, #tpu.memory_space<vmem>>, vector<1x512xf32>
    %23 = vector.broadcast %22 : vector<1x512xf32> to vector<64x512xf32>
    %24 = arith.addf %21, %23 : vector<64x512xf32>
    %c0_19 = arith.constant 0 : index
    %c0_20 = arith.constant 0 : index
    %25 = vector.load %arg14[%c0_19, %c0_20] : memref<64x512xf32, #tpu.memory_space<vmem>>, vector<64x512xf32>
    tpu.vector_store %arg14[%c0_19, %c0_20], %24 {strides = array<i32>} : memref<64x512xf32, #tpu.memory_space<vmem>>, vector<64x512xf32>,
    %cst_21 = arith.constant 0.000000e+00 : f32
    %26 = vector.broadcast %cst_21 : f32 to vector<8x128xf32>
    %c0_i32 = arith.constant 0 : i32
    %c8_i32 = arith.constant 8 : i32
    %27 = arith.muli %c0_i32, %c8_i32 : i32
    %28 = tpu.assume_multiple %27, 8 : i32
    %29 = arith.index_cast %28 : i32 to index
    %c0_22 = arith.constant 0 : index
    %30 = vector.load %arg14[%29, %c0_22] : memref<64x512xf32, #tpu.memory_space<vmem>>, vector<8x512xf32>
    %31 = arith.index_cast %28 : i32 to index
    %c0_23 = arith.constant 0 : index
    %32 = vector.load %arg17[%31, %c0_23] : memref<96x128xf32, #tpu.memory_space<vmem>>, vector<8x128xf32>
    %33 = arith.truncf %26 : vector<8x128xf32> to vector<8x128xbf16>
    %c0_24 = arith.constant 0 : index
    %c0_25 = arith.constant 0 : index
    %34 = vector.load %arg5[%c0_24, %c0_25] : memref<128x384xbf16, #tpu.memory_space<vmem>>, vector<128x384xbf16>
    %cst_26 = arith.constant dense<0.000000e+00> : vector<8x384xf32>
    %35 = tpu.matmul %33, %34, %cst_26 {dimension_numbers = #tpu.dot_dimension_numbers<[1], [0], [0], [1], [0, 0, 1, 1], [], []>} : vector<8x128xbf16>, vector<128x384xbf16>, vector<8x384xf32> -> vector<8x384xf32>
    %36 = vector.extract_strided_slice %30 {offsets = [0, 0], sizes = [8, 256], strides = [1, 1]} : vector<8x512xf32> to vector<8x256xf32>
    %37 = vector.extract_strided_slice %35 {offsets = [0, 0], sizes = [8, 256], strides = [1, 1]} : vector<8x384xf32> to vector<8x256xf32>
    %38 = arith.addf %36, %37 : vector<8x256xf32>
    %39 = arith.negf %38 : vector<8x256xf32>
    %40 = math.exp %39 : vector<8x256xf32>
    %cst_27 = arith.constant 1.000000e+00 : f32
    %41 = vector.broadcast %cst_27 : f32 to vector<8x256xf32>
    %42 = arith.addf %41, %40 : vector<8x256xf32>
    %43 = arith.divf %41, %42 : vector<8x256xf32>
    %44 = vector.extract_strided_slice %43 {offsets = [0, 0], sizes = [8, 128], strides = [1, 1]} : vector<8x256xf32> to vector<8x128xf32>
    %45 = vector.extract_strided_slice %43 {offsets = [0, 128], sizes = [8, 128], strides = [1, 1]} : vector<8x256xf32> to vector<8x128xf32>
    %46 = vector.extract_strided_slice %30 {offsets = [0, 256], sizes = [8, 128], strides = [1, 1]} : vector<8x512xf32> to vector<8x128xf32>
    %47 = arith.addf %46, %32 : vector<8x128xf32>
    %48 = arith.negf %47 : vector<8x128xf32>
    %49 = math.exp %48 : vector<8x128xf32>
    %cst_28 = arith.constant 1.000000e+00 : f32
    %50 = vector.broadcast %cst_28 : f32 to vector<8x128xf32>
    %51 = arith.addf %50, %49 : vector<8x128xf32>
    %52 = arith.divf %50, %51 : vector<8x128xf32>
    %53 = vector.extract_strided_slice %30 {offsets = [0, 384], sizes = [8, 128], strides = [1, 1]} : vector<8x512xf32> to vector<8x128xf32>
    %54 = vector.extract_strided_slice %35 {offsets = [0, 256], sizes = [8, 128], strides = [1, 1]} : vector<8x384xf32> to vector<8x128xf32>
    %55 = arith.mulf %44, %54 : vector<8x128xf32>
    %56 = arith.addf %53, %55 : vector<8x128xf32>
    %57 = math.tanh %56 : vector<8x128xf32>
    %58 = arith.mulf %57, %52 : vector<8x128xf32>
    %cst_29 = arith.constant 1.000000e+00 : f32
    %59 = vector.broadcast %cst_29 : f32 to vector<8x128xf32>
    %60 = arith.subf %59, %45 : vector<8x128xf32>
    %61 = arith.mulf %60, %58 : vector<8x128xf32>
    %62 = arith.mulf %45, %26 : vector<8x128xf32>
    %63 = arith.addf %61, %62 : vector<8x128xf32>
    %64 = arith.index_cast %28 : i32 to index
    %c0_30 = arith.constant 0 : index
    %65 = vector.load %arg16[%64, %c0_30] : memref<64x128xf32, #tpu.memory_space<vmem>>, vector<8x128xf32>
    tpu.vector_store %arg16[%64, %c0_30], %63 {strides = array<i32>} : memref<64x128xf32, #tpu.memory_space<vmem>>, vector<8x128xf32>,
    %c1_i32 = arith.constant 1 : i32
    %c8_i32_31 = arith.constant 8 : i32
    %66 = arith.muli %c1_i32, %c8_i32_31 : i32
    %67 = tpu.assume_multiple %66, 8 : i32
    %68 = arith.index_cast %67 : i32 to index
    %c0_32 = arith.constant 0 : index
    %69 = vector.load %arg14[%68, %c0_32] : memref<64x512xf32, #tpu.memory_space<vmem>>, vector<8x512xf32>
    %70 = arith.index_cast %67 : i32 to index
    %c0_33 = arith.constant 0 : index
    %71 = vector.load %arg17[%70, %c0_33] : memref<96x128xf32, #tpu.memory_space<vmem>>, vector<8x128xf32>
    %72 = arith.truncf %63 : vector<8x128xf32> to vector<8x128xbf16>
    %c0_34 = arith.constant 0 : index
    %c0_35 = arith.constant 0 : index
    %73 = vector.load %arg5[%c0_34, %c0_35] : memref<128x384xbf16, #tpu.memory_space<vmem>>, vector<128x384xbf16>
    %cst_36 = arith.constant dense<0.000000e+00> : vector<8x384xf32>
    %74 = tpu.matmul %72, %73, %cst_36 {dimension_numbers = #tpu.dot_dimension_numbers<[1], [0], [0], [1], [0, 0, 1, 1], [], []>} : vector<8x128xbf16>, vector<128x384xbf16>, vector<8x384xf32> -> vector<8x384xf32>
    %75 = vector.extract_strided_slice %69 {offsets = [0, 0], sizes = [8, 256], strides = [1, 1]} : vector<8x512xf32> to vector<8x256xf32>
    %76 = vector.extract_strided_slice %74 {offsets = [0, 0], sizes = [8, 256], strides = [1, 1]} : vector<8x384xf32> to vector<8x256xf32>
    %77 = arith.addf %75, %76 : vector<8x256xf32>
    %78 = arith.negf %77 : vector<8x256xf32>
    %79 = math.exp %78 : vector<8x256xf32>
    %cst_37 = arith.constant 1.000000e+00 : f32
    %80 = vector.broadcast %cst_37 : f32 to vector<8x256xf32>
    %81 = arith.addf %80, %79 : vector<8x256xf32>
    %82 = arith.divf %80, %81 : vector<8x256xf32>
    %83 = vector.extract_strided_slice %82 {offsets = [0, 0], sizes = [8, 128], strides = [1, 1]} : vector<8x256xf32> to vector<8x128xf32>
    %84 = vector.extract_strided_slice %82 {offsets = [0, 128], sizes = [8, 128], strides = [1, 1]} : vector<8x256xf32> to vector<8x128xf32>
    %85 = vector.extract_strided_slice %69 {offsets = [0, 256], sizes = [8, 128], strides = [1, 1]} : vector<8x512xf32> to vector<8x128xf32>
    %86 = arith.addf %85, %71 : vector<8x128xf32>
    %87 = arith.negf %86 : vector<8x128xf32>
    %88 = math.exp %87 : vector<8x128xf32>
    %cst_38 = arith.constant 1.000000e+00 : f32
    %89 = vector.broadcast %cst_38 : f32 to vector<8x128xf32>
    %90 = arith.addf %89, %88 : vector<8x128xf32>
    %91 = arith.divf %89, %90 : vector<8x128xf32>
    %92 = vector.extract_strided_slice %69 {offsets = [0, 384], sizes = [8, 128], strides = [1, 1]} : vector<8x512xf32> to vector<8x128xf32>
    %93 = vector.extract_strided_slice %74 {offsets = [0, 256], sizes = [8, 128], strides = [1, 1]} : vector<8x384xf32> to vector<8x128xf32>
    %94 = arith.mulf %83, %93 : vector<8x128xf32>
    %95 = arith.addf %92, %94 : vector<8x128xf32>
    %96 = math.tanh %95 : vector<8x128xf32>
    %97 = arith.mulf %96, %91 : vector<8x128xf32>
    %cst_39 = arith.constant 1.000000e+00 : f32
    %98 = vector.broadcast %cst_39 : f32 to vector<8x128xf32>
    %99 = arith.subf %98, %84 : vector<8x128xf32>
    %100 = arith.mulf %99, %97 : vector<8x128xf32>
    %101 = arith.mulf %84, %63 : vector<8x128xf32>
    %102 = arith.addf %100, %101 : vector<8x128xf32>
    %103 = arith.index_cast %67 : i32 to index
    %c0_40 = arith.constant 0 : index
    %104 = vector.load %arg16[%103, %c0_40] : memref<64x128xf32, #tpu.memory_space<vmem>>, vector<8x128xf32>
    tpu.vector_store %arg16[%103, %c0_40], %102 {strides = array<i32>} : memref<64x128xf32, #tpu.memory_space<vmem>>, vector<8x128xf32>,
    %c2_i32 = arith.constant 2 : i32
    %c8_i32_41 = arith.constant 8 : i32
    %105 = arith.muli %c2_i32, %c8_i32_41 : i32
    %106 = tpu.assume_multiple %105, 8 : i32
    %107 = arith.index_cast %106 : i32 to index
    %c0_42 = arith.constant 0 : index
    %108 = vector.load %arg14[%107, %c0_42] : memref<64x512xf32, #tpu.memory_space<vmem>>, vector<8x512xf32>
    %109 = arith.index_cast %106 : i32 to index
    %c0_43 = arith.constant 0 : index
    %110 = vector.load %arg17[%109, %c0_43] : memref<96x128xf32, #tpu.memory_space<vmem>>, vector<8x128xf32>
    %111 = arith.truncf %102 : vector<8x128xf32> to vector<8x128xbf16>
    %c0_44 = arith.constant 0 : index
    %c0_45 = arith.constant 0 : index
    %112 = vector.load %arg5[%c0_44, %c0_45] : memref<128x384xbf16, #tpu.memory_space<vmem>>, vector<128x384xbf16>
    %cst_46 = arith.constant dense<0.000000e+00> : vector<8x384xf32>
    %113 = tpu.matmul %111, %112, %cst_46 {dimension_numbers = #tpu.dot_dimension_numbers<[1], [0], [0], [1], [0, 0, 1, 1], [], []>} : vector<8x128xbf16>, vector<128x384xbf16>, vector<8x384xf32> -> vector<8x384xf32>
    %114 = vector.extract_strided_slice %108 {offsets = [0, 0], sizes = [8, 256], strides = [1, 1]} : vector<8x512xf32> to vector<8x256xf32>
    %115 = vector.extract_strided_slice %113 {offsets = [0, 0], sizes = [8, 256], strides = [1, 1]} : vector<8x384xf32> to vector<8x256xf32>
    %116 = arith.addf %114, %115 : vector<8x256xf32>
    %117 = arith.negf %116 : vector<8x256xf32>
    %118 = math.exp %117 : vector<8x256xf32>
    %cst_47 = arith.constant 1.000000e+00 : f32
    %119 = vector.broadcast %cst_47 : f32 to vector<8x256xf32>
    %120 = arith.addf %119, %118 : vector<8x256xf32>
    %121 = arith.divf %119, %120 : vector<8x256xf32>
    %122 = vector.extract_strided_slice %121 {offsets = [0, 0], sizes = [8, 128], strides = [1, 1]} : vector<8x256xf32> to vector<8x128xf32>
    %123 = vector.extract_strided_slice %121 {offsets = [0, 128], sizes = [8, 128], strides = [1, 1]} : vector<8x256xf32> to vector<8x128xf32>
    %124 = vector.extract_strided_slice %108 {offsets = [0, 256], sizes = [8, 128], strides = [1, 1]} : vector<8x512xf32> to vector<8x128xf32>
    %125 = arith.addf %124, %110 : vector<8x128xf32>
    %126 = arith.negf %125 : vector<8x128xf32>
    %127 = math.exp %126 : vector<8x128xf32>
    %cst_48 = arith.constant 1.000000e+00 : f32
    %128 = vector.broadcast %cst_48 : f32 to vector<8x128xf32>
    %129 = arith.addf %128, %127 : vector<8x128xf32>
    %130 = arith.divf %128, %129 : vector<8x128xf32>
    %131 = vector.extract_strided_slice %108 {offsets = [0, 384], sizes = [8, 128], strides = [1, 1]} : vector<8x512xf32> to vector<8x128xf32>
    %132 = vector.extract_strided_slice %113 {offsets = [0, 256], sizes = [8, 128], strides = [1, 1]} : vector<8x384xf32> to vector<8x128xf32>
    %133 = arith.mulf %122, %132 : vector<8x128xf32>
    %134 = arith.addf %131, %133 : vector<8x128xf32>
    %135 = math.tanh %134 : vector<8x128xf32>
    %136 = arith.mulf %135, %130 : vector<8x128xf32>
    %cst_49 = arith.constant 1.000000e+00 : f32
    %137 = vector.broadcast %cst_49 : f32 to vector<8x128xf32>
    %138 = arith.subf %137, %123 : vector<8x128xf32>
    %139 = arith.mulf %138, %136 : vector<8x128xf32>
    %140 = arith.mulf %123, %102 : vector<8x128xf32>
    %141 = arith.addf %139, %140 : vector<8x128xf32>
    %142 = arith.index_cast %106 : i32 to index
    %c0_50 = arith.constant 0 : index
    %143 = vector.load %arg16[%142, %c0_50] : memref<64x128xf32, #tpu.memory_space<vmem>>, vector<8x128xf32>
    tpu.vector_store %arg16[%142, %c0_50], %141 {strides = array<i32>} : memref<64x128xf32, #tpu.memory_space<vmem>>, vector<8x128xf32>,
    %c3_i32 = arith.constant 3 : i32
    %c8_i32_51 = arith.constant 8 : i32
    %144 = arith.muli %c3_i32, %c8_i32_51 : i32
    %145 = tpu.assume_multiple %144, 8 : i32
    %146 = arith.index_cast %145 : i32 to index
    %c0_52 = arith.constant 0 : index
    %147 = vector.load %arg14[%146, %c0_52] : memref<64x512xf32, #tpu.memory_space<vmem>>, vector<8x512xf32>
    %148 = arith.index_cast %145 : i32 to index
    %c0_53 = arith.constant 0 : index
    %149 = vector.load %arg17[%148, %c0_53] : memref<96x128xf32, #tpu.memory_space<vmem>>, vector<8x128xf32>
    %150 = arith.truncf %141 : vector<8x128xf32> to vector<8x128xbf16>
    %c0_54 = arith.constant 0 : index
    %c0_55 = arith.constant 0 : index
    %151 = vector.load %arg5[%c0_54, %c0_55] : memref<128x384xbf16, #tpu.memory_space<vmem>>, vector<128x384xbf16>
    %cst_56 = arith.constant dense<0.000000e+00> : vector<8x384xf32>
    %152 = tpu.matmul %150, %151, %cst_56 {dimension_numbers = #tpu.dot_dimension_numbers<[1], [0], [0], [1], [0, 0, 1, 1], [], []>} : vector<8x128xbf16>, vector<128x384xbf16>, vector<8x384xf32> -> vector<8x384xf32>
    %153 = vector.extract_strided_slice %147 {offsets = [0, 0], sizes = [8, 256], strides = [1, 1]} : vector<8x512xf32> to vector<8x256xf32>
    %154 = vector.extract_strided_slice %152 {offsets = [0, 0], sizes = [8, 256], strides = [1, 1]} : vector<8x384xf32> to vector<8x256xf32>
    %155 = arith.addf %153, %154 : vector<8x256xf32>
    %156 = arith.negf %155 : vector<8x256xf32>
    %157 = math.exp %156 : vector<8x256xf32>
    %cst_57 = arith.constant 1.000000e+00 : f32
    %158 = vector.broadcast %cst_57 : f32 to vector<8x256xf32>
    %159 = arith.addf %158, %157 : vector<8x256xf32>
    %160 = arith.divf %158, %159 : vector<8x256xf32>
    %161 = vector.extract_strided_slice %160 {offsets = [0, 0], sizes = [8, 128], strides = [1, 1]} : vector<8x256xf32> to vector<8x128xf32>
    %162 = vector.extract_strided_slice %160 {offsets = [0, 128], sizes = [8, 128], strides = [1, 1]} : vector<8x256xf32> to vector<8x128xf32>
    %163 = vector.extract_strided_slice %147 {offsets = [0, 256], sizes = [8, 128], strides = [1, 1]} : vector<8x512xf32> to vector<8x128xf32>
    %164 = arith.addf %163, %149 : vector<8x128xf32>
    %165 = arith.negf %164 : vector<8x128xf32>
    %166 = math.exp %165 : vector<8x128xf32>
    %cst_58 = arith.constant 1.000000e+00 : f32
    %167 = vector.broadcast %cst_58 : f32 to vector<8x128xf32>
    %168 = arith.addf %167, %166 : vector<8x128xf32>
    %169 = arith.divf %167, %168 : vector<8x128xf32>
    %170 = vector.extract_strided_slice %147 {offsets = [0, 384], sizes = [8, 128], strides = [1, 1]} : vector<8x512xf32> to vector<8x128xf32>
    %171 = vector.extract_strided_slice %152 {offsets = [0, 256], sizes = [8, 128], strides = [1, 1]} : vector<8x384xf32> to vector<8x128xf32>
    %172 = arith.mulf %161, %171 : vector<8x128xf32>
    %173 = arith.addf %170, %172 : vector<8x128xf32>
    %174 = math.tanh %173 : vector<8x128xf32>
    %175 = arith.mulf %174, %169 : vector<8x128xf32>
    %cst_59 = arith.constant 1.000000e+00 : f32
    %176 = vector.broadcast %cst_59 : f32 to vector<8x128xf32>
    %177 = arith.subf %176, %162 : vector<8x128xf32>
    %178 = arith.mulf %177, %175 : vector<8x128xf32>
    %179 = arith.mulf %162, %141 : vector<8x128xf32>
    %180 = arith.addf %178, %179 : vector<8x128xf32>
    %181 = arith.index_cast %145 : i32 to index
    %c0_60 = arith.constant 0 : index
    %182 = vector.load %arg16[%181, %c0_60] : memref<64x128xf32, #tpu.memory_space<vmem>>, vector<8x128xf32>
    tpu.vector_store %arg16[%181, %c0_60], %180 {strides = array<i32>} : memref<64x128xf32, #tpu.memory_space<vmem>>, vector<8x128xf32>,
    %c4_i32 = arith.constant 4 : i32
    %c8_i32_61 = arith.constant 8 : i32
    %183 = arith.muli %c4_i32, %c8_i32_61 : i32
    %184 = tpu.assume_multiple %183, 8 : i32
    %185 = arith.index_cast %184 : i32 to index
    %c0_62 = arith.constant 0 : index
    %186 = vector.load %arg14[%185, %c0_62] : memref<64x512xf32, #tpu.memory_space<vmem>>, vector<8x512xf32>
    %187 = arith.index_cast %184 : i32 to index
    %c0_63 = arith.constant 0 : index
    %188 = vector.load %arg17[%187, %c0_63] : memref<96x128xf32, #tpu.memory_space<vmem>>, vector<8x128xf32>
    %189 = arith.truncf %180 : vector<8x128xf32> to vector<8x128xbf16>
    %c0_64 = arith.constant 0 : index
    %c0_65 = arith.constant 0 : index
    %190 = vector.load %arg5[%c0_64, %c0_65] : memref<128x384xbf16, #tpu.memory_space<vmem>>, vector<128x384xbf16>
    %cst_66 = arith.constant dense<0.000000e+00> : vector<8x384xf32>
    %191 = tpu.matmul %189, %190, %cst_66 {dimension_numbers = #tpu.dot_dimension_numbers<[1], [0], [0], [1], [0, 0, 1, 1], [], []>} : vector<8x128xbf16>, vector<128x384xbf16>, vector<8x384xf32> -> vector<8x384xf32>
    %192 = vector.extract_strided_slice %186 {offsets = [0, 0], sizes = [8, 256], strides = [1, 1]} : vector<8x512xf32> to vector<8x256xf32>
    %193 = vector.extract_strided_slice %191 {offsets = [0, 0], sizes = [8, 256], strides = [1, 1]} : vector<8x384xf32> to vector<8x256xf32>
    %194 = arith.addf %192, %193 : vector<8x256xf32>
    %195 = arith.negf %194 : vector<8x256xf32>
    %196 = math.exp %195 : vector<8x256xf32>
    %cst_67 = arith.constant 1.000000e+00 : f32
    %197 = vector.broadcast %cst_67 : f32 to vector<8x256xf32>
    %198 = arith.addf %197, %196 : vector<8x256xf32>
    %199 = arith.divf %197, %198 : vector<8x256xf32>
    %200 = vector.extract_strided_slice %199 {offsets = [0, 0], sizes = [8, 128], strides = [1, 1]} : vector<8x256xf32> to vector<8x128xf32>
    %201 = vector.extract_strided_slice %199 {offsets = [0, 128], sizes = [8, 128], strides = [1, 1]} : vector<8x256xf32> to vector<8x128xf32>
    %202 = vector.extract_strided_slice %186 {offsets = [0, 256], sizes = [8, 128], strides = [1, 1]} : vector<8x512xf32> to vector<8x128xf32>
    %203 = arith.addf %202, %188 : vector<8x128xf32>
    %204 = arith.negf %203 : vector<8x128xf32>
    %205 = math.exp %204 : vector<8x128xf32>
    %cst_68 = arith.constant 1.000000e+00 : f32
    %206 = vector.broadcast %cst_68 : f32 to vector<8x128xf32>
    %207 = arith.addf %206, %205 : vector<8x128xf32>
    %208 = arith.divf %206, %207 : vector<8x128xf32>
    %209 = vector.extract_strided_slice %186 {offsets = [0, 384], sizes = [8, 128], strides = [1, 1]} : vector<8x512xf32> to vector<8x128xf32>
    %210 = vector.extract_strided_slice %191 {offsets = [0, 256], sizes = [8, 128], strides = [1, 1]} : vector<8x384xf32> to vector<8x128xf32>
    %211 = arith.mulf %200, %210 : vector<8x128xf32>
    %212 = arith.addf %209, %211 : vector<8x128xf32>
    %213 = math.tanh %212 : vector<8x128xf32>
    %214 = arith.mulf %213, %208 : vector<8x128xf32>
    %cst_69 = arith.constant 1.000000e+00 : f32
    %215 = vector.broadcast %cst_69 : f32 to vector<8x128xf32>
    %216 = arith.subf %215, %201 : vector<8x128xf32>
    %217 = arith.mulf %216, %214 : vector<8x128xf32>
    %218 = arith.mulf %201, %180 : vector<8x128xf32>
    %219 = arith.addf %217, %218 : vector<8x128xf32>
    %220 = arith.index_cast %184 : i32 to index
    %c0_70 = arith.constant 0 : index
    %221 = vector.load %arg16[%220, %c0_70] : memref<64x128xf32, #tpu.memory_space<vmem>>, vector<8x128xf32>
    tpu.vector_store %arg16[%220, %c0_70], %219 {strides = array<i32>} : memref<64x128xf32, #tpu.memory_space<vmem>>, vector<8x128xf32>,
    %c5_i32 = arith.constant 5 : i32
    %c8_i32_71 = arith.constant 8 : i32
    %222 = arith.muli %c5_i32, %c8_i32_71 : i32
    %223 = tpu.assume_multiple %222, 8 : i32
    %224 = arith.index_cast %223 : i32 to index
    %c0_72 = arith.constant 0 : index
    %225 = vector.load %arg14[%224, %c0_72] : memref<64x512xf32, #tpu.memory_space<vmem>>, vector<8x512xf32>
    %226 = arith.index_cast %223 : i32 to index
    %c0_73 = arith.constant 0 : index
    %227 = vector.load %arg17[%226, %c0_73] : memref<96x128xf32, #tpu.memory_space<vmem>>, vector<8x128xf32>
    %228 = arith.truncf %219 : vector<8x128xf32> to vector<8x128xbf16>
    %c0_74 = arith.constant 0 : index
    %c0_75 = arith.constant 0 : index
    %229 = vector.load %arg5[%c0_74, %c0_75] : memref<128x384xbf16, #tpu.memory_space<vmem>>, vector<128x384xbf16>
    %cst_76 = arith.constant dense<0.000000e+00> : vector<8x384xf32>
    %230 = tpu.matmul %228, %229, %cst_76 {dimension_numbers = #tpu.dot_dimension_numbers<[1], [0], [0], [1], [0, 0, 1, 1], [], []>} : vector<8x128xbf16>, vector<128x384xbf16>, vector<8x384xf32> -> vector<8x384xf32>
    %231 = vector.extract_strided_slice %225 {offsets = [0, 0], sizes = [8, 256], strides = [1, 1]} : vector<8x512xf32> to vector<8x256xf32>
    %232 = vector.extract_strided_slice %230 {offsets = [0, 0], sizes = [8, 256], strides = [1, 1]} : vector<8x384xf32> to vector<8x256xf32>
    %233 = arith.addf %231, %232 : vector<8x256xf32>
    %234 = arith.negf %233 : vector<8x256xf32>
    %235 = math.exp %234 : vector<8x256xf32>
    %cst_77 = arith.constant 1.000000e+00 : f32
    %236 = vector.broadcast %cst_77 : f32 to vector<8x256xf32>
    %237 = arith.addf %236, %235 : vector<8x256xf32>
    %238 = arith.divf %236, %237 : vector<8x256xf32>
    %239 = vector.extract_strided_slice %238 {offsets = [0, 0], sizes = [8, 128], strides = [1, 1]} : vector<8x256xf32> to vector<8x128xf32>
    %240 = vector.extract_strided_slice %238 {offsets = [0, 128], sizes = [8, 128], strides = [1, 1]} : vector<8x256xf32> to vector<8x128xf32>
    %241 = vector.extract_strided_slice %225 {offsets = [0, 256], sizes = [8, 128], strides = [1, 1]} : vector<8x512xf32> to vector<8x128xf32>
    %242 = arith.addf %241, %227 : vector<8x128xf32>
    %243 = arith.negf %242 : vector<8x128xf32>
    %244 = math.exp %243 : vector<8x128xf32>
    %cst_78 = arith.constant 1.000000e+00 : f32
    %245 = vector.broadcast %cst_78 : f32 to vector<8x128xf32>
    %246 = arith.addf %245, %244 : vector<8x128xf32>
    %247 = arith.divf %245, %246 : vector<8x128xf32>
    %248 = vector.extract_strided_slice %225 {offsets = [0, 384], sizes = [8, 128], strides = [1, 1]} : vector<8x512xf32> to vector<8x128xf32>
    %249 = vector.extract_strided_slice %230 {offsets = [0, 256], sizes = [8, 128], strides = [1, 1]} : vector<8x384xf32> to vector<8x128xf32>
    %250 = arith.mulf %239, %249 : vector<8x128xf32>
    %251 = arith.addf %248, %250 : vector<8x128xf32>
    %252 = math.tanh %251 : vector<8x128xf32>
    %253 = arith.mulf %252, %247 : vector<8x128xf32>
    %cst_79 = arith.constant 1.000000e+00 : f32
    %254 = vector.broadcast %cst_79 : f32 to vector<8x128xf32>
    %255 = arith.subf %254, %240 : vector<8x128xf32>
    %256 = arith.mulf %255, %253 : vector<8x128xf32>
    %257 = arith.mulf %240, %219 : vector<8x128xf32>
    %258 = arith.addf %256, %257 : vector<8x128xf32>
    %259 = arith.index_cast %223 : i32 to index
    %c0_80 = arith.constant 0 : index
    %260 = vector.load %arg16[%259, %c0_80] : memref<64x128xf32, #tpu.memory_space<vmem>>, vector<8x128xf32>
    tpu.vector_store %arg16[%259, %c0_80], %258 {strides = array<i32>} : memref<64x128xf32, #tpu.memory_space<vmem>>, vector<8x128xf32>,
    %c6_i32 = arith.constant 6 : i32
    %c8_i32_81 = arith.constant 8 : i32
    %261 = arith.muli %c6_i32, %c8_i32_81 : i32
    %262 = tpu.assume_multiple %261, 8 : i32
    %263 = arith.index_cast %262 : i32 to index
    %c0_82 = arith.constant 0 : index
    %264 = vector.load %arg14[%263, %c0_82] : memref<64x512xf32, #tpu.memory_space<vmem>>, vector<8x512xf32>
    %265 = arith.index_cast %262 : i32 to index
    %c0_83 = arith.constant 0 : index
    %266 = vector.load %arg17[%265, %c0_83] : memref<96x128xf32, #tpu.memory_space<vmem>>, vector<8x128xf32>
    %267 = arith.truncf %258 : vector<8x128xf32> to vector<8x128xbf16>
    %c0_84 = arith.constant 0 : index
    %c0_85 = arith.constant 0 : index
    %268 = vector.load %arg5[%c0_84, %c0_85] : memref<128x384xbf16, #tpu.memory_space<vmem>>, vector<128x384xbf16>
    %cst_86 = arith.constant dense<0.000000e+00> : vector<8x384xf32>
    %269 = tpu.matmul %267, %268, %cst_86 {dimension_numbers = #tpu.dot_dimension_numbers<[1], [0], [0], [1], [0, 0, 1, 1], [], []>} : vector<8x128xbf16>, vector<128x384xbf16>, vector<8x384xf32> -> vector<8x384xf32>
    %270 = vector.extract_strided_slice %264 {offsets = [0, 0], sizes = [8, 256], strides = [1, 1]} : vector<8x512xf32> to vector<8x256xf32>
    %271 = vector.extract_strided_slice %269 {offsets = [0, 0], sizes = [8, 256], strides = [1, 1]} : vector<8x384xf32> to vector<8x256xf32>
    %272 = arith.addf %270, %271 : vector<8x256xf32>
    %273 = arith.negf %272 : vector<8x256xf32>
    %274 = math.exp %273 : vector<8x256xf32>
    %cst_87 = arith.constant 1.000000e+00 : f32
    %275 = vector.broadcast %cst_87 : f32 to vector<8x256xf32>
    %276 = arith.addf %275, %274 : vector<8x256xf32>
    %277 = arith.divf %275, %276 : vector<8x256xf32>
    %278 = vector.extract_strided_slice %277 {offsets = [0, 0], sizes = [8, 128], strides = [1, 1]} : vector<8x256xf32> to vector<8x128xf32>
    %279 = vector.extract_strided_slice %277 {offsets = [0, 128], sizes = [8, 128], strides = [1, 1]} : vector<8x256xf32> to vector<8x128xf32>
    %280 = vector.extract_strided_slice %264 {offsets = [0, 256], sizes = [8, 128], strides = [1, 1]} : vector<8x512xf32> to vector<8x128xf32>
    %281 = arith.addf %280, %266 : vector<8x128xf32>
    %282 = arith.negf %281 : vector<8x128xf32>
    %283 = math.exp %282 : vector<8x128xf32>
    %cst_88 = arith.constant 1.000000e+00 : f32
    %284 = vector.broadcast %cst_88 : f32 to vector<8x128xf32>
    %285 = arith.addf %284, %283 : vector<8x128xf32>
    %286 = arith.divf %284, %285 : vector<8x128xf32>
    %287 = vector.extract_strided_slice %264 {offsets = [0, 384], sizes = [8, 128], strides = [1, 1]} : vector<8x512xf32> to vector<8x128xf32>
    %288 = vector.extract_strided_slice %269 {offsets = [0, 256], sizes = [8, 128], strides = [1, 1]} : vector<8x384xf32> to vector<8x128xf32>
    %289 = arith.mulf %278, %288 : vector<8x128xf32>
    %290 = arith.addf %287, %289 : vector<8x128xf32>
    %291 = math.tanh %290 : vector<8x128xf32>
    %292 = arith.mulf %291, %286 : vector<8x128xf32>
    %cst_89 = arith.constant 1.000000e+00 : f32
    %293 = vector.broadcast %cst_89 : f32 to vector<8x128xf32>
    %294 = arith.subf %293, %279 : vector<8x128xf32>
    %295 = arith.mulf %294, %292 : vector<8x128xf32>
    %296 = arith.mulf %279, %258 : vector<8x128xf32>
    %297 = arith.addf %295, %296 : vector<8x128xf32>
    %298 = arith.index_cast %262 : i32 to index
    %c0_90 = arith.constant 0 : index
    %299 = vector.load %arg16[%298, %c0_90] : memref<64x128xf32, #tpu.memory_space<vmem>>, vector<8x128xf32>
    tpu.vector_store %arg16[%298, %c0_90], %297 {strides = array<i32>} : memref<64x128xf32, #tpu.memory_space<vmem>>, vector<8x128xf32>,
    %c7_i32 = arith.constant 7 : i32
    %c8_i32_91 = arith.constant 8 : i32
    %300 = arith.muli %c7_i32, %c8_i32_91 : i32
    %301 = tpu.assume_multiple %300, 8 : i32
    %302 = arith.index_cast %301 : i32 to index
    %c0_92 = arith.constant 0 : index
    %303 = vector.load %arg14[%302, %c0_92] : memref<64x512xf32, #tpu.memory_space<vmem>>, vector<8x512xf32>
    %304 = arith.index_cast %301 : i32 to index
    %c0_93 = arith.constant 0 : index
    %305 = vector.load %arg17[%304, %c0_93] : memref<96x128xf32, #tpu.memory_space<vmem>>, vector<8x128xf32>
    %306 = arith.truncf %297 : vector<8x128xf32> to vector<8x128xbf16>
    %c0_94 = arith.constant 0 : index
    %c0_95 = arith.constant 0 : index
    %307 = vector.load %arg5[%c0_94, %c0_95] : memref<128x384xbf16, #tpu.memory_space<vmem>>, vector<128x384xbf16>
    %cst_96 = arith.constant dense<0.000000e+00> : vector<8x384xf32>
    %308 = tpu.matmul %306, %307, %cst_96 {dimension_numbers = #tpu.dot_dimension_numbers<[1], [0], [0], [1], [0, 0, 1, 1], [], []>} : vector<8x128xbf16>, vector<128x384xbf16>, vector<8x384xf32> -> vector<8x384xf32>
    %309 = vector.extract_strided_slice %303 {offsets = [0, 0], sizes = [8, 256], strides = [1, 1]} : vector<8x512xf32> to vector<8x256xf32>
    %310 = vector.extract_strided_slice %308 {offsets = [0, 0], sizes = [8, 256], strides = [1, 1]} : vector<8x384xf32> to vector<8x256xf32>
    %311 = arith.addf %309, %310 : vector<8x256xf32>
    %312 = arith.negf %311 : vector<8x256xf32>
    %313 = math.exp %312 : vector<8x256xf32>
    %cst_97 = arith.constant 1.000000e+00 : f32
    %314 = vector.broadcast %cst_97 : f32 to vector<8x256xf32>
    %315 = arith.addf %314, %313 : vector<8x256xf32>
    %316 = arith.divf %314, %315 : vector<8x256xf32>
    %317 = vector.extract_strided_slice %316 {offsets = [0, 0], sizes = [8, 128], strides = [1, 1]} : vector<8x256xf32> to vector<8x128xf32>
    %318 = vector.extract_strided_slice %316 {offsets = [0, 128], sizes = [8, 128], strides = [1, 1]} : vector<8x256xf32> to vector<8x128xf32>
    %319 = vector.extract_strided_slice %303 {offsets = [0, 256], sizes = [8, 128], strides = [1, 1]} : vector<8x512xf32> to vector<8x128xf32>
    %320 = arith.addf %319, %305 : vector<8x128xf32>
    %321 = arith.negf %320 : vector<8x128xf32>
    %322 = math.exp %321 : vector<8x128xf32>
    %cst_98 = arith.constant 1.000000e+00 : f32
    %323 = vector.broadcast %cst_98 : f32 to vector<8x128xf32>
    %324 = arith.addf %323, %322 : vector<8x128xf32>
    %325 = arith.divf %323, %324 : vector<8x128xf32>
    %326 = vector.extract_strided_slice %303 {offsets = [0, 384], sizes = [8, 128], strides = [1, 1]} : vector<8x512xf32> to vector<8x128xf32>
    %327 = vector.extract_strided_slice %308 {offsets = [0, 256], sizes = [8, 128], strides = [1, 1]} : vector<8x384xf32> to vector<8x128xf32>
    %328 = arith.mulf %317, %327 : vector<8x128xf32>
    %329 = arith.addf %326, %328 : vector<8x128xf32>
    %330 = math.tanh %329 : vector<8x128xf32>
    %331 = arith.mulf %330, %325 : vector<8x128xf32>
    %cst_99 = arith.constant 1.000000e+00 : f32
    %332 = vector.broadcast %cst_99 : f32 to vector<8x128xf32>
    %333 = arith.subf %332, %318 : vector<8x128xf32>
    %334 = arith.mulf %333, %331 : vector<8x128xf32>
    %335 = arith.mulf %318, %297 : vector<8x128xf32>
    %336 = arith.addf %334, %335 : vector<8x128xf32>
    %337 = arith.index_cast %301 : i32 to index
    %c0_100 = arith.constant 0 : index
    %338 = vector.load %arg16[%337, %c0_100] : memref<64x128xf32, #tpu.memory_space<vmem>>, vector<8x128xf32>
    tpu.vector_store %arg16[%337, %c0_100], %336 {strides = array<i32>} : memref<64x128xf32, #tpu.memory_space<vmem>>, vector<8x128xf32>,
    %c8_i32_101 = arith.constant 8 : i32
    %c0_102 = arith.constant 0 : index
    %c0_103 = arith.constant 0 : index
    %339 = vector.load %arg16[%c0_102, %c0_103] : memref<64x128xf32, #tpu.memory_space<vmem>>, vector<64x128xf32>
    %340 = arith.truncf %339 : vector<64x128xf32> to vector<64x128xbf16>
    %c0_104 = arith.constant 0 : index
    %c0_105 = arith.constant 0 : index
    %341 = vector.load %arg7[%c0_104, %c0_105] : memref<128x512xbf16, #tpu.memory_space<vmem>>, vector<128x512xbf16>
    %cst_106 = arith.constant dense<0.000000e+00> : vector<64x512xf32>
    %342 = tpu.matmul %340, %341, %cst_106 {dimension_numbers = #tpu.dot_dimension_numbers<[1], [0], [0], [1], [0, 0, 1, 1], [], []>} : vector<64x128xbf16>, vector<128x512xbf16>, vector<64x512xf32> -> vector<64x512xf32>
    %c0_107 = arith.constant 0 : index
    %c0_108 = arith.constant 0 : index
    %343 = vector.load %arg8[%c0_107, %c0_108] : memref<1x512xf32, #tpu.memory_space<vmem>>, vector<1x512xf32>
    %344 = vector.broadcast %343 : vector<1x512xf32> to vector<64x512xf32>
    %345 = arith.addf %342, %344 : vector<64x512xf32>
    %c0_109 = arith.constant 0 : index
    %c0_110 = arith.constant 0 : index
    %346 = vector.load %arg15[%c0_109, %c0_110] : memref<64x512xf32, #tpu.memory_space<vmem>>, vector<64x512xf32>
    tpu.vector_store %arg15[%c0_109, %c0_110], %345 {strides = array<i32>} : memref<64x512xf32, #tpu.memory_space<vmem>>, vector<64x512xf32>,
    %c0_i32_111 = arith.constant 0 : i32
    %c8_i32_112 = arith.constant 8 : i32
    %347 = arith.muli %c0_i32_111, %c8_i32_112 : i32
    %348 = tpu.assume_multiple %347, 8 : i32
    %349 = arith.index_cast %348 : i32 to index
    %c0_113 = arith.constant 0 : index
    %350 = vector.load %arg15[%349, %c0_113] : memref<64x512xf32, #tpu.memory_space<vmem>>, vector<8x512xf32>
    %351 = arith.index_cast %348 : i32 to index
    %c0_114 = arith.constant 0 : index
    %352 = vector.load %arg18[%351, %c0_114] : memref<96x128xf32, #tpu.memory_space<vmem>>, vector<8x128xf32>
    %353 = arith.truncf %26 : vector<8x128xf32> to vector<8x128xbf16>
    %c0_115 = arith.constant 0 : index
    %c0_116 = arith.constant 0 : index
    %354 = vector.load %arg9[%c0_115, %c0_116] : memref<128x384xbf16, #tpu.memory_space<vmem>>, vector<128x384xbf16>
    %cst_117 = arith.constant dense<0.000000e+00> : vector<8x384xf32>
    %355 = tpu.matmul %353, %354, %cst_117 {dimension_numbers = #tpu.dot_dimension_numbers<[1], [0], [0], [1], [0, 0, 1, 1], [], []>} : vector<8x128xbf16>, vector<128x384xbf16>, vector<8x384xf32> -> vector<8x384xf32>
    %356 = vector.extract_strided_slice %350 {offsets = [0, 0], sizes = [8, 256], strides = [1, 1]} : vector<8x512xf32> to vector<8x256xf32>
    %357 = vector.extract_strided_slice %355 {offsets = [0, 0], sizes = [8, 256], strides = [1, 1]} : vector<8x384xf32> to vector<8x256xf32>
    %358 = arith.addf %356, %357 : vector<8x256xf32>
    %359 = arith.negf %358 : vector<8x256xf32>
    %360 = math.exp %359 : vector<8x256xf32>
    %cst_118 = arith.constant 1.000000e+00 : f32
    %361 = vector.broadcast %cst_118 : f32 to vector<8x256xf32>
    %362 = arith.addf %361, %360 : vector<8x256xf32>
    %363 = arith.divf %361, %362 : vector<8x256xf32>
    %364 = vector.extract_strided_slice %363 {offsets = [0, 0], sizes = [8, 128], strides = [1, 1]} : vector<8x256xf32> to vector<8x128xf32>
    %365 = vector.extract_strided_slice %363 {offsets = [0, 128], sizes = [8, 128], strides = [1, 1]} : vector<8x256xf32> to vector<8x128xf32>
    %366 = vector.extract_strided_slice %350 {offsets = [0, 256], sizes = [8, 128], strides = [1, 1]} : vector<8x512xf32> to vector<8x128xf32>
    %367 = arith.addf %366, %352 : vector<8x128xf32>
    %368 = arith.negf %367 : vector<8x128xf32>
    %369 = math.exp %368 : vector<8x128xf32>
    %cst_119 = arith.constant 1.000000e+00 : f32
    %370 = vector.broadcast %cst_119 : f32 to vector<8x128xf32>
    %371 = arith.addf %370, %369 : vector<8x128xf32>
    %372 = arith.divf %370, %371 : vector<8x128xf32>
    %373 = vector.extract_strided_slice %350 {offsets = [0, 384], sizes = [8, 128], strides = [1, 1]} : vector<8x512xf32> to vector<8x128xf32>
    %374 = vector.extract_strided_slice %355 {offsets = [0, 256], sizes = [8, 128], strides = [1, 1]} : vector<8x384xf32> to vector<8x128xf32>
    %375 = arith.mulf %364, %374 : vector<8x128xf32>
    %376 = arith.addf %373, %375 : vector<8x128xf32>
    %377 = math.tanh %376 : vector<8x128xf32>
    %378 = arith.mulf %377, %372 : vector<8x128xf32>
    %cst_120 = arith.constant 1.000000e+00 : f32
    %379 = vector.broadcast %cst_120 : f32 to vector<8x128xf32>
    %380 = arith.subf %379, %365 : vector<8x128xf32>
    %381 = arith.mulf %380, %378 : vector<8x128xf32>
    %382 = arith.mulf %365, %26 : vector<8x128xf32>
    %383 = arith.addf %381, %382 : vector<8x128xf32>
    %c1_i32_121 = arith.constant 1 : i32
    %c8_i32_122 = arith.constant 8 : i32
    %384 = arith.muli %c1_i32_121, %c8_i32_122 : i32
    %385 = tpu.assume_multiple %384, 8 : i32
    %386 = arith.index_cast %385 : i32 to index
    %c0_123 = arith.constant 0 : index
    %387 = vector.load %arg15[%386, %c0_123] : memref<64x512xf32, #tpu.memory_space<vmem>>, vector<8x512xf32>
    %388 = arith.index_cast %385 : i32 to index
    %c0_124 = arith.constant 0 : index
    %389 = vector.load %arg18[%388, %c0_124] : memref<96x128xf32, #tpu.memory_space<vmem>>, vector<8x128xf32>
    %390 = arith.truncf %383 : vector<8x128xf32> to vector<8x128xbf16>
    %c0_125 = arith.constant 0 : index
    %c0_126 = arith.constant 0 : index
    %391 = vector.load %arg9[%c0_125, %c0_126] : memref<128x384xbf16, #tpu.memory_space<vmem>>, vector<128x384xbf16>
    %cst_127 = arith.constant dense<0.000000e+00> : vector<8x384xf32>
    %392 = tpu.matmul %390, %391, %cst_127 {dimension_numbers = #tpu.dot_dimension_numbers<[1], [0], [0], [1], [0, 0, 1, 1], [], []>} : vector<8x128xbf16>, vector<128x384xbf16>, vector<8x384xf32> -> vector<8x384xf32>
    %393 = vector.extract_strided_slice %387 {offsets = [0, 0], sizes = [8, 256], strides = [1, 1]} : vector<8x512xf32> to vector<8x256xf32>
    %394 = vector.extract_strided_slice %392 {offsets = [0, 0], sizes = [8, 256], strides = [1, 1]} : vector<8x384xf32> to vector<8x256xf32>
    %395 = arith.addf %393, %394 : vector<8x256xf32>
    %396 = arith.negf %395 : vector<8x256xf32>
    %397 = math.exp %396 : vector<8x256xf32>
    %cst_128 = arith.constant 1.000000e+00 : f32
    %398 = vector.broadcast %cst_128 : f32 to vector<8x256xf32>
    %399 = arith.addf %398, %397 : vector<8x256xf32>
    %400 = arith.divf %398, %399 : vector<8x256xf32>
    %401 = vector.extract_strided_slice %400 {offsets = [0, 0], sizes = [8, 128], strides = [1, 1]} : vector<8x256xf32> to vector<8x128xf32>
    %402 = vector.extract_strided_slice %400 {offsets = [0, 128], sizes = [8, 128], strides = [1, 1]} : vector<8x256xf32> to vector<8x128xf32>
    %403 = vector.extract_strided_slice %387 {offsets = [0, 256], sizes = [8, 128], strides = [1, 1]} : vector<8x512xf32> to vector<8x128xf32>
    %404 = arith.addf %403, %389 : vector<8x128xf32>
    %405 = arith.negf %404 : vector<8x128xf32>
    %406 = math.exp %405 : vector<8x128xf32>
    %cst_129 = arith.constant 1.000000e+00 : f32
    %407 = vector.broadcast %cst_129 : f32 to vector<8x128xf32>
    %408 = arith.addf %407, %406 : vector<8x128xf32>
    %409 = arith.divf %407, %408 : vector<8x128xf32>
    %410 = vector.extract_strided_slice %387 {offsets = [0, 384], sizes = [8, 128], strides = [1, 1]} : vector<8x512xf32> to vector<8x128xf32>
    %411 = vector.extract_strided_slice %392 {offsets = [0, 256], sizes = [8, 128], strides = [1, 1]} : vector<8x384xf32> to vector<8x128xf32>
    %412 = arith.mulf %401, %411 : vector<8x128xf32>
    %413 = arith.addf %410, %412 : vector<8x128xf32>
    %414 = math.tanh %413 : vector<8x128xf32>
    %415 = arith.mulf %414, %409 : vector<8x128xf32>
    %cst_130 = arith.constant 1.000000e+00 : f32
    %416 = vector.broadcast %cst_130 : f32 to vector<8x128xf32>
    %417 = arith.subf %416, %402 : vector<8x128xf32>
    %418 = arith.mulf %417, %415 : vector<8x128xf32>
    %419 = arith.mulf %402, %383 : vector<8x128xf32>
    %420 = arith.addf %418, %419 : vector<8x128xf32>
    %c2_i32_131 = arith.constant 2 : i32
    %c8_i32_132 = arith.constant 8 : i32
    %421 = arith.muli %c2_i32_131, %c8_i32_132 : i32
    %422 = tpu.assume_multiple %421, 8 : i32
    %423 = arith.index_cast %422 : i32 to index
    %c0_133 = arith.constant 0 : index
    %424 = vector.load %arg15[%423, %c0_133] : memref<64x512xf32, #tpu.memory_space<vmem>>, vector<8x512xf32>
    %425 = arith.index_cast %422 : i32 to index
    %c0_134 = arith.constant 0 : index
    %426 = vector.load %arg18[%425, %c0_134] : memref<96x128xf32, #tpu.memory_space<vmem>>, vector<8x128xf32>
    %427 = arith.truncf %420 : vector<8x128xf32> to vector<8x128xbf16>
    %c0_135 = arith.constant 0 : index
    %c0_136 = arith.constant 0 : index
    %428 = vector.load %arg9[%c0_135, %c0_136] : memref<128x384xbf16, #tpu.memory_space<vmem>>, vector<128x384xbf16>
    %cst_137 = arith.constant dense<0.000000e+00> : vector<8x384xf32>
    %429 = tpu.matmul %427, %428, %cst_137 {dimension_numbers = #tpu.dot_dimension_numbers<[1], [0], [0], [1], [0, 0, 1, 1], [], []>} : vector<8x128xbf16>, vector<128x384xbf16>, vector<8x384xf32> -> vector<8x384xf32>
    %430 = vector.extract_strided_slice %424 {offsets = [0, 0], sizes = [8, 256], strides = [1, 1]} : vector<8x512xf32> to vector<8x256xf32>
    %431 = vector.extract_strided_slice %429 {offsets = [0, 0], sizes = [8, 256], strides = [1, 1]} : vector<8x384xf32> to vector<8x256xf32>
    %432 = arith.addf %430, %431 : vector<8x256xf32>
    %433 = arith.negf %432 : vector<8x256xf32>
    %434 = math.exp %433 : vector<8x256xf32>
    %cst_138 = arith.constant 1.000000e+00 : f32
    %435 = vector.broadcast %cst_138 : f32 to vector<8x256xf32>
    %436 = arith.addf %435, %434 : vector<8x256xf32>
    %437 = arith.divf %435, %436 : vector<8x256xf32>
    %438 = vector.extract_strided_slice %437 {offsets = [0, 0], sizes = [8, 128], strides = [1, 1]} : vector<8x256xf32> to vector<8x128xf32>
    %439 = vector.extract_strided_slice %437 {offsets = [0, 128], sizes = [8, 128], strides = [1, 1]} : vector<8x256xf32> to vector<8x128xf32>
    %440 = vector.extract_strided_slice %424 {offsets = [0, 256], sizes = [8, 128], strides = [1, 1]} : vector<8x512xf32> to vector<8x128xf32>
    %441 = arith.addf %440, %426 : vector<8x128xf32>
    %442 = arith.negf %441 : vector<8x128xf32>
    %443 = math.exp %442 : vector<8x128xf32>
    %cst_139 = arith.constant 1.000000e+00 : f32
    %444 = vector.broadcast %cst_139 : f32 to vector<8x128xf32>
    %445 = arith.addf %444, %443 : vector<8x128xf32>
    %446 = arith.divf %444, %445 : vector<8x128xf32>
    %447 = vector.extract_strided_slice %424 {offsets = [0, 384], sizes = [8, 128], strides = [1, 1]} : vector<8x512xf32> to vector<8x128xf32>
    %448 = vector.extract_strided_slice %429 {offsets = [0, 256], sizes = [8, 128], strides = [1, 1]} : vector<8x384xf32> to vector<8x128xf32>
    %449 = arith.mulf %438, %448 : vector<8x128xf32>
    %450 = arith.addf %447, %449 : vector<8x128xf32>
    %451 = math.tanh %450 : vector<8x128xf32>
    %452 = arith.mulf %451, %446 : vector<8x128xf32>
    %cst_140 = arith.constant 1.000000e+00 : f32
    %453 = vector.broadcast %cst_140 : f32 to vector<8x128xf32>
    %454 = arith.subf %453, %439 : vector<8x128xf32>
    %455 = arith.mulf %454, %452 : vector<8x128xf32>
    %456 = arith.mulf %439, %420 : vector<8x128xf32>
    %457 = arith.addf %455, %456 : vector<8x128xf32>
    %c3_i32_141 = arith.constant 3 : i32
    %c8_i32_142 = arith.constant 8 : i32
    %458 = arith.muli %c3_i32_141, %c8_i32_142 : i32
    %459 = tpu.assume_multiple %458, 8 : i32
    %460 = arith.index_cast %459 : i32 to index
    %c0_143 = arith.constant 0 : index
    %461 = vector.load %arg15[%460, %c0_143] : memref<64x512xf32, #tpu.memory_space<vmem>>, vector<8x512xf32>
    %462 = arith.index_cast %459 : i32 to index
    %c0_144 = arith.constant 0 : index
    %463 = vector.load %arg18[%462, %c0_144] : memref<96x128xf32, #tpu.memory_space<vmem>>, vector<8x128xf32>
    %464 = arith.truncf %457 : vector<8x128xf32> to vector<8x128xbf16>
    %c0_145 = arith.constant 0 : index
    %c0_146 = arith.constant 0 : index
    %465 = vector.load %arg9[%c0_145, %c0_146] : memref<128x384xbf16, #tpu.memory_space<vmem>>, vector<128x384xbf16>
    %cst_147 = arith.constant dense<0.000000e+00> : vector<8x384xf32>
    %466 = tpu.matmul %464, %465, %cst_147 {dimension_numbers = #tpu.dot_dimension_numbers<[1], [0], [0], [1], [0, 0, 1, 1], [], []>} : vector<8x128xbf16>, vector<128x384xbf16>, vector<8x384xf32> -> vector<8x384xf32>
    %467 = vector.extract_strided_slice %461 {offsets = [0, 0], sizes = [8, 256], strides = [1, 1]} : vector<8x512xf32> to vector<8x256xf32>
    %468 = vector.extract_strided_slice %466 {offsets = [0, 0], sizes = [8, 256], strides = [1, 1]} : vector<8x384xf32> to vector<8x256xf32>
    %469 = arith.addf %467, %468 : vector<8x256xf32>
    %470 = arith.negf %469 : vector<8x256xf32>
    %471 = math.exp %470 : vector<8x256xf32>
    %cst_148 = arith.constant 1.000000e+00 : f32
    %472 = vector.broadcast %cst_148 : f32 to vector<8x256xf32>
    %473 = arith.addf %472, %471 : vector<8x256xf32>
    %474 = arith.divf %472, %473 : vector<8x256xf32>
    %475 = vector.extract_strided_slice %474 {offsets = [0, 0], sizes = [8, 128], strides = [1, 1]} : vector<8x256xf32> to vector<8x128xf32>
    %476 = vector.extract_strided_slice %474 {offsets = [0, 128], sizes = [8, 128], strides = [1, 1]} : vector<8x256xf32> to vector<8x128xf32>
    %477 = vector.extract_strided_slice %461 {offsets = [0, 256], sizes = [8, 128], strides = [1, 1]} : vector<8x512xf32> to vector<8x128xf32>
    %478 = arith.addf %477, %463 : vector<8x128xf32>
    %479 = arith.negf %478 : vector<8x128xf32>
    %480 = math.exp %479 : vector<8x128xf32>
    %cst_149 = arith.constant 1.000000e+00 : f32
    %481 = vector.broadcast %cst_149 : f32 to vector<8x128xf32>
    %482 = arith.addf %481, %480 : vector<8x128xf32>
    %483 = arith.divf %481, %482 : vector<8x128xf32>
    %484 = vector.extract_strided_slice %461 {offsets = [0, 384], sizes = [8, 128], strides = [1, 1]} : vector<8x512xf32> to vector<8x128xf32>
    %485 = vector.extract_strided_slice %466 {offsets = [0, 256], sizes = [8, 128], strides = [1, 1]} : vector<8x384xf32> to vector<8x128xf32>
    %486 = arith.mulf %475, %485 : vector<8x128xf32>
    %487 = arith.addf %484, %486 : vector<8x128xf32>
    %488 = math.tanh %487 : vector<8x128xf32>
    %489 = arith.mulf %488, %483 : vector<8x128xf32>
    %cst_150 = arith.constant 1.000000e+00 : f32
    %490 = vector.broadcast %cst_150 : f32 to vector<8x128xf32>
    %491 = arith.subf %490, %476 : vector<8x128xf32>
    %492 = arith.mulf %491, %489 : vector<8x128xf32>
    %493 = arith.mulf %476, %457 : vector<8x128xf32>
    %494 = arith.addf %492, %493 : vector<8x128xf32>
    %c4_i32_151 = arith.constant 4 : i32
    %c8_i32_152 = arith.constant 8 : i32
    %495 = arith.muli %c4_i32_151, %c8_i32_152 : i32
    %496 = tpu.assume_multiple %495, 8 : i32
    %497 = arith.index_cast %496 : i32 to index
    %c0_153 = arith.constant 0 : index
    %498 = vector.load %arg15[%497, %c0_153] : memref<64x512xf32, #tpu.memory_space<vmem>>, vector<8x512xf32>
    %499 = arith.index_cast %496 : i32 to index
    %c0_154 = arith.constant 0 : index
    %500 = vector.load %arg18[%499, %c0_154] : memref<96x128xf32, #tpu.memory_space<vmem>>, vector<8x128xf32>
    %501 = arith.truncf %494 : vector<8x128xf32> to vector<8x128xbf16>
    %c0_155 = arith.constant 0 : index
    %c0_156 = arith.constant 0 : index
    %502 = vector.load %arg9[%c0_155, %c0_156] : memref<128x384xbf16, #tpu.memory_space<vmem>>, vector<128x384xbf16>
    %cst_157 = arith.constant dense<0.000000e+00> : vector<8x384xf32>
    %503 = tpu.matmul %501, %502, %cst_157 {dimension_numbers = #tpu.dot_dimension_numbers<[1], [0], [0], [1], [0, 0, 1, 1], [], []>} : vector<8x128xbf16>, vector<128x384xbf16>, vector<8x384xf32> -> vector<8x384xf32>
    %504 = vector.extract_strided_slice %498 {offsets = [0, 0], sizes = [8, 256], strides = [1, 1]} : vector<8x512xf32> to vector<8x256xf32>
    %505 = vector.extract_strided_slice %503 {offsets = [0, 0], sizes = [8, 256], strides = [1, 1]} : vector<8x384xf32> to vector<8x256xf32>
    %506 = arith.addf %504, %505 : vector<8x256xf32>
    %507 = arith.negf %506 : vector<8x256xf32>
    %508 = math.exp %507 : vector<8x256xf32>
    %cst_158 = arith.constant 1.000000e+00 : f32
    %509 = vector.broadcast %cst_158 : f32 to vector<8x256xf32>
    %510 = arith.addf %509, %508 : vector<8x256xf32>
    %511 = arith.divf %509, %510 : vector<8x256xf32>
    %512 = vector.extract_strided_slice %511 {offsets = [0, 0], sizes = [8, 128], strides = [1, 1]} : vector<8x256xf32> to vector<8x128xf32>
    %513 = vector.extract_strided_slice %511 {offsets = [0, 128], sizes = [8, 128], strides = [1, 1]} : vector<8x256xf32> to vector<8x128xf32>
    %514 = vector.extract_strided_slice %498 {offsets = [0, 256], sizes = [8, 128], strides = [1, 1]} : vector<8x512xf32> to vector<8x128xf32>
    %515 = arith.addf %514, %500 : vector<8x128xf32>
    %516 = arith.negf %515 : vector<8x128xf32>
    %517 = math.exp %516 : vector<8x128xf32>
    %cst_159 = arith.constant 1.000000e+00 : f32
    %518 = vector.broadcast %cst_159 : f32 to vector<8x128xf32>
    %519 = arith.addf %518, %517 : vector<8x128xf32>
    %520 = arith.divf %518, %519 : vector<8x128xf32>
    %521 = vector.extract_strided_slice %498 {offsets = [0, 384], sizes = [8, 128], strides = [1, 1]} : vector<8x512xf32> to vector<8x128xf32>
    %522 = vector.extract_strided_slice %503 {offsets = [0, 256], sizes = [8, 128], strides = [1, 1]} : vector<8x384xf32> to vector<8x128xf32>
    %523 = arith.mulf %512, %522 : vector<8x128xf32>
    %524 = arith.addf %521, %523 : vector<8x128xf32>
    %525 = math.tanh %524 : vector<8x128xf32>
    %526 = arith.mulf %525, %520 : vector<8x128xf32>
    %cst_160 = arith.constant 1.000000e+00 : f32
    %527 = vector.broadcast %cst_160 : f32 to vector<8x128xf32>
    %528 = arith.subf %527, %513 : vector<8x128xf32>
    %529 = arith.mulf %528, %526 : vector<8x128xf32>
    %530 = arith.mulf %513, %494 : vector<8x128xf32>
    %531 = arith.addf %529, %530 : vector<8x128xf32>
    %c5_i32_161 = arith.constant 5 : i32
    %c8_i32_162 = arith.constant 8 : i32
    %532 = arith.muli %c5_i32_161, %c8_i32_162 : i32
    %533 = tpu.assume_multiple %532, 8 : i32
    %534 = arith.index_cast %533 : i32 to index
    %c0_163 = arith.constant 0 : index
    %535 = vector.load %arg15[%534, %c0_163] : memref<64x512xf32, #tpu.memory_space<vmem>>, vector<8x512xf32>
    %536 = arith.index_cast %533 : i32 to index
    %c0_164 = arith.constant 0 : index
    %537 = vector.load %arg18[%536, %c0_164] : memref<96x128xf32, #tpu.memory_space<vmem>>, vector<8x128xf32>
    %538 = arith.truncf %531 : vector<8x128xf32> to vector<8x128xbf16>
    %c0_165 = arith.constant 0 : index
    %c0_166 = arith.constant 0 : index
    %539 = vector.load %arg9[%c0_165, %c0_166] : memref<128x384xbf16, #tpu.memory_space<vmem>>, vector<128x384xbf16>
    %cst_167 = arith.constant dense<0.000000e+00> : vector<8x384xf32>
    %540 = tpu.matmul %538, %539, %cst_167 {dimension_numbers = #tpu.dot_dimension_numbers<[1], [0], [0], [1], [0, 0, 1, 1], [], []>} : vector<8x128xbf16>, vector<128x384xbf16>, vector<8x384xf32> -> vector<8x384xf32>
    %541 = vector.extract_strided_slice %535 {offsets = [0, 0], sizes = [8, 256], strides = [1, 1]} : vector<8x512xf32> to vector<8x256xf32>
    %542 = vector.extract_strided_slice %540 {offsets = [0, 0], sizes = [8, 256], strides = [1, 1]} : vector<8x384xf32> to vector<8x256xf32>
    %543 = arith.addf %541, %542 : vector<8x256xf32>
    %544 = arith.negf %543 : vector<8x256xf32>
    %545 = math.exp %544 : vector<8x256xf32>
    %cst_168 = arith.constant 1.000000e+00 : f32
    %546 = vector.broadcast %cst_168 : f32 to vector<8x256xf32>
    %547 = arith.addf %546, %545 : vector<8x256xf32>
    %548 = arith.divf %546, %547 : vector<8x256xf32>
    %549 = vector.extract_strided_slice %548 {offsets = [0, 0], sizes = [8, 128], strides = [1, 1]} : vector<8x256xf32> to vector<8x128xf32>
    %550 = vector.extract_strided_slice %548 {offsets = [0, 128], sizes = [8, 128], strides = [1, 1]} : vector<8x256xf32> to vector<8x128xf32>
    %551 = vector.extract_strided_slice %535 {offsets = [0, 256], sizes = [8, 128], strides = [1, 1]} : vector<8x512xf32> to vector<8x128xf32>
    %552 = arith.addf %551, %537 : vector<8x128xf32>
    %553 = arith.negf %552 : vector<8x128xf32>
    %554 = math.exp %553 : vector<8x128xf32>
    %cst_169 = arith.constant 1.000000e+00 : f32
    %555 = vector.broadcast %cst_169 : f32 to vector<8x128xf32>
    %556 = arith.addf %555, %554 : vector<8x128xf32>
    %557 = arith.divf %555, %556 : vector<8x128xf32>
    %558 = vector.extract_strided_slice %535 {offsets = [0, 384], sizes = [8, 128], strides = [1, 1]} : vector<8x512xf32> to vector<8x128xf32>
    %559 = vector.extract_strided_slice %540 {offsets = [0, 256], sizes = [8, 128], strides = [1, 1]} : vector<8x384xf32> to vector<8x128xf32>
    %560 = arith.mulf %549, %559 : vector<8x128xf32>
    %561 = arith.addf %558, %560 : vector<8x128xf32>
    %562 = math.tanh %561 : vector<8x128xf32>
    %563 = arith.mulf %562, %557 : vector<8x128xf32>
    %cst_170 = arith.constant 1.000000e+00 : f32
    %564 = vector.broadcast %cst_170 : f32 to vector<8x128xf32>
    %565 = arith.subf %564, %550 : vector<8x128xf32>
    %566 = arith.mulf %565, %563 : vector<8x128xf32>
    %567 = arith.mulf %550, %531 : vector<8x128xf32>
    %568 = arith.addf %566, %567 : vector<8x128xf32>
    %c6_i32_171 = arith.constant 6 : i32
    %c8_i32_172 = arith.constant 8 : i32
    %569 = arith.muli %c6_i32_171, %c8_i32_172 : i32
    %570 = tpu.assume_multiple %569, 8 : i32
    %571 = arith.index_cast %570 : i32 to index
    %c0_173 = arith.constant 0 : index
    %572 = vector.load %arg15[%571, %c0_173] : memref<64x512xf32, #tpu.memory_space<vmem>>, vector<8x512xf32>
    %573 = arith.index_cast %570 : i32 to index
    %c0_174 = arith.constant 0 : index
    %574 = vector.load %arg18[%573, %c0_174] : memref<96x128xf32, #tpu.memory_space<vmem>>, vector<8x128xf32>
    %575 = arith.truncf %568 : vector<8x128xf32> to vector<8x128xbf16>
    %c0_175 = arith.constant 0 : index
    %c0_176 = arith.constant 0 : index
    %576 = vector.load %arg9[%c0_175, %c0_176] : memref<128x384xbf16, #tpu.memory_space<vmem>>, vector<128x384xbf16>
    %cst_177 = arith.constant dense<0.000000e+00> : vector<8x384xf32>
    %577 = tpu.matmul %575, %576, %cst_177 {dimension_numbers = #tpu.dot_dimension_numbers<[1], [0], [0], [1], [0, 0, 1, 1], [], []>} : vector<8x128xbf16>, vector<128x384xbf16>, vector<8x384xf32> -> vector<8x384xf32>
    %578 = vector.extract_strided_slice %572 {offsets = [0, 0], sizes = [8, 256], strides = [1, 1]} : vector<8x512xf32> to vector<8x256xf32>
    %579 = vector.extract_strided_slice %577 {offsets = [0, 0], sizes = [8, 256], strides = [1, 1]} : vector<8x384xf32> to vector<8x256xf32>
    %580 = arith.addf %578, %579 : vector<8x256xf32>
    %581 = arith.negf %580 : vector<8x256xf32>
    %582 = math.exp %581 : vector<8x256xf32>
    %cst_178 = arith.constant 1.000000e+00 : f32
    %583 = vector.broadcast %cst_178 : f32 to vector<8x256xf32>
    %584 = arith.addf %583, %582 : vector<8x256xf32>
    %585 = arith.divf %583, %584 : vector<8x256xf32>
    %586 = vector.extract_strided_slice %585 {offsets = [0, 0], sizes = [8, 128], strides = [1, 1]} : vector<8x256xf32> to vector<8x128xf32>
    %587 = vector.extract_strided_slice %585 {offsets = [0, 128], sizes = [8, 128], strides = [1, 1]} : vector<8x256xf32> to vector<8x128xf32>
    %588 = vector.extract_strided_slice %572 {offsets = [0, 256], sizes = [8, 128], strides = [1, 1]} : vector<8x512xf32> to vector<8x128xf32>
    %589 = arith.addf %588, %574 : vector<8x128xf32>
    %590 = arith.negf %589 : vector<8x128xf32>
    %591 = math.exp %590 : vector<8x128xf32>
    %cst_179 = arith.constant 1.000000e+00 : f32
    %592 = vector.broadcast %cst_179 : f32 to vector<8x128xf32>
    %593 = arith.addf %592, %591 : vector<8x128xf32>
    %594 = arith.divf %592, %593 : vector<8x128xf32>
    %595 = vector.extract_strided_slice %572 {offsets = [0, 384], sizes = [8, 128], strides = [1, 1]} : vector<8x512xf32> to vector<8x128xf32>
    %596 = vector.extract_strided_slice %577 {offsets = [0, 256], sizes = [8, 128], strides = [1, 1]} : vector<8x384xf32> to vector<8x128xf32>
    %597 = arith.mulf %586, %596 : vector<8x128xf32>
    %598 = arith.addf %595, %597 : vector<8x128xf32>
    %599 = math.tanh %598 : vector<8x128xf32>
    %600 = arith.mulf %599, %594 : vector<8x128xf32>
    %cst_180 = arith.constant 1.000000e+00 : f32
    %601 = vector.broadcast %cst_180 : f32 to vector<8x128xf32>
    %602 = arith.subf %601, %587 : vector<8x128xf32>
    %603 = arith.mulf %602, %600 : vector<8x128xf32>
    %604 = arith.mulf %587, %568 : vector<8x128xf32>
    %605 = arith.addf %603, %604 : vector<8x128xf32>
    %c7_i32_181 = arith.constant 7 : i32
    %c8_i32_182 = arith.constant 8 : i32
    %606 = arith.muli %c7_i32_181, %c8_i32_182 : i32
    %607 = tpu.assume_multiple %606, 8 : i32
    %608 = arith.index_cast %607 : i32 to index
    %c0_183 = arith.constant 0 : index
    %609 = vector.load %arg15[%608, %c0_183] : memref<64x512xf32, #tpu.memory_space<vmem>>, vector<8x512xf32>
    %610 = arith.index_cast %607 : i32 to index
    %c0_184 = arith.constant 0 : index
    %611 = vector.load %arg18[%610, %c0_184] : memref<96x128xf32, #tpu.memory_space<vmem>>, vector<8x128xf32>
    %612 = arith.truncf %605 : vector<8x128xf32> to vector<8x128xbf16>
    %c0_185 = arith.constant 0 : index
    %c0_186 = arith.constant 0 : index
    %613 = vector.load %arg9[%c0_185, %c0_186] : memref<128x384xbf16, #tpu.memory_space<vmem>>, vector<128x384xbf16>
    %cst_187 = arith.constant dense<0.000000e+00> : vector<8x384xf32>
    %614 = tpu.matmul %612, %613, %cst_187 {dimension_numbers = #tpu.dot_dimension_numbers<[1], [0], [0], [1], [0, 0, 1, 1], [], []>} : vector<8x128xbf16>, vector<128x384xbf16>, vector<8x384xf32> -> vector<8x384xf32>
    %615 = vector.extract_strided_slice %609 {offsets = [0, 0], sizes = [8, 256], strides = [1, 1]} : vector<8x512xf32> to vector<8x256xf32>
    %616 = vector.extract_strided_slice %614 {offsets = [0, 0], sizes = [8, 256], strides = [1, 1]} : vector<8x384xf32> to vector<8x256xf32>
    %617 = arith.addf %615, %616 : vector<8x256xf32>
    %618 = arith.negf %617 : vector<8x256xf32>
    %619 = math.exp %618 : vector<8x256xf32>
    %cst_188 = arith.constant 1.000000e+00 : f32
    %620 = vector.broadcast %cst_188 : f32 to vector<8x256xf32>
    %621 = arith.addf %620, %619 : vector<8x256xf32>
    %622 = arith.divf %620, %621 : vector<8x256xf32>
    %623 = vector.extract_strided_slice %622 {offsets = [0, 0], sizes = [8, 128], strides = [1, 1]} : vector<8x256xf32> to vector<8x128xf32>
    %624 = vector.extract_strided_slice %622 {offsets = [0, 128], sizes = [8, 128], strides = [1, 1]} : vector<8x256xf32> to vector<8x128xf32>
    %625 = vector.extract_strided_slice %609 {offsets = [0, 256], sizes = [8, 128], strides = [1, 1]} : vector<8x512xf32> to vector<8x128xf32>
    %626 = arith.addf %625, %611 : vector<8x128xf32>
    %627 = arith.negf %626 : vector<8x128xf32>
    %628 = math.exp %627 : vector<8x128xf32>
    %cst_189 = arith.constant 1.000000e+00 : f32
    %629 = vector.broadcast %cst_189 : f32 to vector<8x128xf32>
    %630 = arith.addf %629, %628 : vector<8x128xf32>
    %631 = arith.divf %629, %630 : vector<8x128xf32>
    %632 = vector.extract_strided_slice %609 {offsets = [0, 384], sizes = [8, 128], strides = [1, 1]} : vector<8x512xf32> to vector<8x128xf32>
    %633 = vector.extract_strided_slice %614 {offsets = [0, 256], sizes = [8, 128], strides = [1, 1]} : vector<8x384xf32> to vector<8x128xf32>
    %634 = arith.mulf %623, %633 : vector<8x128xf32>
    %635 = arith.addf %632, %634 : vector<8x128xf32>
    %636 = math.tanh %635 : vector<8x128xf32>
    %637 = arith.mulf %636, %631 : vector<8x128xf32>
    %cst_190 = arith.constant 1.000000e+00 : f32
    %638 = vector.broadcast %cst_190 : f32 to vector<8x128xf32>
    %639 = arith.subf %638, %624 : vector<8x128xf32>
    %640 = arith.mulf %639, %637 : vector<8x128xf32>
    %641 = arith.mulf %624, %605 : vector<8x128xf32>
    %642 = arith.addf %640, %641 : vector<8x128xf32>
    %c8_i32_191 = arith.constant 8 : i32
    %c0_i32_192 = arith.constant 0 : i32
    %c8_i32_193 = arith.constant 8 : i32
    %643 = arith.addi %c8_i32_193, %c0_i32_192 : i32
    %c8_i32_194 = arith.constant 8 : i32
    %644 = arith.muli %643, %c8_i32_194 : i32
    %645 = tpu.assume_multiple %644, 8 : i32
    %646 = arith.index_cast %645 : i32 to index
    %c0_195 = arith.constant 0 : index
    %647 = vector.load %arg17[%646, %c0_195] : memref<96x128xf32, #tpu.memory_space<vmem>>, vector<8x128xf32>
    %648 = arith.index_cast %645 : i32 to index
    %c0_196 = arith.constant 0 : index
    %649 = vector.load %arg18[%648, %c0_196] : memref<96x128xf32, #tpu.memory_space<vmem>>, vector<8x128xf32>
    %650 = arith.truncf %642 : vector<8x128xf32> to vector<8x128xbf16>
    %c0_197 = arith.constant 0 : index
    %c0_198 = arith.constant 0 : index
    %651 = vector.load %arg3[%c0_197, %c0_198] : memref<128x512xbf16, #tpu.memory_space<vmem>>, vector<128x512xbf16>
    %cst_199 = arith.constant dense<0.000000e+00> : vector<8x512xf32>
    %652 = tpu.matmul %650, %651, %cst_199 {dimension_numbers = #tpu.dot_dimension_numbers<[1], [0], [0], [1], [0, 0, 1, 1], [], []>} : vector<8x128xbf16>, vector<128x512xbf16>, vector<8x512xf32> -> vector<8x512xf32>
    %c0_200 = arith.constant 0 : index
    %c0_201 = arith.constant 0 : index
    %653 = vector.load %arg4[%c0_200, %c0_201] : memref<1x512xf32, #tpu.memory_space<vmem>>, vector<1x512xf32>
    %654 = vector.broadcast %653 : vector<1x512xf32> to vector<8x512xf32>
    %655 = arith.addf %652, %654 : vector<8x512xf32>
    %656 = arith.truncf %336 : vector<8x128xf32> to vector<8x128xbf16>
    %c0_202 = arith.constant 0 : index
    %c0_203 = arith.constant 0 : index
    %657 = vector.load %arg5[%c0_202, %c0_203] : memref<128x384xbf16, #tpu.memory_space<vmem>>, vector<128x384xbf16>
    %cst_204 = arith.constant dense<0.000000e+00> : vector<8x384xf32>
    %658 = tpu.matmul %656, %657, %cst_204 {dimension_numbers = #tpu.dot_dimension_numbers<[1], [0], [0], [1], [0, 0, 1, 1], [], []>} : vector<8x128xbf16>, vector<128x384xbf16>, vector<8x384xf32> -> vector<8x384xf32>
    %659 = vector.extract_strided_slice %655 {offsets = [0, 0], sizes = [8, 256], strides = [1, 1]} : vector<8x512xf32> to vector<8x256xf32>
    %660 = vector.extract_strided_slice %658 {offsets = [0, 0], sizes = [8, 256], strides = [1, 1]} : vector<8x384xf32> to vector<8x256xf32>
    %661 = arith.addf %659, %660 : vector<8x256xf32>
    %662 = arith.negf %661 : vector<8x256xf32>
    %663 = math.exp %662 : vector<8x256xf32>
    %cst_205 = arith.constant 1.000000e+00 : f32
    %664 = vector.broadcast %cst_205 : f32 to vector<8x256xf32>
    %665 = arith.addf %664, %663 : vector<8x256xf32>
    %666 = arith.divf %664, %665 : vector<8x256xf32>
    %667 = vector.extract_strided_slice %666 {offsets = [0, 0], sizes = [8, 128], strides = [1, 1]} : vector<8x256xf32> to vector<8x128xf32>
    %668 = vector.extract_strided_slice %666 {offsets = [0, 128], sizes = [8, 128], strides = [1, 1]} : vector<8x256xf32> to vector<8x128xf32>
    %669 = vector.extract_strided_slice %655 {offsets = [0, 256], sizes = [8, 128], strides = [1, 1]} : vector<8x512xf32> to vector<8x128xf32>
    %670 = arith.addf %669, %647 : vector<8x128xf32>
    %671 = arith.negf %670 : vector<8x128xf32>
    %672 = math.exp %671 : vector<8x128xf32>
    %cst_206 = arith.constant 1.000000e+00 : f32
    %673 = vector.broadcast %cst_206 : f32 to vector<8x128xf32>
    %674 = arith.addf %673, %672 : vector<8x128xf32>
    %675 = arith.divf %673, %674 : vector<8x128xf32>
    %676 = vector.extract_strided_slice %655 {offsets = [0, 384], sizes = [8, 128], strides = [1, 1]} : vector<8x512xf32> to vector<8x128xf32>
    %677 = vector.extract_strided_slice %658 {offsets = [0, 256], sizes = [8, 128], strides = [1, 1]} : vector<8x384xf32> to vector<8x128xf32>
    %678 = arith.mulf %667, %677 : vector<8x128xf32>
    %679 = arith.addf %676, %678 : vector<8x128xf32>
    %680 = math.tanh %679 : vector<8x128xf32>
    %681 = arith.mulf %680, %675 : vector<8x128xf32>
    %cst_207 = arith.constant 1.000000e+00 : f32
    %682 = vector.broadcast %cst_207 : f32 to vector<8x128xf32>
    %683 = arith.subf %682, %668 : vector<8x128xf32>
    %684 = arith.mulf %683, %681 : vector<8x128xf32>
    %685 = arith.mulf %668, %336 : vector<8x128xf32>
    %686 = arith.addf %684, %685 : vector<8x128xf32>
    %687 = arith.truncf %686 : vector<8x128xf32> to vector<8x128xbf16>
    %c0_208 = arith.constant 0 : index
    %c0_209 = arith.constant 0 : index
    %688 = vector.load %arg7[%c0_208, %c0_209] : memref<128x512xbf16, #tpu.memory_space<vmem>>, vector<128x512xbf16>
    %cst_210 = arith.constant dense<0.000000e+00> : vector<8x512xf32>
    %689 = tpu.matmul %687, %688, %cst_210 {dimension_numbers = #tpu.dot_dimension_numbers<[1], [0], [0], [1], [0, 0, 1, 1], [], []>} : vector<8x128xbf16>, vector<128x512xbf16>, vector<8x512xf32> -> vector<8x512xf32>
    %c0_211 = arith.constant 0 : index
    %c0_212 = arith.constant 0 : index
    %690 = vector.load %arg8[%c0_211, %c0_212] : memref<1x512xf32, #tpu.memory_space<vmem>>, vector<1x512xf32>
    %691 = vector.broadcast %690 : vector<1x512xf32> to vector<8x512xf32>
    %692 = arith.addf %689, %691 : vector<8x512xf32>
    %693 = arith.truncf %642 : vector<8x128xf32> to vector<8x128xbf16>
    %c0_213 = arith.constant 0 : index
    %c0_214 = arith.constant 0 : index
    %694 = vector.load %arg9[%c0_213, %c0_214] : memref<128x384xbf16, #tpu.memory_space<vmem>>, vector<128x384xbf16>
    %cst_215 = arith.constant dense<0.000000e+00> : vector<8x384xf32>
    %695 = tpu.matmul %693, %694, %cst_215 {dimension_numbers = #tpu.dot_dimension_numbers<[1], [0], [0], [1], [0, 0, 1, 1], [], []>} : vector<8x128xbf16>, vector<128x384xbf16>, vector<8x384xf32> -> vector<8x384xf32>
    %696 = vector.extract_strided_slice %692 {offsets = [0, 0], sizes = [8, 256], strides = [1, 1]} : vector<8x512xf32> to vector<8x256xf32>
    %697 = vector.extract_strided_slice %695 {offsets = [0, 0], sizes = [8, 256], strides = [1, 1]} : vector<8x384xf32> to vector<8x256xf32>
    %698 = arith.addf %696, %697 : vector<8x256xf32>
    %699 = arith.negf %698 : vector<8x256xf32>
    %700 = math.exp %699 : vector<8x256xf32>
    %cst_216 = arith.constant 1.000000e+00 : f32
    %701 = vector.broadcast %cst_216 : f32 to vector<8x256xf32>
    %702 = arith.addf %701, %700 : vector<8x256xf32>
    %703 = arith.divf %701, %702 : vector<8x256xf32>
    %704 = vector.extract_strided_slice %703 {offsets = [0, 0], sizes = [8, 128], strides = [1, 1]} : vector<8x256xf32> to vector<8x128xf32>
    %705 = vector.extract_strided_slice %703 {offsets = [0, 128], sizes = [8, 128], strides = [1, 1]} : vector<8x256xf32> to vector<8x128xf32>
    %706 = vector.extract_strided_slice %692 {offsets = [0, 256], sizes = [8, 128], strides = [1, 1]} : vector<8x512xf32> to vector<8x128xf32>
    %707 = arith.addf %706, %649 : vector<8x128xf32>
    %708 = arith.negf %707 : vector<8x128xf32>
    %709 = math.exp %708 : vector<8x128xf32>
    %cst_217 = arith.constant 1.000000e+00 : f32
    %710 = vector.broadcast %cst_217 : f32 to vector<8x128xf32>
    %711 = arith.addf %710, %709 : vector<8x128xf32>
    %712 = arith.divf %710, %711 : vector<8x128xf32>
    %713 = vector.extract_strided_slice %692 {offsets = [0, 384], sizes = [8, 128], strides = [1, 1]} : vector<8x512xf32> to vector<8x128xf32>
    %714 = vector.extract_strided_slice %695 {offsets = [0, 256], sizes = [8, 128], strides = [1, 1]} : vector<8x384xf32> to vector<8x128xf32>
    %715 = arith.mulf %704, %714 : vector<8x128xf32>
    %716 = arith.addf %713, %715 : vector<8x128xf32>
    %717 = math.tanh %716 : vector<8x128xf32>
    %718 = arith.mulf %717, %712 : vector<8x128xf32>
    %cst_218 = arith.constant 1.000000e+00 : f32
    %719 = vector.broadcast %cst_218 : f32 to vector<8x128xf32>
    %720 = arith.subf %719, %705 : vector<8x128xf32>
    %721 = arith.mulf %720, %718 : vector<8x128xf32>
    %722 = arith.mulf %705, %642 : vector<8x128xf32>
    %723 = arith.addf %721, %722 : vector<8x128xf32>
    %c8_i32_219 = arith.constant 8 : i32
    %724 = arith.muli %c0_i32_192, %c8_i32_219 : i32
    %725 = tpu.assume_multiple %724, 8 : i32
    %726 = arith.index_cast %725 : i32 to index
    %c0_220 = arith.constant 0 : index
    %727 = vector.load %arg19[%726, %c0_220] : memref<32x128xf32, #tpu.memory_space<vmem>>, vector<8x128xf32>
    tpu.vector_store %arg19[%726, %c0_220], %723 {strides = array<i32>} : memref<32x128xf32, #tpu.memory_space<vmem>>, vector<8x128xf32>,
    %c1_i32_221 = arith.constant 1 : i32
    %c8_i32_222 = arith.constant 8 : i32
    %728 = arith.addi %c8_i32_222, %c1_i32_221 : i32
    %c8_i32_223 = arith.constant 8 : i32
    %729 = arith.muli %728, %c8_i32_223 : i32
    %730 = tpu.assume_multiple %729, 8 : i32
    %731 = arith.index_cast %730 : i32 to index
    %c0_224 = arith.constant 0 : index
    %732 = vector.load %arg17[%731, %c0_224] : memref<96x128xf32, #tpu.memory_space<vmem>>, vector<8x128xf32>
    %733 = arith.index_cast %730 : i32 to index
    %c0_225 = arith.constant 0 : index
    %734 = vector.load %arg18[%733, %c0_225] : memref<96x128xf32, #tpu.memory_space<vmem>>, vector<8x128xf32>
    %735 = arith.truncf %723 : vector<8x128xf32> to vector<8x128xbf16>
    %c0_226 = arith.constant 0 : index
    %c0_227 = arith.constant 0 : index
    %736 = vector.load %arg3[%c0_226, %c0_227] : memref<128x512xbf16, #tpu.memory_space<vmem>>, vector<128x512xbf16>
    %cst_228 = arith.constant dense<0.000000e+00> : vector<8x512xf32>
    %737 = tpu.matmul %735, %736, %cst_228 {dimension_numbers = #tpu.dot_dimension_numbers<[1], [0], [0], [1], [0, 0, 1, 1], [], []>} : vector<8x128xbf16>, vector<128x512xbf16>, vector<8x512xf32> -> vector<8x512xf32>
    %c0_229 = arith.constant 0 : index
    %c0_230 = arith.constant 0 : index
    %738 = vector.load %arg4[%c0_229, %c0_230] : memref<1x512xf32, #tpu.memory_space<vmem>>, vector<1x512xf32>
    %739 = vector.broadcast %738 : vector<1x512xf32> to vector<8x512xf32>
    %740 = arith.addf %737, %739 : vector<8x512xf32>
    %741 = arith.truncf %686 : vector<8x128xf32> to vector<8x128xbf16>
    %c0_231 = arith.constant 0 : index
    %c0_232 = arith.constant 0 : index
    %742 = vector.load %arg5[%c0_231, %c0_232] : memref<128x384xbf16, #tpu.memory_space<vmem>>, vector<128x384xbf16>
    %cst_233 = arith.constant dense<0.000000e+00> : vector<8x384xf32>
    %743 = tpu.matmul %741, %742, %cst_233 {dimension_numbers = #tpu.dot_dimension_numbers<[1], [0], [0], [1], [0, 0, 1, 1], [], []>} : vector<8x128xbf16>, vector<128x384xbf16>, vector<8x384xf32> -> vector<8x384xf32>
    %744 = vector.extract_strided_slice %740 {offsets = [0, 0], sizes = [8, 256], strides = [1, 1]} : vector<8x512xf32> to vector<8x256xf32>
    %745 = vector.extract_strided_slice %743 {offsets = [0, 0], sizes = [8, 256], strides = [1, 1]} : vector<8x384xf32> to vector<8x256xf32>
    %746 = arith.addf %744, %745 : vector<8x256xf32>
    %747 = arith.negf %746 : vector<8x256xf32>
    %748 = math.exp %747 : vector<8x256xf32>
    %cst_234 = arith.constant 1.000000e+00 : f32
    %749 = vector.broadcast %cst_234 : f32 to vector<8x256xf32>
    %750 = arith.addf %749, %748 : vector<8x256xf32>
    %751 = arith.divf %749, %750 : vector<8x256xf32>
    %752 = vector.extract_strided_slice %751 {offsets = [0, 0], sizes = [8, 128], strides = [1, 1]} : vector<8x256xf32> to vector<8x128xf32>
    %753 = vector.extract_strided_slice %751 {offsets = [0, 128], sizes = [8, 128], strides = [1, 1]} : vector<8x256xf32> to vector<8x128xf32>
    %754 = vector.extract_strided_slice %740 {offsets = [0, 256], sizes = [8, 128], strides = [1, 1]} : vector<8x512xf32> to vector<8x128xf32>
    %755 = arith.addf %754, %732 : vector<8x128xf32>
    %756 = arith.negf %755 : vector<8x128xf32>
    %757 = math.exp %756 : vector<8x128xf32>
    %cst_235 = arith.constant 1.000000e+00 : f32
    %758 = vector.broadcast %cst_235 : f32 to vector<8x128xf32>
    %759 = arith.addf %758, %757 : vector<8x128xf32>
    %760 = arith.divf %758, %759 : vector<8x128xf32>
    %761 = vector.extract_strided_slice %740 {offsets = [0, 384], sizes = [8, 128], strides = [1, 1]} : vector<8x512xf32> to vector<8x128xf32>
    %762 = vector.extract_strided_slice %743 {offsets = [0, 256], sizes = [8, 128], strides = [1, 1]} : vector<8x384xf32> to vector<8x128xf32>
    %763 = arith.mulf %752, %762 : vector<8x128xf32>
    %764 = arith.addf %761, %763 : vector<8x128xf32>
    %765 = math.tanh %764 : vector<8x128xf32>
    %766 = arith.mulf %765, %760 : vector<8x128xf32>
    %cst_236 = arith.constant 1.000000e+00 : f32
    %767 = vector.broadcast %cst_236 : f32 to vector<8x128xf32>
    %768 = arith.subf %767, %753 : vector<8x128xf32>
    %769 = arith.mulf %768, %766 : vector<8x128xf32>
    %770 = arith.mulf %753, %686 : vector<8x128xf32>
    %771 = arith.addf %769, %770 : vector<8x128xf32>
    %772 = arith.truncf %771 : vector<8x128xf32> to vector<8x128xbf16>
    %c0_237 = arith.constant 0 : index
    %c0_238 = arith.constant 0 : index
    %773 = vector.load %arg7[%c0_237, %c0_238] : memref<128x512xbf16, #tpu.memory_space<vmem>>, vector<128x512xbf16>
    %cst_239 = arith.constant dense<0.000000e+00> : vector<8x512xf32>
    %774 = tpu.matmul %772, %773, %cst_239 {dimension_numbers = #tpu.dot_dimension_numbers<[1], [0], [0], [1], [0, 0, 1, 1], [], []>} : vector<8x128xbf16>, vector<128x512xbf16>, vector<8x512xf32> -> vector<8x512xf32>
    %c0_240 = arith.constant 0 : index
    %c0_241 = arith.constant 0 : index
    %775 = vector.load %arg8[%c0_240, %c0_241] : memref<1x512xf32, #tpu.memory_space<vmem>>, vector<1x512xf32>
    %776 = vector.broadcast %775 : vector<1x512xf32> to vector<8x512xf32>
    %777 = arith.addf %774, %776 : vector<8x512xf32>
    %778 = arith.truncf %723 : vector<8x128xf32> to vector<8x128xbf16>
    %c0_242 = arith.constant 0 : index
    %c0_243 = arith.constant 0 : index
    %779 = vector.load %arg9[%c0_242, %c0_243] : memref<128x384xbf16, #tpu.memory_space<vmem>>, vector<128x384xbf16>
    %cst_244 = arith.constant dense<0.000000e+00> : vector<8x384xf32>
    %780 = tpu.matmul %778, %779, %cst_244 {dimension_numbers = #tpu.dot_dimension_numbers<[1], [0], [0], [1], [0, 0, 1, 1], [], []>} : vector<8x128xbf16>, vector<128x384xbf16>, vector<8x384xf32> -> vector<8x384xf32>
    %781 = vector.extract_strided_slice %777 {offsets = [0, 0], sizes = [8, 256], strides = [1, 1]} : vector<8x512xf32> to vector<8x256xf32>
    %782 = vector.extract_strided_slice %780 {offsets = [0, 0], sizes = [8, 256], strides = [1, 1]} : vector<8x384xf32> to vector<8x256xf32>
    %783 = arith.addf %781, %782 : vector<8x256xf32>
    %784 = arith.negf %783 : vector<8x256xf32>
    %785 = math.exp %784 : vector<8x256xf32>
    %cst_245 = arith.constant 1.000000e+00 : f32
    %786 = vector.broadcast %cst_245 : f32 to vector<8x256xf32>
    %787 = arith.addf %786, %785 : vector<8x256xf32>
    %788 = arith.divf %786, %787 : vector<8x256xf32>
    %789 = vector.extract_strided_slice %788 {offsets = [0, 0], sizes = [8, 128], strides = [1, 1]} : vector<8x256xf32> to vector<8x128xf32>
    %790 = vector.extract_strided_slice %788 {offsets = [0, 128], sizes = [8, 128], strides = [1, 1]} : vector<8x256xf32> to vector<8x128xf32>
    %791 = vector.extract_strided_slice %777 {offsets = [0, 256], sizes = [8, 128], strides = [1, 1]} : vector<8x512xf32> to vector<8x128xf32>
    %792 = arith.addf %791, %734 : vector<8x128xf32>
    %793 = arith.negf %792 : vector<8x128xf32>
    %794 = math.exp %793 : vector<8x128xf32>
    %cst_246 = arith.constant 1.000000e+00 : f32
    %795 = vector.broadcast %cst_246 : f32 to vector<8x128xf32>
    %796 = arith.addf %795, %794 : vector<8x128xf32>
    %797 = arith.divf %795, %796 : vector<8x128xf32>
    %798 = vector.extract_strided_slice %777 {offsets = [0, 384], sizes = [8, 128], strides = [1, 1]} : vector<8x512xf32> to vector<8x128xf32>
    %799 = vector.extract_strided_slice %780 {offsets = [0, 256], sizes = [8, 128], strides = [1, 1]} : vector<8x384xf32> to vector<8x128xf32>
    %800 = arith.mulf %789, %799 : vector<8x128xf32>
    %801 = arith.addf %798, %800 : vector<8x128xf32>
    %802 = math.tanh %801 : vector<8x128xf32>
    %803 = arith.mulf %802, %797 : vector<8x128xf32>
    %cst_247 = arith.constant 1.000000e+00 : f32
    %804 = vector.broadcast %cst_247 : f32 to vector<8x128xf32>
    %805 = arith.subf %804, %790 : vector<8x128xf32>
    %806 = arith.mulf %805, %803 : vector<8x128xf32>
    %807 = arith.mulf %790, %723 : vector<8x128xf32>
    %808 = arith.addf %806, %807 : vector<8x128xf32>
    %c8_i32_248 = arith.constant 8 : i32
    %809 = arith.muli %c1_i32_221, %c8_i32_248 : i32
    %810 = tpu.assume_multiple %809, 8 : i32
    %811 = arith.index_cast %810 : i32 to index
    %c0_249 = arith.constant 0 : index
    %812 = vector.load %arg19[%811, %c0_249] : memref<32x128xf32, #tpu.memory_space<vmem>>, vector<8x128xf32>
    tpu.vector_store %arg19[%811, %c0_249], %808 {strides = array<i32>} : memref<32x128xf32, #tpu.memory_space<vmem>>, vector<8x128xf32>,
    %c2_i32_250 = arith.constant 2 : i32
    %c8_i32_251 = arith.constant 8 : i32
    %813 = arith.addi %c8_i32_251, %c2_i32_250 : i32
    %c8_i32_252 = arith.constant 8 : i32
    %814 = arith.muli %813, %c8_i32_252 : i32
    %815 = tpu.assume_multiple %814, 8 : i32
    %816 = arith.index_cast %815 : i32 to index
    %c0_253 = arith.constant 0 : index
    %817 = vector.load %arg17[%816, %c0_253] : memref<96x128xf32, #tpu.memory_space<vmem>>, vector<8x128xf32>
    %818 = arith.index_cast %815 : i32 to index
    %c0_254 = arith.constant 0 : index
    %819 = vector.load %arg18[%818, %c0_254] : memref<96x128xf32, #tpu.memory_space<vmem>>, vector<8x128xf32>
    %820 = arith.truncf %808 : vector<8x128xf32> to vector<8x128xbf16>
    %c0_255 = arith.constant 0 : index
    %c0_256 = arith.constant 0 : index
    %821 = vector.load %arg3[%c0_255, %c0_256] : memref<128x512xbf16, #tpu.memory_space<vmem>>, vector<128x512xbf16>
    %cst_257 = arith.constant dense<0.000000e+00> : vector<8x512xf32>
    %822 = tpu.matmul %820, %821, %cst_257 {dimension_numbers = #tpu.dot_dimension_numbers<[1], [0], [0], [1], [0, 0, 1, 1], [], []>} : vector<8x128xbf16>, vector<128x512xbf16>, vector<8x512xf32> -> vector<8x512xf32>
    %c0_258 = arith.constant 0 : index
    %c0_259 = arith.constant 0 : index
    %823 = vector.load %arg4[%c0_258, %c0_259] : memref<1x512xf32, #tpu.memory_space<vmem>>, vector<1x512xf32>
    %824 = vector.broadcast %823 : vector<1x512xf32> to vector<8x512xf32>
    %825 = arith.addf %822, %824 : vector<8x512xf32>
    %826 = arith.truncf %771 : vector<8x128xf32> to vector<8x128xbf16>
    %c0_260 = arith.constant 0 : index
    %c0_261 = arith.constant 0 : index
    %827 = vector.load %arg5[%c0_260, %c0_261] : memref<128x384xbf16, #tpu.memory_space<vmem>>, vector<128x384xbf16>
    %cst_262 = arith.constant dense<0.000000e+00> : vector<8x384xf32>
    %828 = tpu.matmul %826, %827, %cst_262 {dimension_numbers = #tpu.dot_dimension_numbers<[1], [0], [0], [1], [0, 0, 1, 1], [], []>} : vector<8x128xbf16>, vector<128x384xbf16>, vector<8x384xf32> -> vector<8x384xf32>
    %829 = vector.extract_strided_slice %825 {offsets = [0, 0], sizes = [8, 256], strides = [1, 1]} : vector<8x512xf32> to vector<8x256xf32>
    %830 = vector.extract_strided_slice %828 {offsets = [0, 0], sizes = [8, 256], strides = [1, 1]} : vector<8x384xf32> to vector<8x256xf32>
    %831 = arith.addf %829, %830 : vector<8x256xf32>
    %832 = arith.negf %831 : vector<8x256xf32>
    %833 = math.exp %832 : vector<8x256xf32>
    %cst_263 = arith.constant 1.000000e+00 : f32
    %834 = vector.broadcast %cst_263 : f32 to vector<8x256xf32>
    %835 = arith.addf %834, %833 : vector<8x256xf32>
    %836 = arith.divf %834, %835 : vector<8x256xf32>
    %837 = vector.extract_strided_slice %836 {offsets = [0, 0], sizes = [8, 128], strides = [1, 1]} : vector<8x256xf32> to vector<8x128xf32>
    %838 = vector.extract_strided_slice %836 {offsets = [0, 128], sizes = [8, 128], strides = [1, 1]} : vector<8x256xf32> to vector<8x128xf32>
    %839 = vector.extract_strided_slice %825 {offsets = [0, 256], sizes = [8, 128], strides = [1, 1]} : vector<8x512xf32> to vector<8x128xf32>
    %840 = arith.addf %839, %817 : vector<8x128xf32>
    %841 = arith.negf %840 : vector<8x128xf32>
    %842 = math.exp %841 : vector<8x128xf32>
    %cst_264 = arith.constant 1.000000e+00 : f32
    %843 = vector.broadcast %cst_264 : f32 to vector<8x128xf32>
    %844 = arith.addf %843, %842 : vector<8x128xf32>
    %845 = arith.divf %843, %844 : vector<8x128xf32>
    %846 = vector.extract_strided_slice %825 {offsets = [0, 384], sizes = [8, 128], strides = [1, 1]} : vector<8x512xf32> to vector<8x128xf32>
    %847 = vector.extract_strided_slice %828 {offsets = [0, 256], sizes = [8, 128], strides = [1, 1]} : vector<8x384xf32> to vector<8x128xf32>
    %848 = arith.mulf %837, %847 : vector<8x128xf32>
    %849 = arith.addf %846, %848 : vector<8x128xf32>
    %850 = math.tanh %849 : vector<8x128xf32>
    %851 = arith.mulf %850, %845 : vector<8x128xf32>
    %cst_265 = arith.constant 1.000000e+00 : f32
    %852 = vector.broadcast %cst_265 : f32 to vector<8x128xf32>
    %853 = arith.subf %852, %838 : vector<8x128xf32>
    %854 = arith.mulf %853, %851 : vector<8x128xf32>
    %855 = arith.mulf %838, %771 : vector<8x128xf32>
    %856 = arith.addf %854, %855 : vector<8x128xf32>
    %857 = arith.truncf %856 : vector<8x128xf32> to vector<8x128xbf16>
    %c0_266 = arith.constant 0 : index
    %c0_267 = arith.constant 0 : index
    %858 = vector.load %arg7[%c0_266, %c0_267] : memref<128x512xbf16, #tpu.memory_space<vmem>>, vector<128x512xbf16>
    %cst_268 = arith.constant dense<0.000000e+00> : vector<8x512xf32>
    %859 = tpu.matmul %857, %858, %cst_268 {dimension_numbers = #tpu.dot_dimension_numbers<[1], [0], [0], [1], [0, 0, 1, 1], [], []>} : vector<8x128xbf16>, vector<128x512xbf16>, vector<8x512xf32> -> vector<8x512xf32>
    %c0_269 = arith.constant 0 : index
    %c0_270 = arith.constant 0 : index
    %860 = vector.load %arg8[%c0_269, %c0_270] : memref<1x512xf32, #tpu.memory_space<vmem>>, vector<1x512xf32>
    %861 = vector.broadcast %860 : vector<1x512xf32> to vector<8x512xf32>
    %862 = arith.addf %859, %861 : vector<8x512xf32>
    %863 = arith.truncf %808 : vector<8x128xf32> to vector<8x128xbf16>
    %c0_271 = arith.constant 0 : index
    %c0_272 = arith.constant 0 : index
    %864 = vector.load %arg9[%c0_271, %c0_272] : memref<128x384xbf16, #tpu.memory_space<vmem>>, vector<128x384xbf16>
    %cst_273 = arith.constant dense<0.000000e+00> : vector<8x384xf32>
    %865 = tpu.matmul %863, %864, %cst_273 {dimension_numbers = #tpu.dot_dimension_numbers<[1], [0], [0], [1], [0, 0, 1, 1], [], []>} : vector<8x128xbf16>, vector<128x384xbf16>, vector<8x384xf32> -> vector<8x384xf32>
    %866 = vector.extract_strided_slice %862 {offsets = [0, 0], sizes = [8, 256], strides = [1, 1]} : vector<8x512xf32> to vector<8x256xf32>
    %867 = vector.extract_strided_slice %865 {offsets = [0, 0], sizes = [8, 256], strides = [1, 1]} : vector<8x384xf32> to vector<8x256xf32>
    %868 = arith.addf %866, %867 : vector<8x256xf32>
    %869 = arith.negf %868 : vector<8x256xf32>
    %870 = math.exp %869 : vector<8x256xf32>
    %cst_274 = arith.constant 1.000000e+00 : f32
    %871 = vector.broadcast %cst_274 : f32 to vector<8x256xf32>
    %872 = arith.addf %871, %870 : vector<8x256xf32>
    %873 = arith.divf %871, %872 : vector<8x256xf32>
    %874 = vector.extract_strided_slice %873 {offsets = [0, 0], sizes = [8, 128], strides = [1, 1]} : vector<8x256xf32> to vector<8x128xf32>
    %875 = vector.extract_strided_slice %873 {offsets = [0, 128], sizes = [8, 128], strides = [1, 1]} : vector<8x256xf32> to vector<8x128xf32>
    %876 = vector.extract_strided_slice %862 {offsets = [0, 256], sizes = [8, 128], strides = [1, 1]} : vector<8x512xf32> to vector<8x128xf32>
    %877 = arith.addf %876, %819 : vector<8x128xf32>
    %878 = arith.negf %877 : vector<8x128xf32>
    %879 = math.exp %878 : vector<8x128xf32>
    %cst_275 = arith.constant 1.000000e+00 : f32
    %880 = vector.broadcast %cst_275 : f32 to vector<8x128xf32>
    %881 = arith.addf %880, %879 : vector<8x128xf32>
    %882 = arith.divf %880, %881 : vector<8x128xf32>
    %883 = vector.extract_strided_slice %862 {offsets = [0, 384], sizes = [8, 128], strides = [1, 1]} : vector<8x512xf32> to vector<8x128xf32>
    %884 = vector.extract_strided_slice %865 {offsets = [0, 256], sizes = [8, 128], strides = [1, 1]} : vector<8x384xf32> to vector<8x128xf32>
    %885 = arith.mulf %874, %884 : vector<8x128xf32>
    %886 = arith.addf %883, %885 : vector<8x128xf32>
    %887 = math.tanh %886 : vector<8x128xf32>
    %888 = arith.mulf %887, %882 : vector<8x128xf32>
    %cst_276 = arith.constant 1.000000e+00 : f32
    %889 = vector.broadcast %cst_276 : f32 to vector<8x128xf32>
    %890 = arith.subf %889, %875 : vector<8x128xf32>
    %891 = arith.mulf %890, %888 : vector<8x128xf32>
    %892 = arith.mulf %875, %808 : vector<8x128xf32>
    %893 = arith.addf %891, %892 : vector<8x128xf32>
    %c8_i32_277 = arith.constant 8 : i32
    %894 = arith.muli %c2_i32_250, %c8_i32_277 : i32
    %895 = tpu.assume_multiple %894, 8 : i32
    %896 = arith.index_cast %895 : i32 to index
    %c0_278 = arith.constant 0 : index
    %897 = vector.load %arg19[%896, %c0_278] : memref<32x128xf32, #tpu.memory_space<vmem>>, vector<8x128xf32>
    tpu.vector_store %arg19[%896, %c0_278], %893 {strides = array<i32>} : memref<32x128xf32, #tpu.memory_space<vmem>>, vector<8x128xf32>,
    %c3_i32_279 = arith.constant 3 : i32
    %c8_i32_280 = arith.constant 8 : i32
    %898 = arith.addi %c8_i32_280, %c3_i32_279 : i32
    %c8_i32_281 = arith.constant 8 : i32
    %899 = arith.muli %898, %c8_i32_281 : i32
    %900 = tpu.assume_multiple %899, 8 : i32
    %901 = arith.index_cast %900 : i32 to index
    %c0_282 = arith.constant 0 : index
    %902 = vector.load %arg17[%901, %c0_282] : memref<96x128xf32, #tpu.memory_space<vmem>>, vector<8x128xf32>
    %903 = arith.index_cast %900 : i32 to index
    %c0_283 = arith.constant 0 : index
    %904 = vector.load %arg18[%903, %c0_283] : memref<96x128xf32, #tpu.memory_space<vmem>>, vector<8x128xf32>
    %905 = arith.truncf %893 : vector<8x128xf32> to vector<8x128xbf16>
    %c0_284 = arith.constant 0 : index
    %c0_285 = arith.constant 0 : index
    %906 = vector.load %arg3[%c0_284, %c0_285] : memref<128x512xbf16, #tpu.memory_space<vmem>>, vector<128x512xbf16>
    %cst_286 = arith.constant dense<0.000000e+00> : vector<8x512xf32>
    %907 = tpu.matmul %905, %906, %cst_286 {dimension_numbers = #tpu.dot_dimension_numbers<[1], [0], [0], [1], [0, 0, 1, 1], [], []>} : vector<8x128xbf16>, vector<128x512xbf16>, vector<8x512xf32> -> vector<8x512xf32>
    %c0_287 = arith.constant 0 : index
    %c0_288 = arith.constant 0 : index
    %908 = vector.load %arg4[%c0_287, %c0_288] : memref<1x512xf32, #tpu.memory_space<vmem>>, vector<1x512xf32>
    %909 = vector.broadcast %908 : vector<1x512xf32> to vector<8x512xf32>
    %910 = arith.addf %907, %909 : vector<8x512xf32>
    %911 = arith.truncf %856 : vector<8x128xf32> to vector<8x128xbf16>
    %c0_289 = arith.constant 0 : index
    %c0_290 = arith.constant 0 : index
    %912 = vector.load %arg5[%c0_289, %c0_290] : memref<128x384xbf16, #tpu.memory_space<vmem>>, vector<128x384xbf16>
    %cst_291 = arith.constant dense<0.000000e+00> : vector<8x384xf32>
    %913 = tpu.matmul %911, %912, %cst_291 {dimension_numbers = #tpu.dot_dimension_numbers<[1], [0], [0], [1], [0, 0, 1, 1], [], []>} : vector<8x128xbf16>, vector<128x384xbf16>, vector<8x384xf32> -> vector<8x384xf32>
    %914 = vector.extract_strided_slice %910 {offsets = [0, 0], sizes = [8, 256], strides = [1, 1]} : vector<8x512xf32> to vector<8x256xf32>
    %915 = vector.extract_strided_slice %913 {offsets = [0, 0], sizes = [8, 256], strides = [1, 1]} : vector<8x384xf32> to vector<8x256xf32>
    %916 = arith.addf %914, %915 : vector<8x256xf32>
    %917 = arith.negf %916 : vector<8x256xf32>
    %918 = math.exp %917 : vector<8x256xf32>
    %cst_292 = arith.constant 1.000000e+00 : f32
    %919 = vector.broadcast %cst_292 : f32 to vector<8x256xf32>
    %920 = arith.addf %919, %918 : vector<8x256xf32>
    %921 = arith.divf %919, %920 : vector<8x256xf32>
    %922 = vector.extract_strided_slice %921 {offsets = [0, 0], sizes = [8, 128], strides = [1, 1]} : vector<8x256xf32> to vector<8x128xf32>
    %923 = vector.extract_strided_slice %921 {offsets = [0, 128], sizes = [8, 128], strides = [1, 1]} : vector<8x256xf32> to vector<8x128xf32>
    %924 = vector.extract_strided_slice %910 {offsets = [0, 256], sizes = [8, 128], strides = [1, 1]} : vector<8x512xf32> to vector<8x128xf32>
    %925 = arith.addf %924, %902 : vector<8x128xf32>
    %926 = arith.negf %925 : vector<8x128xf32>
    %927 = math.exp %926 : vector<8x128xf32>
    %cst_293 = arith.constant 1.000000e+00 : f32
    %928 = vector.broadcast %cst_293 : f32 to vector<8x128xf32>
    %929 = arith.addf %928, %927 : vector<8x128xf32>
    %930 = arith.divf %928, %929 : vector<8x128xf32>
    %931 = vector.extract_strided_slice %910 {offsets = [0, 384], sizes = [8, 128], strides = [1, 1]} : vector<8x512xf32> to vector<8x128xf32>
    %932 = vector.extract_strided_slice %913 {offsets = [0, 256], sizes = [8, 128], strides = [1, 1]} : vector<8x384xf32> to vector<8x128xf32>
    %933 = arith.mulf %922, %932 : vector<8x128xf32>
    %934 = arith.addf %931, %933 : vector<8x128xf32>
    %935 = math.tanh %934 : vector<8x128xf32>
    %936 = arith.mulf %935, %930 : vector<8x128xf32>
    %cst_294 = arith.constant 1.000000e+00 : f32
    %937 = vector.broadcast %cst_294 : f32 to vector<8x128xf32>
    %938 = arith.subf %937, %923 : vector<8x128xf32>
    %939 = arith.mulf %938, %936 : vector<8x128xf32>
    %940 = arith.mulf %923, %856 : vector<8x128xf32>
    %941 = arith.addf %939, %940 : vector<8x128xf32>
    %942 = arith.truncf %941 : vector<8x128xf32> to vector<8x128xbf16>
    %c0_295 = arith.constant 0 : index
    %c0_296 = arith.constant 0 : index
    %943 = vector.load %arg7[%c0_295, %c0_296] : memref<128x512xbf16, #tpu.memory_space<vmem>>, vector<128x512xbf16>
    %cst_297 = arith.constant dense<0.000000e+00> : vector<8x512xf32>
    %944 = tpu.matmul %942, %943, %cst_297 {dimension_numbers = #tpu.dot_dimension_numbers<[1], [0], [0], [1], [0, 0, 1, 1], [], []>} : vector<8x128xbf16>, vector<128x512xbf16>, vector<8x512xf32> -> vector<8x512xf32>
    %c0_298 = arith.constant 0 : index
    %c0_299 = arith.constant 0 : index
    %945 = vector.load %arg8[%c0_298, %c0_299] : memref<1x512xf32, #tpu.memory_space<vmem>>, vector<1x512xf32>
    %946 = vector.broadcast %945 : vector<1x512xf32> to vector<8x512xf32>
    %947 = arith.addf %944, %946 : vector<8x512xf32>
    %948 = arith.truncf %893 : vector<8x128xf32> to vector<8x128xbf16>
    %c0_300 = arith.constant 0 : index
    %c0_301 = arith.constant 0 : index
    %949 = vector.load %arg9[%c0_300, %c0_301] : memref<128x384xbf16, #tpu.memory_space<vmem>>, vector<128x384xbf16>
    %cst_302 = arith.constant dense<0.000000e+00> : vector<8x384xf32>
    %950 = tpu.matmul %948, %949, %cst_302 {dimension_numbers = #tpu.dot_dimension_numbers<[1], [0], [0], [1], [0, 0, 1, 1], [], []>} : vector<8x128xbf16>, vector<128x384xbf16>, vector<8x384xf32> -> vector<8x384xf32>
    %951 = vector.extract_strided_slice %947 {offsets = [0, 0], sizes = [8, 256], strides = [1, 1]} : vector<8x512xf32> to vector<8x256xf32>
    %952 = vector.extract_strided_slice %950 {offsets = [0, 0], sizes = [8, 256], strides = [1, 1]} : vector<8x384xf32> to vector<8x256xf32>
    %953 = arith.addf %951, %952 : vector<8x256xf32>
    %954 = arith.negf %953 : vector<8x256xf32>
    %955 = math.exp %954 : vector<8x256xf32>
    %cst_303 = arith.constant 1.000000e+00 : f32
    %956 = vector.broadcast %cst_303 : f32 to vector<8x256xf32>
    %957 = arith.addf %956, %955 : vector<8x256xf32>
    %958 = arith.divf %956, %957 : vector<8x256xf32>
    %959 = vector.extract_strided_slice %958 {offsets = [0, 0], sizes = [8, 128], strides = [1, 1]} : vector<8x256xf32> to vector<8x128xf32>
    %960 = vector.extract_strided_slice %958 {offsets = [0, 128], sizes = [8, 128], strides = [1, 1]} : vector<8x256xf32> to vector<8x128xf32>
    %961 = vector.extract_strided_slice %947 {offsets = [0, 256], sizes = [8, 128], strides = [1, 1]} : vector<8x512xf32> to vector<8x128xf32>
    %962 = arith.addf %961, %904 : vector<8x128xf32>
    %963 = arith.negf %962 : vector<8x128xf32>
    %964 = math.exp %963 : vector<8x128xf32>
    %cst_304 = arith.constant 1.000000e+00 : f32
    %965 = vector.broadcast %cst_304 : f32 to vector<8x128xf32>
    %966 = arith.addf %965, %964 : vector<8x128xf32>
    %967 = arith.divf %965, %966 : vector<8x128xf32>
    %968 = vector.extract_strided_slice %947 {offsets = [0, 384], sizes = [8, 128], strides = [1, 1]} : vector<8x512xf32> to vector<8x128xf32>
    %969 = vector.extract_strided_slice %950 {offsets = [0, 256], sizes = [8, 128], strides = [1, 1]} : vector<8x384xf32> to vector<8x128xf32>
    %970 = arith.mulf %959, %969 : vector<8x128xf32>
    %971 = arith.addf %968, %970 : vector<8x128xf32>
    %972 = math.tanh %971 : vector<8x128xf32>
    %973 = arith.mulf %972, %967 : vector<8x128xf32>
    %cst_305 = arith.constant 1.000000e+00 : f32
    %974 = vector.broadcast %cst_305 : f32 to vector<8x128xf32>
    %975 = arith.subf %974, %960 : vector<8x128xf32>
    %976 = arith.mulf %975, %973 : vector<8x128xf32>
    %977 = arith.mulf %960, %893 : vector<8x128xf32>
    %978 = arith.addf %976, %977 : vector<8x128xf32>
    %c8_i32_306 = arith.constant 8 : i32
    %979 = arith.muli %c3_i32_279, %c8_i32_306 : i32
    %980 = tpu.assume_multiple %979, 8 : i32
    %981 = arith.index_cast %980 : i32 to index
    %c0_307 = arith.constant 0 : index
    %982 = vector.load %arg19[%981, %c0_307] : memref<32x128xf32, #tpu.memory_space<vmem>>, vector<8x128xf32>
    tpu.vector_store %arg19[%981, %c0_307], %978 {strides = array<i32>} : memref<32x128xf32, #tpu.memory_space<vmem>>, vector<8x128xf32>,
    %c4_i32_308 = arith.constant 4 : i32
    %c0_309 = arith.constant 0 : index
    %c0_310 = arith.constant 0 : index
    %983 = vector.load %arg19[%c0_309, %c0_310] : memref<32x128xf32, #tpu.memory_space<vmem>>, vector<32x128xf32>
    %984 = arith.truncf %983 : vector<32x128xf32> to vector<32x128xbf16>
    %c0_311 = arith.constant 0 : index
    %c0_312 = arith.constant 0 : index
    %985 = vector.load %arg11[%c0_311, %c0_312] : memref<128x128xbf16, #tpu.memory_space<vmem>>, vector<128x128xbf16>
    %cst_313 = arith.constant dense<0.000000e+00> : vector<32x128xf32>
    %986 = tpu.matmul %984, %985, %cst_313 {dimension_numbers = #tpu.dot_dimension_numbers<[1], [0], [0], [1], [0, 0, 1, 1], [], []>} : vector<32x128xbf16>, vector<128x128xbf16>, vector<32x128xf32> -> vector<32x128xf32>
    %c0_314 = arith.constant 0 : index
    %c0_315 = arith.constant 0 : index
    %987 = vector.load %arg12[%c0_314, %c0_315] : memref<1x128xf32, #tpu.memory_space<vmem>>, vector<1x128xf32>
    %988 = vector.broadcast %987 : vector<1x128xf32> to vector<32x128xf32>
    %989 = arith.addf %986, %988 : vector<32x128xf32>
    %c0_316 = arith.constant 0 : index
    %c0_317 = arith.constant 0 : index
    %990 = vector.load %arg13[%c0_316, %c0_317] : memref<32x128xf32, #tpu.memory_space<vmem>>, vector<32x128xf32>
    tpu.vector_store %arg13[%c0_316, %c0_317], %989 {strides = array<i32>} : memref<32x128xf32, #tpu.memory_space<vmem>>, vector<32x128xf32>,
    return
  }
  func.func @transform_0(%arg0: i32) -> (i32, i32) {
    %c0_i32 = arith.constant 0 : i32
    %c0_i32_0 = arith.constant 0 : i32
    return %arg0, %c0_i32 : i32, i32
  }
  func.func @transform_1(%arg0: i32) -> (i32, i32) {
    %c0_i32 = arith.constant 0 : i32
    %c0_i32_0 = arith.constant 0 : i32
    return %arg0, %c0_i32 : i32, i32
  }
  func.func @transform_2(%arg0: i32) -> (i32, i32) {
    %c0_i32 = arith.constant 0 : i32
    %c0_i32_0 = arith.constant 0 : i32
    %c0_i32_1 = arith.constant 0 : i32
    return %c0_i32, %c0_i32_0 : i32, i32
  }
  func.func @transform_3(%arg0: i32) -> (i32, i32) {
    %c0_i32 = arith.constant 0 : i32
    %c0_i32_0 = arith.constant 0 : i32
    %c0_i32_1 = arith.constant 0 : i32
    return %c0_i32, %c0_i32_0 : i32, i32
  }
  func.func @transform_4(%arg0: i32) -> (i32, i32) {
    %c0_i32 = arith.constant 0 : i32
    %c0_i32_0 = arith.constant 0 : i32
    %c0_i32_1 = arith.constant 0 : i32
    return %c0_i32, %c0_i32_0 : i32, i32
  }
  func.func @transform_5(%arg0: i32) -> (i32, i32) {
    %c0_i32 = arith.constant 0 : i32
    %c0_i32_0 = arith.constant 0 : i32
    %c0_i32_1 = arith.constant 0 : i32
    return %c0_i32, %c0_i32_0 : i32, i32
  }
  func.func @transform_6(%arg0: i32) -> (i32, i32) {
    %c0_i32 = arith.constant 0 : i32
    %c0_i32_0 = arith.constant 0 : i32
    %c0_i32_1 = arith.constant 0 : i32
    return %c0_i32, %c0_i32_0 : i32, i32
  }
  func.func @transform_7(%arg0: i32) -> (i32, i32) {
    %c0_i32 = arith.constant 0 : i32
    %c0_i32_0 = arith.constant 0 : i32
    %c0_i32_1 = arith.constant 0 : i32
    return %c0_i32, %c0_i32_0 : i32, i32
  }
  func.func @transform_8(%arg0: i32) -> (i32, i32) {
    %c0_i32 = arith.constant 0 : i32
    %c0_i32_0 = arith.constant 0 : i32
    %c0_i32_1 = arith.constant 0 : i32
    return %c0_i32, %c0_i32_0 : i32, i32
  }
  func.func @transform_9(%arg0: i32) -> (i32, i32) {
    %c0_i32 = arith.constant 0 : i32
    %c0_i32_0 = arith.constant 0 : i32
    %c0_i32_1 = arith.constant 0 : i32
    return %c0_i32, %c0_i32_0 : i32, i32
  }
  func.func @transform_10(%arg0: i32) -> (i32, i32) {
    %c0_i32 = arith.constant 0 : i32
    %c0_i32_0 = arith.constant 0 : i32
    %c0_i32_1 = arith.constant 0 : i32
    return %c0_i32, %c0_i32_0 : i32, i32
  }
  func.func @transform_11(%arg0: i32) -> (i32, i32) {
    %c0_i32 = arith.constant 0 : i32
    %c0_i32_0 = arith.constant 0 : i32
    %c0_i32_1 = arith.constant 0 : i32
    return %c0_i32, %c0_i32_0 : i32, i32
  }
  func.func @transform_12(%arg0: i32) -> (i32, i32) {
    %c0_i32 = arith.constant 0 : i32
    %c0_i32_0 = arith.constant 0 : i32
    return %arg0, %c0_i32 : i32, i32
  }
}

</mosaic_0001>

<bundles_post_ra>
// kernel: seq_time_gru_pallas.1
= control target key start
LH: loop header
LB: loop body
LE: loop exit
PB: predicated region body
PF: predicated region fallthrough
CT: control target
= control target key end

     0   :  { %s15612_s0 = inlined_call_operand.hbm [shape: f32[128,128], index: 0, kind: input, shape index: {}]   ;;  %s15613_s1 = inlined_call_operand.hbm [shape: f32[192,128], index: 1, kind: input, shape index: {}]   ;;  %s15614_s2 = inlined_call_operand.hbm [shape: bf16[128,512], index: 2, kind: input, shape index: {}]   ;;  %s15615_s3 = inlined_call_operand.vmem [shape: f32[1,512], index: 3, kind: input, shape index: {}]   ;;  %s15616_s4 = inlined_call_operand.hbm [shape: bf16[128,384], index: 4, kind: input, shape index: {}]   ;;  %s15617_s5 = inlined_call_operand.hbm [shape: bf16[128,128], index: 5, kind: input, shape index: {}]   ;;  %s15618_s6 = inlined_call_operand.hbm [shape: bf16[128,512], index: 6, kind: input, shape index: {}]   ;;  %s15619_s7 = inlined_call_operand.vmem [shape: f32[1,512], index: 7, kind: input, shape index: {}]   ;;  %s15620_s8 = inlined_call_operand.hbm [shape: bf16[128,384], index: 8, kind: input, shape index: {}]   ;;  %s15621_s9 = inlined_call_operand.hbm [shape: bf16[128,128], index: 9, kind: input, shape index: {}]   ;;  %s15622_s10 = inlined_call_operand.hbm [shape: bf16[128,128], index: 10, kind: input, shape index: {}]   ;;  %s15623_s11 = inlined_call_operand.vmem [shape: f32[1,128], index: 11, kind: input, shape index: {}]   ;;  %s15624_s12 = inlined_call_operand.hbm [shape: f32[64,128], index: 12, kind: output, shape index: {}]  }
   0x1   :  { %15782 = sst [smem:[#allocation115_spill]] %s15612_s0 }
   0x2   :  { %15783 = sst [smem:[#allocation116_spill]] %s15614_s2 }
   0x3   :  { %15784 = sst [smem:[#allocation117_spill]] %s15616_s4 }
   0x4   :  { %15785 = sst [smem:[#allocation118_spill]] %s15617_s5 }
   0x5   :  { %15786 = sst [smem:[#allocation119_spill]] %s15618_s6 }
   0x6   :  { %15787 = sst [smem:[#allocation120_spill]] %s15620_s8 }
   0x7   :  { %15788 = sst [smem:[#allocation121_spill]] %s15621_s9 }
   0x8   :  { %15789 = sst [smem:[#allocation122_spill]] %s15622_s10 }
   0x9   :  { %17 = vsyncpa [#allocation9], 0 }
   0xa   :  { %19 = vsyncpa [#allocation9 + $0x1], 0 }
   0xb   :  { %20 = vsyncpa [#allocation12], 0 }
   0xc   :  { %22 = vsyncpa [#allocation12 + $0x1], 0 }
   0xd   :  { %23 = vsyncpa [#allocation15], 0 }
   0xe   :  { %24 = vsyncpa [#allocation18], 0 }
   0xf   :  { %25 = vsyncpa [#allocation21], 0 }
  0x10   :  { %26 = vsyncpa [#allocation10], 0 }
  0x11   :  { %28 = vsyncpa [#allocation10 + $0x1], 0  ;;  %s13239_s21 = smov 0   ;;  %s13241_s22 = smov 0  }
  0x12   :  { %s13243_s23 = smov 0   ;;  %s13245_s24 = smov 0  }
  0x13 LB: > { %15790 = sst [smem:[#allocation31_spill]] %s13145_s23  ;;  %s13151_s25 = smov [#allocation13]   ;;  %s13149_s24 = sphi %s13245_s24, %s16175_s24   ;;  %s13145_s23 = sphi %s13243_s23, %s16172_s23   ;;  %s13141_s22 = sphi %s13241_s22, %s16174_s22   ;;  %s13137_s21 = sphi %s13239_s21, %s16173_s21  }
  0x14   : > { %s339_s26 = sshll.u32 %s13151_s25, 4  ;;  %s13260_s27 = sadd.s32 4294967295, %s13149_s24   ;;  %s340_s26 = int_to_ptr.vmem [resolvable:$true] %s339_s26 }
  0x15   : > { %p9945_p0 = scmp.ge.s32.totalorder %s13149_s24, 1  ;;  %p15627_p1 = scmp.eq.s32.totalorder %s13260_s27, 0 }
  0x16   : > { %p327_p2 = scmp.lt.s32.totalorder %s13149_s24, 3  ;;  %s13152_s29 = smov [#allocation14]  }
  0x17   : > { %s355_s30 = sshll.u32 %s13152_s29, 4  ;;  %s13153_s14 = smov [#allocation17]   ;;  %s13278_s30 = int_to_ptr.vmem [resolvable:$true] %s355_s30 }
  0x18   : > { %p13265_p3 = pnand %p9945_p0, %p327_p2  ;;  %s13280_s15 = sshll.u32 %s13153_s14, 4  ;;  %s382_s15 = int_to_ptr.vmem [resolvable:$true] %s13280_s15 }
  0x19   : > { %s12838_s17 = scalar_lea.vmem %s340_s26, 4096  ;;  %p12846_p11 = scmp.lt.s32.totalorder %s340_s26, %s340_s26 }
  0x1a   : > { %p11647_p5 = pneg %p13265_p3  ;;  %p12839_p8 = scmp.ne.s32.totalorder %s340_s26, %s12838_s17 }
  0x1b   : > { %p12847_p12 = scmp.lt.s32.totalorder %s12838_s17, %s12838_s17 }
  0x1c   : > { %p13274_p6 = pnand %p11647_p5, %p15627_p1 }
  0x1d   : > { %p12848_p13 = por %p12847_p12, %p12846_p11 }
  0x1e   : > { %p13284_p7 = pneg %p13274_p6 }
  0x20   : > { %p12841_p9 = pnand %p12839_p8, %p13284_p7 }
  0x22   : > { %p12842_p10 = pneg %p12841_p9 }
  0x24   : > { %p12849_p0 = pnand %p12848_p13, %p12842_p10 }
  0x26   : > { %12852 = shalt.err (!%p12849_p0)
}
  0x27   : > { %s13154_s18 = smov 256   ;;  %s13155_s19 = smov 16  }
  0x28   : > { %s15794_s2 = sld [smem:[#allocation116_spill]]  ;;  %s12864_s29 = scalar_lea.vmem %s13278_s30, 3072 }
  0x29   : > { %p12865_p2 = scmp.ne.s32.totalorder %s13278_s30, %s12864_s29  ;;  %p12872_p9 = scmp.lt.s32.totalorder %s13278_s30, %s13278_s30 }
  0x2a   : > { %p12873_p10 = scmp.lt.s32.totalorder %s12864_s29, %s12864_s29 }
  0x2b   : > { %p12867_p5 = pnand %p12865_p2, %p13284_p7 }
  0x2c   : > { %p12874_p11 = por %p12873_p10, %p12872_p9 }
  0x2d   : > { %p12868_p8 = pneg %p12867_p5 }
  0x2e   : > { %11650 = dma.hbm_to_vmem [thread:$0]  (!%p13274_p6), %s15794_s2, 4096, %s340_s26, [#allocation12], %s13154_s18, %s13154_s18, %s13155_s19  }
  0x2f   : > { %p12875_p12 = pnand %p12874_p11, %p12868_p8 }
  0x31   : > { %12878 = shalt.err (!%p12875_p12)
}
  0x32   : > { %s15625_s14 = smov 192   ;;  %s15626_s17 = smov 12  }
  0x33   : > { %s15795_s4 = sld [smem:[#allocation117_spill]]  ;;  %s12890_s25 = scalar_lea.vmem %s382_s15, 4096 }
  0x34   : > { %p12891_p13 = scmp.ne.s32.totalorder %s382_s15, %s12890_s25  ;;  %p12898_p5 = scmp.lt.s32.totalorder %s382_s15, %s382_s15 }
  0x35   : > { %p12899_p8 = scmp.lt.s32.totalorder %s12890_s25, %s12890_s25 }
  0x36   : > { %p12893_p0 = pnand %p12891_p13, %p13284_p7 }
  0x37   : > { %p12900_p9 = por %p12899_p8, %p12898_p5 }
  0x38   : > { %p12894_p2 = pneg %p12893_p0 }
  0x39   : > { %11653 = dma.hbm_to_vmem [thread:$0]  (!%p13274_p6), %s15795_s4, 3072, %s13278_s30, [#allocation15], %s15625_s14, %s15625_s14, %s15626_s17  }
  0x3a   : > { %p12901_p10 = pnand %p12900_p9, %p12894_p2 }
  0x3c   : > { %12904 = shalt.err (!%p12901_p10)
}
  0x3d   : > { %s15796_s6 = sld [smem:[#allocation119_spill]]  ;;  %s13158_s26 = smov [#allocation20]  }
  0x3e   : > { %s410_s30 = sshll.u32 %s13158_s26, 4  ;;  %s13159_s20 = smov [#allocation16]   ;;  %s411_s30 = int_to_ptr.vmem [resolvable:$true] %s410_s30 }
  0x3f   : > { %s368_s14 = sshll.u32 %s13159_s20, 4  ;;  %s12916_s17 = scalar_lea.vmem %s411_s30, 1024  ;;  %s369_s14 = int_to_ptr.vmem [resolvable:$true] %s368_s14 }
  0x40   : > { %p12917_p11 = scmp.ne.s32.totalorder %s411_s30, %s12916_s17  ;;  %p12924_p0 = scmp.lt.s32.totalorder %s411_s30, %s411_s30 }
  0x41   : > { %p12925_p2 = scmp.lt.s32.totalorder %s12916_s17, %s12916_s17 }
  0x42   : > { %p12919_p12 = pnand %p12917_p11, %p13284_p7 }
  0x43   : > { %11659 = dma.hbm_to_vmem [thread:$0]  (!%p13274_p6), %s15796_s6, 4096, %s382_s15, [#allocation18], %s13154_s18, %s13154_s18, %s13155_s19  }
  0x44   : > { %p12920_p13 = pneg %p12919_p12  ;;  %p12926_p5 = por %p12925_p2, %p12924_p0 }
  0x46   : > { %p12927_p8 = pnand %p12926_p5, %p12920_p13 }
  0x48   : > { %12930 = shalt.err (!%p12927_p8)
}
  0x49   : > { %s13160_s25 = smov 64   ;;  %s13161_s2 = smov 4  }
  0x4a   : > { %s15797_s9 = sld [smem:[#allocation121_spill]]  ;;  %s12942_s19 = scalar_lea.vmem %s369_s14, 1024 }
  0x4b   : > { %p12943_p9 = scmp.ne.s32.totalorder %s369_s14, %s12942_s19  ;;  %p12950_p12 = scmp.lt.s32.totalorder %s369_s14, %s369_s14 }
  0x4c   : > { %p12951_p13 = scmp.lt.s32.totalorder %s12942_s19, %s12942_s19 }
  0x4d   : > { %p12945_p10 = pnand %p12943_p9, %p13284_p7 }
  0x4e   : > { %p12952_p0 = por %p12951_p13, %p12950_p12 }
  0x4f   : > { %p12946_p11 = pneg %p12945_p10 }
  0x50   : > { %11665 = dma.hbm_to_vmem [thread:$0]  (!%p13274_p6), %s15797_s9, 1024, %s411_s30, [#allocation21], %s13160_s25, %s13160_s25, %s13161_s2  }
  0x51   : > { %p12953_p2 = pnand %p12952_p0, %p12946_p11 }
  0x53   : > { %12956 = shalt.err (!%p12953_p2)
}
  0x54   : > { %s15798_s5 = sld [smem:[#allocation118_spill]]  ;;  %s13162_s26 = smov [#allocation19]  }
  0x55   : > { %s397_s30 = sshll.u32 %s13162_s26, 4  ;;  %s13163_s20 = smov [#allocation22]   ;;  %s398_s30 = int_to_ptr.vmem [resolvable:$true] %s397_s30 }
  0x56   : > { %s423_s15 = sshll.u32 %s13163_s20, 4  ;;  %s12968_s18 = scalar_lea.vmem %s398_s30, 3072  ;;  %s424_s15 = int_to_ptr.vmem [resolvable:$true] %s423_s15 }
  0x57   : > { %p12969_p5 = scmp.ne.s32.totalorder %s398_s30, %s12968_s18  ;;  %p12976_p10 = scmp.lt.s32.totalorder %s398_s30, %s398_s30 }
  0x58   : > { %p12977_p11 = scmp.lt.s32.totalorder %s12968_s18, %s12968_s18 }
  0x59   : > { %p12971_p8 = pnand %p12969_p5, %p13284_p7 }
  0x5a   : > { %11656 = dma.hbm_to_vmem [thread:$0]  (!%p13274_p6), %s15798_s5, 1024, %s369_s14, [#allocation15], %s13160_s25, %s13160_s25, %s13161_s2  }
  0x5b   : > { %p12972_p9 = pneg %p12971_p8  ;;  %p12978_p12 = por %p12977_p11, %p12976_p10 }
  0x5d   : > { %p12979_p13 = pnand %p12978_p12, %p12972_p9 }
  0x5f   : > { %12982 = shalt.err (!%p12979_p13)
}
  0x60   : > { %s15799_s19 = smov 12   ;;  %s15800_s17 = smov 192  }
  0x61   : > { %s15801_s8 = sld [smem:[#allocation120_spill]]  ;;  %s12994_s26 = scalar_lea.vmem %s424_s15, 1024 }
  0x62   : > { %p12995_p0 = scmp.ne.s32.totalorder %s424_s15, %s12994_s26  ;;  %p13002_p8 = scmp.lt.s32.totalorder %s424_s15, %s424_s15 }
  0x63   : > { %p13003_p10 = scmp.lt.s32.totalorder %s12994_s26, %s12994_s26 }
  0x64   : > { %p12997_p2 = pnand %p12995_p0, %p13284_p7 }
  0x65   : > { %p13004_p9 = por %p13003_p10, %p13002_p8 }
  0x66   : > { %p12998_p5 = pneg %p12997_p2 }
  0x67   : > { %11662 = dma.hbm_to_vmem [thread:$0]  (!%p13274_p6), %s15801_s8, 3072, %s398_s30, [#allocation18], %s15800_s17, %s15800_s17, %s15799_s19  }
  0x68   : > { %p13005_p11 = pnand %p13004_p9, %p12998_p5 }
  0x6a   : > { %13008 = shalt.err (!%p13005_p11)
}
  0x6b   : > { %s15802_s10 = sld [smem:[#allocation122_spill]]  ;;  %s9944_s13 = sadd.s32 4294967294, %s13149_s24  }
  0x6c   : > { %s13360_s16 = sadd.s32 1, %s13149_s24   ;;  %s41_s30 = sadd.s32 1, %s13145_s23 }
  0x6d   : > { %s38_s19 = ssub.s32 %s13149_s24, %s13360_s16  ;;  %p48_p7 = scmp.ne.s32.totalorder %s13145_s23, %s13141_s22 }
  0x6e   : > { %p39_p12 = scmp.eq.s32.totalorder %s38_s19, 0  ;;  %p49_p13 = scmp.eq.s32.totalorder %s13149_s24, 0 }
  0x6f   : > { %p54_p0 = scmp.ne.s32.totalorder %s13141_s22, %s13137_s21  ;;  %p314_p2 = scmp.eq.s32.totalorder %s13260_s27, 1 }
  0x70   : > { %s13372_s17 = scalar_select %p39_p12, %s13145_s23, %s41_s30  }
  0x71   : > { %11668 = dma.hbm_to_vmem [thread:$0]  (!%p13274_p6), %s15802_s10, 1024, %s424_s15, [#allocation21], %s13160_s25, %s13160_s25, %s13161_s2  }
  0x72   : > { %15803 = sst [smem:[#allocation32_spill]] %s13372_s17  ;;  %p50_p5 = por %p49_p13, %p48_p7 }
  0x73   : > { %p13376_p8 = por %p15627_p1, %p54_p0  ;;  %p13380_p6 = por %p314_p2, %p48_p7 }
  0x74   : > { %p320_p10 = scmp.eq.s32.totalorder %s9944_s13, 1  ;;  %p11687_p9 = scmp.lt.s32.totalorder %s13149_s24, 2 }
  0x75   : > { %s15804_s14 = scalar_select %p13376_p8, 1, 0 }
  0x76   : > { %s15805_s25 = scalar_select %p13380_p6, 1, 0 }
  0x77   : > { %s13386_s2 = sand.u32 1, %s13145_s23   ;;  %p13388_p11 = por %p320_p10, %p54_p0 }
  0x78   : > { %s9954_s29 = sshll.u32 %s13386_s2, 6  ;;  %s10798_s26 = sshll.u32 %s13149_s24, 10 }
  0x79   : > { %s15806_s15 = scalar_select %p13388_p11, 1, 0 }
  0x7a   : > { %s15807_s0 = sld [smem:[#allocation115_spill]]  ;;  %s444_s13 = scalar_lea.vmem [#allocation8], %s9954_s29 }
  0x7b   : > { %s451_s19 = sshll.u32 %s444_s13, 4  ;;  %p13399_p7 = pnand %p11687_p9, %p50_p5  ;;  %s13403_s19 = int_to_ptr.vmem [resolvable:$true] %s451_s19 }
  0x7d   : > { %p13011_p13 = pneg %p13399_p7 }
  0x80   : > { %s13397_s30 = scalar_lea.hbm %s15807_s0, %s10798_s26  ;;  %s13014_s20 = scalar_lea.hbm %s15807_s0, 2048 }
  0x81   : > { %s13009_s6 = scalar_lea.hbm %s13397_s30, 1024  ;;  %p13015_p5 = scmp.lt.s32.totalorder %s13397_s30, %s15807_s0 }
  0x82   : > { %p13010_p12 = scmp.ne.s32.totalorder %s13397_s30, %s13009_s6  ;;  %p13016_p10 = scmp.lt.s32.totalorder %s13014_s20, %s13009_s6 }
  0x84   : > { %p13012_p0 = pnand %p13011_p13, %p13010_p12  ;;  %p13017_p9 = por %p13016_p10, %p13015_p5 }
  0x86   : > { %p13013_p2 = pneg %p13012_p0 }
  0x88   : > { %p13018_p4 = pnand %p13017_p9, %p13013_p2 }
  0x8a   : > { %13021 = shalt.err (!%p13018_p4)
}
  0x8b   : > { %s13022_s5 = scalar_lea.vmem %s13403_s19, 1024  ;;  %s13164_s26 = smov [#allocation8]  }
  0x8c   : > { %p13023_p1 = scmp.ne.s32.totalorder %s13403_s19, %s13022_s5  ;;  %s13027_s29 = sshll.u32 %s13164_s26, 4  ;;  %s13028_s29 = int_to_ptr.vmem [resolvable:$false] %s13027_s29 }
  0x8d   : > { %s13029_s8 = scalar_lea.vmem %s13028_s29, 2048  ;;  %p13030_p11 = scmp.lt.s32.totalorder %s13403_s19, %s13028_s29 }
  0x8e   : > { %p13025_p12 = pnand %p13023_p1, %p13011_p13  ;;  %p13031_p6 = scmp.lt.s32.totalorder %s13029_s8, %s13022_s5 }
  0x90   : > { %p13026_p0 = pneg %p13025_p12  ;;  %p13032_p8 = por %p13031_p6, %p13030_p11 }
  0x92   : > { %p13033_p5 = pnand %p13032_p8, %p13026_p0 }
  0x94   : > { %13036 = shalt.err (!%p13033_p5)
}
  0x95   : > { %s13165_s6 = smov 128   ;;  %s13166_s20 = smov 8  }
  0x96   : > { %s15809_s18 = scalar_lea.sflag [#allocation9], %s13386_s2  ;;  %s461_s5 = sand.u32 1, %s13149_s24  }
  0x97   : > { %11672 = dma.hbm_to_vmem [thread:$0]  (!%p13399_p7), %s13397_s30, 1024, %s13403_s19, %s15809_s18, %s13165_s6, %s13165_s6, %s13166_s20  }
  0x98   : > { %s11611_s8 = smul.u32 96, %s13386_s2  ;;  %s462_s17 = scalar_lea.sflag [#allocation12], %s461_s5 }
  0x99   : > { %s10799_s13 = smul.u32 1536, %s13149_s24  ;;  %s13042_s19 = scalar_lea.hbm %s15613_s1, 3072 }
  0x9a   : > { %s465_s9 = scalar_lea.vmem [#allocation11], %s11611_s8 }
  0x9b   : > { %s13441_s0 = scalar_lea.hbm %s15613_s1, %s10799_s13  ;;  %s472_s10 = sshll.u32 %s465_s9, 4  ;;  %s13443_s10 = int_to_ptr.vmem [resolvable:$true] %s472_s10 }
  0x9c   : > { %s13037_s23 = scalar_lea.hbm %s13441_s0, 1536  ;;  %p13043_p6 = scmp.lt.s32.totalorder %s13441_s0, %s15613_s1 }
  0x9d   : > { %p13038_p1 = scmp.ne.s32.totalorder %s13441_s0, %s13037_s23  ;;  %p13044_p11 = scmp.lt.s32.totalorder %s13042_s19, %s13037_s23 }
  0x9f   : > { %p13040_p4 = pnand %p13038_p1, %p13011_p13  ;;  %p13045_p2 = por %p13044_p11, %p13043_p6 }
  0xa1   : > { %p13041_p8 = pneg %p13040_p4 }
  0xa3   : > { %p13046_p10 = pnand %p13045_p2, %p13041_p8 }
  0xa5   : > { %13049 = shalt.err (!%p13046_p10)
}
  0xa6   : > { %s13050_s9 = scalar_lea.vmem %s13443_s10, 1536  ;;  %s13167_s5 = smov [#allocation11]  }
  0xa7   : > { %p13051_p9 = scmp.ne.s32.totalorder %s13443_s10, %s13050_s9  ;;  %s13055_s8 = sshll.u32 %s13167_s5, 4  ;;  %s13056_s8 = int_to_ptr.vmem [resolvable:$false] %s13055_s8 }
  0xa8   : > { %s13057_s26 = scalar_lea.vmem %s13056_s8, 3072  ;;  %p13058_p5 = scmp.lt.s32.totalorder %s13443_s10, %s13056_s8 }
  0xa9   : > { %p13053_p12 = pnand %p13051_p9, %p13011_p13  ;;  %p13059_p1 = scmp.lt.s32.totalorder %s13057_s26, %s13050_s9 }
  0xab   : > { %p13054_p0 = pneg %p13053_p12  ;;  %p13060_p4 = por %p13059_p1, %p13058_p5 }
  0xad   : > { %p13061_p6 = pnand %p13060_p4, %p13054_p0 }
  0xaf   : > { %13064 = shalt.err (!%p13061_p6)
}
  0xb0   : > { %11675 = dma.hbm_to_vmem [thread:$0]  (!%p13399_p7), %s13441_s0, 1536, %s13443_s10, %s462_s17, %s13165_s6, %s13165_s6, %s13166_s20  }
  0xb1   : > { %484 = sbr.rel (%p13265_p3) target bundleno = 6850 (0x1ac2), region = 68 }
  0xb6   : > { %s13473_s23 = sand.u32 1, %s13141_s22   ;;  %p15810_p13 = scmp.ne.s32.totalorder %s15804_s14, 0 }
  0xb7   : > { %s9959_s29 = sshll.u32 %s13473_s23, 6  ;;  %s487_s2 = scalar_lea.sflag [#allocation9], %s13473_s23 }
  0xb8   : > { %s13477_s30 = scalar_lea.vmem [#allocation8], %s9959_s29 }
  0xb9   : > { %13108 = dma.done.wait (%p15810_p13), %s487_s2, 1024  }
  0xba   : > { %13110 = vsyncadd (%p15810_p13), %s487_s2, 4294966272  ;;  %s495_s0 = sand.u32 1, %s13260_s27   ;;  %s11612_s4 = smul.u32 96, %s13473_s23 }
  0xbb   : > { %s496_s10 = scalar_lea.sflag [#allocation12], %s495_s0 }
  0xbc   : > { %s13485_s28 = scalar_lea.vmem [#allocation11], %s11612_s4 }
  0xbd   : > { %13112 = dma.done.wait (%p15810_p13), %s496_s10, 1536  }
  0xbe   : > { %13114 = vsyncadd (%p15810_p13), %s496_s10, 4294965760  ;;  %p15811_p3 = scmp.eq.s32.totalorder %s13260_s27, 0 }
  0xc0   : > { %13116 = dma.done.wait (%p15811_p3), [#allocation12], 4096   ;;  %p15812_p7 = pmov %p15811_p3 }
  0xc1   : > { %p15813_p8 = pmov %p15811_p3 }
  0xc2   : > { %13118 = vsyncadd (%p15812_p7), [#allocation12], 4294963200 }
  0xc3   : > { %13120 = dma.done.wait (%p15813_p8), [#allocation15], 4096   ;;  %p15814_p11 = pmov %p15811_p3 }
  0xc4   : > { %p15815_p2 = pmov %p15811_p3 }
  0xc5   : > { %13122 = vsyncadd (%p15814_p11), [#allocation15], 4294963200 }
  0xc6   : > { %13124 = dma.done.wait (%p15815_p2), [#allocation18], 7168   ;;  %p15816_p10 = pmov %p15815_p2 }
  0xc7   : > { %p15817_p9 = pmov %p15815_p2 }
  0xc8   : > { %13126 = vsyncadd (%p15816_p10), [#allocation18], 4294960128 }
  0xc9   : > { %13128 = dma.done.wait (%p15817_p9), [#allocation21], 2048   ;;  %p15818_p12 = pmov %p15815_p2 }
  0xca   : > { %v11748_v0 = vld [vmem:[#allocation16 + $0x38] sm:$0xff]   ;;  %v11750_v2 = vld [vmem:[#allocation16 + $0x30] sm:$0xff]   ;;  %v11752_v4 = vld [vmem:[#allocation16 + $0x28] sm:$0xff]   ;;  %v15633_v60 = vmov 0   ;;  %vm13170_vm0 = vmmov 0   ;;  %s9967_s6 = sshll.u32 %s13473_s23, 5 }
  0xcb   : > { %13130 = vsyncadd (%p15818_p12), [#allocation21], 4294965248  ;;  %v11749_v1 = vld [vmem:[#allocation20 + $0x38] sm:$0xff]   ;;  %11055 = vmatprep.subr.bf16.mxu0 %v11748_v0  ;;  %v11751_v3 = vld [vmem:[#allocation20 + $0x30] sm:$0xff]   ;;  %s572_s18 = scalar_lea.vmem [#allocation23], %s9967_s6  ;;  %s10800_s9 = sshll.u32 %s13260_s27, 9 }
  0xcc   : > { %11083 = vmatprep.subr.bf16.mxu1 %v11749_v1  ;;  %11056 = vmatpush3.bf16.msra.mxu0 %v11748_v0  ;;  %v11753_v5 = vld [vmem:[#allocation20 + $0x28] sm:$0xff]   ;;  %v11754_v6 = vld [vmem:[#allocation16 + $0x20] sm:$0xff]   ;;  %v11756_v8 = vld [vmem:[#allocation16 + $0x18] sm:$0xff]   ;;  %s9768_s13 = sshll.u32 %s572_s18, 4  ;;  %s15569_s26 = scalar_lea.hbm %s15624_s12, %s10800_s9  ;;  %s15564_s13 = int_to_ptr.vmem [resolvable:$true] %s9768_s13 }
  0xcd   : > { %11084 = vmatpush3.bf16.msra.mxu1 %v11749_v1  ;;  %11057 = vmatprep.subr.bf16.mxu0 %v11750_v2  ;;  %v11755_v7 = vld [vmem:[#allocation20 + $0x20] sm:$0xff]   ;;  %v11757_v9 = vld [vmem:[#allocation20 + $0x18] sm:$0xff]   ;;  %v11758_v10 = vld [vmem:[#allocation16 + $0x10] sm:$0xff]   ;;  %s9755_s29 = scalar_lea.sflag [#allocation10], %s13473_s23  ;;  %s13065_s2 = scalar_lea.vmem %s15564_s13, 512 }
  0xce   : > { %11085 = vmatprep.subr.bf16.mxu1 %v11751_v3  ;;  %v577_v11 = vld [vmem:[%s13485_s28] sm:$0xff]  ;;  %v578_v12 = vld [vmem:[%s13485_s28 + $0x8] sm:$0xff]  ;;  %v11759_v13 = vld [vmem:[#allocation20 + $0x10] sm:$0xff]   ;;  %p13066_p0 = scmp.ne.s32.totalorder %s15564_s13, %s13065_s2  ;;  %p16168_p5 = scmp.ne.s32.totalorder %s15805_s25, 0 }
  0xcf   : > { %v589_v14 = vpack.c.bf16 %v578_v12, %v577_v11  ;;  %v11760_v15 = vld [vmem:[#allocation16 + $0x8] sm:$0xff]   ;;  %v11762_v17 = vld [vmem:[#allocation16] sm:$0xff]   ;;  %v579_v19 = vld [vmem:[%s13485_s28 + $0x10] sm:$0xff]  ;;  %s13171_s27 = smov [#allocation23]  }
  0xd0   : > { %11058 = vmatpush3.bf16.msra.mxu0 %v11750_v2  ;;  %v11761_v16 = vld [vmem:[#allocation20 + $0x8] sm:$0xff]   ;;  %v11763_v18 = vld [vmem:[#allocation20] sm:$0xff]   ;;  %v580_v20 = vld [vmem:[%s13485_s28 + $0x18] sm:$0xff]  ;;  %p13067_p1 = pnand %p13066_p0, %p16168_p5 }
  0xd1   : > { %11086 = vmatpush3.bf16.msra.mxu1 %v11751_v3  ;;  %11059 = vmatprep.subr.bf16.mxu0 %v11752_v4  ;;  %v11766_v21 = vld [vmem:[#allocation13 + $0xe4] ss:$16 sps:$4 sm:$0xff]   ;;  %v11769_v22 = vld [vmem:[#allocation13 + $0xec] ss:$16 sps:$4 sm:$0xff]   ;;  %v590_v23 = vpack.c.bf16 %v580_v20, %v579_v19  ;;  %v11764_v26 = vld [vmem:[#allocation13 + $0xe0] ss:$16 sps:$4 sm:$0xff]  }
  0xd2   : > { %11087 = vmatprep.subr.bf16.mxu1 %v11753_v5  ;;  %11071 = vmatprep.mubr.bf16.mxu0 %v589_v14  ;;  %v581_v24 = vld [vmem:[%s13485_s28 + $0x20] sm:$0xff]  ;;  %v582_v25 = vld [vmem:[%s13485_s28 + $0x28] sm:$0xff]  ;;  %v583_v33 = vld [vmem:[%s13485_s28 + $0x30] sm:$0xff]  ;;  %p13068_p4 = pneg %p13067_p1 }
  0xd3   : > { %11099 = vmatprep.mubr.bf16.mxu1 %v589_v14  ;;  %v11767_v27 = vld [vmem:[#allocation13 + $0xe8] ss:$16 sps:$4 sm:$0xff]   ;;  %v11772_v28 = vld [vmem:[#allocation13 + $0xc4] ss:$16 sps:$4 sm:$0xff]   ;;  %v11775_v29 = vld [vmem:[#allocation13 + $0xcc] ss:$16 sps:$4 sm:$0xff]   ;;  %v591_v30 = vpack.c.bf16 %v582_v25, %v581_v24 }
  0xd4   : > { %11060 = vmatpush3.bf16.msra.mxu0 %v11752_v4  ;;  %v11770_v31 = vld [vmem:[#allocation13 + $0xc0] ss:$16 sps:$4 sm:$0xff]   ;;  %v11773_v32 = vld [vmem:[#allocation13 + $0xc8] ss:$16 sps:$4 sm:$0xff]   ;;  %v11778_v35 = vld [vmem:[#allocation13 + $0xa4] ss:$16 sps:$4 sm:$0xff]  }
  0xd5   : > { %11088 = vmatpush3.bf16.msra.mxu1 %v11753_v5  ;;  %11061 = vmatprep.subr.bf16.mxu0 %v11754_v6  ;;  %v584_v34 = vld [vmem:[%s13485_s28 + $0x38] sm:$0xff]  ;;  %v585_v38 = vld [vmem:[%s13485_s28 + $0x40] sm:$0xff]  ;;  %v586_v39 = vld [vmem:[%s13485_s28 + $0x48] sm:$0xff] }
  0xd6   : > { %11089 = vmatprep.subr.bf16.mxu1 %v11755_v7  ;;  %v11781_v36 = vld [vmem:[#allocation13 + $0xac] ss:$16 sps:$4 sm:$0xff]   ;;  %v592_v37 = vpack.c.bf16 %v584_v34, %v583_v33  ;;  %v11776_v40 = vld [vmem:[#allocation13 + $0xa0] ss:$16 sps:$4 sm:$0xff]   ;;  %v11779_v41 = vld [vmem:[#allocation13 + $0xa8] ss:$16 sps:$4 sm:$0xff]   ;;  %v593_v45 = vpack.c.bf16 %v586_v39, %v585_v38 }
  0xd7   : > { %v11784_v42 = vld [vmem:[#allocation13 + $0x84] ss:$16 sps:$4 sm:$0xff]   ;;  %v11782_v43 = vld [vmem:[#allocation13 + $0x80] ss:$16 sps:$4 sm:$0xff]   ;;  %v11787_v44 = vld [vmem:[#allocation13 + $0x8c] ss:$16 sps:$4 sm:$0xff]  }
  0xd8   : > { %11062 = vmatpush3.bf16.msra.mxu0 %v11754_v6  ;;  %v587_v46 = vld [vmem:[%s13485_s28 + $0x50] sm:$0xff]  ;;  %v588_v47 = vld [vmem:[%s13485_s28 + $0x58] sm:$0xff]  ;;  %v1053_v3 = vld [vmem:[%s13477_s30] sm:$0xff] }
  0xd9   : > { %11090 = vmatpush3.bf16.msra.mxu1 %v11755_v7  ;;  %11063 = vmatprep.subr.bf16.mxu0 %v11756_v8  ;;  %v11785_v48 = vld [vmem:[#allocation13 + $0x88] ss:$16 sps:$4 sm:$0xff]   ;;  %v11790_v49 = vld [vmem:[#allocation13 + $0x64] ss:$16 sps:$4 sm:$0xff]   ;;  %v11793_v50 = vld [vmem:[#allocation13 + $0x6c] ss:$16 sps:$4 sm:$0xff]   ;;  %v594_v51 = vpack.c.bf16 %v588_v47, %v587_v46 }
  0xda   : > { %11091 = vmatprep.subr.bf16.mxu1 %v11757_v9  ;;  %v11788_v52 = vld [vmem:[#allocation13 + $0x60] ss:$16 sps:$4 sm:$0xff]   ;;  %v11791_v53 = vld [vmem:[#allocation13 + $0x68] ss:$16 sps:$4 sm:$0xff]   ;;  %v11796_v54 = vld [vmem:[#allocation13 + $0x44] ss:$16 sps:$4 sm:$0xff]  }
  0xdb   : > { %v11799_v55 = vld [vmem:[#allocation13 + $0x4c] ss:$16 sps:$4 sm:$0xff]   ;;  %v11794_v56 = vld [vmem:[#allocation13 + $0x40] ss:$16 sps:$4 sm:$0xff]   ;;  %v11797_v57 = vld [vmem:[#allocation13 + $0x48] ss:$16 sps:$4 sm:$0xff]  }
  0xdc   : > { %11064 = vmatpush3.bf16.msra.mxu0 %v11756_v8  ;;  %v11802_v58 = vld [vmem:[#allocation13 + $0x24] ss:$16 sps:$4 sm:$0xff]   ;;  %v11805_v59 = vld [vmem:[#allocation13 + $0x2c] ss:$16 sps:$4 sm:$0xff]   ;;  %v11800_v61 = vld [vmem:[#allocation13 + $0x20] ss:$16 sps:$4 sm:$0xff]  }
  0xdd   : > { %11092 = vmatpush3.bf16.msra.mxu1 %v11757_v9  ;;  %11065 = vmatprep.subr.bf16.mxu0 %v11758_v10  ;;  %v11803_v62 = vld [vmem:[#allocation13 + $0x28] ss:$16 sps:$4 sm:$0xff]   ;;  %v11808_v63 = vld [vmem:[#allocation13 + $0x4] ss:$16 sps:$4 sm:$0xff]   ;;  %v11806_v0 = vld [vmem:[#allocation13] ss:$16 sps:$4 sm:$0xff]  }
  0xde   : > { %11093 = vmatprep.subr.bf16.mxu1 %v11759_v13  ;;  %v11811_v1 = vld [vmem:[#allocation13 + $0xc] ss:$16 sps:$4 sm:$0xff]   ;;  %v11809_v2 = vld [vmem:[#allocation13 + $0x8] ss:$16 sps:$4 sm:$0xff]   ;;  %v13527_v8 = vld [vmem:[#allocation14 + $0x94] ss:$12 sps:$4 sm:$0xff]  }
  0xdf   : > { %v1054_v4 = vld [vmem:[%s13477_s30 + $0x8] sm:$0xff]  ;;  %v11836_v9 = vld [vmem:[#allocation14 + $0xb0] ss:$12 sps:$4 sm:$0xff]   ;;  %v11841_v33 = vld [vmem:[#allocation14 + $0x38] ss:$12 sps:$4 sm:$0xff]  }
  0xe0   : > { %11066 = vmatpush3.bf16.msra.mxu0 %v11758_v10  ;;  %v13523_v5 = vld [vmem:[#allocation14 + $0xac] ss:$12 sps:$4 sm:$0xff]   ;;  %v13525_v6 = vld [vmem:[#allocation14 + $0xa8] ss:$12 sps:$4 sm:$0xff]   ;;  %v1061_v7 = vpack.c.bf16 %v1054_v4, %v1053_v3  ;;  %v13530_v10 = vld [vmem:[#allocation14 + $0x90] ss:$12 sps:$4 sm:$0xff]  }
  0xe1   : > { %11094 = vmatpush3.bf16.msra.mxu1 %v11759_v13  ;;  %11067 = vmatprep.subr.bf16.mxu0 %v11760_v15  ;;  %v1055_v11 = vld [vmem:[%s13477_s30 + $0x10] sm:$0xff]  ;;  %v1056_v12 = vld [vmem:[%s13477_s30 + $0x18] sm:$0xff]  ;;  %v15631_v13 = vmov 0.0   ;;  %v11838_v19 = vld [vmem:[#allocation14 + $0x80] ss:$12 sps:$4 sm:$0xff]  }
  0xe2   : > { %11095 = vmatprep.subr.bf16.mxu1 %v11761_v16  ;;  %v13535_v14 = vld [vmem:[#allocation14 + $0x7c] ss:$12 sps:$4 sm:$0xff]   ;;  %v13548_v20 = vld [vmem:[#allocation14 + $0x60] ss:$12 sps:$4 sm:$0xff]   ;;  %v11830_v34 = vld [vmem:[#allocation14 + $0x18] ss:$12 sps:$4 sm:$0xff]  }
  0xe3   : > { %v11839_v24 = vld [vmem:[#allocation14 + $0x68] ss:$12 sps:$4 sm:$0xff]   ;;  %v11833_v38 = vld [vmem:[#allocation14] ss:$12 sps:$4 sm:$0xff]  }
  0xe4   : > { %11068 = vmatpush3.bf16.msra.mxu0 %v11760_v15  ;;  %v11837_v15 = vld [vmem:[#allocation14 + $0x98] ss:$12 sps:$4 sm:$0xff]   ;;  %v11824_v25 = vld [vmem:[#allocation14 + $0x48] ss:$12 sps:$4 sm:$0xff]   ;;  %v11850_v46 = vld [vmem:[#allocation14 + $0x20] ss:$12 sps:$4 sm:$0xff]  }
  0xe5   : > { %11096 = vmatpush3.bf16.msra.mxu1 %v11761_v16  ;;  %11069 = vmatprep.subr.bf16.mxu0 %v11762_v17  ;;  %v13541_v16 = vld [vmem:[#allocation14 + $0x78] ss:$12 sps:$4 sm:$0xff]   ;;  %v11843_v39 = vld [vmem:[#allocation14 + $0x8] ss:$12 sps:$4 sm:$0xff]  }
  0xe6   : > { %11097 = vmatprep.subr.bf16.mxu1 %v11763_v18 }
  0xe8   : > { %11070 = vmatpush3.bf16.msra.mxu0 %v11762_v17  ;;  %v1062_v17 = vpack.c.bf16 %v1056_v12, %v1055_v11 }
  0xe9   : > { %11098 = vmatpush3.bf16.msra.mxu1 %v11763_v18  ;;  %1279 = vmatprep.subr.bf16.mxu0 %v11766_v21  ;;  %v13543_v18 = vld [vmem:[#allocation14 + $0x64] ss:$12 sps:$4 sm:$0xff]  }
  0xea   : > { %1352 = vmatprep.subr.bf16.mxu1 %v11769_v22  ;;  %v1057_v21 = vld [vmem:[%s13477_s30 + $0x20] sm:$0xff]  ;;  %v1058_v22 = vld [vmem:[%s13477_s30 + $0x28] sm:$0xff] }
  0xeb   : > { %11072 = vmatmul.mubr.bf16.vlgmr.msra.gmra.mxu0 %v590_v23 }
  0xec   : > { %11100 = vmatmul.mubr.bf16.vlgmr.msra.gmra.mxu1 %v590_v23  ;;  %1280 = vmatpush1.bf16.msra.mxu0 %v11764_v26  ;;  %v13552_v23 = vld [vmem:[#allocation14 + $0x4c] ss:$12 sps:$4 sm:$0xff]   ;;  %v1063_v26 = vpack.c.bf16 %v1058_v22, %v1057_v21 }
  0xed   : > { %1353 = vmatpush1.bf16.msra.mxu1 %v11767_v27  ;;  %1281 = vmatprep.subr.bf16.mxu0 %v11772_v28  ;;  %v11829_v27 = vld [vmem:[#allocation14 + $0x34] ss:$12 sps:$4 sm:$0xff]   ;;  %v11840_v28 = vld [vmem:[#allocation14 + $0x50] ss:$12 sps:$4 sm:$0xff]  }
  0xee   : > { %1354 = vmatprep.subr.bf16.mxu1 %v11775_v29  ;;  %11075 = vmatprep.mubr.bf16.mxu0 %v591_v30  ;;  %v11827_v29 = vld [vmem:[#allocation14 + $0x30] ss:$12 sps:$4 sm:$0xff]  }
  0xef   : > { %11103 = vmatprep.mubr.bf16.mxu1 %v591_v30  ;;  %v1059_v30 = vld [vmem:[%s13477_s30 + $0x30] sm:$0xff] }
  0xf0   : > { %1282 = vmatpush1.bf16.msra.mxu0 %v11770_v31  ;;  %v1060_v31 = vld [vmem:[%s13477_s30 + $0x38] sm:$0xff]  ;;  %s13069_s30 = sshll.u32 %s13171_s27, 4  ;;  %s13070_s30 = int_to_ptr.vmem [resolvable:$false] %s13069_s30 }
  0xf1   : > { %1355 = vmatpush1.bf16.msra.mxu1 %v11773_v32  ;;  %1283 = vmatprep.subr.bf16.mxu0 %v11778_v35  ;;  %v11832_v32 = vld [vmem:[#allocation14 + $0x1c] ss:$12 sps:$4 sm:$0xff]   ;;  %v1064_v35 = vpack.c.bf16 %v1060_v31, %v1059_v30  ;;  %s13071_s0 = scalar_lea.vmem %s13070_s30, 1024  ;;  %p13072_p6 = scmp.lt.s32.totalorder %s15564_s13, %s13070_s30 }
  0xf2   : > { %1356 = vmatprep.subr.bf16.mxu1 %v11781_v36  ;;  %v11835_v36 = vld [vmem:[#allocation14 + $0x4] ss:$12 sps:$4 sm:$0xff]   ;;  %p13073_p13 = scmp.lt.s32.totalorder %s13071_s0, %s13065_s2 }
  0xf3   : > { %11076 = vmatmul.mubr.bf16.gmra.mxu0 %v592_v37 }
  0xf4   : > { %1284 = vmatpush1.bf16.msra.mxu0 %v11776_v40  ;;  %11104 = vmatmul.mubr.bf16.gmra.mxu1 %v592_v37  ;;  %v11842_v37 = vld [vmem:[#allocation14 + $0x20] ss:$12 sps:$4 sm:$0xff]   ;;  %v11844_v40 = vld [vmem:[#allocation14 + $0xb0] ss:$12 sps:$4 sm:$0xff]   ;;  %p13074_p3 = por %p13073_p13, %p13072_p6 }
  0xf5   : > { %1357 = vmatpush1.bf16.msra.mxu1 %v11779_v41  ;;  %1285 = vmatprep.subr.bf16.mxu0 %v11784_v42  ;;  %v11845_v41 = vld [vmem:[#allocation14 + $0x98] ss:$12 sps:$4 sm:$0xff]   ;;  %v11846_v42 = vld [vmem:[#allocation14 + $0x80] ss:$12 sps:$4 sm:$0xff]  }
  0xf6   : > { %1358 = vmatprep.subr.bf16.mxu1 %v11787_v44  ;;  %11079 = vmatprep.mubr.bf16.mxu0 %v593_v45  ;;  %v11848_v44 = vld [vmem:[#allocation14 + $0x50] ss:$12 sps:$4 sm:$0xff]   ;;  %p13075_p7 = pnand %p13074_p3, %p13068_p4 }
  0xf7   : > { %11107 = vmatprep.mubr.bf16.mxu1 %v593_v45  ;;  %v11849_v45 = vld [vmem:[#allocation14 + $0x38] ss:$12 sps:$4 sm:$0xff]  }
  0xf8   : > { %1286 = vmatpush1.bf16.msra.mxu0 %v11782_v43  ;;  %v11847_v43 = vld [vmem:[#allocation14 + $0x68] ss:$12 sps:$4 sm:$0xff]  }
  0xf9   : > { %1359 = vmatpush1.bf16.msra.mxu1 %v11785_v48  ;;  %1287 = vmatprep.subr.bf16.mxu0 %v11790_v49  ;;  %v11851_v48 = vld [vmem:[#allocation14 + $0x8] ss:$12 sps:$4 sm:$0xff]  }
  0xfa   : > { %1360 = vmatprep.subr.bf16.mxu1 %v11793_v50 }
  0xfb   : > { %11080 = vmatmul.mubr.bf16.gmra.mxu0 %v594_v51 }
  0xfc   : > { %1288 = vmatpush1.bf16.msra.mxu0 %v11788_v52  ;;  %11108 = vmatmul.mubr.bf16.gmra.mxu1 %v594_v51 }
  0xfd   : > { %1361 = vmatpush1.bf16.msra.mxu1 %v11791_v53  ;;  %1289 = vmatprep.subr.bf16.mxu0 %v11796_v54 }
  0xfe   : > { %1362 = vmatprep.subr.bf16.mxu1 %v11799_v55  ;;  %1311 = vmatprep.mubr.bf16.mxu0 %v15633_v60 }
  0xff   : > { %1384 = vmatprep.mubr.bf16.mxu1 %v15633_v60 }
 0x100   : > { %1290 = vmatpush1.bf16.msra.mxu0 %v11794_v56 }
 0x101   : > { %1363 = vmatpush1.bf16.msra.mxu1 %v11797_v57  ;;  %1291 = vmatprep.subr.bf16.mxu0 %v11802_v58 }
 0x102   : > { %1364 = vmatprep.subr.bf16.mxu1 %v11805_v59 }
 0x104   : > { %1292 = vmatpush1.bf16.msra.mxu0 %v11800_v61 }
 0x105   : > { %1365 = vmatpush1.bf16.msra.mxu1 %v11803_v62  ;;  %1293 = vmatprep.subr.bf16.mxu0 %v11808_v63 }
 0x106   : > { %1366 = vmatprep.subr.bf16.mxu1 %v11811_v1 }
 0x108   : > { %1294 = vmatpush1.bf16.msra.mxu0 %v11806_v0 }
 0x109   : > { %1367 = vmatpush1.bf16.msra.mxu1 %v11809_v2  ;;  %1625 = vmatprep.subr.bf16.mxu0 %v13523_v5 }
 0x10a   : > { %11111 = vmatprep.subr.bf16.mxu1 %v15631_v13 }
 0x10b   : > { %1312 = vmatmul.mubr.bf16.vlgmr.msra.gmra.mxu0 %v1061_v7 }
 0x10c   : > { %1385 = vmatmul.mubr.bf16.vlgmr.msra.gmra.mxu1 %v1061_v7  ;;  %1626 = vmatpush1.bf16.msra.mxu0 %v13525_v6 }
 0x10d   : > { %1627 = vmatprep.subr.bf16.mxu0 %v13527_v8  ;;  %1321 = vmatprep.mubr.bf16.mxu0 %v15633_v60 }
 0x10e   : > { %1394 = vmatprep.mubr.bf16.mxu1 %v15633_v60  ;;  %11112 = vmatpush3.bf16.msra.mxu1 %v11836_v9 }
 0x10f   : > { %11113 = vmatprep.subr.bf16.mxu1 %v15631_v13 }
 0x110   : > { %1628 = vmatpush1.bf16.msra.mxu0 %v13530_v10 }
 0x111   : > { %1629 = vmatprep.subr.bf16.mxu0 %v13535_v14 }
 0x112   : > { %11114 = vmatpush3.bf16.msra.mxu1 %v11837_v15 }
 0x113   : > { %1322 = vmatmul.mubr.bf16.gmra.mxu0 %v1062_v17  ;;  %11115 = vmatprep.subr.bf16.mxu1 %v15631_v13 }
 0x114   : > { %1395 = vmatmul.mubr.bf16.gmra.mxu1 %v1062_v17  ;;  %1630 = vmatpush1.bf16.msra.mxu0 %v13541_v16 }
 0x115   : > { %1631 = vmatprep.subr.bf16.mxu0 %v13543_v18  ;;  %1331 = vmatprep.mubr.bf16.mxu0 %v15633_v60 }
 0x116   : > { %1404 = vmatprep.mubr.bf16.mxu1 %v15633_v60  ;;  %11116 = vmatpush3.bf16.msra.mxu1 %v11838_v19 }
 0x117   : > { %11117 = vmatprep.subr.bf16.mxu1 %v15631_v13 }
 0x118   : > { %1632 = vmatpush1.bf16.msra.mxu0 %v13548_v20 }
 0x119   : > { %1633 = vmatprep.subr.bf16.mxu0 %v13552_v23 }
 0x11a   : > { %11118 = vmatpush3.bf16.msra.mxu1 %v11839_v24 }
 0x11b   : > { %1332 = vmatmul.mubr.bf16.gmra.mxu0 %v1063_v26  ;;  %11119 = vmatprep.subr.bf16.mxu1 %v15631_v13 }
 0x11c   : > { %1405 = vmatmul.mubr.bf16.gmra.mxu1 %v1063_v26  ;;  %1634 = vmatpush1.bf16.msra.mxu0 %v11824_v25 }
 0x11d   : > { %1635 = vmatprep.subr.bf16.mxu0 %v11829_v27  ;;  %1341 = vmatprep.mubr.bf16.mxu0 %v15633_v60 }
 0x11e   : > { %1414 = vmatprep.mubr.bf16.mxu1 %v15633_v60  ;;  %11120 = vmatpush3.bf16.msra.mxu1 %v11840_v28 }
 0x11f   : > { %11121 = vmatprep.subr.bf16.mxu1 %v15631_v13 }
 0x120   : > { %1636 = vmatpush1.bf16.msra.mxu0 %v11827_v29 }
 0x121   : > { %1637 = vmatprep.subr.bf16.mxu0 %v11832_v32 }
 0x122   : > { %11122 = vmatpush3.bf16.msra.mxu1 %v11841_v33 }
 0x123   : > { %1342 = vmatmul.mubr.bf16.gmra.mxu0 %v1064_v35  ;;  %11123 = vmatprep.subr.bf16.mxu1 %v15631_v13 }
 0x124   : > { %1415 = vmatmul.mubr.bf16.gmra.mxu1 %v1064_v35  ;;  %1638 = vmatpush1.bf16.msra.mxu0 %v11830_v34 }
 0x125   : > { %1639 = vmatprep.subr.bf16.mxu0 %v11835_v36  ;;  %1657 = vmatprep.mubr.bf16.mxu0 %v15633_v60 }
 0x126   : > { %11124 = vmatpush3.bf16.msra.mxu1 %v11842_v37  ;;  %11127 = vmatprep.mubr.msk.bf16.mxu1 %vm13170_vm0, %v15631_v13 }
 0x127   : > { %11125 = vmatprep.subr.bf16.mxu1 %v15631_v13 }
 0x128   : > { %1640 = vmatpush1.bf16.msra.mxu0 %v11833_v38 }
 0x129   : > { %1906 = vmatprep.subr.bf16.mxu0 %v13523_v5 }
 0x12a   : > { %11126 = vmatpush3.bf16.msra.mxu1 %v11843_v39 }
 0x12b   : > { %1658 = vmatmul.mubr.bf16.vlgmr.msra.gmra.mxu0 %v15633_v60  ;;  %11131 = vmatprep.subr.bf16.mxu1 %v15631_v13 }
 0x12c   : > { %1907 = vmatpush1.bf16.msra.mxu0 %v13525_v6  ;;  %1938 = vmatprep.mubr.bf16.mxu0 %v15633_v60 }
 0x12d   : > { %11128 = vmatmul.mubr.bf16.vlgmr.msra.gmra.mxu1 %v15633_v60  ;;  %1908 = vmatprep.subr.bf16.mxu0 %v13527_v8 }
 0x12e   : > { %11147 = vmatprep.mubr.msk.bf16.mxu1 %vm13170_vm0, %v15631_v13  ;;  %11132 = vmatpush3.bf16.msra.mxu1 %v11844_v40 }
 0x12f   : > { %11133 = vmatprep.subr.bf16.mxu1 %v15631_v13 }
 0x130   : > { %1909 = vmatpush1.bf16.msra.mxu0 %v13530_v10  ;;  %v1099_v10 = vlaneseq }
 0x131   : > { %1910 = vmatprep.subr.bf16.mxu0 %v13535_v14 }
 0x132   : > { %11134 = vmatpush3.bf16.msra.mxu1 %v11845_v41  ;;  %v1100_v17 = vshrl.u32 %v1099_v10, 7 }
 0x133   : > { %11135 = vmatprep.subr.bf16.mxu1 %v15631_v13 }
 0x134   : > { %1911 = vmatpush1.bf16.msra.mxu0 %v13541_v16  ;;  %v13633_v22 = vsub.s32 0, %v1100_v17  ;;  %v13659_v37 = vsub.s32 3, %v1100_v17 }
 0x135   : > { %1912 = vmatprep.subr.bf16.mxu0 %v13543_v18 }
 0x136   : > { %11136 = vmatpush3.bf16.msra.mxu1 %v11846_v42  ;;  %15832 = vst [vmem:[#allocation46_spill] sm:$0xff] %v13633_v22  ;;  %15835 = vst [vmem:[#allocation49_spill] sm:$0xff] %v13659_v37 }
 0x137   : > { %11137 = vmatprep.subr.bf16.mxu1 %v15631_v13 }
 0x138   : > { %1913 = vmatpush1.bf16.msra.mxu0 %v13548_v20 }
 0x139   : > { %1914 = vmatprep.subr.bf16.mxu0 %v13552_v23  ;;  %v1097_v23 = vld [vmem:[%s15615_s3] sm:$0xf] }
 0x13a   : > { %11138 = vmatpush3.bf16.msra.mxu1 %v11847_v43  ;;  %v13647_v30 = vrot.slane %v1097_v23, %v13633_v22 }
 0x13b   : > { %11139 = vmatprep.subr.bf16.mxu1 %v15631_v13 }
 0x13c   : > { %1915 = vmatpush1.bf16.msra.mxu0 %v11824_v25  ;;  %v13640_v25 = vsub.s32 2, %v1100_v17 }
 0x13d   : > { %1916 = vmatprep.subr.bf16.mxu0 %v11829_v27 }
 0x13e   : > { %11140 = vmatpush3.bf16.msra.mxu1 %v11848_v44  ;;  %15833 = vst [vmem:[#allocation47_spill] sm:$0xff] %v13640_v25 }
 0x13f   : > { %11141 = vmatprep.subr.bf16.mxu1 %v15631_v13 }
 0x140   : > { %1917 = vmatpush1.bf16.msra.mxu0 %v11827_v29 }
 0x141   : > { %1918 = vmatprep.subr.bf16.mxu0 %v11832_v32  ;;  %v13652_v32 = vrot.slane %v1097_v23, %v13640_v25 }
 0x142   : > { %11142 = vmatpush3.bf16.msra.mxu1 %v11849_v45 }
 0x143   : > { %11143 = vmatprep.subr.bf16.mxu1 %v15631_v13 }
 0x144   : > { %1919 = vmatpush1.bf16.msra.mxu0 %v11830_v34  ;;  %v13654_v34 = vsub.s32 1, %v1100_v17 }
 0x145   : > { %1920 = vmatprep.subr.bf16.mxu0 %v11835_v36 }
 0x146   : > { %11144 = vmatpush3.bf16.msra.mxu1 %v11850_v46  ;;  %15834 = vst [vmem:[#allocation48_spill] sm:$0xff] %v13654_v34  ;;  %v13669_v43 = vrot.slane %v1097_v23, %v13654_v34 }
 0x147   : > { %11145 = vmatprep.subr.bf16.mxu1 %v15631_v13 }
 0x148   : > { %1921 = vmatpush1.bf16.msra.mxu0 %v11833_v38 }
 0x149   : > { %2188 = vmatprep.subr.bf16.mxu0 %v13523_v5 }
 0x14a   : > { %11146 = vmatpush3.bf16.msra.mxu1 %v11851_v48  ;;  %v13675_v48 = vrot.slane %v1097_v23, %v13659_v37 }
 0x14b   : > { %11151 = vmatprep.subr.bf16.mxu1 %v15631_v13 }
 0x1ab   : > { %v11073_v47 = vpop.f32.mrf.mxu0 }
 0x1ac   : > { %v13595_v49 = vpop.f32.mrf.mxu1  ;;  %v9978_v54 = vmul.f32 -1.442695, %v11073_v47 }
 0x1ad   : > { %v693_v50 = vpop.f32.mrf.mxu0 }
 0x1ae   : > { %v13597_v51 = vpop.f32.mrf.mxu1  ;;  %12356 = vpow2.f32 %v9978_v54  ;;  %v9976_v29 = vmul.f32 -1.442695, %v693_v50 }
 0x1af   : > { %15819 = vst [vmem:[#allocation33_spill] sm:$0xff] %v13597_v51  ;;  %v11074_v52 = vpop.f32.mrf.mxu0 }
 0x1b0   : > { %v13600_v53 = vpop.f32.mrf.mxu1  ;;  %v9979_v59 = vmul.f32 -1.442695, %v11074_v52 }
 0x1b1   : > { %v13602_v55 = vpop.f32.mrf.mxu0 }
 0x1b2   : > { %v13604_v56 = vpop.f32.mrf.mxu1  ;;  %12358 = vpow2.f32 %v9979_v59 }
 0x1b3   : > { %15820 = vst [vmem:[#allocation34_spill] sm:$0xff] %v13604_v56  ;;  %v11077_v57 = vpop.f32.mrf.mxu0 }
 0x1b4   : > { %v13607_v58 = vpop.f32.mrf.mxu1  ;;  %v9982_v7 = vmul.f32 -1.442695, %v11077_v57 }
 0x1b5   : > { %15821 = vst [vmem:[#allocation35_spill] sm:$0xff] %v13607_v58  ;;  %v709_v61 = vpop.f32.mrf.mxu0 }
 0x1b6   : > { %v13609_v62 = vpop.f32.mrf.mxu1  ;;  %v9980_v1 = vmul.f32 -1.442695, %v709_v61 }
 0x1b7   : > { %v11078_v63 = vpop.f32.mrf.mxu0 }
 0x1b8   : > { %v13611_v0 = vpop.f32.mrf.mxu1  ;;  %12360 = vpow2.f32 %v9980_v1  ;;  %v9983_v11 = vmul.f32 -1.442695, %v11078_v63 }
 0x1b9   : > { %15822 = vst [vmem:[#allocation36_spill] sm:$0xff] %v13611_v0  ;;  %v13613_v2 = vpop.f32.mrf.mxu0  ;;  %12362 = vpow2.f32 %v9982_v7 }
 0x1ba   : > { %v13615_v3 = vpop.f32.mrf.mxu1  ;;  %12364 = vpow2.f32 %v9983_v11 }
 0x1bb   : > { %15823 = vst [vmem:[#allocation37_spill] sm:$0xff] %v13615_v3  ;;  %v13619_v5 = vpop.f32.mrf.mxu0  ;;  %v12357_v9 = vpop.eup %12356 }
 0x1bc   : > { %v13617_v4 = vpop.f32.mrf.mxu1  ;;  %15825 = vst [vmem:[#allocation39_spill] sm:$0xff] %v13619_v5  ;;  %v778_v14 = vadd.f32 1.0, %v12357_v9 }
 0x1bd   : > { %15824 = vst [vmem:[#allocation38_spill] sm:$0xff] %v13617_v4  ;;  %v13623_v8 = vpop.f32.mrf.mxu0 }
 0x1be   : > { %v13621_v6 = vpop.f32.mrf.mxu1  ;;  %15827 = vst [vmem:[#allocation41_spill] sm:$0xff] %v13623_v8  ;;  %12366 = vrcp.f32 %v778_v14 }
 0x1bf   : > { %15826 = vst [vmem:[#allocation40_spill] sm:$0xff] %v13621_v6  ;;  %v13627_v15 = vpop.f32.mrf.mxu0  ;;  %v12359_v16 = vpop.eup %12358 }
 0x1c0   : > { %v13625_v12 = vpop.f32.mrf.mxu1  ;;  %15829 = vst [vmem:[#allocation43_spill] sm:$0xff] %v13627_v15  ;;  %v779_v19 = vadd.f32 1.0, %v12359_v16 }
 0x1c1   : > { %15828 = vst [vmem:[#allocation42_spill] sm:$0xff] %v13625_v12  ;;  %v13631_v20 = vpop.f32.mrf.mxu0 }
 0x1c2   : > { %v13629_v18 = vpop.f32.mrf.mxu1  ;;  %15831 = vst [vmem:[#allocation45_spill] sm:$0xff] %v13631_v20  ;;  %12368 = vrcp.f32 %v779_v19 }
 0x1c3   : > { %15830 = vst [vmem:[#allocation44_spill] sm:$0xff] %v13629_v18 }
 0x1c5   : > { %v12361_v21 = vpop.eup %12360 }
 0x1c6   : > { %v780_v27 = vadd.f32 1.0, %v12361_v21  ;;  %v12363_v40 = vpop.eup %12362 }
 0x1c7   : > { %v12365_v46 = vpop.eup %12364  ;;  %v782_v47 = vadd.f32 1.0, %v12363_v40 }
 0x1c8   : > { %12370 = vrcp.f32 %v780_v27  ;;  %v783_v10 = vadd.f32 1.0, %v12365_v46 }
 0x1c9   : > { %12372 = vpow2.f32 %v9976_v29 }
 0x1ca   : > { %12374 = vrcp.f32 %v782_v47 }
 0x1cb   : > { %v13638_v24 = vpop.f32.mrf.mxu0  ;;  %v12367_v54 = vpop.eup %12366  ;;  %12376 = vrcp.f32 %v783_v10 }
 0x1cc   : > { %v13642_v26 = vpop.f32.mrf.mxu1 }
 0x1cd   : > { %v13644_v28 = vpop.f32.mrf.mxu0  ;;  %v1387_v6 = vadd.f32 %v13642_v26, %v13652_v32 }
 0x1ce   : > { %v13649_v31 = vpop.f32.mrf.mxu1 }
 0x1cf   : > { %v1317_v33 = vpop.f32.mrf.mxu0  ;;  %v12369_v16 = vpop.eup %12368  ;;  %v1389_v26 = vadd.f32 %v13649_v31, %v13675_v48  ;;  %v12788_v31 = vld [vmem:[#allocation14 + $0xa8] ss:$12 sps:$4 sm:$0xff]  }
 0x1d0   : > { %v13657_v35 = vadd.f32 %v1317_v33, %v13647_v30  ;;  %v1390_v36 = vpop.f32.mrf.mxu1 }
 0x1d1   : > { %v13662_v38 = vadd.f32 %v1390_v36, %v13652_v32  ;;  %v13664_v39 = vpop.f32.mrf.mxu0 }
 0x1d2   : > { %v13666_v41 = vpop.f32.mrf.mxu1 }
 0x1d3   : > { %v1323_v42 = vpop.f32.mrf.mxu0 }
 0x1d4   : > { %v13672_v44 = vadd.f32 %v1323_v42, %v13647_v30  ;;  %v1396_v45 = vpop.f32.mrf.mxu1 }
 0x1d5   : > { %v1397_v50 = vadd.f32 %v1396_v45, %v13652_v32  ;;  %v1325_v52 = vpop.f32.mrf.mxu0  ;;  %v12371_v36 = vpop.eup %12370 }
 0x1d6   : > { %v13679_v57 = vadd.f32 %v1325_v52, %v13669_v43  ;;  %v1398_v59 = vpop.f32.mrf.mxu1  ;;  %v12373_v45 = vpop.eup %12372 }
 0x1d7   : > { %v13681_v61 = vadd.f32 %v12367_v54, %v1397_v50  ;;  %v13684_v63 = vadd.f32 %v1398_v59, %v13675_v48  ;;  %v1327_v1 = vpop.f32.mrf.mxu0 }
 0x1d8   : > { %v13687_v7 = vadd.f32 %v1327_v1, %v13647_v30  ;;  %v1400_v9 = vpop.f32.mrf.mxu1 }
 0x1d9   : > { %v1401_v11 = vadd.f32 %v1400_v9, %v13652_v32  ;;  %v13690_v14 = vpop.f32.mrf.mxu0  ;;  %v776_v9 = vadd.f32 1.0, %v12373_v45 }
 0x1da   : > { %v13692_v17 = vpop.f32.mrf.mxu1 }
 0x1db   : > { %v13694_v19 = vadd.f32 %v12369_v16, %v1401_v11  ;;  %v1333_v21 = vpop.f32.mrf.mxu0  ;;  %12378 = vrcp.f32 %v776_v9  ;;  %v1314_v9 = vadd.f32 %v13638_v24, %v13647_v30  ;;  %v1316_v24 = vadd.f32 %v13644_v28, %v13669_v43 }
 0x1dc   : > { %v13697_v23 = vadd.f32 %v1333_v21, %v13647_v30  ;;  %v1406_v27 = vpop.f32.mrf.mxu1 }
 0x1dd   : > { %v1407_v29 = vadd.f32 %v1406_v27, %v13652_v32  ;;  %v1335_v33 = vpop.f32.mrf.mxu0 }
 0x1de   : > { %v13701_v40 = vadd.f32 %v1335_v33, %v13669_v43  ;;  %v1408_v42 = vpop.f32.mrf.mxu1  ;;  %v12375_v33 = vpop.eup %12374 }
 0x1df   : > { %v13703_v46 = vadd.f32 %v12371_v36, %v1407_v29  ;;  %v13706_v47 = vadd.f32 %v1408_v42, %v13675_v48  ;;  %v1337_v50 = vpop.f32.mrf.mxu0  ;;  %v12377_v12 = vpop.eup %12376 }
 0x1e0   : > { %v13709_v52 = vadd.f32 %v1337_v50, %v13647_v30  ;;  %v1410_v54 = vpop.f32.mrf.mxu1 }
 0x1e1   : > { %v13712_v59 = vadd.f32 %v1410_v54, %v13652_v32  ;;  %v13714_v1 = vpop.f32.mrf.mxu0 }
 0x1e2   : > { %v13716_v10 = vpop.f32.mrf.mxu1 }
 0x1e3   : > { %v1343_v11 = vpop.f32.mrf.mxu0 }
 0x1e4   : > { %v13719_v16 = vadd.f32 %v1343_v11, %v13647_v30  ;;  %v1416_v21 = vpop.f32.mrf.mxu1 }
 0x1e5   : > { %v1417_v27 = vadd.f32 %v1416_v21, %v13652_v32  ;;  %v1345_v29 = vpop.f32.mrf.mxu0 }
 0x1e6   : > { %v13723_v36 = vadd.f32 %v1345_v29, %v13669_v43  ;;  %v1418_v42 = vpop.f32.mrf.mxu1 }
 0x1e7   : > { %v13725_v50 = vadd.f32 %v12375_v33, %v1417_v27  ;;  %v13728_v45 = vadd.f32 %v1418_v42, %v13675_v48  ;;  %v1347_v54 = vpop.f32.mrf.mxu0 }
 0x1e8   : > { %v13731_v13 = vadd.f32 %v1347_v54, %v13647_v30  ;;  %v1420_v11 = vpop.f32.mrf.mxu1  ;;  %v12379_v8 = vpop.eup %12378 }
 0x1e9   : > { %v1421_v60 = vadd.f32 %v1420_v11, %v13652_v32  ;;  %v13734_v21 = vpop.f32.mrf.mxu0 }
 0x1ea   : > { %v13738_v29 = vpop.f32.mrf.mxu1 }
 0x1eb   : > { %15836 = vst [vmem:[#allocation50_spill] sm:$0xff] %v13738_v29  ;;  %v13740_v27 = vadd.f32 %v12377_v12, %v1421_v60  ;;  %v1659_v33 = vpop.f32.mrf.mxu0  ;;  %v1720_v12 = vadd.f32 %v12379_v8, %v1387_v6 }
 0x1ec   : > { %v1706_v42 = vadd.f32 %v1659_v33, %v1314_v9 }
 0x1ed   : > { %15837 = vst [vmem:[#allocation51_spill] sm:$0xff] %v13740_v27  ;;  %v1661_v15 = vpop.f32.mrf.mxu0  ;;  %v1700_v4 = vpop.f32.mrf.mxu1  ;;  %v10066_v9 = vmul.f32 -1.442695, %v1720_v12 }
 0x1ee   : > { %v10064_v5 = vmul.f32 -1.442695, %v1706_v42  ;;  %v1707_v60 = vadd.f32 %v1661_v15, %v1316_v24 }
 0x1ef   : > { %v1663_v54 = vpop.f32.mrf.mxu0  ;;  %v11129_v18 = vpop.f32.mrf.mxu1 }
 0x1f0   : > { %12380 = vpow2.f32 %v10064_v5  ;;  %v10065_v3 = vmul.f32 -1.442695, %v1707_v60 }
 0x1f1   : > { %v1664_v20 = vpop.f32.mrf.mxu0  ;;  %v1703_v11 = vpop.f32.mrf.mxu1 }
 0x1f2   : > { %12382 = vpow2.f32 %v10065_v3 }
 0x1f3   : > { %v11130_v30 = vpop.f32.mrf.mxu1  ;;  %12384 = vpow2.f32 %v10066_v9 }
 0x1fd   : > { %v12381_v33 = vpop.eup %12380 }
 0x1fe   : > { %v1714_v42 = vadd.f32 1.0, %v12381_v33  ;;  %v12789_v33 = vld [vmem:[#allocation14 + $0x94] ss:$12 sps:$4 sm:$0xff]  }
 0x1ff   : > { %v12383_v5 = vpop.eup %12382 }
 0x200   : > { %12386 = vrcp.f32 %v1714_v42  ;;  %v12385_v18 = vpop.eup %12384  ;;  %v1715_v20 = vadd.f32 1.0, %v12383_v5  ;;  %v15839_v42 = vmov 0.0   ;;  %v12790_v5 = vld [vmem:[#allocation14 + $0x90] ss:$12 sps:$4 sm:$0xff]  }
 0x201   : > { %v1724_v11 = vadd.f32 1.0, %v12385_v18  ;;  %v12791_v18 = vld [vmem:[#allocation14 + $0x7c] ss:$12 sps:$4 sm:$0xff]  }
 0x202   : > { %12388 = vrcp.f32 %v1715_v20  ;;  %v12792_v20 = vld [vmem:[#allocation14 + $0x78] ss:$12 sps:$4 sm:$0xff]  }
 0x203   : > { %12390 = vrcp.f32 %v1724_v11  ;;  %v12794_v11 = vld [vmem:[#allocation14 + $0x60] ss:$12 sps:$4 sm:$0xff]  }
 0x20d   : > { %v12387_v54 = vpop.eup %12386 }
 0x20e   : > { %v1727_v32 = vmul.f32 %v12387_v54, %v1700_v4  ;;  %v15838_v4 = vmov 0   ;;  %v12793_v54 = vld [vmem:[#allocation14 + $0x64] ss:$12 sps:$4 sm:$0xff]  }
 0x20f   : > { %v12389_v6 = vpop.eup %12388 }
 0x210   : > { %v1728_v28 = vadd.f32 %v1727_v32, %v1389_v26  ;;  %v12391_v8 = vpop.eup %12390  ;;  %v1731_v24 = vsub.f32 1.0, %v12389_v6  ;;  %v1733_v60 = vmul.f32 0.0, %v12389_v6  ;;  %v12795_v26 = vld [vmem:[#allocation14 + $0x4c] ss:$12 sps:$4 sm:$0xff]   ;;  %v12796_v32 = vld [vmem:[#allocation14 + $0x48] ss:$12 sps:$4 sm:$0xff]  }
 0x211   : > { %v12798_v6 = vld [vmem:[#allocation14 + $0x30] ss:$12 sps:$4 sm:$0xff]  }
 0x212   : > { %12392 = vtanh.f32 %v1728_v28  ;;  %v12797_v28 = vld [vmem:[#allocation14 + $0x34] ss:$12 sps:$4 sm:$0xff]  }
 0x21f   : > { %v12393_v3 = vpop.eup %12392 }
 0x220   : > { %v1730_v15 = vmul.f32 %v12393_v3, %v12391_v8  ;;  %v12799_v8 = vld [vmem:[#allocation14 + $0x1c] ss:$12 sps:$4 sm:$0xff]   ;;  %v12800_v3 = vld [vmem:[#allocation14 + $0x18] ss:$12 sps:$4 sm:$0xff]  }
 0x222   : > { %v1732_v30 = vmul.f32 %v1731_v24, %v1730_v15  ;;  %v12801_v15 = vld [vmem:[#allocation14 + $0x4] ss:$12 sps:$4 sm:$0xff]   ;;  %v12802_v24 = vld [vmem:[#allocation14] ss:$12 sps:$4 sm:$0xff]  }
 0x224   : > { %v13748_v12 = vadd.f32 %v1733_v60, %v1732_v30  ;;  %v11852_v30 = vld [vmem:[#allocation14 + $0xb0] ss:$12 sps:$4 sm:$0xff]   ;;  %v11853_v60 = vld [vmem:[#allocation14 + $0x98] ss:$12 sps:$4 sm:$0xff]  }
 0x226   : > { %v1745_v9 = vpack.c.bf16 %v13748_v12, %v13748_v12 }
 0x228   : > { %1939 = vmatmul.mubr.bf16.vlgmr.msra.gmra.mxu0 %v1745_v9  ;;  %11148 = vmatmul.mubr.bf16.vlgmr.msra.gmra.mxu1 %v1745_v9  ;;  %v11854_v9 = vld [vmem:[#allocation14 + $0x80] ss:$12 sps:$4 sm:$0xff]  }
 0x229   : > { %2189 = vmatpush1.bf16.msra.mxu0 %v12788_v31  ;;  %2220 = vmatprep.mubr.bf16.mxu0 %v15838_v4  ;;  %v11855_v31 = vld [vmem:[#allocation14 + $0x68] ss:$12 sps:$4 sm:$0xff]  }
 0x22a   : > { %2190 = vmatprep.subr.bf16.mxu0 %v12789_v33  ;;  %11167 = vmatprep.mubr.msk.bf16.mxu1 %vm13170_vm0, %v15839_v42  ;;  %v11856_v33 = vld [vmem:[#allocation14 + $0x50] ss:$12 sps:$4 sm:$0xff]  }
 0x22b   : > { %11152 = vmatpush3.bf16.msra.mxu1 %v11852_v30 }
 0x22c   : > { %11153 = vmatprep.subr.bf16.mxu1 %v15839_v42 }
 0x22d   : > { %2191 = vmatpush1.bf16.msra.mxu0 %v12790_v5  ;;  %v11857_v5 = vld [vmem:[#allocation14 + $0x38] ss:$12 sps:$4 sm:$0xff]  }
 0x22e   : > { %2192 = vmatprep.subr.bf16.mxu0 %v12791_v18  ;;  %v11858_v18 = vld [vmem:[#allocation14 + $0x20] ss:$12 sps:$4 sm:$0xff]  }
 0x22f   : > { %11154 = vmatpush3.bf16.msra.mxu1 %v11853_v60 }
 0x230   : > { %11155 = vmatprep.subr.bf16.mxu1 %v15839_v42 }
 0x231   : > { %2193 = vmatpush1.bf16.msra.mxu0 %v12792_v20  ;;  %v11859_v20 = vld [vmem:[#allocation14 + $0x8] ss:$12 sps:$4 sm:$0xff]  }
 0x232   : > { %2194 = vmatprep.subr.bf16.mxu0 %v12793_v54  ;;  %v9977_v54 = vmul.f32 -1.442695, %v13602_v55  ;;  %v1320_v55 = vadd.f32 %v13664_v39, %v13669_v43 }
 0x233   : > { %11156 = vmatpush3.bf16.msra.mxu1 %v11854_v9 }
 0x234   : > { %11157 = vmatprep.subr.bf16.mxu1 %v15839_v42  ;;  %12394 = vpow2.f32 %v9977_v54 }
 0x235   : > { %2195 = vmatpush1.bf16.msra.mxu0 %v12794_v11 }
 0x236   : > { %2196 = vmatprep.subr.bf16.mxu0 %v12795_v26 }
 0x237   : > { %11158 = vmatpush3.bf16.msra.mxu1 %v11855_v31 }
 0x238   : > { %11159 = vmatprep.subr.bf16.mxu1 %v15839_v42 }
 0x239   : > { %2197 = vmatpush1.bf16.msra.mxu0 %v12796_v32 }
 0x23a   : > { %2198 = vmatprep.subr.bf16.mxu0 %v12797_v28 }
 0x23b   : > { %11160 = vmatpush3.bf16.msra.mxu1 %v11856_v33 }
 0x23c   : > { %11161 = vmatprep.subr.bf16.mxu1 %v15839_v42 }
 0x23d   : > { %2199 = vmatpush1.bf16.msra.mxu0 %v12798_v6 }
 0x23e   : > { %2200 = vmatprep.subr.bf16.mxu0 %v12799_v8 }
 0x23f   : > { %11162 = vmatpush3.bf16.msra.mxu1 %v11857_v5 }
 0x240   : > { %11163 = vmatprep.subr.bf16.mxu1 %v15839_v42 }
 0x241   : > { %2201 = vmatpush1.bf16.msra.mxu0 %v12800_v3  ;;  %v12395_v11 = vpop.eup %12394 }
 0x242   : > { %2202 = vmatprep.subr.bf16.mxu0 %v12801_v15  ;;  %v777_v26 = vadd.f32 1.0, %v12395_v11 }
 0x243   : > { %11164 = vmatpush3.bf16.msra.mxu1 %v11858_v18 }
 0x244   : > { %11165 = vmatprep.subr.bf16.mxu1 %v15839_v42  ;;  %12396 = vrcp.f32 %v777_v26 }
 0x245   : > { %2203 = vmatpush1.bf16.msra.mxu0 %v12802_v24 }
 0x247   : > { %11166 = vmatpush3.bf16.msra.mxu1 %v11859_v20 }
 0x248   : > { %11171 = vmatprep.subr.bf16.mxu1 %v15839_v42 }
 0x251   : > { %v12397_v31 = vpop.eup %12396 }
 0x252   : > { %v2001_v5 = vadd.f32 %v12397_v31, %v13662_v38 }
 0x254   : > { %v10093_v20 = vmul.f32 -1.442695, %v2001_v5 }
 0x2e8   : > { %v1940_v32 = vpop.f32.mrf.mxu0  ;;  %v1981_v28 = vpop.f32.mrf.mxu1 }
 0x2e9   : > { %v1987_v6 = vadd.f32 %v1940_v32, %v13657_v35 }
 0x2ea   : > { %v1942_v8 = vpop.f32.mrf.mxu0  ;;  %v11149_v3 = vpop.f32.mrf.mxu1 }
 0x2eb   : > { %v10091_v15 = vmul.f32 -1.442695, %v1987_v6  ;;  %v1988_v33 = vadd.f32 %v1942_v8, %v1320_v55 }
 0x2ec   : > { %v1944_v24 = vpop.f32.mrf.mxu0  ;;  %v1984_v30 = vpop.f32.mrf.mxu1 }
 0x2ed   : > { %12398 = vpow2.f32 %v10091_v15  ;;  %v10092_v18 = vmul.f32 -1.442695, %v1988_v33  ;;  %v1393_v15 = vadd.f32 %v13666_v41, %v13675_v48  ;;  %v13778_v41 = vld [vmem:[#allocation14 + $0xac] ss:$12 sps:$4 sm:$0xff]  }
 0x2ee   : > { %v1945_v60 = vpop.f32.mrf.mxu0  ;;  %v11150_v9 = vpop.f32.mrf.mxu1  ;;  %2470 = vmatprep.subr.bf16.mxu0 %v13778_v41 }
 0x2ef   : > { %12400 = vpow2.f32 %v10092_v18  ;;  %v11863_v18 = vld [vmem:[#allocation14 + $0xb0] ss:$12 sps:$4 sm:$0xff]  }
 0x2f0   : > { %12402 = vpow2.f32 %v10093_v20  ;;  %v13783_v20 = vld [vmem:[#allocation14 + $0x94] ss:$12 sps:$4 sm:$0xff]  }
 0x2fa   : > { %v12399_v54 = vpop.eup %12398 }
 0x2fb   : > { %v1995_v35 = vadd.f32 1.0, %v12399_v54  ;;  %v13786_v54 = vld [vmem:[#allocation14 + $0x90] ss:$12 sps:$4 sm:$0xff]  }
 0x2fc   : > { %v12401_v11 = vpop.eup %12400 }
 0x2fd   : > { %12404 = vrcp.f32 %v1995_v35  ;;  %v12403_v26 = vpop.eup %12402  ;;  %v1996_v32 = vadd.f32 1.0, %v12401_v11  ;;  %v11867_v35 = vld [vmem:[#allocation14 + $0x98] ss:$12 sps:$4 sm:$0xff]   ;;  %v13790_v11 = vld [vmem:[#allocation14 + $0x7c] ss:$12 sps:$4 sm:$0xff]  }
 0x2fe   : > { %v2005_v3 = vadd.f32 1.0, %v12403_v26  ;;  %v13793_v26 = vld [vmem:[#allocation14 + $0x78] ss:$12 sps:$4 sm:$0xff]  }
 0x2ff   : > { %12406 = vrcp.f32 %v1996_v32  ;;  %v11871_v32 = vld [vmem:[#allocation14 + $0x80] ss:$12 sps:$4 sm:$0xff]  }
 0x300   : > { %12408 = vrcp.f32 %v2005_v3  ;;  %v13800_v3 = vld [vmem:[#allocation14 + $0x60] ss:$12 sps:$4 sm:$0xff]  }
 0x30a   : > { %v12405_v6 = vpop.eup %12404 }
 0x30b   : > { %v2008_v24 = vmul.f32 %v12405_v6, %v1981_v28  ;;  %v13780_v28 = vld [vmem:[#allocation14 + $0xa8] ss:$12 sps:$4 sm:$0xff]   ;;  %v13797_v6 = vld [vmem:[#allocation14 + $0x64] ss:$12 sps:$4 sm:$0xff]  }
 0x30c   : > { %v12407_v38 = vpop.eup %12406 }
 0x30d   : > { %v2009_v39 = vadd.f32 %v2008_v24, %v1393_v15  ;;  %v12409_v8 = vpop.eup %12408  ;;  %v2012_v9 = vsub.f32 1.0, %v12407_v38  ;;  %v2014_v55 = vmul.f32 %v12407_v38, %v13748_v12  ;;  %v11875_v15 = vld [vmem:[#allocation14 + $0x68] ss:$12 sps:$4 sm:$0xff]   ;;  %v13804_v24 = vld [vmem:[#allocation14 + $0x4c] ss:$12 sps:$4 sm:$0xff]  }
 0x30e   : > { %v11879_v38 = vld [vmem:[#allocation14 + $0x50] ss:$12 sps:$4 sm:$0xff]  }
 0x30f   : > { %12410 = vtanh.f32 %v2009_v39  ;;  %v13807_v39 = vld [vmem:[#allocation14 + $0x48] ss:$12 sps:$4 sm:$0xff]  }
 0x31c   : > { %v12411_v30 = vpop.eup %12410 }
 0x31d   : > { %v2011_v60 = vmul.f32 %v12411_v30, %v12409_v8  ;;  %v13811_v8 = vld [vmem:[#allocation14 + $0x34] ss:$12 sps:$4 sm:$0xff]   ;;  %v13814_v30 = vld [vmem:[#allocation14 + $0x30] ss:$12 sps:$4 sm:$0xff]  }
 0x31f   : > { %v2013_v31 = vmul.f32 %v2012_v9, %v2011_v60  ;;  %v11883_v60 = vld [vmem:[#allocation14 + $0x38] ss:$12 sps:$4 sm:$0xff]   ;;  %v13818_v9 = vld [vmem:[#allocation14 + $0x1c] ss:$12 sps:$4 sm:$0xff]  }
 0x321   : > { %v13771_v33 = vadd.f32 %v2014_v55, %v2013_v31  ;;  %v13821_v31 = vld [vmem:[#allocation14 + $0x18] ss:$12 sps:$4 sm:$0xff]   ;;  %v11887_v55 = vld [vmem:[#allocation14 + $0x20] ss:$12 sps:$4 sm:$0xff]  }
 0x323   : > { %v2027_v5 = vpack.c.bf16 %v13771_v33, %v13771_v33 }
 0x325   : > { %2221 = vmatmul.mubr.bf16.vlgmr.msra.gmra.mxu0 %v2027_v5  ;;  %11168 = vmatmul.mubr.bf16.vlgmr.msra.gmra.mxu1 %v2027_v5  ;;  %v13825_v5 = vld [vmem:[#allocation14 + $0x4] ss:$12 sps:$4 sm:$0xff]  }
 0x326   : > { %2502 = vmatprep.mubr.bf16.mxu0 %v15838_v4  ;;  %11187 = vmatprep.mubr.msk.bf16.mxu1 %vm13170_vm0, %v15839_v42 }
 0x327   : > { %2471 = vmatpush1.bf16.msra.mxu0 %v13780_v28  ;;  %11172 = vmatpush3.bf16.msra.mxu1 %v11863_v18  ;;  %v13828_v18 = vld [vmem:[#allocation14] ss:$12 sps:$4 sm:$0xff]  }
 0x328   : > { %2472 = vmatprep.subr.bf16.mxu0 %v13783_v20  ;;  %11173 = vmatprep.subr.bf16.mxu1 %v15839_v42 }
 0x32b   : > { %2473 = vmatpush1.bf16.msra.mxu0 %v13786_v54  ;;  %11174 = vmatpush3.bf16.msra.mxu1 %v11867_v35  ;;  %v11891_v35 = vld [vmem:[#allocation14 + $0x8] ss:$12 sps:$4 sm:$0xff]  }
 0x32c   : > { %2474 = vmatprep.subr.bf16.mxu0 %v13790_v11  ;;  %11175 = vmatprep.subr.bf16.mxu1 %v15839_v42 }
 0x32f   : > { %2475 = vmatpush1.bf16.msra.mxu0 %v13793_v26  ;;  %11176 = vmatpush3.bf16.msra.mxu1 %v11871_v32 }
 0x330   : > { %2476 = vmatprep.subr.bf16.mxu0 %v13797_v6  ;;  %11177 = vmatprep.subr.bf16.mxu1 %v15839_v42 }
 0x333   : > { %2477 = vmatpush1.bf16.msra.mxu0 %v13800_v3  ;;  %11178 = vmatpush3.bf16.msra.mxu1 %v11875_v15 }
 0x334   : > { %2478 = vmatprep.subr.bf16.mxu0 %v13804_v24  ;;  %11179 = vmatprep.subr.bf16.mxu1 %v15839_v42 }
 0x337   : > { %2479 = vmatpush1.bf16.msra.mxu0 %v13807_v39  ;;  %11180 = vmatpush3.bf16.msra.mxu1 %v11879_v38 }
 0x338   : > { %2480 = vmatprep.subr.bf16.mxu0 %v13811_v8  ;;  %11181 = vmatprep.subr.bf16.mxu1 %v15839_v42 }
 0x33b   : > { %2481 = vmatpush1.bf16.msra.mxu0 %v13814_v30  ;;  %11182 = vmatpush3.bf16.msra.mxu1 %v11883_v60 }
 0x33c   : > { %2482 = vmatprep.subr.bf16.mxu0 %v13818_v9  ;;  %11183 = vmatprep.subr.bf16.mxu1 %v15839_v42 }
 0x33f   : > { %2483 = vmatpush1.bf16.msra.mxu0 %v13821_v31  ;;  %11184 = vmatpush3.bf16.msra.mxu1 %v11887_v55 }
 0x340   : > { %2484 = vmatprep.subr.bf16.mxu0 %v13825_v5  ;;  %11185 = vmatprep.subr.bf16.mxu1 %v15839_v42 }
 0x343   : > { %2485 = vmatpush1.bf16.msra.mxu0 %v13828_v18  ;;  %11186 = vmatpush3.bf16.msra.mxu1 %v11891_v35  ;;  %v10120_v35 = vmul.f32 -1.442695, %v13681_v61 }
 0x344   : > { %2752 = vmatprep.subr.bf16.mxu0 %v13778_v41  ;;  %11191 = vmatprep.subr.bf16.mxu1 %v15839_v42 }
 0x3e5   : > { %v2222_v32 = vpop.f32.mrf.mxu0  ;;  %v2263_v15 = vpop.f32.mrf.mxu1 }
 0x3e6   : > { %v2269_v38 = vadd.f32 %v2222_v32, %v13672_v44 }
 0x3e7   : > { %v2224_v60 = vpop.f32.mrf.mxu0  ;;  %v11169_v55 = vpop.f32.mrf.mxu1 }
 0x3e8   : > { %v10118_v56 = vmul.f32 -1.442695, %v2269_v38  ;;  %v2270_v0 = vadd.f32 %v2224_v60, %v13679_v57  ;;  %v11895_v60 = vld [vmem:[#allocation14 + $0x68] ss:$12 sps:$4 sm:$0xff]  }
 0x3e9   : > { %v2226_v37 = vpop.f32.mrf.mxu0  ;;  %v2266_v34 = vpop.f32.mrf.mxu1 }
 0x3ea   : > { %12412 = vpow2.f32 %v10118_v56  ;;  %v10119_v58 = vmul.f32 -1.442695, %v2270_v0 }
 0x3eb   : > { %v2227_v22 = vpop.f32.mrf.mxu0  ;;  %v11170_v51 = vpop.f32.mrf.mxu1 }
 0x3ec   : > { %12414 = vpow2.f32 %v10119_v58 }
 0x3ed   : > { %12416 = vpow2.f32 %v10120_v35  ;;  %v11896_v35 = vld [vmem:[#allocation14 + $0x50] ss:$12 sps:$4 sm:$0xff]  }
 0x3f7   : > { %v12413_v25 = vpop.eup %12412 }
 0x3f8   : > { %v2277_v29 = vadd.f32 1.0, %v12413_v25 }
 0x3f9   : > { %v12415_v27 = vpop.eup %12414 }
 0x3fa   : > { %12418 = vrcp.f32 %v2277_v29  ;;  %v12417_v44 = vpop.eup %12416  ;;  %v2278_v32 = vadd.f32 1.0, %v12415_v27  ;;  %v11893_v27 = vld [vmem:[#allocation14 + $0x98] ss:$12 sps:$4 sm:$0xff]  }
 0x3fb   : > { %v2287_v38 = vadd.f32 1.0, %v12417_v44  ;;  %v11897_v44 = vld [vmem:[#allocation14 + $0x38] ss:$12 sps:$4 sm:$0xff]  }
 0x3fc   : > { %12420 = vrcp.f32 %v2278_v32  ;;  %v11898_v32 = vld [vmem:[#allocation14 + $0x20] ss:$12 sps:$4 sm:$0xff]  }
 0x3fd   : > { %12422 = vrcp.f32 %v2287_v38 }
 0x407   : > { %v12419_v55 = vpop.eup %12418 }
 0x408   : > { %v2290_v37 = vmul.f32 %v12419_v55, %v2263_v15  ;;  %v11894_v15 = vld [vmem:[#allocation14 + $0x80] ss:$12 sps:$4 sm:$0xff]   ;;  %v11899_v55 = vld [vmem:[#allocation14 + $0x8] ss:$12 sps:$4 sm:$0xff]  }
 0x409   : > { %v12421_v51 = vpop.eup %12420 }
 0x40a   : > { %v2291_v56 = vadd.f32 %v2290_v37, %v13684_v63  ;;  %v12423_v0 = vpop.eup %12422  ;;  %v2294_v58 = vsub.f32 1.0, %v12421_v51  ;;  %v2296_v25 = vmul.f32 %v12421_v51, %v13771_v33  ;;  %v11892_v63 = vld [vmem:[#allocation14 + $0xb0] ss:$12 sps:$4 sm:$0xff]  }
 0x40c   : > { %12424 = vtanh.f32 %v2291_v56 }
 0x419   : > { %v12425_v22 = vpop.eup %12424 }
 0x41a   : > { %v2293_v34 = vmul.f32 %v12425_v22, %v12423_v0 }
 0x41c   : > { %v2295_v57 = vmul.f32 %v2294_v58, %v2293_v34 }
 0x41e   : > { %v13840_v61 = vadd.f32 %v2296_v25, %v2295_v57 }
 0x420   : > { %v2309_v29 = vpack.c.bf16 %v13840_v61, %v13840_v61 }
 0x422   : > { %2503 = vmatmul.mubr.bf16.vlgmr.msra.gmra.mxu0 %v2309_v29  ;;  %11188 = vmatmul.mubr.bf16.vlgmr.msra.gmra.mxu1 %v2309_v29  ;;  %v1330_v29 = vadd.f32 %v13690_v14, %v13669_v43 }
 0x423   : > { %2753 = vmatpush1.bf16.msra.mxu0 %v13780_v28  ;;  %2784 = vmatprep.mubr.bf16.mxu0 %v15838_v4 }
 0x424   : > { %2754 = vmatprep.subr.bf16.mxu0 %v13783_v20  ;;  %11207 = vmatprep.mubr.msk.bf16.mxu1 %vm13170_vm0, %v15839_v42 }
 0x425   : > { %11192 = vmatpush3.bf16.msra.mxu1 %v11892_v63 }
 0x426   : > { %11193 = vmatprep.subr.bf16.mxu1 %v15839_v42 }
 0x427   : > { %2755 = vmatpush1.bf16.msra.mxu0 %v13786_v54 }
 0x428   : > { %2756 = vmatprep.subr.bf16.mxu0 %v13790_v11 }
 0x429   : > { %11194 = vmatpush3.bf16.msra.mxu1 %v11893_v27 }
 0x42a   : > { %11195 = vmatprep.subr.bf16.mxu1 %v15839_v42 }
 0x42b   : > { %2757 = vmatpush1.bf16.msra.mxu0 %v13793_v26 }
 0x42c   : > { %2758 = vmatprep.subr.bf16.mxu0 %v13797_v6 }
 0x42d   : > { %11196 = vmatpush3.bf16.msra.mxu1 %v11894_v15  ;;  %v10147_v15 = vmul.f32 -1.442695, %v13694_v19 }
 0x42e   : > { %11197 = vmatprep.subr.bf16.mxu1 %v15839_v42 }
 0x42f   : > { %2759 = vmatpush1.bf16.msra.mxu0 %v13800_v3 }
 0x430   : > { %2760 = vmatprep.subr.bf16.mxu0 %v13804_v24 }
 0x431   : > { %11198 = vmatpush3.bf16.msra.mxu1 %v11895_v60 }
 0x432   : > { %11199 = vmatprep.subr.bf16.mxu1 %v15839_v42 }
 0x433   : > { %2761 = vmatpush1.bf16.msra.mxu0 %v13807_v39 }
 0x434   : > { %2762 = vmatprep.subr.bf16.mxu0 %v13811_v8 }
 0x435   : > { %11200 = vmatpush3.bf16.msra.mxu1 %v11896_v35 }
 0x436   : > { %11201 = vmatprep.subr.bf16.mxu1 %v15839_v42 }
 0x437   : > { %2763 = vmatpush1.bf16.msra.mxu0 %v13814_v30 }
 0x438   : > { %2764 = vmatprep.subr.bf16.mxu0 %v13818_v9 }
 0x439   : > { %11202 = vmatpush3.bf16.msra.mxu1 %v11897_v44 }
 0x43a   : > { %11203 = vmatprep.subr.bf16.mxu1 %v15839_v42 }
 0x43b   : > { %2765 = vmatpush1.bf16.msra.mxu0 %v13821_v31 }
 0x43c   : > { %2766 = vmatprep.subr.bf16.mxu0 %v13825_v5 }
 0x43d   : > { %11204 = vmatpush3.bf16.msra.mxu1 %v11898_v32 }
 0x43e   : > { %11205 = vmatprep.subr.bf16.mxu1 %v15839_v42 }
 0x43f   : > { %2767 = vmatpush1.bf16.msra.mxu0 %v13828_v18 }
 0x440   : > { %3034 = vmatprep.subr.bf16.mxu0 %v13778_v41 }
 0x441   : > { %11206 = vmatpush3.bf16.msra.mxu1 %v11899_v55 }
 0x442   : > { %11211 = vmatprep.subr.bf16.mxu1 %v15839_v42 }
 0x4e2   : > { %v2504_v38 = vpop.f32.mrf.mxu0  ;;  %v2545_v37 = vpop.f32.mrf.mxu1 }
 0x4e3   : > { %v2551_v56 = vadd.f32 %v2504_v38, %v13687_v7 }
 0x4e4   : > { %v2506_v51 = vpop.f32.mrf.mxu0  ;;  %v11189_v0 = vpop.f32.mrf.mxu1 }
 0x4e5   : > { %v10145_v22 = vmul.f32 -1.442695, %v2551_v56  ;;  %v2552_v63 = vadd.f32 %v2506_v51, %v1330_v29  ;;  %v1403_v56 = vadd.f32 %v13692_v17, %v13675_v48  ;;  %v11900_v17 = vld [vmem:[#allocation14 + $0xb0] ss:$12 sps:$4 sm:$0xff]  }
 0x4e6   : > { %v2508_v34 = vpop.f32.mrf.mxu0  ;;  %v2548_v58 = vpop.f32.mrf.mxu1 }
 0x4e7   : > { %12426 = vpow2.f32 %v10145_v22  ;;  %v10146_v27 = vmul.f32 -1.442695, %v2552_v63 }
 0x4e8   : > { %v2509_v57 = vpop.f32.mrf.mxu0  ;;  %v11190_v25 = vpop.f32.mrf.mxu1 }
 0x4e9   : > { %12428 = vpow2.f32 %v10146_v27  ;;  %v11902_v27 = vld [vmem:[#allocation14 + $0x80] ss:$12 sps:$4 sm:$0xff]  }
 0x4ea   : > { %12430 = vpow2.f32 %v10147_v15  ;;  %v11903_v15 = vld [vmem:[#allocation14 + $0x68] ss:$12 sps:$4 sm:$0xff]  }
 0x4f4   : > { %v12427_v60 = vpop.eup %12426 }
 0x4f5   : > { %v2559_v35 = vadd.f32 1.0, %v12427_v60  ;;  %v11904_v60 = vld [vmem:[#allocation14 + $0x50] ss:$12 sps:$4 sm:$0xff]  }
 0x4f6   : > { %v12429_v7 = vpop.eup %12428 }
 0x4f7   : > { %12432 = vrcp.f32 %v2559_v35  ;;  %v12431_v44 = vpop.eup %12430  ;;  %v2560_v32 = vadd.f32 1.0, %v12429_v7  ;;  %v11905_v35 = vld [vmem:[#allocation14 + $0x38] ss:$12 sps:$4 sm:$0xff]   ;;  %v11906_v7 = vld [vmem:[#allocation14 + $0x20] ss:$12 sps:$4 sm:$0xff]  }
 0x4f8   : > { %v2569_v38 = vadd.f32 1.0, %v12431_v44  ;;  %v11907_v44 = vld [vmem:[#allocation14 + $0x8] ss:$12 sps:$4 sm:$0xff]  }
 0x4f9   : > { %12434 = vrcp.f32 %v2560_v32 }
 0x4fa   : > { %12436 = vrcp.f32 %v2569_v38 }
 0x504   : > { %v12433_v55 = vpop.eup %12432 }
 0x505   : > { %v2572_v0 = vmul.f32 %v12433_v55, %v2545_v37  ;;  %v11901_v37 = vld [vmem:[#allocation14 + $0x98] ss:$12 sps:$4 sm:$0xff]  }
 0x506   : > { %v12435_v14 = vpop.eup %12434 }
 0x507   : > { %v2573_v22 = vadd.f32 %v2572_v0, %v1403_v56  ;;  %v12437_v19 = vpop.eup %12436  ;;  %v2576_v58 = vsub.f32 1.0, %v12435_v14  ;;  %v2578_v25 = vmul.f32 %v12435_v14, %v13840_v61 }
 0x509   : > { %12438 = vtanh.f32 %v2573_v22 }
 0x516   : > { %v12439_v51 = vpop.eup %12438 }
 0x517   : > { %v2575_v34 = vmul.f32 %v12439_v51, %v12437_v19 }
 0x519   : > { %v2577_v57 = vmul.f32 %v2576_v58, %v2575_v34 }
 0x51b   : > { %v13878_v29 = vadd.f32 %v2578_v25, %v2577_v57  ;;  %v10174_v25 = vmul.f32 -1.442695, %v13703_v46 }
 0x51d   : > { %v2591_v63 = vpack.c.bf16 %v13878_v29, %v13878_v29 }
 0x51f   : > { %2785 = vmatmul.mubr.bf16.vlgmr.msra.gmra.mxu0 %v2591_v63  ;;  %11208 = vmatmul.mubr.bf16.vlgmr.msra.gmra.mxu1 %v2591_v63 }
 0x520   : > { %3035 = vmatpush1.bf16.msra.mxu0 %v13780_v28  ;;  %3066 = vmatprep.mubr.bf16.mxu0 %v15838_v4 }
 0x521   : > { %3036 = vmatprep.subr.bf16.mxu0 %v13783_v20  ;;  %11227 = vmatprep.mubr.msk.bf16.mxu1 %vm13170_vm0, %v15839_v42 }
 0x522   : > { %11212 = vmatpush3.bf16.msra.mxu1 %v11900_v17 }
 0x523   : > { %11213 = vmatprep.subr.bf16.mxu1 %v15839_v42 }
 0x524   : > { %3037 = vmatpush1.bf16.msra.mxu0 %v13786_v54 }
 0x525   : > { %3038 = vmatprep.subr.bf16.mxu0 %v13790_v11 }
 0x526   : > { %11214 = vmatpush3.bf16.msra.mxu1 %v11901_v37 }
 0x527   : > { %11215 = vmatprep.subr.bf16.mxu1 %v15839_v42 }
 0x528   : > { %3039 = vmatpush1.bf16.msra.mxu0 %v13793_v26 }
 0x529   : > { %3040 = vmatprep.subr.bf16.mxu0 %v13797_v6 }
 0x52a   : > { %11216 = vmatpush3.bf16.msra.mxu1 %v11902_v27 }
 0x52b   : > { %11217 = vmatprep.subr.bf16.mxu1 %v15839_v42 }
 0x52c   : > { %3041 = vmatpush1.bf16.msra.mxu0 %v13800_v3 }
 0x52d   : > { %3042 = vmatprep.subr.bf16.mxu0 %v13804_v24 }
 0x52e   : > { %11218 = vmatpush3.bf16.msra.mxu1 %v11903_v15 }
 0x52f   : > { %11219 = vmatprep.subr.bf16.mxu1 %v15839_v42 }
 0x530   : > { %3043 = vmatpush1.bf16.msra.mxu0 %v13807_v39 }
 0x531   : > { %3044 = vmatprep.subr.bf16.mxu0 %v13811_v8 }
 0x532   : > { %11220 = vmatpush3.bf16.msra.mxu1 %v11904_v60 }
 0x533   : > { %11221 = vmatprep.subr.bf16.mxu1 %v15839_v42 }
 0x534   : > { %3045 = vmatpush1.bf16.msra.mxu0 %v13814_v30 }
 0x535   : > { %3046 = vmatprep.subr.bf16.mxu0 %v13818_v9 }
 0x536   : > { %11222 = vmatpush3.bf16.msra.mxu1 %v11905_v35 }
 0x537   : > { %11223 = vmatprep.subr.bf16.mxu1 %v15839_v42 }
 0x538   : > { %3047 = vmatpush1.bf16.msra.mxu0 %v13821_v31 }
 0x539   : > { %3048 = vmatprep.subr.bf16.mxu0 %v13825_v5 }
 0x53a   : > { %11224 = vmatpush3.bf16.msra.mxu1 %v11906_v7 }
 0x53b   : > { %11225 = vmatprep.subr.bf16.mxu1 %v15839_v42 }
 0x53c   : > { %3049 = vmatpush1.bf16.msra.mxu0 %v13828_v18 }
 0x53d   : > { %3316 = vmatprep.subr.bf16.mxu0 %v13778_v41 }
 0x53e   : > { %11226 = vmatpush3.bf16.msra.mxu1 %v11907_v44 }
 0x53f   : > { %11231 = vmatprep.subr.bf16.mxu1 %v15839_v42 }
 0x5df   : > { %v2786_v32 = vpop.f32.mrf.mxu0  ;;  %v2827_v55 = vpop.f32.mrf.mxu1 }
 0x5e0   : > { %v2833_v38 = vadd.f32 %v2786_v32, %v13697_v23 }
 0x5e1   : > { %v2788_v56 = vpop.f32.mrf.mxu0  ;;  %v11209_v0 = vpop.f32.mrf.mxu1 }
 0x5e2   : > { %v10172_v22 = vmul.f32 -1.442695, %v2833_v38  ;;  %v2834_v58 = vadd.f32 %v2788_v56, %v13701_v40 }
 0x5e3   : > { %v2790_v14 = vpop.f32.mrf.mxu0  ;;  %v2830_v19 = vpop.f32.mrf.mxu1 }
 0x5e4   : > { %12440 = vpow2.f32 %v10172_v22  ;;  %v10173_v57 = vmul.f32 -1.442695, %v2834_v58  ;;  %v11910_v19 = vld [vmem:[#allocation14 + $0x80] ss:$12 sps:$4 sm:$0xff]   ;;  %v11913_v58 = vld [vmem:[#allocation14 + $0x38] ss:$12 sps:$4 sm:$0xff]  }
 0x5e5   : > { %v2791_v51 = vpop.f32.mrf.mxu0  ;;  %v11210_v34 = vpop.f32.mrf.mxu1 }
 0x5e6   : > { %12442 = vpow2.f32 %v10173_v57  ;;  %v11911_v51 = vld [vmem:[#allocation14 + $0x68] ss:$12 sps:$4 sm:$0xff]   ;;  %v11912_v34 = vld [vmem:[#allocation14 + $0x50] ss:$12 sps:$4 sm:$0xff]  }
 0x5e7   : > { %12444 = vpow2.f32 %v10174_v25  ;;  %v11915_v57 = vld [vmem:[#allocation14 + $0x8] ss:$12 sps:$4 sm:$0xff]   ;;  %v9981_v25 = vmul.f32 -1.442695, %v13613_v2 }
 0x5f1   : > { %v12441_v63 = vpop.eup %12440 }
 0x5f2   : > { %v2841_v17 = vadd.f32 1.0, %v12441_v63 }
 0x5f3   : > { %v12443_v37 = vpop.eup %12442 }
 0x5f4   : > { %12446 = vrcp.f32 %v2841_v17  ;;  %v12445_v23 = vpop.eup %12444  ;;  %v2842_v27 = vadd.f32 1.0, %v12443_v37 }
 0x5f5   : > { %v2851_v60 = vadd.f32 1.0, %v12445_v23 }
 0x5f6   : > { %12448 = vrcp.f32 %v2842_v27 }
 0x5f7   : > { %12450 = vrcp.f32 %v2851_v60 }
 0x601   : > { %v12447_v15 = vpop.eup %12446 }
 0x602   : > { %v2854_v35 = vmul.f32 %v12447_v15, %v2827_v55  ;;  %v11909_v55 = vld [vmem:[#allocation14 + $0x98] ss:$12 sps:$4 sm:$0xff]  }
 0x603   : > { %v12449_v40 = vpop.eup %12448 }
 0x604   : > { %v2855_v7 = vadd.f32 %v2854_v35, %v13706_v47  ;;  %v12451_v44 = vpop.eup %12450  ;;  %v2858_v38 = vsub.f32 1.0, %v12449_v40  ;;  %v2860_v0 = vmul.f32 %v12449_v40, %v13878_v29  ;;  %v11908_v47 = vld [vmem:[#allocation14 + $0xb0] ss:$12 sps:$4 sm:$0xff]  }
 0x606   : > { %12452 = vtanh.f32 %v2855_v7 }
 0x607   : > { %12454 = vpow2.f32 %v9981_v25 }
 0x613   : > { %v12453_v32 = vpop.eup %12452 }
 0x614   : > { %v2857_v46 = vmul.f32 %v12453_v32, %v12451_v44  ;;  %v12455_v63 = vpop.eup %12454 }
 0x615   : > { %v781_v17 = vadd.f32 1.0, %v12455_v63 }
 0x616   : > { %v2859_v56 = vmul.f32 %v2858_v38, %v2857_v46  ;;  %v1340_v46 = vadd.f32 %v13714_v1, %v13669_v43 }
 0x617   : > { %12456 = vrcp.f32 %v781_v17 }
 0x618   : > { %v13914_v22 = vadd.f32 %v2860_v0, %v2859_v56 }
 0x61a   : > { %v2873_v14 = vpack.c.bf16 %v13914_v22, %v13914_v22 }
 0x61c   : > { %3067 = vmatmul.mubr.bf16.vlgmr.msra.gmra.mxu0 %v2873_v14  ;;  %11228 = vmatmul.mubr.bf16.vlgmr.msra.gmra.mxu1 %v2873_v14 }
 0x61d   : > { %3317 = vmatpush1.bf16.msra.mxu0 %v13780_v28  ;;  %3348 = vmatprep.mubr.bf16.mxu0 %v15838_v4 }
 0x61e   : > { %3318 = vmatprep.subr.bf16.mxu0 %v13783_v20  ;;  %11247 = vmatprep.mubr.msk.bf16.mxu1 %vm13170_vm0, %v15839_v42 }
 0x61f   : > { %11232 = vmatpush3.bf16.msra.mxu1 %v11908_v47 }
 0x620   : > { %11233 = vmatprep.subr.bf16.mxu1 %v15839_v42 }
 0x621   : > { %3319 = vmatpush1.bf16.msra.mxu0 %v13786_v54 }
 0x622   : > { %3320 = vmatprep.subr.bf16.mxu0 %v13790_v11 }
 0x623   : > { %11234 = vmatpush3.bf16.msra.mxu1 %v11909_v55 }
 0x624   : > { %11235 = vmatprep.subr.bf16.mxu1 %v15839_v42  ;;  %v12457_v2 = vpop.eup %12456 }
 0x625   : > { %3321 = vmatpush1.bf16.msra.mxu0 %v13793_v26  ;;  %v3129_v56 = vadd.f32 %v12457_v2, %v13712_v59  ;;  %v10228_v2 = vmul.f32 -1.442695, %v13725_v50 }
 0x626   : > { %3322 = vmatprep.subr.bf16.mxu0 %v13797_v6 }
 0x627   : > { %11236 = vmatpush3.bf16.msra.mxu1 %v11910_v19  ;;  %v10201_v14 = vmul.f32 -1.442695, %v3129_v56 }
 0x628   : > { %11237 = vmatprep.subr.bf16.mxu1 %v15839_v42 }
 0x629   : > { %3323 = vmatpush1.bf16.msra.mxu0 %v13800_v3 }
 0x62a   : > { %3324 = vmatprep.subr.bf16.mxu0 %v13804_v24 }
 0x62b   : > { %11238 = vmatpush3.bf16.msra.mxu1 %v11911_v51 }
 0x62c   : > { %11239 = vmatprep.subr.bf16.mxu1 %v15839_v42 }
 0x62d   : > { %3325 = vmatpush1.bf16.msra.mxu0 %v13807_v39 }
 0x62e   : > { %3326 = vmatprep.subr.bf16.mxu0 %v13811_v8 }
 0x62f   : > { %11240 = vmatpush3.bf16.msra.mxu1 %v11912_v34 }
 0x630   : > { %11241 = vmatprep.subr.bf16.mxu1 %v15839_v42 }
 0x631   : > { %3327 = vmatpush1.bf16.msra.mxu0 %v13814_v30 }
 0x632   : > { %3328 = vmatprep.subr.bf16.mxu0 %v13818_v9 }
 0x633   : > { %11242 = vmatpush3.bf16.msra.mxu1 %v11913_v58 }
 0x634   : > { %11243 = vmatprep.subr.bf16.mxu1 %v15839_v42 }
 0x635   : > { %3329 = vmatpush1.bf16.msra.mxu0 %v13821_v31 }
 0x636   : > { %3330 = vmatprep.subr.bf16.mxu0 %v13825_v5 }
 0x639   : > { %3331 = vmatpush1.bf16.msra.mxu0 %v13828_v18 }
 0x63a   : > { %3598 = vmatprep.subr.bf16.mxu0 %v13778_v41  ;;  %v11914_v41 = vld [vmem:[#allocation14 + $0x20] ss:$12 sps:$4 sm:$0xff]  }
 0x63b   : > { %11244 = vmatpush3.bf16.msra.mxu1 %v11914_v41  ;;  %v1413_v41 = vadd.f32 %v13716_v10, %v13675_v48  ;;  %v11916_v10 = vld [vmem:[#allocation14 + $0xb0] ss:$12 sps:$4 sm:$0xff]  }
 0x63c   : > { %11245 = vmatprep.subr.bf16.mxu1 %v15839_v42 }
 0x63f   : > { %11246 = vmatpush3.bf16.msra.mxu1 %v11915_v57 }
 0x640   : > { %11251 = vmatprep.subr.bf16.mxu1 %v15839_v42 }
 0x6dc   : > { %v3068_v37 = vpop.f32.mrf.mxu0  ;;  %v3109_v23 = vpop.f32.mrf.mxu1 }
 0x6dd   : > { %v3115_v27 = vadd.f32 %v3068_v37, %v13709_v52 }
 0x6de   : > { %v3070_v15 = vpop.f32.mrf.mxu0  ;;  %v11229_v60 = vpop.f32.mrf.mxu1 }
 0x6df   : > { %v10199_v35 = vmul.f32 -1.442695, %v3115_v27  ;;  %v3116_v38 = vadd.f32 %v3070_v15, %v1340_v46 }
 0x6e0   : > { %v3072_v7 = vpop.f32.mrf.mxu0  ;;  %v3112_v40 = vpop.f32.mrf.mxu1 }
 0x6e1   : > { %12458 = vpow2.f32 %v10199_v35  ;;  %v10200_v0 = vmul.f32 -1.442695, %v3116_v38 }
 0x6e2   : > { %v3073_v44 = vpop.f32.mrf.mxu0  ;;  %v11230_v32 = vpop.f32.mrf.mxu1 }
 0x6e3   : > { %12460 = vpow2.f32 %v10200_v0 }
 0x6e4   : > { %12462 = vpow2.f32 %v10201_v14 }
 0x6ee   : > { %v12459_v47 = vpop.eup %12458 }
 0x6ef   : > { %v3123_v52 = vadd.f32 1.0, %v12459_v47 }
 0x6f0   : > { %v12461_v55 = vpop.eup %12460 }
 0x6f1   : > { %12464 = vrcp.f32 %v3123_v52  ;;  %v12463_v19 = vpop.eup %12462  ;;  %v3124_v51 = vadd.f32 1.0, %v12461_v55 }
 0x6f2   : > { %v3133_v58 = vadd.f32 1.0, %v12463_v19 }
 0x6f3   : > { %12466 = vrcp.f32 %v3124_v51 }
 0x6f4   : > { %12468 = vrcp.f32 %v3133_v58 }
 0x6fe   : > { %v12465_v34 = vpop.eup %12464 }
 0x6ff   : > { %v3136_v1 = vmul.f32 %v12465_v34, %v3109_v23 }
 0x700   : > { %v12467_v59 = vpop.eup %12466 }
 0x701   : > { %v3137_v57 = vadd.f32 %v3136_v1, %v1413_v41  ;;  %v12469_v25 = vpop.eup %12468  ;;  %v3140_v37 = vsub.f32 1.0, %v12467_v59  ;;  %v3142_v15 = vmul.f32 %v12467_v59, %v13914_v22  ;;  %v11924_v59 = vld [vmem:[#allocation17 + $0xe0] ss:$16 sps:$4 sm:$0xff]  }
 0x703   : > { %12470 = vtanh.f32 %v3137_v57 }
 0x710   : > { %v12471_v63 = vpop.eup %12470 }
 0x711   : > { %v3139_v17 = vmul.f32 %v12471_v63, %v12469_v25  ;;  %v11927_v25 = vld [vmem:[#allocation17 + $0xe8] ss:$16 sps:$4 sm:$0xff]  }
 0x713   : > { %v3141_v27 = vmul.f32 %v3140_v37, %v3139_v17  ;;  %v11932_v17 = vld [vmem:[#allocation17 + $0xc4] ss:$16 sps:$4 sm:$0xff]   ;;  %v11930_v37 = vld [vmem:[#allocation17 + $0xc0] ss:$16 sps:$4 sm:$0xff]  }
 0x715   : > { %v13953_v60 = vadd.f32 %v3142_v15, %v3141_v27  ;;  %v11933_v27 = vld [vmem:[#allocation17 + $0xc8] ss:$16 sps:$4 sm:$0xff]   ;;  %v11938_v15 = vld [vmem:[#allocation17 + $0xa4] ss:$16 sps:$4 sm:$0xff]  }
 0x717   : > { %v3155_v35 = vpack.c.bf16 %v13953_v60, %v13953_v60 }
 0x719   : > { %3349 = vmatmul.mubr.bf16.vlgmr.msra.gmra.mxu0 %v3155_v35  ;;  %11248 = vmatmul.mubr.bf16.vlgmr.msra.gmra.mxu1 %v3155_v35  ;;  %v11941_v35 = vld [vmem:[#allocation17 + $0xac] ss:$16 sps:$4 sm:$0xff]  }
 0x71a   : > { %3599 = vmatpush1.bf16.msra.mxu0 %v13780_v28  ;;  %3630 = vmatprep.mubr.bf16.mxu0 %v15838_v4  ;;  %v11917_v28 = vld [vmem:[#allocation14 + $0x98] ss:$12 sps:$4 sm:$0xff]  }
 0x71b   : > { %3600 = vmatprep.subr.bf16.mxu0 %v13783_v20  ;;  %11267 = vmatprep.mubr.msk.bf16.mxu1 %vm13170_vm0, %v15839_v42  ;;  %v11926_v20 = vld [vmem:[#allocation17 + $0xe4] ss:$16 sps:$4 sm:$0xff]  }
 0x71c   : > { %11252 = vmatpush3.bf16.msra.mxu1 %v11916_v10  ;;  %v11936_v10 = vld [vmem:[#allocation17 + $0xa0] ss:$16 sps:$4 sm:$0xff]  }
 0x71d   : > { %11253 = vmatprep.subr.bf16.mxu1 %v15839_v42 }
 0x71e   : > { %3601 = vmatpush1.bf16.msra.mxu0 %v13786_v54  ;;  %v11918_v54 = vld [vmem:[#allocation14 + $0x80] ss:$12 sps:$4 sm:$0xff]  }
 0x71f   : > { %3602 = vmatprep.subr.bf16.mxu0 %v13790_v11  ;;  %v11919_v11 = vld [vmem:[#allocation14 + $0x68] ss:$12 sps:$4 sm:$0xff]  }
 0x720   : > { %11254 = vmatpush3.bf16.msra.mxu1 %v11917_v28  ;;  %v11939_v28 = vld [vmem:[#allocation17 + $0xa8] ss:$16 sps:$4 sm:$0xff]  }
 0x721   : > { %11255 = vmatprep.subr.bf16.mxu1 %v15839_v42 }
 0x722   : > { %3603 = vmatpush1.bf16.msra.mxu0 %v13793_v26  ;;  %v11920_v26 = vld [vmem:[#allocation14 + $0x50] ss:$12 sps:$4 sm:$0xff]  }
 0x723   : > { %3604 = vmatprep.subr.bf16.mxu0 %v13797_v6  ;;  %v11921_v6 = vld [vmem:[#allocation14 + $0x38] ss:$12 sps:$4 sm:$0xff]  }
 0x724   : > { %11256 = vmatpush3.bf16.msra.mxu1 %v11918_v54  ;;  %v11947_v54 = vld [vmem:[#allocation17 + $0x8c] ss:$16 sps:$4 sm:$0xff]  }
 0x725   : > { %11257 = vmatprep.subr.bf16.mxu1 %v15839_v42 }
 0x726   : > { %3605 = vmatpush1.bf16.msra.mxu0 %v13800_v3  ;;  %v11922_v3 = vld [vmem:[#allocation14 + $0x20] ss:$12 sps:$4 sm:$0xff]  }
 0x727   : > { %3606 = vmatprep.subr.bf16.mxu0 %v13804_v24  ;;  %v11923_v24 = vld [vmem:[#allocation14 + $0x8] ss:$12 sps:$4 sm:$0xff]  }
 0x728   : > { %11258 = vmatpush3.bf16.msra.mxu1 %v11919_v11  ;;  %v11942_v11 = vld [vmem:[#allocation17 + $0x80] ss:$16 sps:$4 sm:$0xff]  }
 0x729   : > { %11259 = vmatprep.subr.bf16.mxu1 %v15839_v42 }
 0x72a   : > { %3607 = vmatpush1.bf16.msra.mxu0 %v13807_v39  ;;  %v11929_v39 = vld [vmem:[#allocation17 + $0xec] ss:$16 sps:$4 sm:$0xff]  }
 0x72b   : > { %3608 = vmatprep.subr.bf16.mxu0 %v13811_v8 }
 0x72c   : > { %11260 = vmatpush3.bf16.msra.mxu1 %v11920_v26  ;;  %v11945_v26 = vld [vmem:[#allocation17 + $0x88] ss:$16 sps:$4 sm:$0xff]  }
 0x72d   : > { %11261 = vmatprep.subr.bf16.mxu1 %v15839_v42 }
 0x72e   : > { %3609 = vmatpush1.bf16.msra.mxu0 %v13814_v30 }
 0x72f   : > { %3610 = vmatprep.subr.bf16.mxu0 %v13818_v9 }
 0x730   : > { %11262 = vmatpush3.bf16.msra.mxu1 %v11921_v6  ;;  %v11950_v6 = vld [vmem:[#allocation17 + $0x64] ss:$16 sps:$4 sm:$0xff]  }
 0x731   : > { %11263 = vmatprep.subr.bf16.mxu1 %v15839_v42 }
 0x732   : > { %3611 = vmatpush1.bf16.msra.mxu0 %v13821_v31 }
 0x733   : > { %3612 = vmatprep.subr.bf16.mxu0 %v13825_v5 }
 0x734   : > { %11264 = vmatpush3.bf16.msra.mxu1 %v11922_v3  ;;  %v11953_v3 = vld [vmem:[#allocation17 + $0x6c] ss:$16 sps:$4 sm:$0xff]  }
 0x735   : > { %11265 = vmatprep.subr.bf16.mxu1 %v15839_v42 }
 0x736   : > { %3613 = vmatpush1.bf16.msra.mxu0 %v13828_v18 }
 0x737   : > { %3936 = vmatprep.subr.bf16.mxu0 %v11926_v20  ;;  %v11944_v20 = vld [vmem:[#allocation17 + $0x84] ss:$16 sps:$4 sm:$0xff]  }
 0x738   : > { %11266 = vmatpush3.bf16.msra.mxu1 %v11923_v24  ;;  %v11948_v24 = vld [vmem:[#allocation17 + $0x60] ss:$16 sps:$4 sm:$0xff]  }
 0x739   : > { %4009 = vmatprep.subr.bf16.mxu1 %v11929_v39  ;;  %v11951_v39 = vld [vmem:[#allocation17 + $0x68] ss:$16 sps:$4 sm:$0xff]  }
 0x7d9   : > { %v3350_v8 = vpop.f32.mrf.mxu0  ;;  %v3391_v30 = vpop.f32.mrf.mxu1 }
 0x7da   : > { %v3397_v9 = vadd.f32 %v3350_v8, %v13719_v16  ;;  %v11956_v8 = vld [vmem:[#allocation17 + $0x44] ss:$16 sps:$4 sm:$0xff]  }
 0x7db   : > { %v3352_v31 = vpop.f32.mrf.mxu0  ;;  %v11249_v5 = vpop.f32.mrf.mxu1 }
 0x7dc   : > { %v10226_v18 = vmul.f32 -1.442695, %v3397_v9  ;;  %v3398_v32 = vadd.f32 %v3352_v31, %v13723_v36  ;;  %v11954_v9 = vld [vmem:[#allocation17 + $0x40] ss:$16 sps:$4 sm:$0xff]   ;;  %v11957_v31 = vld [vmem:[#allocation17 + $0x48] ss:$16 sps:$4 sm:$0xff]  }
 0x7dd   : > { %v3354_v23 = vpop.f32.mrf.mxu0  ;;  %v3394_v7 = vpop.f32.mrf.mxu1  ;;  %v11962_v5 = vld [vmem:[#allocation17 + $0x24] ss:$16 sps:$4 sm:$0xff]  }
 0x7de   : > { %12472 = vpow2.f32 %v10226_v18  ;;  %v10227_v46 = vmul.f32 -1.442695, %v3398_v32  ;;  %v11965_v18 = vld [vmem:[#allocation17 + $0x2c] ss:$16 sps:$4 sm:$0xff]   ;;  %v11960_v23 = vld [vmem:[#allocation17 + $0x20] ss:$16 sps:$4 sm:$0xff]  }
 0x7df   : > { %v3355_v40 = vpop.f32.mrf.mxu0  ;;  %v11250_v44 = vpop.f32.mrf.mxu1  ;;  %v11963_v7 = vld [vmem:[#allocation17 + $0x28] ss:$16 sps:$4 sm:$0xff]   ;;  %v11966_v32 = vld [vmem:[#allocation17] ss:$16 sps:$4 sm:$0xff]  }
 0x7e0   : > { %12474 = vpow2.f32 %v10227_v46  ;;  %v11968_v40 = vld [vmem:[#allocation17 + $0x4] ss:$16 sps:$4 sm:$0xff]   ;;  %v11971_v44 = vld [vmem:[#allocation17 + $0xc] ss:$16 sps:$4 sm:$0xff]   ;;  %v11969_v46 = vld [vmem:[#allocation17 + $0x8] ss:$16 sps:$4 sm:$0xff]  }
 0x7e1   : > { %12476 = vpow2.f32 %v10228_v2  ;;  %v3718_v2 = vpack.c.bf16 %v13771_v33, %v13748_v12  ;;  %v3720_v12 = vpack.c.bf16 %v13953_v60, %v13914_v22  ;;  %v14006_v33 = vld [vmem:[#allocation19 + $0xac] ss:$12 sps:$4 sm:$0xff]   ;;  %v14018_v22 = vld [vmem:[#allocation19 + $0x7c] ss:$12 sps:$4 sm:$0xff]  }
 0x7eb   : > { %v12473_v38 = vpop.eup %12472 }
 0x7ec   : > { %v3405_v56 = vadd.f32 1.0, %v12473_v38  ;;  %v3719_v38 = vpack.c.bf16 %v13878_v29, %v13840_v61  ;;  %v14012_v61 = vld [vmem:[#allocation19 + $0x94] ss:$12 sps:$4 sm:$0xff]   ;;  %v14014_v29 = vld [vmem:[#allocation19 + $0x90] ss:$12 sps:$4 sm:$0xff]  }
 0x7ed   : > { %v12475_v0 = vpop.eup %12474 }
 0x7ee   : > { %12478 = vrcp.f32 %v3405_v56  ;;  %v12477_v16 = vpop.eup %12476  ;;  %v3406_v14 = vadd.f32 1.0, %v12475_v0  ;;  %v14008_v56 = vld [vmem:[#allocation19 + $0xa8] ss:$12 sps:$4 sm:$0xff]   ;;  %v14024_v0 = vld [vmem:[#allocation19 + $0x64] ss:$12 sps:$4 sm:$0xff]  }
 0x7ef   : > { %v3415_v52 = vadd.f32 1.0, %v12477_v16  ;;  %v14026_v16 = vld [vmem:[#allocation19 + $0x60] ss:$12 sps:$4 sm:$0xff]  }
 0x7f0   : > { %12480 = vrcp.f32 %v3406_v14  ;;  %v14030_v14 = vld [vmem:[#allocation19 + $0x4c] ss:$12 sps:$4 sm:$0xff]  }
 0x7f1   : > { %12482 = vrcp.f32 %v3415_v52  ;;  %v14036_v52 = vld [vmem:[#allocation19 + $0x34] ss:$12 sps:$4 sm:$0xff]  }
 0x7fb   : > { %v12479_v47 = vpop.eup %12478 }
 0x7fc   : > { %v3418_v55 = vmul.f32 %v12479_v47, %v3391_v30  ;;  %v11959_v30 = vld [vmem:[#allocation17 + $0x4c] ss:$16 sps:$4 sm:$0xff]   ;;  %v14032_v47 = vld [vmem:[#allocation19 + $0x48] ss:$12 sps:$4 sm:$0xff]  }
 0x7fd   : > { %v12481_v36 = vpop.eup %12480 }
 0x7fe   : > { %v3419_v19 = vadd.f32 %v3418_v55, %v13728_v45  ;;  %v12483_v51 = vpop.eup %12482  ;;  %v3422_v58 = vsub.f32 1.0, %v12481_v36  ;;  %v3424_v1 = vmul.f32 %v12481_v36, %v13953_v60  ;;  %v11935_v45 = vld [vmem:[#allocation17 + $0xcc] ss:$16 sps:$4 sm:$0xff]   ;;  %v14020_v60 = vld [vmem:[#allocation19 + $0x78] ss:$12 sps:$4 sm:$0xff]  }
 0x7ff   : > { %v14038_v55 = vld [vmem:[#allocation19 + $0x30] ss:$12 sps:$4 sm:$0xff]   ;;  %v14044_v36 = vld [vmem:[#allocation19 + $0x18] ss:$12 sps:$4 sm:$0xff]  }
 0x800   : > { %12484 = vtanh.f32 %v3419_v19  ;;  %v14042_v19 = vld [vmem:[#allocation19 + $0x1c] ss:$12 sps:$4 sm:$0xff]  }
 0x80d   : > { %v12485_v34 = vpop.eup %12484 }
 0x80e   : > { %v3421_v50 = vmul.f32 %v12485_v34, %v12483_v51  ;;  %v14048_v51 = vld [vmem:[#allocation19 + $0x4] ss:$12 sps:$4 sm:$0xff]   ;;  %v14050_v34 = vld [vmem:[#allocation19] ss:$12 sps:$4 sm:$0xff]  }
 0x810   : > { %v3423_v41 = vmul.f32 %v3422_v58, %v3421_v50  ;;  %v14052_v50 = vld [vmem:[#allocation19 + $0xb0] ss:$12 sps:$4 sm:$0xff]   ;;  %v14057_v58 = vld [vmem:[#allocation19 + $0x98] ss:$12 sps:$4 sm:$0xff]  }
 0x812   : > { %v13987_v57 = vadd.f32 %v3424_v1, %v3423_v41  ;;  %v14062_v41 = vld [vmem:[#allocation19 + $0x80] ss:$12 sps:$4 sm:$0xff]   ;;  %v14066_v1 = vld [vmem:[#allocation19 + $0x68] ss:$12 sps:$4 sm:$0xff]  }
 0x814   : > { %v3437_v63 = vpack.c.bf16 %v13987_v57, %v13987_v57 }
 0x816   : > { %3631 = vmatmul.mubr.bf16.vlgmr.msra.gmra.mxu0 %v3437_v63  ;;  %11268 = vmatmul.mubr.bf16.vlgmr.msra.gmra.mxu1 %v3437_v63  ;;  %v14078_v63 = vld [vmem:[#allocation19 + $0x20] ss:$12 sps:$4 sm:$0xff]  }
 0x817   : > { %3937 = vmatpush1.bf16.msra.mxu0 %v11924_v59  ;;  %4010 = vmatpush1.bf16.msra.mxu1 %v11927_v25  ;;  %v14070_v59 = vld [vmem:[#allocation19 + $0x50] ss:$12 sps:$4 sm:$0xff]   ;;  %v14074_v25 = vld [vmem:[#allocation19 + $0x38] ss:$12 sps:$4 sm:$0xff]  }
 0x818   : > { %3938 = vmatprep.subr.bf16.mxu0 %v11932_v17  ;;  %4011 = vmatprep.subr.bf16.mxu1 %v11935_v45  ;;  %v14082_v17 = vld [vmem:[#allocation19 + $0x8] ss:$12 sps:$4 sm:$0xff]  }
 0x819   : > { %3968 = vmatprep.mubr.bf16.mxu0 %v15838_v4  ;;  %4041 = vmatprep.mubr.bf16.mxu1 %v15838_v4 }
 0x81b   : > { %3939 = vmatpush1.bf16.msra.mxu0 %v11930_v37  ;;  %4012 = vmatpush1.bf16.msra.mxu1 %v11933_v27 }
 0x81c   : > { %3940 = vmatprep.subr.bf16.mxu0 %v11938_v15  ;;  %4013 = vmatprep.subr.bf16.mxu1 %v11941_v35 }
 0x81f   : > { %3941 = vmatpush1.bf16.msra.mxu0 %v11936_v10  ;;  %4014 = vmatpush1.bf16.msra.mxu1 %v11939_v28 }
 0x820   : > { %3942 = vmatprep.subr.bf16.mxu0 %v11944_v20  ;;  %4015 = vmatprep.subr.bf16.mxu1 %v11947_v54  ;;  %v9998_v54 = vmul.f32 -1.442695, %v13595_v49 }
 0x823   : > { %3943 = vmatpush1.bf16.msra.mxu0 %v11942_v11  ;;  %4016 = vmatpush1.bf16.msra.mxu1 %v11945_v26 }
 0x824   : > { %3944 = vmatprep.subr.bf16.mxu0 %v11950_v6  ;;  %4017 = vmatprep.subr.bf16.mxu1 %v11953_v3  ;;  %v1350_v6 = vadd.f32 %v13734_v21, %v13669_v43  ;;  %v9999_v3 = vmul.f32 -1.442695, %v13600_v53 }
 0x827   : > { %3945 = vmatpush1.bf16.msra.mxu0 %v11948_v24  ;;  %4018 = vmatpush1.bf16.msra.mxu1 %v11951_v39  ;;  %v10000_v39 = vmul.f32 -1.442695, %v13609_v62 }
 0x828   : > { %3946 = vmatprep.subr.bf16.mxu0 %v11956_v8  ;;  %4019 = vmatprep.subr.bf16.mxu1 %v11959_v30 }
 0x82b   : > { %3947 = vmatpush1.bf16.msra.mxu0 %v11954_v9  ;;  %4020 = vmatpush1.bf16.msra.mxu1 %v11957_v31 }
 0x82c   : > { %3948 = vmatprep.subr.bf16.mxu0 %v11962_v5  ;;  %4021 = vmatprep.subr.bf16.mxu1 %v11965_v18 }
 0x82f   : > { %3949 = vmatpush1.bf16.msra.mxu0 %v11960_v23  ;;  %4022 = vmatpush1.bf16.msra.mxu1 %v11963_v7 }
 0x830   : > { %3950 = vmatprep.subr.bf16.mxu0 %v11968_v40  ;;  %4023 = vmatprep.subr.bf16.mxu1 %v11971_v44 }
 0x833   : > { %3951 = vmatpush1.bf16.msra.mxu0 %v11966_v32  ;;  %4024 = vmatpush1.bf16.msra.mxu1 %v11969_v46 }
 0x834   : > { %11271 = vmatprep.subr.bf16.mxu1 %v15839_v42  ;;  %4281 = vmatprep.subr.bf16.mxu0 %v14006_v33 }
 0x836   : > { %3969 = vmatmul.mubr.bf16.vlgmr.msra.gmra.mxu0 %v3718_v2  ;;  %4042 = vmatmul.mubr.bf16.vlgmr.msra.gmra.mxu1 %v3718_v2  ;;  %v15841_v2 = vld [vmem:[#allocation50_spill] sm:$0xff] }
 0x837   : > { %3978 = vmatprep.mubr.bf16.mxu0 %v15838_v4  ;;  %4051 = vmatprep.mubr.bf16.mxu1 %v15838_v4 }
 0x838   : > { %4282 = vmatpush1.bf16.msra.mxu0 %v14008_v56  ;;  %11272 = vmatpush3.bf16.msra.mxu1 %v14052_v50 }
 0x839   : > { %4283 = vmatprep.subr.bf16.mxu0 %v14012_v61  ;;  %11273 = vmatprep.subr.bf16.mxu1 %v15839_v42 }
 0x83c   : > { %4284 = vmatpush1.bf16.msra.mxu0 %v14014_v29  ;;  %11274 = vmatpush3.bf16.msra.mxu1 %v14057_v58 }
 0x83d   : > { %4285 = vmatprep.subr.bf16.mxu0 %v14018_v22  ;;  %11275 = vmatprep.subr.bf16.mxu1 %v15839_v42 }
 0x83e   : > { %3979 = vmatmul.mubr.bf16.gmra.mxu0 %v3719_v38  ;;  %4052 = vmatmul.mubr.bf16.gmra.mxu1 %v3719_v38  ;;  %v1423_v38 = vadd.f32 %v15841_v2, %v13675_v48 }
 0x83f   : > { %3988 = vmatprep.mubr.bf16.mxu0 %v15838_v4  ;;  %4061 = vmatprep.mubr.bf16.mxu1 %v15838_v4 }
 0x840   : > { %4286 = vmatpush1.bf16.msra.mxu0 %v14020_v60  ;;  %11276 = vmatpush3.bf16.msra.mxu1 %v14062_v41 }
 0x841   : > { %4287 = vmatprep.subr.bf16.mxu0 %v14024_v0  ;;  %11277 = vmatprep.subr.bf16.mxu1 %v15839_v42 }
 0x844   : > { %4288 = vmatpush1.bf16.msra.mxu0 %v14026_v16  ;;  %11278 = vmatpush3.bf16.msra.mxu1 %v14066_v1 }
 0x845   : > { %4289 = vmatprep.subr.bf16.mxu0 %v14030_v14  ;;  %11279 = vmatprep.subr.bf16.mxu1 %v15839_v42 }
 0x846   : > { %3989 = vmatmul.mubr.bf16.gmra.mxu0 %v3720_v12  ;;  %4062 = vmatmul.mubr.bf16.gmra.mxu1 %v3720_v12 }
 0x847   : > { %3998 = vmatprep.mubr.bf16.mxu0 %v15838_v4  ;;  %4071 = vmatprep.mubr.bf16.mxu1 %v15838_v4 }
 0x848   : > { %4290 = vmatpush1.bf16.msra.mxu0 %v14032_v47  ;;  %11280 = vmatpush3.bf16.msra.mxu1 %v14070_v59 }
 0x849   : > { %4291 = vmatprep.subr.bf16.mxu0 %v14036_v52  ;;  %11281 = vmatprep.subr.bf16.mxu1 %v15839_v42 }
 0x84c   : > { %4292 = vmatpush1.bf16.msra.mxu0 %v14038_v55  ;;  %11282 = vmatpush3.bf16.msra.mxu1 %v14074_v25 }
 0x84d   : > { %4293 = vmatprep.subr.bf16.mxu0 %v14042_v19  ;;  %11283 = vmatprep.subr.bf16.mxu1 %v15839_v42 }
 0x850   : > { %4294 = vmatpush1.bf16.msra.mxu0 %v14044_v36  ;;  %11284 = vmatpush3.bf16.msra.mxu1 %v14078_v63 }
 0x851   : > { %4295 = vmatprep.subr.bf16.mxu0 %v14048_v51  ;;  %11285 = vmatprep.subr.bf16.mxu1 %v15839_v42 }
 0x854   : > { %4296 = vmatpush1.bf16.msra.mxu0 %v14050_v34  ;;  %11286 = vmatpush3.bf16.msra.mxu1 %v14082_v17 }
 0x855   : > { %4400 = vmatprep.subr.bf16.mxu0 %v14006_v33  ;;  %11291 = vmatprep.subr.bf16.mxu1 %v15839_v42 }
 0x8d6   : > { %v3632_v45 = vpop.f32.mrf.mxu0  ;;  %v3673_v37 = vpop.f32.mrf.mxu1 }
 0x8d7   : > { %v3679_v27 = vadd.f32 %v3632_v45, %v13731_v13  ;;  %v15840_v13 = vld [vmem:[#allocation51_spill] sm:$0xff]  ;;  %v14103_v45 = vld [vmem:[%s15619_s7] sm:$0xf] }
 0x8d8   : > { %v3634_v15 = vpop.f32.mrf.mxu0  ;;  %v11269_v35 = vpop.f32.mrf.mxu1  ;;  %v10255_v8 = vmul.f32 -1.442695, %v15840_v13 }
 0x8d9   : > { %v10253_v10 = vmul.f32 -1.442695, %v3679_v27  ;;  %v3680_v24 = vadd.f32 %v3634_v15, %v1350_v6 }
 0x8da   : > { %v3636_v28 = vpop.f32.mrf.mxu0  ;;  %v3676_v20 = vpop.f32.mrf.mxu1 }
 0x8db   : > { %12486 = vpow2.f32 %v10253_v10  ;;  %v10254_v30 = vmul.f32 -1.442695, %v3680_v24  ;;  %v15842_v10 = vld [vmem:[#allocation47_spill] sm:$0xff] }
 0x8dc   : > { %v3637_v11 = vpop.f32.mrf.mxu0  ;;  %v11270_v26 = vpop.f32.mrf.mxu1  ;;  %12488 = vpow2.f32 %v9998_v54  ;;  %v14111_v28 = vrot.slane %v14103_v45, %v15842_v10 }
 0x8dd   : > { %12490 = vpow2.f32 %v9999_v3 }
 0x8de   : > { %12492 = vpow2.f32 %v10000_v39 }
 0x8df   : > { %12494 = vpow2.f32 %v10255_v8 }
 0x8e0   : > { %12496 = vpow2.f32 %v10254_v30 }
 0x8e8   : > { %v12487_v9 = vpop.eup %12486 }
 0x8e9   : > { %v3687_v49 = vadd.f32 1.0, %v12487_v9  ;;  %v12489_v31 = vpop.eup %12488 }
 0x8ea   : > { %v1007_v5 = vadd.f32 1.0, %v12489_v31  ;;  %v12491_v18 = vpop.eup %12490 }
 0x8eb   : > { %12498 = vrcp.f32 %v3687_v49  ;;  %v12493_v43 = vpop.eup %12492  ;;  %v1008_v21 = vadd.f32 1.0, %v12491_v18 }
 0x8ec   : > { %12500 = vrcp.f32 %v1007_v5  ;;  %v12495_v53 = vpop.eup %12494  ;;  %v1009_v7 = vadd.f32 1.0, %v12493_v43 }
 0x8ed   : > { %v12497_v23 = vpop.eup %12496  ;;  %12502 = vrcp.f32 %v1008_v21  ;;  %v3697_v40 = vadd.f32 1.0, %v12495_v53 }
 0x8ee   : > { %v3688_v32 = vadd.f32 1.0, %v12497_v23  ;;  %12504 = vrcp.f32 %v1009_v7 }
 0x8ef   : > { %12506 = vrcp.f32 %v3697_v40 }
 0x8f0   : > { %12508 = vrcp.f32 %v3688_v32  ;;  %v15845_v32 = vld [vmem:[#allocation35_spill] sm:$0xff] }
 0x8f1   : > { %v10002_v2 = vmul.f32 -1.442695, %v15845_v32 }
 0x8f6   : > { %v14094_v62 = vpop.f32.mrf.mxu1 }
 0x8f8   : > { %v12499_v44 = vpop.eup %12498  ;;  %v14096_v46 = vpop.f32.mrf.mxu1 }
 0x8f9   : > { %v3700_v12 = vmul.f32 %v12499_v44, %v3673_v37  ;;  %v12501_v20 = vpop.eup %12500 }
 0x8fa   : > { %v14105_v27 = vpop.f32.mrf.mxu1  ;;  %v12503_v3 = vpop.eup %12502 }
 0x8fb   : > { %v3701_v15 = vadd.f32 %v3700_v12, %v1423_v38  ;;  %v12505_v8 = vpop.eup %12504  ;;  %v15846_v12 = vld [vmem:[#allocation36_spill] sm:$0xff] }
 0x8fc   : > { %v14107_v35 = vpop.f32.mrf.mxu1  ;;  %v12507_v9 = vpop.eup %12506 }
 0x8fd   : > { %12510 = vtanh.f32 %v3701_v15  ;;  %v12509_v49 = vpop.eup %12508  ;;  %v10003_v15 = vmul.f32 -1.442695, %v15846_v12 }
 0x8fe   : > { %v4053_v48 = vpop.f32.mrf.mxu1  ;;  %v3704_v43 = vsub.f32 1.0, %v12509_v49  ;;  %v3706_v53 = vmul.f32 %v12509_v49, %v13987_v57  ;;  %12512 = vpow2.f32 %v10002_v2 }
 0x8ff   : > { %v4054_v37 = vadd.f32 %v4053_v48, %v14111_v28  ;;  %12514 = vpow2.f32 %v10003_v15 }
 0x900   : > { %v14114_v54 = vpop.f32.mrf.mxu1 }
 0x901   : > { %v14116_v11 = vadd.f32 %v12501_v20, %v4054_v37 }
 0x902   : > { %v4057_v26 = vpop.f32.mrf.mxu1 }
 0x903   : > { %v4058_v6 = vadd.f32 %v4057_v26, %v14111_v28  ;;  %v15847_v26 = vld [vmem:[#allocation33_spill] sm:$0xff] }
 0x904   : > { %v14119_v24 = vpop.f32.mrf.mxu1 }
 0x905   : > { %v14121_v39 = vadd.f32 %v12503_v3, %v4058_v6  ;;  %v9996_v6 = vmul.f32 -1.442695, %v15847_v26 }
 0x906   : > { %v4063_v13 = vpop.f32.mrf.mxu1 }
 0x907   : > { %v4064_v30 = vadd.f32 %v4063_v13, %v14111_v28  ;;  %12516 = vpow2.f32 %v9996_v6 }
 0x909   : > { %v14124_v31 = vadd.f32 %v12505_v8, %v4064_v30 }
 0x90a   : > { %v12511_v5 = vpop.eup %12510 }
 0x90b   : > { %15843 = vst [vmem:[#allocation51_spill] sm:$0xff] %v14124_v31  ;;  %v3703_v18 = vmul.f32 %v12511_v5, %v12507_v9  ;;  %v12513_v3 = vpop.eup %12512 }
 0x90c   : > { %v1011_v8 = vadd.f32 1.0, %v12513_v3  ;;  %v12515_v30 = vpop.eup %12514 }
 0x90d   : > { %v3705_v21 = vmul.f32 %v3704_v43, %v3703_v18  ;;  %v1012_v49 = vadd.f32 1.0, %v12515_v30  ;;  %v14190_v18 = vpop.f32.mrf.mxu1  ;;  %v15856_v30 = vld [vmem:[#allocation46_spill] sm:$0xff] }
 0x90e   : > { %12518 = vrcp.f32 %v1011_v8  ;;  %15848 = vst [vmem:[#allocation35_spill] sm:$0xff] %v14190_v18 }
 0x90f   : > { %v14127_v23 = vadd.f32 %v3706_v53, %v3705_v21  ;;  %12520 = vrcp.f32 %v1012_v49  ;;  %v14194_v21 = vpop.f32.mrf.mxu1  ;;  %v14209_v49 = vrot.slane %v14103_v45, %v15856_v30 }
 0x910   : > { %15850 = vst [vmem:[#allocation33_spill] sm:$0xff] %v14194_v21 }
 0x911   : > { %15844 = vst [vmem:[#allocation50_spill] sm:$0xff] %v14127_v23  ;;  %v3721_v7 = vpack.c.bf16 %v14127_v23, %v13987_v57  ;;  %v3970_v57 = vpop.f32.mrf.mxu0  ;;  %v14198_v32 = vpop.f32.mrf.mxu1 }
 0x912   : > { %15852 = vst [vmem:[#allocation53_spill] sm:$0xff] %v14198_v32 }
 0x913   : > { %3999 = vmatmul.mubr.bf16.gmra.mxu0 %v3721_v7  ;;  %4072 = vmatmul.mubr.bf16.gmra.mxu1 %v3721_v7  ;;  %v3972_v40 = vpop.f32.mrf.mxu0 }
 0x914   : > { %4313 = vmatprep.mubr.bf16.mxu0 %v15838_v4  ;;  %11287 = vmatprep.mubr.msk.bf16.mxu1 %vm13170_vm0, %v15839_v42  ;;  %v12517_v53 = vpop.eup %12516 }
 0x915   : > { %v14171_v44 = vpop.f32.mrf.mxu0  ;;  %v1005_v2 = vadd.f32 1.0, %v12517_v53 }
 0x917   : > { %v14174_v38 = vpop.f32.mrf.mxu0  ;;  %12522 = vrcp.f32 %v1005_v2  ;;  %v15862_v2 = vld [vmem:[#allocation48_spill] sm:$0xff] }
 0x919   : > { %v14177_v48 = vpop.f32.mrf.mxu0 }
 0x91b   : > { %4314 = vmatmul.mubr.bf16.vlgmr.msra.gmra.mxu0 %v15838_v4  ;;  %11288 = vmatmul.mubr.bf16.vlgmr.msra.gmra.mxu1 %v15838_v4  ;;  %v14179_v37 = vpop.f32.mrf.mxu0  ;;  %v12519_v6 = vpop.eup %12518 }
 0x91c   : > { %4401 = vmatpush1.bf16.msra.mxu0 %v14008_v56  ;;  %11292 = vmatpush3.bf16.msra.mxu1 %v14052_v50  ;;  %v12521_v32 = vpop.eup %12520 }
 0x91d   : > { %4402 = vmatprep.subr.bf16.mxu0 %v14012_v61  ;;  %11293 = vmatprep.subr.bf16.mxu1 %v15839_v42  ;;  %v14181_v20 = vpop.f32.mrf.mxu0 }
 0x91e   : > { %4432 = vmatprep.mubr.bf16.mxu0 %v15838_v4  ;;  %11307 = vmatprep.mubr.msk.bf16.mxu1 %vm13170_vm0, %v15839_v42 }
 0x91f   : > { %v14184_v13 = vpop.f32.mrf.mxu0 }
 0x920   : > { %4403 = vmatpush1.bf16.msra.mxu0 %v14014_v29  ;;  %11294 = vmatpush3.bf16.msra.mxu1 %v14057_v58 }
 0x921   : > { %4404 = vmatprep.subr.bf16.mxu0 %v14018_v22  ;;  %11295 = vmatprep.subr.bf16.mxu1 %v15839_v42  ;;  %v14186_v9 = vpop.f32.mrf.mxu0 }
 0x923   : > { %v14188_v5 = vpop.f32.mrf.mxu0 }
 0x924   : > { %4405 = vmatpush1.bf16.msra.mxu0 %v14020_v60  ;;  %11296 = vmatpush3.bf16.msra.mxu1 %v14062_v41 }
 0x925   : > { %4406 = vmatprep.subr.bf16.mxu0 %v14024_v0  ;;  %11297 = vmatprep.subr.bf16.mxu1 %v15839_v42  ;;  %v14192_v43 = vpop.f32.mrf.mxu0 }
 0x926   : > { %15849 = vst [vmem:[#allocation36_spill] sm:$0xff] %v14192_v43 }
 0x927   : > { %v14196_v7 = vpop.f32.mrf.mxu0 }
 0x928   : > { %4407 = vmatpush1.bf16.msra.mxu0 %v14026_v16  ;;  %11298 = vmatpush3.bf16.msra.mxu1 %v14066_v1  ;;  %15851 = vst [vmem:[#allocation52_spill] sm:$0xff] %v14196_v7 }
 0x929   : > { %4408 = vmatprep.subr.bf16.mxu0 %v14030_v14  ;;  %11299 = vmatprep.subr.bf16.mxu1 %v15839_v42 }
 0x92c   : > { %4409 = vmatpush1.bf16.msra.mxu0 %v14032_v47  ;;  %11300 = vmatpush3.bf16.msra.mxu1 %v14070_v59 }
 0x92d   : > { %4410 = vmatprep.subr.bf16.mxu0 %v14036_v52  ;;  %11301 = vmatprep.subr.bf16.mxu1 %v15839_v42 }
 0x930   : > { %4411 = vmatpush1.bf16.msra.mxu0 %v14038_v55  ;;  %11302 = vmatpush3.bf16.msra.mxu1 %v14074_v25 }
 0x931   : > { %4412 = vmatprep.subr.bf16.mxu0 %v14042_v19  ;;  %11303 = vmatprep.subr.bf16.mxu1 %v15839_v42 }
 0x934   : > { %4413 = vmatpush1.bf16.msra.mxu0 %v14044_v36  ;;  %11304 = vmatpush3.bf16.msra.mxu1 %v14078_v63 }
 0x935   : > { %4414 = vmatprep.subr.bf16.mxu0 %v14048_v51  ;;  %11305 = vmatprep.subr.bf16.mxu1 %v15839_v42 }
 0x938   : > { %4415 = vmatpush1.bf16.msra.mxu0 %v14050_v34  ;;  %11306 = vmatpush3.bf16.msra.mxu1 %v14082_v17 }
 0x939   : > { %4519 = vmatprep.subr.bf16.mxu0 %v14006_v33  ;;  %11311 = vmatprep.subr.bf16.mxu1 %v15839_v42 }
 0x9d3   : > { %v14200_v12 = vpop.f32.mrf.mxu0  ;;  %v4073_v15 = vpop.f32.mrf.mxu1 }
 0x9d4   : > { %15853 = vst [vmem:[#allocation54_spill] sm:$0xff] %v14200_v12  ;;  %v4074_v26 = vadd.f32 %v4073_v15, %v14111_v28 }
 0x9d5   : > { %v14203_v3 = vpop.f32.mrf.mxu0  ;;  %v14205_v8 = vpop.f32.mrf.mxu1 }
 0x9d6   : > { %15854 = vst [vmem:[#allocation55_spill] sm:$0xff] %v14203_v3  ;;  %15855 = vst [vmem:[#allocation56_spill] sm:$0xff] %v14205_v8  ;;  %v14211_v10 = vadd.f32 %v12519_v6, %v4074_v26  ;;  %v3971_v3 = vadd.f32 %v3970_v57, %v14209_v49 }
 0x9d7   : > { %v14213_v23 = vpop.f32.mrf.mxu0  ;;  %v4077_v53 = vpop.f32.mrf.mxu1 }
 0x9d8   : > { %15857 = vst [vmem:[#allocation57_spill] sm:$0xff] %v14211_v10  ;;  %15858 = vst [vmem:[#allocation58_spill] sm:$0xff] %v14213_v23  ;;  %v4078_v12 = vadd.f32 %v4077_v53, %v14111_v28  ;;  %v14225_v23 = vrot.slane %v14103_v45, %v15862_v2 }
 0x9d9   : > { %v14216_v7 = vpop.f32.mrf.mxu0  ;;  %v14218_v15 = vpop.f32.mrf.mxu1 }
 0x9da   : > { %15859 = vst [vmem:[#allocation59_spill] sm:$0xff] %v14216_v7  ;;  %15860 = vst [vmem:[#allocation60_spill] sm:$0xff] %v14218_v15  ;;  %v14221_v8 = vadd.f32 %v12521_v32, %v4078_v12  ;;  %v4044_v15 = vadd.f32 %v14094_v62, %v14111_v28  ;;  %v3973_v32 = vadd.f32 %v3972_v40, %v14225_v23  ;;  %v12523_v12 = vpop.eup %12522 }
 0x9db   : > { %v4315_v21 = vpop.f32.mrf.mxu0  ;;  %v4356_v30 = vpop.f32.mrf.mxu1 }
 0x9dc   : > { %15861 = vst [vmem:[#allocation61_spill] sm:$0xff] %v14221_v8  ;;  %v4362_v43 = vadd.f32 %v4315_v21, %v3971_v3  ;;  %v4376_v21 = vadd.f32 %v12523_v12, %v4044_v15 }
 0x9dd   : > { %v4317_v26 = vpop.f32.mrf.mxu0  ;;  %v11289_v6 = vpop.f32.mrf.mxu1 }
 0x9de   : > { %v10312_v10 = vmul.f32 -1.442695, %v4362_v43  ;;  %v4363_v8 = vadd.f32 %v4317_v26, %v3973_v32  ;;  %v10314_v6 = vmul.f32 -1.442695, %v4376_v21 }
 0x9df   : > { %v4319_v53 = vpop.f32.mrf.mxu0  ;;  %v4359_v18 = vpop.f32.mrf.mxu1 }
 0x9e0   : > { %12524 = vpow2.f32 %v10312_v10  ;;  %v10313_v3 = vmul.f32 -1.442695, %v4363_v8  ;;  %v15863_v10 = vld [vmem:[#allocation49_spill] sm:$0xff] }
 0x9e1   : > { %v4320_v7 = vpop.f32.mrf.mxu0  ;;  %v11290_v57 = vpop.f32.mrf.mxu1  ;;  %v14232_v53 = vrot.slane %v14103_v45, %v15863_v10 }
 0x9e2   : > { %12526 = vpow2.f32 %v10313_v3 }
 0x9e3   : > { %12528 = vpow2.f32 %v10314_v6  ;;  %v4046_v40 = vadd.f32 %v14096_v46, %v14232_v53  ;;  %v15864_v46 = vld [vmem:[#allocation34_spill] sm:$0xff] }
 0x9ed   : > { %v12525_v31 = vpop.eup %12524 }
 0x9ee   : > { %v4370_v2 = vadd.f32 1.0, %v12525_v31 }
 0x9ef   : > { %v12527_v43 = vpop.eup %12526 }
 0x9f0   : > { %12530 = vrcp.f32 %v4370_v2  ;;  %v12529_v18 = vpop.eup %12528  ;;  %v4371_v62 = vadd.f32 1.0, %v12527_v43 }
 0x9f1   : > { %v4380_v57 = vadd.f32 1.0, %v12529_v18 }
 0x9f2   : > { %12532 = vrcp.f32 %v4371_v62  ;;  %v3975_v62 = vadd.f32 %v14171_v44, %v14209_v49 }
 0x9f3   : > { %12534 = vrcp.f32 %v4380_v57 }
 0x9fd   : > { %v12531_v7 = vpop.eup %12530 }
 0x9fe   : > { %v4383_v15 = vmul.f32 %v12531_v7, %v4356_v30  ;;  %v9997_v30 = vmul.f32 -1.442695, %v15864_v46 }
 0x9ff   : > { %v12533_v26 = vpop.eup %12532 }
 0xa00   : > { %v4384_v8 = vadd.f32 %v4383_v15, %v4046_v40  ;;  %v12535_v31 = vpop.eup %12534  ;;  %v4387_v12 = vsub.f32 1.0, %v12533_v26  ;;  %v4389_v3 = vmul.f32 0.0, %v12533_v26 }
 0xa02   : > { %12536 = vtanh.f32 %v4384_v8 }
 0xa03   : > { %12538 = vpow2.f32 %v9997_v30 }
 0xa0f   : > { %v12537_v2 = vpop.eup %12536 }
 0xa10   : > { %v4386_v32 = vmul.f32 %v12537_v2, %v12535_v31  ;;  %v12539_v43 = vpop.eup %12538 }
 0xa11   : > { %v1006_v18 = vadd.f32 1.0, %v12539_v43 }
 0xa12   : > { %v4388_v21 = vmul.f32 %v4387_v12, %v4386_v32  ;;  %v4048_v32 = vadd.f32 %v14105_v27, %v14111_v28 }
 0xa13   : > { %12540 = vrcp.f32 %v1006_v18 }
 0xa14   : > { %v14236_v45 = vadd.f32 %v4389_v3, %v4388_v21  ;;  %v3977_v3 = vadd.f32 %v14174_v38, %v14225_v23 }
 0xa16   : > { %v4399_v6 = vpack.c.bf16 %v14236_v45, %v14236_v45 }
 0xa18   : > { %4433 = vmatmul.mubr.bf16.vlgmr.msra.gmra.mxu0 %v4399_v6  ;;  %11308 = vmatmul.mubr.bf16.vlgmr.msra.gmra.mxu1 %v4399_v6 }
 0xa19   : > { %4520 = vmatpush1.bf16.msra.mxu0 %v14008_v56  ;;  %11312 = vmatpush3.bf16.msra.mxu1 %v14052_v50 }
 0xa1a   : > { %4521 = vmatprep.subr.bf16.mxu0 %v14012_v61  ;;  %11313 = vmatprep.subr.bf16.mxu1 %v15839_v42 }
 0xa1b   : > { %4551 = vmatprep.mubr.bf16.mxu0 %v15838_v4  ;;  %11327 = vmatprep.mubr.msk.bf16.mxu1 %vm13170_vm0, %v15839_v42 }
 0xa1d   : > { %4522 = vmatpush1.bf16.msra.mxu0 %v14014_v29  ;;  %11314 = vmatpush3.bf16.msra.mxu1 %v14057_v58 }
 0xa1e   : > { %4523 = vmatprep.subr.bf16.mxu0 %v14018_v22  ;;  %11315 = vmatprep.subr.bf16.mxu1 %v15839_v42 }
 0xa20   : > { %v12541_v6 = vpop.eup %12540 }
 0xa21   : > { %4524 = vmatpush1.bf16.msra.mxu0 %v14020_v60  ;;  %11316 = vmatpush3.bf16.msra.mxu1 %v14062_v41  ;;  %v4495_v44 = vadd.f32 %v12541_v6, %v4048_v32 }
 0xa22   : > { %4525 = vmatprep.subr.bf16.mxu0 %v14024_v0  ;;  %11317 = vmatprep.subr.bf16.mxu1 %v15839_v42 }
 0xa23   : > { %v10317_v43 = vmul.f32 -1.442695, %v4495_v44 }
 0xa25   : > { %4526 = vmatpush1.bf16.msra.mxu0 %v14026_v16  ;;  %11318 = vmatpush3.bf16.msra.mxu1 %v14066_v1 }
 0xa26   : > { %4527 = vmatprep.subr.bf16.mxu0 %v14030_v14  ;;  %11319 = vmatprep.subr.bf16.mxu1 %v15839_v42 }
 0xa29   : > { %4528 = vmatpush1.bf16.msra.mxu0 %v14032_v47  ;;  %11320 = vmatpush3.bf16.msra.mxu1 %v14070_v59 }
 0xa2a   : > { %4529 = vmatprep.subr.bf16.mxu0 %v14036_v52  ;;  %11321 = vmatprep.subr.bf16.mxu1 %v15839_v42 }
 0xa2d   : > { %4530 = vmatpush1.bf16.msra.mxu0 %v14038_v55  ;;  %11322 = vmatpush3.bf16.msra.mxu1 %v14074_v25 }
 0xa2e   : > { %4531 = vmatprep.subr.bf16.mxu0 %v14042_v19  ;;  %11323 = vmatprep.subr.bf16.mxu1 %v15839_v42 }
 0xa31   : > { %4532 = vmatpush1.bf16.msra.mxu0 %v14044_v36  ;;  %11324 = vmatpush3.bf16.msra.mxu1 %v14078_v63 }
 0xa32   : > { %4533 = vmatprep.subr.bf16.mxu0 %v14048_v51  ;;  %11325 = vmatprep.subr.bf16.mxu1 %v15839_v42 }
 0xa35   : > { %4534 = vmatpush1.bf16.msra.mxu0 %v14050_v34  ;;  %11326 = vmatpush3.bf16.msra.mxu1 %v14082_v17 }
 0xa36   : > { %4638 = vmatprep.subr.bf16.mxu0 %v14006_v33  ;;  %11331 = vmatprep.subr.bf16.mxu1 %v15839_v42 }
 0xad8   : > { %v4434_v7 = vpop.f32.mrf.mxu0  ;;  %v4475_v57 = vpop.f32.mrf.mxu1 }
 0xad9   : > { %v4481_v40 = vadd.f32 %v4434_v7, %v3975_v62 }
 0xada   : > { %v4436_v15 = vpop.f32.mrf.mxu0  ;;  %v11309_v8 = vpop.f32.mrf.mxu1 }
 0xadb   : > { %v10315_v26 = vmul.f32 -1.442695, %v4481_v40  ;;  %v4482_v46 = vadd.f32 %v4436_v15, %v3977_v3 }
 0xadc   : > { %v4438_v31 = vpop.f32.mrf.mxu0  ;;  %v4478_v2 = vpop.f32.mrf.mxu1 }
 0xadd   : > { %12542 = vpow2.f32 %v10315_v26  ;;  %v10316_v30 = vmul.f32 -1.442695, %v4482_v46  ;;  %v4050_v31 = vadd.f32 %v14107_v35, %v14232_v53  ;;  %v3981_v35 = vadd.f32 %v14177_v48, %v14209_v49 }
 0xade   : > { %v4439_v12 = vpop.f32.mrf.mxu0  ;;  %v11310_v21 = vpop.f32.mrf.mxu1 }
 0xadf   : > { %12544 = vpow2.f32 %v10316_v30 }
 0xae0   : > { %12546 = vpow2.f32 %v10317_v43 }
 0xaea   : > { %v12543_v18 = vpop.eup %12542 }
 0xaeb   : > { %v4489_v62 = vadd.f32 1.0, %v12543_v18 }
 0xaec   : > { %v12545_v7 = vpop.eup %12544 }
 0xaed   : > { %12548 = vrcp.f32 %v4489_v62  ;;  %v12547_v40 = vpop.eup %12546  ;;  %v4490_v8 = vadd.f32 1.0, %v12545_v7 }
 0xaee   : > { %v4499_v27 = vadd.f32 1.0, %v12547_v40 }
 0xaef   : > { %12550 = vrcp.f32 %v4490_v8 }
 0xaf0   : > { %12552 = vrcp.f32 %v4499_v27 }
 0xafa   : > { %v12549_v26 = vpop.eup %12548 }
 0xafb   : > { %v4502_v2 = vmul.f32 %v12549_v26, %v4475_v57 }
 0xafc   : > { %v12551_v15 = vpop.eup %12550 }
 0xafd   : > { %v4503_v38 = vadd.f32 %v4502_v2, %v4050_v31  ;;  %v12553_v32 = vpop.eup %12552  ;;  %v4506_v3 = vsub.f32 1.0, %v12551_v15  ;;  %v4508_v46 = vmul.f32 %v12551_v15, %v14236_v45  ;;  %v3983_v31 = vadd.f32 %v14179_v37, %v14225_v23 }
 0xafe   : > { %v10320_v15 = vmul.f32 -1.442695, %v14116_v11 }
 0xaff   : > { %12554 = vtanh.f32 %v4503_v38 }
 0xb0c   : > { %v12555_v12 = vpop.eup %12554 }
 0xb0d   : > { %v4505_v21 = vmul.f32 %v12555_v12, %v12553_v32 }
 0xb0f   : > { %v4507_v6 = vmul.f32 %v4506_v3, %v4505_v21 }
 0xb11   : > { %v14285_v44 = vadd.f32 %v4508_v46, %v4507_v6 }
 0xb13   : > { %v4518_v30 = vpack.c.bf16 %v14285_v44, %v14285_v44 }
 0xb15   : > { %4552 = vmatmul.mubr.bf16.vlgmr.msra.gmra.mxu0 %v4518_v30  ;;  %11328 = vmatmul.mubr.bf16.vlgmr.msra.gmra.mxu1 %v4518_v30  ;;  %v4056_v30 = vadd.f32 %v14114_v54, %v14232_v53  ;;  %v3985_v54 = vadd.f32 %v14181_v20, %v14209_v49 }
 0xb16   : > { %4639 = vmatpush1.bf16.msra.mxu0 %v14008_v56  ;;  %11332 = vmatpush3.bf16.msra.mxu1 %v14052_v50 }
 0xb17   : > { %4640 = vmatprep.subr.bf16.mxu0 %v14012_v61  ;;  %11333 = vmatprep.subr.bf16.mxu1 %v15839_v42 }
 0xb18   : > { %4670 = vmatprep.mubr.bf16.mxu0 %v15838_v4  ;;  %11347 = vmatprep.mubr.msk.bf16.mxu1 %vm13170_vm0, %v15839_v42 }
 0xb1a   : > { %4641 = vmatpush1.bf16.msra.mxu0 %v14014_v29  ;;  %11334 = vmatpush3.bf16.msra.mxu1 %v14057_v58 }
 0xb1b   : > { %4642 = vmatprep.subr.bf16.mxu0 %v14018_v22  ;;  %11335 = vmatprep.subr.bf16.mxu1 %v15839_v42 }
 0xb1e   : > { %4643 = vmatpush1.bf16.msra.mxu0 %v14020_v60  ;;  %11336 = vmatpush3.bf16.msra.mxu1 %v14062_v41 }
 0xb1f   : > { %4644 = vmatprep.subr.bf16.mxu0 %v14024_v0  ;;  %11337 = vmatprep.subr.bf16.mxu1 %v15839_v42 }
 0xb22   : > { %4645 = vmatpush1.bf16.msra.mxu0 %v14026_v16  ;;  %11338 = vmatpush3.bf16.msra.mxu1 %v14066_v1 }
 0xb23   : > { %4646 = vmatprep.subr.bf16.mxu0 %v14030_v14  ;;  %11339 = vmatprep.subr.bf16.mxu1 %v15839_v42 }
 0xb26   : > { %4647 = vmatpush1.bf16.msra.mxu0 %v14032_v47  ;;  %11340 = vmatpush3.bf16.msra.mxu1 %v14070_v59 }
 0xb27   : > { %4648 = vmatprep.subr.bf16.mxu0 %v14036_v52  ;;  %11341 = vmatprep.subr.bf16.mxu1 %v15839_v42 }
 0xb2a   : > { %4649 = vmatpush1.bf16.msra.mxu0 %v14038_v55  ;;  %11342 = vmatpush3.bf16.msra.mxu1 %v14074_v25 }
 0xb2b   : > { %4650 = vmatprep.subr.bf16.mxu0 %v14042_v19  ;;  %11343 = vmatprep.subr.bf16.mxu1 %v15839_v42 }
 0xb2e   : > { %4651 = vmatpush1.bf16.msra.mxu0 %v14044_v36  ;;  %11344 = vmatpush3.bf16.msra.mxu1 %v14078_v63 }
 0xb2f   : > { %4652 = vmatprep.subr.bf16.mxu0 %v14048_v51  ;;  %11345 = vmatprep.subr.bf16.mxu1 %v15839_v42 }
 0xb32   : > { %4653 = vmatpush1.bf16.msra.mxu0 %v14050_v34  ;;  %11346 = vmatpush3.bf16.msra.mxu1 %v14082_v17 }
 0xb33   : > { %4757 = vmatprep.subr.bf16.mxu0 %v14006_v33  ;;  %11351 = vmatprep.subr.bf16.mxu1 %v15839_v42 }
 0xbd5   : > { %v4553_v45 = vpop.f32.mrf.mxu0  ;;  %v4594_v57 = vpop.f32.mrf.mxu1 }
 0xbd6   : > { %v4600_v43 = vadd.f32 %v4553_v45, %v3981_v35 }
 0xbd7   : > { %v4555_v18 = vpop.f32.mrf.mxu0  ;;  %v11329_v62 = vpop.f32.mrf.mxu1 }
 0xbd8   : > { %v10318_v7 = vmul.f32 -1.442695, %v4600_v43  ;;  %v4601_v2 = vadd.f32 %v4555_v18, %v3983_v31 }
 0xbd9   : > { %v4557_v40 = vpop.f32.mrf.mxu0  ;;  %v4597_v8 = vpop.f32.mrf.mxu1 }
 0xbda   : > { %12556 = vpow2.f32 %v10318_v7  ;;  %v10319_v38 = vmul.f32 -1.442695, %v4601_v2 }
 0xbdb   : > { %v4558_v26 = vpop.f32.mrf.mxu0  ;;  %v11330_v27 = vpop.f32.mrf.mxu1 }
 0xbdc   : > { %12558 = vpow2.f32 %v10319_v38 }
 0xbdd   : > { %12560 = vpow2.f32 %v10320_v15 }
 0xbe7   : > { %v12557_v48 = vpop.eup %12556 }
 0xbe8   : > { %v4608_v32 = vadd.f32 1.0, %v12557_v48 }
 0xbe9   : > { %v12559_v12 = vpop.eup %12558 }
 0xbea   : > { %12562 = vrcp.f32 %v4608_v32  ;;  %v12561_v21 = vpop.eup %12560  ;;  %v4609_v3 = vadd.f32 1.0, %v12559_v12 }
 0xbeb   : > { %v4618_v46 = vadd.f32 1.0, %v12561_v21  ;;  %v3987_v21 = vadd.f32 %v14184_v13, %v14225_v23 }
 0xbec   : > { %12564 = vrcp.f32 %v4609_v3 }
 0xbed   : > { %12566 = vrcp.f32 %v4618_v46 }
 0xbf7   : > { %v12563_v6 = vpop.eup %12562 }
 0xbf8   : > { %v4621_v35 = vmul.f32 %v12563_v6, %v4594_v57  ;;  %v10323_v6 = vmul.f32 -1.442695, %v14121_v39 }
 0xbf9   : > { %v12565_v37 = vpop.eup %12564 }
 0xbfa   : > { %v4622_v45 = vadd.f32 %v4621_v35, %v4056_v30  ;;  %v12567_v11 = vpop.eup %12566  ;;  %v4625_v62 = vsub.f32 1.0, %v12565_v37  ;;  %v4627_v40 = vmul.f32 %v12565_v37, %v14285_v44 }
 0xbfc   : > { %12568 = vtanh.f32 %v4622_v45 }
 0xc09   : > { %v12569_v43 = vpop.eup %12568 }
 0xc0a   : > { %v4624_v18 = vmul.f32 %v12569_v43, %v12567_v11  ;;  %v4060_v43 = vadd.f32 %v14119_v24, %v14232_v53 }
 0xc0c   : > { %v4626_v7 = vmul.f32 %v4625_v62, %v4624_v18 }
 0xc0e   : > { %v14332_v8 = vadd.f32 %v4627_v40, %v4626_v7 }
 0xc10   : > { %v4637_v26 = vpack.c.bf16 %v14332_v8, %v14332_v8 }
 0xc12   : > { %4671 = vmatmul.mubr.bf16.vlgmr.msra.gmra.mxu0 %v4637_v26  ;;  %11348 = vmatmul.mubr.bf16.vlgmr.msra.gmra.mxu1 %v4637_v26 }
 0xc13   : > { %4758 = vmatpush1.bf16.msra.mxu0 %v14008_v56  ;;  %11352 = vmatpush3.bf16.msra.mxu1 %v14052_v50 }
 0xc14   : > { %4759 = vmatprep.subr.bf16.mxu0 %v14012_v61  ;;  %11353 = vmatprep.subr.bf16.mxu1 %v15839_v42 }
 0xc15   : > { %4789 = vmatprep.mubr.bf16.mxu0 %v15838_v4  ;;  %11367 = vmatprep.mubr.msk.bf16.mxu1 %vm13170_vm0, %v15839_v42 }
 0xc17   : > { %4760 = vmatpush1.bf16.msra.mxu0 %v14014_v29  ;;  %11354 = vmatpush3.bf16.msra.mxu1 %v14057_v58 }
 0xc18   : > { %4761 = vmatprep.subr.bf16.mxu0 %v14018_v22  ;;  %11355 = vmatprep.subr.bf16.mxu1 %v15839_v42 }
 0xc1b   : > { %4762 = vmatpush1.bf16.msra.mxu0 %v14020_v60  ;;  %11356 = vmatpush3.bf16.msra.mxu1 %v14062_v41 }
 0xc1c   : > { %4763 = vmatprep.subr.bf16.mxu0 %v14024_v0  ;;  %11357 = vmatprep.subr.bf16.mxu1 %v15839_v42 }
 0xc1f   : > { %4764 = vmatpush1.bf16.msra.mxu0 %v14026_v16  ;;  %11358 = vmatpush3.bf16.msra.mxu1 %v14066_v1 }
 0xc20   : > { %4765 = vmatprep.subr.bf16.mxu0 %v14030_v14  ;;  %11359 = vmatprep.subr.bf16.mxu1 %v15839_v42 }
 0xc23   : > { %4766 = vmatpush1.bf16.msra.mxu0 %v14032_v47  ;;  %11360 = vmatpush3.bf16.msra.mxu1 %v14070_v59 }
 0xc24   : > { %4767 = vmatprep.subr.bf16.mxu0 %v14036_v52  ;;  %11361 = vmatprep.subr.bf16.mxu1 %v15839_v42 }
 0xc27   : > { %4768 = vmatpush1.bf16.msra.mxu0 %v14038_v55  ;;  %11362 = vmatpush3.bf16.msra.mxu1 %v14074_v25 }
 0xc28   : > { %4769 = vmatprep.subr.bf16.mxu0 %v14042_v19  ;;  %11363 = vmatprep.subr.bf16.mxu1 %v15839_v42 }
 0xc2b   : > { %4770 = vmatpush1.bf16.msra.mxu0 %v14044_v36  ;;  %11364 = vmatpush3.bf16.msra.mxu1 %v14078_v63 }
 0xc2c   : > { %4771 = vmatprep.subr.bf16.mxu0 %v14048_v51  ;;  %11365 = vmatprep.subr.bf16.mxu1 %v15839_v42 }
 0xc2f   : > { %4772 = vmatpush1.bf16.msra.mxu0 %v14050_v34  ;;  %11366 = vmatpush3.bf16.msra.mxu1 %v14082_v17 }
 0xc30   : > { %4876 = vmatprep.subr.bf16.mxu0 %v14006_v33  ;;  %11371 = vmatprep.subr.bf16.mxu1 %v15839_v42 }
 0xcd2   : > { %v4672_v44 = vpop.f32.mrf.mxu0  ;;  %v4713_v57 = vpop.f32.mrf.mxu1 }
 0xcd3   : > { %v4719_v27 = vadd.f32 %v4672_v44, %v3985_v54 }
 0xcd4   : > { %v4674_v31 = vpop.f32.mrf.mxu0  ;;  %v11349_v2 = vpop.f32.mrf.mxu1 }
 0xcd5   : > { %v10321_v38 = vmul.f32 -1.442695, %v4719_v27  ;;  %v4720_v33 = vadd.f32 %v4674_v31, %v3987_v21 }
 0xcd6   : > { %v4676_v15 = vpop.f32.mrf.mxu0  ;;  %v4716_v48 = vpop.f32.mrf.mxu1 }
 0xcd7   : > { %12570 = vpow2.f32 %v10321_v38  ;;  %v10322_v3 = vmul.f32 -1.442695, %v4720_v33 }
 0xcd8   : > { %v4677_v32 = vpop.f32.mrf.mxu0  ;;  %v11350_v12 = vpop.f32.mrf.mxu1 }
 0xcd9   : > { %12572 = vpow2.f32 %v10322_v3 }
 0xcda   : > { %12574 = vpow2.f32 %v10323_v6  ;;  %v14432_v6 = vld [vmem:[#allocation19 + $0xa8] ss:$12 sps:$4 sm:$0xff]  }
 0xce4   : > { %v12571_v20 = vpop.eup %12570 }
 0xce5   : > { %v4727_v46 = vadd.f32 1.0, %v12571_v20  ;;  %v14435_v20 = vld [vmem:[#allocation19 + $0xb0] ss:$12 sps:$4 sm:$0xff]  }
 0xce6   : > { %v12573_v30 = vpop.eup %12572 }
 0xce7   : > { %12576 = vrcp.f32 %v4727_v46  ;;  %v12575_v35 = vpop.eup %12574  ;;  %v4728_v45 = vadd.f32 1.0, %v12573_v30  ;;  %v14438_v46 = vld [vmem:[#allocation19 + $0x94] ss:$12 sps:$4 sm:$0xff]   ;;  %v14445_v30 = vld [vmem:[#allocation19 + $0x90] ss:$12 sps:$4 sm:$0xff]  }
 0xce8   : > { %v4737_v11 = vadd.f32 1.0, %v12575_v35  ;;  %v14448_v35 = vld [vmem:[#allocation19 + $0x98] ss:$12 sps:$4 sm:$0xff]  }
 0xce9   : > { %12578 = vrcp.f32 %v4728_v45  ;;  %v14451_v45 = vld [vmem:[#allocation19 + $0x7c] ss:$12 sps:$4 sm:$0xff]  }
 0xcea   : > { %12580 = vrcp.f32 %v4737_v11  ;;  %v14458_v11 = vld [vmem:[#allocation19 + $0x80] ss:$12 sps:$4 sm:$0xff]  }
 0xcf4   : > { %v12577_v37 = vpop.eup %12576 }
 0xcf5   : > { %v4740_v18 = vmul.f32 %v12577_v37, %v4713_v57  ;;  %v14455_v37 = vld [vmem:[#allocation19 + $0x78] ss:$12 sps:$4 sm:$0xff]  }
 0xcf6   : > { %v12579_v13 = vpop.eup %12578 }
 0xcf7   : > { %v4741_v62 = vadd.f32 %v4740_v18, %v4060_v43  ;;  %v12581_v39 = vpop.eup %12580  ;;  %v4744_v26 = vsub.f32 1.0, %v12579_v13  ;;  %v4746_v44 = vmul.f32 %v12579_v13, %v14332_v8  ;;  %v14461_v43 = vld [vmem:[#allocation19 + $0x64] ss:$12 sps:$4 sm:$0xff]   ;;  %v14465_v18 = vld [vmem:[#allocation19 + $0x60] ss:$12 sps:$4 sm:$0xff]  }
 0xcf8   : > { %v14471_v13 = vld [vmem:[#allocation19 + $0x4c] ss:$12 sps:$4 sm:$0xff]  }
 0xcf9   : > { %12582 = vtanh.f32 %v4741_v62  ;;  %v14468_v62 = vld [vmem:[#allocation19 + $0x68] ss:$12 sps:$4 sm:$0xff]  }
 0xd06   : > { %v12583_v7 = vpop.eup %12582 }
 0xd07   : > { %v4743_v40 = vmul.f32 %v12583_v7, %v12581_v39  ;;  %v14475_v39 = vld [vmem:[#allocation19 + $0x48] ss:$12 sps:$4 sm:$0xff]   ;;  %v14478_v7 = vld [vmem:[#allocation19 + $0x50] ss:$12 sps:$4 sm:$0xff]  }
 0xd09   : > { %v4745_v54 = vmul.f32 %v4744_v26, %v4743_v40  ;;  %v14481_v40 = vld [vmem:[#allocation19 + $0x34] ss:$12 sps:$4 sm:$0xff]   ;;  %v14485_v26 = vld [vmem:[#allocation19 + $0x30] ss:$12 sps:$4 sm:$0xff]  }
 0xd0b   : > { %v14379_v27 = vadd.f32 %v4746_v44, %v4745_v54  ;;  %v14488_v54 = vld [vmem:[#allocation19 + $0x38] ss:$12 sps:$4 sm:$0xff]   ;;  %v14491_v44 = vld [vmem:[#allocation19 + $0x1c] ss:$12 sps:$4 sm:$0xff]  }
 0xd0d   : > { %v4756_v31 = vpack.c.bf16 %v14379_v27, %v14379_v27 }
 0xd0f   : > { %4790 = vmatmul.mubr.bf16.vlgmr.msra.gmra.mxu0 %v4756_v31  ;;  %11368 = vmatmul.mubr.bf16.vlgmr.msra.gmra.mxu1 %v4756_v31  ;;  %v14498_v31 = vld [vmem:[#allocation19 + $0x20] ss:$12 sps:$4 sm:$0xff]  }
 0xd10   : > { %4877 = vmatpush1.bf16.msra.mxu0 %v14008_v56  ;;  %11372 = vmatpush3.bf16.msra.mxu1 %v14052_v50  ;;  %v14416_v56 = vld [vmem:[#allocation19 + $0xac] ss:$12 sps:$4 sm:$0xff]   ;;  %v15865_v50 = vld [vmem:[#allocation51_spill] sm:$0xff] }
 0xd11   : > { %4878 = vmatprep.subr.bf16.mxu0 %v14012_v61  ;;  %11373 = vmatprep.subr.bf16.mxu1 %v15839_v42  ;;  %v3991_v61 = vadd.f32 %v14186_v9, %v14209_v49  ;;  %v15866_v9 = vld [vmem:[#allocation35_spill] sm:$0xff] }
 0xd12   : > { %4908 = vmatprep.mubr.bf16.mxu0 %v15838_v4  ;;  %11387 = vmatprep.mubr.msk.bf16.mxu1 %vm13170_vm0, %v15839_v42  ;;  %v4066_v8 = vadd.f32 %v15866_v9, %v14232_v53 }
 0xd14   : > { %4879 = vmatpush1.bf16.msra.mxu0 %v14014_v29  ;;  %11374 = vmatpush3.bf16.msra.mxu1 %v14057_v58  ;;  %v10326_v58 = vmul.f32 -1.442695, %v15865_v50 }
 0xd15   : > { %4880 = vmatprep.subr.bf16.mxu0 %v14018_v22  ;;  %11375 = vmatprep.subr.bf16.mxu1 %v15839_v42 }
 0xd18   : > { %4881 = vmatpush1.bf16.msra.mxu0 %v14020_v60  ;;  %11376 = vmatpush3.bf16.msra.mxu1 %v14062_v41 }
 0xd19   : > { %4882 = vmatprep.subr.bf16.mxu0 %v14024_v0  ;;  %11377 = vmatprep.subr.bf16.mxu1 %v15839_v42 }
 0xd1c   : > { %4883 = vmatpush1.bf16.msra.mxu0 %v14026_v16  ;;  %11378 = vmatpush3.bf16.msra.mxu1 %v14066_v1 }
 0xd1d   : > { %4884 = vmatprep.subr.bf16.mxu0 %v14030_v14  ;;  %11379 = vmatprep.subr.bf16.mxu1 %v15839_v42 }
 0xd20   : > { %4885 = vmatpush1.bf16.msra.mxu0 %v14032_v47  ;;  %11380 = vmatpush3.bf16.msra.mxu1 %v14070_v59 }
 0xd21   : > { %4886 = vmatprep.subr.bf16.mxu0 %v14036_v52  ;;  %11381 = vmatprep.subr.bf16.mxu1 %v15839_v42 }
 0xd24   : > { %4887 = vmatpush1.bf16.msra.mxu0 %v14038_v55  ;;  %11382 = vmatpush3.bf16.msra.mxu1 %v14074_v25 }
 0xd25   : > { %4888 = vmatprep.subr.bf16.mxu0 %v14042_v19  ;;  %11383 = vmatprep.subr.bf16.mxu1 %v15839_v42 }
 0xd28   : > { %4889 = vmatpush1.bf16.msra.mxu0 %v14044_v36  ;;  %11384 = vmatpush3.bf16.msra.mxu1 %v14078_v63  ;;  %v3993_v36 = vadd.f32 %v14188_v5, %v14225_v23 }
 0xd29   : > { %4890 = vmatprep.subr.bf16.mxu0 %v14048_v51  ;;  %11385 = vmatprep.subr.bf16.mxu1 %v15839_v42 }
 0xd2c   : > { %4891 = vmatpush1.bf16.msra.mxu0 %v14050_v34  ;;  %11386 = vmatpush3.bf16.msra.mxu1 %v14082_v17 }
 0xd2d   : > { %4995 = vmatprep.subr.bf16.mxu0 %v14416_v56  ;;  %11391 = vmatprep.subr.bf16.mxu1 %v15839_v42 }
 0xdcf   : > { %v4791_v29 = vpop.f32.mrf.mxu0  ;;  %v4832_v22 = vpop.f32.mrf.mxu1 }
 0xdd0   : > { %v4838_v60 = vadd.f32 %v4791_v29, %v3991_v61  ;;  %v14501_v61 = vld [vmem:[#allocation19 + $0x4] ss:$12 sps:$4 sm:$0xff]   ;;  %v14505_v29 = vld [vmem:[#allocation19] ss:$12 sps:$4 sm:$0xff]  }
 0xdd1   : > { %v4793_v0 = vpop.f32.mrf.mxu0  ;;  %v11369_v16 = vpop.f32.mrf.mxu1 }
 0xdd2   : > { %v10324_v14 = vmul.f32 -1.442695, %v4838_v60  ;;  %v4839_v51 = vadd.f32 %v4793_v0, %v3993_v36  ;;  %v15867_v60 = vld [vmem:[#allocation37_spill] sm:$0xff] }
 0xdd3   : > { %v4795_v47 = vpop.f32.mrf.mxu0  ;;  %v4835_v52 = vpop.f32.mrf.mxu1  ;;  %v10001_v0 = vmul.f32 -1.442695, %v15867_v60 }
 0xdd4   : > { %12584 = vpow2.f32 %v10324_v14  ;;  %v10325_v34 = vmul.f32 -1.442695, %v4839_v51  ;;  %v15868_v47 = vld [vmem:[#allocation36_spill] sm:$0xff] }
 0xdd5   : > { %v4796_v55 = vpop.f32.mrf.mxu0  ;;  %v11370_v19 = vpop.f32.mrf.mxu1  ;;  %v3995_v52 = vadd.f32 %v15868_v47, %v14209_v49 }
 0xdd6   : > { %12586 = vpow2.f32 %v10325_v34 }
 0xdd7   : > { %12588 = vpow2.f32 %v10326_v58 }
 0xde1   : > { %v12585_v41 = vpop.eup %12584 }
 0xde2   : > { %v4846_v1 = vadd.f32 1.0, %v12585_v41 }
 0xde3   : > { %v12587_v59 = vpop.eup %12586 }
 0xde4   : > { %12590 = vrcp.f32 %v4846_v1  ;;  %v12589_v25 = vpop.eup %12588  ;;  %v4847_v63 = vadd.f32 1.0, %v12587_v59  ;;  %v15869_v1 = vld [vmem:[#allocation33_spill] sm:$0xff] }
 0xde5   : > { %v4856_v24 = vadd.f32 1.0, %v12589_v25  ;;  %v4068_v59 = vadd.f32 %v15869_v1, %v14111_v28 }
 0xde6   : > { %12592 = vrcp.f32 %v4847_v63 }
 0xde7   : > { %12594 = vrcp.f32 %v4856_v24 }
 0xdf1   : > { %v12591_v17 = vpop.eup %12590 }
 0xdf2   : > { %v4859_v57 = vmul.f32 %v12591_v17, %v4832_v22  ;;  %v14508_v22 = vld [vmem:[#allocation19 + $0x8] ss:$12 sps:$4 sm:$0xff]   ;;  %v15870_v17 = vld [vmem:[#allocation52_spill] sm:$0xff] }
 0xdf3   : > { %v12593_v5 = vpop.eup %12592  ;;  %v3997_v24 = vadd.f32 %v15870_v17, %v14225_v23 }
 0xdf4   : > { %v4860_v2 = vadd.f32 %v4859_v57, %v4066_v8  ;;  %v12595_v38 = vpop.eup %12594  ;;  %v4863_v32 = vsub.f32 1.0, %v12593_v5  ;;  %v4865_v21 = vmul.f32 %v12593_v5, %v14379_v27  ;;  %v14495_v27 = vld [vmem:[#allocation19 + $0x18] ss:$12 sps:$4 sm:$0xff]  }
 0xdf6   : > { %12596 = vtanh.f32 %v4860_v2 }
 0xdf7   : > { %12598 = vpow2.f32 %v10001_v0 }
 0xe03   : > { %v12597_v15 = vpop.eup %12596 }
 0xe04   : > { %v4862_v48 = vmul.f32 %v12597_v15, %v12595_v38  ;;  %v12599_v16 = vpop.eup %12598 }
 0xe05   : > { %v1010_v14 = vadd.f32 1.0, %v12599_v16 }
 0xe06   : > { %v4864_v12 = vmul.f32 %v4863_v32, %v4862_v48 }
 0xe07   : > { %12600 = vrcp.f32 %v1010_v14 }
 0xe08   : > { %v14428_v33 = vadd.f32 %v4865_v21, %v4864_v12 }
 0xe0a   : > { %v4875_v3 = vpack.c.bf16 %v14428_v33, %v14428_v33 }
 0xe0c   : > { %4909 = vmatmul.mubr.bf16.vlgmr.msra.gmra.mxu0 %v4875_v3  ;;  %11388 = vmatmul.mubr.bf16.vlgmr.msra.gmra.mxu1 %v4875_v3  ;;  %v15871_v3 = vld [vmem:[#allocation53_spill] sm:$0xff] }
 0xe0d   : > { %4996 = vmatpush1.bf16.msra.mxu0 %v14432_v6  ;;  %11392 = vmatpush3.bf16.msra.mxu1 %v14435_v20  ;;  %v4070_v60 = vadd.f32 %v15871_v3, %v14232_v53 }
 0xe0e   : > { %4997 = vmatprep.subr.bf16.mxu0 %v14438_v46  ;;  %11393 = vmatprep.subr.bf16.mxu1 %v15839_v42 }
 0xe0f   : > { %5027 = vmatprep.mubr.bf16.mxu0 %v15838_v4  ;;  %11407 = vmatprep.mubr.msk.bf16.mxu1 %vm13170_vm0, %v15839_v42 }
 0xe11   : > { %4998 = vmatpush1.bf16.msra.mxu0 %v14445_v30  ;;  %11394 = vmatpush3.bf16.msra.mxu1 %v14448_v35 }
 0xe12   : > { %4999 = vmatprep.subr.bf16.mxu0 %v14451_v45  ;;  %11395 = vmatprep.subr.bf16.mxu1 %v15839_v42 }
 0xe14   : > { %v12601_v9 = vpop.eup %12600 }
 0xe15   : > { %5000 = vmatpush1.bf16.msra.mxu0 %v14455_v37  ;;  %11396 = vmatpush3.bf16.msra.mxu1 %v14458_v11  ;;  %v4971_v57 = vadd.f32 %v12601_v9, %v4068_v59 }
 0xe16   : > { %5001 = vmatprep.subr.bf16.mxu0 %v14461_v43  ;;  %11397 = vmatprep.subr.bf16.mxu1 %v15839_v42 }
 0xe17   : > { %v10329_v5 = vmul.f32 -1.442695, %v4971_v57 }
 0xe19   : > { %5002 = vmatpush1.bf16.msra.mxu0 %v14465_v18  ;;  %11398 = vmatpush3.bf16.msra.mxu1 %v14468_v62 }
 0xe1a   : > { %5003 = vmatprep.subr.bf16.mxu0 %v14471_v13  ;;  %11399 = vmatprep.subr.bf16.mxu1 %v15839_v42 }
 0xe1d   : > { %5004 = vmatpush1.bf16.msra.mxu0 %v14475_v39  ;;  %11400 = vmatpush3.bf16.msra.mxu1 %v14478_v7 }
 0xe1e   : > { %5005 = vmatprep.subr.bf16.mxu0 %v14481_v40  ;;  %11401 = vmatprep.subr.bf16.mxu1 %v15839_v42 }
 0xe21   : > { %5006 = vmatpush1.bf16.msra.mxu0 %v14485_v26  ;;  %11402 = vmatpush3.bf16.msra.mxu1 %v14488_v54 }
 0xe22   : > { %5007 = vmatprep.subr.bf16.mxu0 %v14491_v44  ;;  %11403 = vmatprep.subr.bf16.mxu1 %v15839_v42 }
 0xe25   : > { %5008 = vmatpush1.bf16.msra.mxu0 %v14495_v27  ;;  %11404 = vmatpush3.bf16.msra.mxu1 %v14498_v31 }
 0xe26   : > { %5009 = vmatprep.subr.bf16.mxu0 %v14501_v61  ;;  %11405 = vmatprep.subr.bf16.mxu1 %v15839_v42 }
 0xe29   : > { %5010 = vmatpush1.bf16.msra.mxu0 %v14505_v29  ;;  %11406 = vmatpush3.bf16.msra.mxu1 %v14508_v22 }
 0xe2a   : > { %5114 = vmatprep.subr.bf16.mxu0 %v14416_v56  ;;  %11411 = vmatprep.subr.bf16.mxu1 %v15839_v42 }
 0xecc   : > { %v4910_v55 = vpop.f32.mrf.mxu0  ;;  %v4951_v19 = vpop.f32.mrf.mxu1 }
 0xecd   : > { %v4957_v36 = vadd.f32 %v4910_v55, %v3995_v52 }
 0xece   : > { %v4912_v51 = vpop.f32.mrf.mxu0  ;;  %v11389_v34 = vpop.f32.mrf.mxu1 }
 0xecf   : > { %v10327_v50 = vmul.f32 -1.442695, %v4957_v36  ;;  %v4958_v8 = vadd.f32 %v4912_v51, %v3997_v24 }
 0xed0   : > { %v4914_v58 = vpop.f32.mrf.mxu0  ;;  %v4954_v41 = vpop.f32.mrf.mxu1 }
 0xed1   : > { %12602 = vpow2.f32 %v10327_v50  ;;  %v10328_v2 = vmul.f32 -1.442695, %v4958_v8 }
 0xed2   : > { %v4915_v25 = vpop.f32.mrf.mxu0  ;;  %v11390_v63 = vpop.f32.mrf.mxu1 }
 0xed3   : > { %12604 = vpow2.f32 %v10328_v2  ;;  %v15873_v2 = vld [vmem:[#allocation55_spill] sm:$0xff] }
 0xed4   : > { %12606 = vpow2.f32 %v10329_v5  ;;  %v4003_v5 = vadd.f32 %v15873_v2, %v14225_v23  ;;  %v14594_v2 = vld [vmem:[#allocation13 + $0xa4] ss:$16 sps:$4 sm:$0xff]  }
 0xede   : > { %v12603_v38 = vpop.eup %12602 }
 0xedf   : > { %v4965_v15 = vadd.f32 1.0, %v12603_v38 }
 0xee0   : > { %v12605_v48 = vpop.eup %12604 }
 0xee1   : > { %12608 = vrcp.f32 %v4965_v15  ;;  %v12607_v32 = vpop.eup %12606  ;;  %v4966_v12 = vadd.f32 1.0, %v12605_v48  ;;  %v15874_v48 = vld [vmem:[#allocation57_spill] sm:$0xff] }
 0xee2   : > { %v4975_v28 = vadd.f32 1.0, %v12607_v32  ;;  %v10332_v32 = vmul.f32 -1.442695, %v15874_v48  ;;  %v14608_v48 = vld [vmem:[#allocation13 + $0x84] ss:$16 sps:$4 sm:$0xff]  }
 0xee3   : > { %12610 = vrcp.f32 %v4966_v12  ;;  %15878 = vst [vmem:[#allocation51_spill] sm:$0xff] %v14608_v48 }
 0xee4   : > { %12612 = vrcp.f32 %v4975_v28 }
 0xeee   : > { %v12609_v21 = vpop.eup %12608 }
 0xeef   : > { %v4978_v0 = vmul.f32 %v12609_v21, %v4951_v19 }
 0xef0   : > { %v12611_v14 = vpop.eup %12610 }
 0xef1   : > { %v4979_v16 = vadd.f32 %v4978_v0, %v4070_v60  ;;  %v12613_v47 = vpop.eup %12612  ;;  %v4982_v36 = vsub.f32 1.0, %v12611_v14  ;;  %v4984_v34 = vmul.f32 %v12611_v14, %v14428_v33  ;;  %v15872_v33 = vld [vmem:[#allocation54_spill] sm:$0xff]  ;;  %v15875_v14 = vld [vmem:[#allocation56_spill] sm:$0xff] }
 0xef2   : > { %v4001_v19 = vadd.f32 %v15872_v33, %v14209_v49 }
 0xef3   : > { %12614 = vtanh.f32 %v4979_v16 }
 0xf00   : > { %v12615_v52 = vpop.eup %12614 }
 0xf01   : > { %v4981_v55 = vmul.f32 %v12615_v52, %v12613_v47  ;;  %v4076_v47 = vadd.f32 %v15875_v14, %v14232_v53  ;;  %v14634_v14 = vld [vmem:[#allocation13 + $0x4c] ss:$16 sps:$4 sm:$0xff]  }
 0xf02   : > { %15887 = vst [vmem:[#allocation57_spill] sm:$0xff] %v14634_v14 }
 0xf03   : > { %v4983_v51 = vmul.f32 %v4982_v36, %v4981_v55 }
 0xf05   : > { %v14523_v50 = vadd.f32 %v4984_v34, %v4983_v51 }
 0xf07   : > { %v4994_v58 = vpack.c.bf16 %v14523_v50, %v14523_v50 }
 0xf09   : > { %5028 = vmatmul.mubr.bf16.vlgmr.msra.gmra.mxu0 %v4994_v58  ;;  %11408 = vmatmul.mubr.bf16.vlgmr.msra.gmra.mxu1 %v4994_v58 }
 0xf0a   : > { %5115 = vmatpush1.bf16.msra.mxu0 %v14432_v6  ;;  %11412 = vmatpush3.bf16.msra.mxu1 %v14435_v20 }
 0xf0b   : > { %5116 = vmatprep.subr.bf16.mxu0 %v14438_v46  ;;  %11413 = vmatprep.subr.bf16.mxu1 %v15839_v42 }
 0xf0c   : > { %5146 = vmatprep.mubr.bf16.mxu0 %v15838_v4  ;;  %11427 = vmatprep.mubr.msk.bf16.mxu1 %vm13170_vm0, %v15839_v42 }
 0xf0e   : > { %5117 = vmatpush1.bf16.msra.mxu0 %v14445_v30  ;;  %11414 = vmatpush3.bf16.msra.mxu1 %v14448_v35 }
 0xf0f   : > { %5118 = vmatprep.subr.bf16.mxu0 %v14451_v45  ;;  %11415 = vmatprep.subr.bf16.mxu1 %v15839_v42 }
 0xf12   : > { %5119 = vmatpush1.bf16.msra.mxu0 %v14455_v37  ;;  %11416 = vmatpush3.bf16.msra.mxu1 %v14458_v11 }
 0xf13   : > { %5120 = vmatprep.subr.bf16.mxu0 %v14461_v43  ;;  %11417 = vmatprep.subr.bf16.mxu1 %v15839_v42 }
 0xf16   : > { %5121 = vmatpush1.bf16.msra.mxu0 %v14465_v18  ;;  %11418 = vmatpush3.bf16.msra.mxu1 %v14468_v62 }
 0xf17   : > { %5122 = vmatprep.subr.bf16.mxu0 %v14471_v13  ;;  %11419 = vmatprep.subr.bf16.mxu1 %v15839_v42 }
 0xf1a   : > { %5123 = vmatpush1.bf16.msra.mxu0 %v14475_v39  ;;  %11420 = vmatpush3.bf16.msra.mxu1 %v14478_v7 }
 0xf1b   : > { %5124 = vmatprep.subr.bf16.mxu0 %v14481_v40  ;;  %11421 = vmatprep.subr.bf16.mxu1 %v15839_v42 }
 0xf1e   : > { %5125 = vmatpush1.bf16.msra.mxu0 %v14485_v26  ;;  %11422 = vmatpush3.bf16.msra.mxu1 %v14488_v54 }
 0xf1f   : > { %5126 = vmatprep.subr.bf16.mxu0 %v14491_v44  ;;  %11423 = vmatprep.subr.bf16.mxu1 %v15839_v42 }
 0xf22   : > { %5127 = vmatpush1.bf16.msra.mxu0 %v14495_v27  ;;  %11424 = vmatpush3.bf16.msra.mxu1 %v14498_v31 }
 0xf23   : > { %5128 = vmatprep.subr.bf16.mxu0 %v14501_v61  ;;  %11425 = vmatprep.subr.bf16.mxu1 %v15839_v42 }
 0xf26   : > { %5129 = vmatpush1.bf16.msra.mxu0 %v14505_v29  ;;  %11426 = vmatpush3.bf16.msra.mxu1 %v14508_v22 }
 0xfc9   : > { %v5029_v41 = vpop.f32.mrf.mxu0  ;;  %v5070_v1 = vpop.f32.mrf.mxu1 }
 0xfca   : > { %v5076_v59 = vadd.f32 %v5029_v41, %v4001_v19 }
 0xfcb   : > { %v5031_v25 = vpop.f32.mrf.mxu0  ;;  %v11409_v63 = vpop.f32.mrf.mxu1 }
 0xfcc   : > { %v10330_v17 = vmul.f32 -1.442695, %v5076_v59  ;;  %v5077_v38 = vadd.f32 %v5031_v25, %v4003_v5  ;;  %v14576_v63 = vld [vmem:[#allocation13 + $0xec] ss:$16 sps:$4 sm:$0xff]  }
 0xfcd   : > { %v5033_v24 = vpop.f32.mrf.mxu0  ;;  %v5073_v9 = vpop.f32.mrf.mxu1  ;;  %5484 = vmatprep.subr.bf16.mxu1 %v14576_v63  ;;  %v14597_v5 = vld [vmem:[#allocation13 + $0xac] ss:$16 sps:$4 sm:$0xff]  }
 0xfce   : > { %12616 = vpow2.f32 %v10330_v17  ;;  %v10331_v15 = vmul.f32 -1.442695, %v5077_v38  ;;  %v14578_v17 = vld [vmem:[#allocation13 + $0xe0] ss:$16 sps:$4 sm:$0xff]   ;;  %v14580_v24 = vld [vmem:[#allocation13 + $0xe8] ss:$16 sps:$4 sm:$0xff]  }
 0xfcf   : > { %v5034_v8 = vpop.f32.mrf.mxu0  ;;  %v11410_v57 = vpop.f32.mrf.mxu1  ;;  %v14588_v9 = vld [vmem:[#allocation13 + $0xc4] ss:$16 sps:$4 sm:$0xff]   ;;  %v14602_v38 = vld [vmem:[#allocation13 + $0xa0] ss:$16 sps:$4 sm:$0xff]  }
 0xfd0   : > { %12618 = vpow2.f32 %v10331_v15  ;;  %v14590_v8 = vld [vmem:[#allocation13 + $0xc8] ss:$16 sps:$4 sm:$0xff]   ;;  %v14592_v57 = vld [vmem:[#allocation13 + $0xcc] ss:$16 sps:$4 sm:$0xff]   ;;  %15876 = vst [vmem:[#allocation49_spill] sm:$0xff] %v14602_v38 }
 0xfd1   : > { %12620 = vpow2.f32 %v10332_v32  ;;  %v14604_v15 = vld [vmem:[#allocation13 + $0xa8] ss:$16 sps:$4 sm:$0xff]   ;;  %v14610_v32 = vld [vmem:[#allocation13 + $0x8c] ss:$16 sps:$4 sm:$0xff]  }
 0xfd2   : > { %15877 = vst [vmem:[#allocation34_spill] sm:$0xff] %v14604_v15  ;;  %15879 = vst [vmem:[#allocation35_spill] sm:$0xff] %v14610_v32 }
 0xfdb   : > { %v12617_v12 = vpop.eup %12616 }
 0xfdc   : > { %v5084_v21 = vadd.f32 1.0, %v12617_v12  ;;  %v14614_v12 = vld [vmem:[#allocation13 + $0x80] ss:$16 sps:$4 sm:$0xff]  }
 0xfdd   : > { %v12619_v28 = vpop.eup %12618  ;;  %15880 = vst [vmem:[#allocation37_spill] sm:$0xff] %v14614_v12 }
 0xfde   : > { %12622 = vrcp.f32 %v5084_v21  ;;  %v12621_v3 = vpop.eup %12620  ;;  %v5085_v60 = vadd.f32 1.0, %v12619_v28  ;;  %v14616_v21 = vld [vmem:[#allocation13 + $0x88] ss:$16 sps:$4 sm:$0xff]   ;;  %v14620_v28 = vld [vmem:[#allocation13 + $0x64] ss:$16 sps:$4 sm:$0xff]  }
 0xfdf   : > { %v5094_v16 = vadd.f32 1.0, %v12621_v3  ;;  %15881 = vst [vmem:[#allocation36_spill] sm:$0xff] %v14616_v21  ;;  %15882 = vst [vmem:[#allocation33_spill] sm:$0xff] %v14620_v28  ;;  %v14622_v3 = vld [vmem:[#allocation13 + $0x6c] ss:$16 sps:$4 sm:$0xff]  }
 0xfe0   : > { %12624 = vrcp.f32 %v5085_v60  ;;  %15883 = vst [vmem:[#allocation52_spill] sm:$0xff] %v14622_v3  ;;  %v14626_v60 = vld [vmem:[#allocation13 + $0x60] ss:$16 sps:$4 sm:$0xff]  }
 0xfe1   : > { %12626 = vrcp.f32 %v5094_v16  ;;  %15884 = vst [vmem:[#allocation53_spill] sm:$0xff] %v14626_v60  ;;  %v14632_v16 = vld [vmem:[#allocation13 + $0x44] ss:$16 sps:$4 sm:$0xff]  }
 0xfe2   : > { %15886 = vst [vmem:[#allocation55_spill] sm:$0xff] %v14632_v16 }
 0xfeb   : > { %v12623_v0 = vpop.eup %12622 }
 0xfec   : > { %v5097_v52 = vmul.f32 %v12623_v0, %v5070_v1  ;;  %v14574_v1 = vld [vmem:[#allocation13 + $0xe4] ss:$16 sps:$4 sm:$0xff]   ;;  %v14628_v0 = vld [vmem:[#allocation13 + $0x68] ss:$16 sps:$4 sm:$0xff]  }
 0xfed   : > { %v12625_v36 = vpop.eup %12624  ;;  %5443 = vmatprep.subr.bf16.mxu0 %v14574_v1  ;;  %15885 = vst [vmem:[#allocation54_spill] sm:$0xff] %v14628_v0 }
 0xfee   : > { %v5098_v55 = vadd.f32 %v5097_v52, %v4076_v47  ;;  %v12627_v51 = vpop.eup %12626  ;;  %v5101_v33 = vsub.f32 1.0, %v12625_v36  ;;  %v5103_v41 = vmul.f32 %v12625_v36, %v14523_v50  ;;  %v14586_v50 = vld [vmem:[#allocation13 + $0xc0] ss:$16 sps:$4 sm:$0xff]   ;;  %v14640_v52 = vld [vmem:[#allocation13 + $0x48] ss:$16 sps:$4 sm:$0xff]  }
 0xfef   : > { %v14638_v47 = vld [vmem:[#allocation13 + $0x40] ss:$16 sps:$4 sm:$0xff]   ;;  %15889 = vst [vmem:[#allocation62_spill] sm:$0xff] %v14640_v52  ;;  %v14646_v36 = vld [vmem:[#allocation13 + $0x2c] ss:$16 sps:$4 sm:$0xff]  }
 0xff0   : > { %12628 = vtanh.f32 %v5098_v55  ;;  %15888 = vst [vmem:[#allocation56_spill] sm:$0xff] %v14638_v47  ;;  %v14644_v55 = vld [vmem:[#allocation13 + $0x24] ss:$16 sps:$4 sm:$0xff]   ;;  %15891 = vst [vmem:[#allocation64_spill] sm:$0xff] %v14646_v36 }
 0xff1   : > { %15890 = vst [vmem:[#allocation63_spill] sm:$0xff] %v14644_v55 }
 0xffd   : > { %v12629_v34 = vpop.eup %12628 }
 0xffe   : > { %v5100_v58 = vmul.f32 %v12629_v34, %v12627_v51  ;;  %v14650_v51 = vld [vmem:[#allocation13 + $0x20] ss:$16 sps:$4 sm:$0xff]   ;;  %v14652_v34 = vld [vmem:[#allocation13 + $0x28] ss:$16 sps:$4 sm:$0xff]  }
 0xfff   : > { %15892 = vst [vmem:[#allocation65_spill] sm:$0xff] %v14650_v51  ;;  %15893 = vst [vmem:[#allocation66_spill] sm:$0xff] %v14652_v34 }
0x1000   : > { %v5102_v19 = vmul.f32 %v5101_v33, %v5100_v58  ;;  %v14656_v58 = vld [vmem:[#allocation13 + $0x4] ss:$16 sps:$4 sm:$0xff]   ;;  %v14658_v33 = vld [vmem:[#allocation13 + $0xc] ss:$16 sps:$4 sm:$0xff]  }
0x1001   : > { %15894 = vst [vmem:[#allocation67_spill] sm:$0xff] %v14656_v58  ;;  %15895 = vst [vmem:[#allocation68_spill] sm:$0xff] %v14658_v33 }
0x1002   : > { %v14568_v59 = vadd.f32 %v5103_v41, %v5102_v19  ;;  %v14662_v19 = vld [vmem:[#allocation13] ss:$16 sps:$4 sm:$0xff]   ;;  %v14664_v41 = vld [vmem:[#allocation13 + $0x8] ss:$16 sps:$4 sm:$0xff]  }
0x1003   : > { %15896 = vst [vmem:[#allocation69_spill] sm:$0xff] %v14662_v19  ;;  %15897 = vst [vmem:[#allocation70_spill] sm:$0xff] %v14664_v41 }
0x1004   : > { %v5113_v25 = vpack.c.bf16 %v14568_v59, %v14568_v59 }
0x1006   : > { %5147 = vmatmul.mubr.bf16.vlgmr.msra.gmra.mxu0 %v5113_v25  ;;  %11428 = vmatmul.mubr.bf16.vlgmr.msra.gmra.mxu1 %v5113_v25  ;;  %v14668_v25 = vld [vmem:[#allocation14 + $0xac] ss:$12 sps:$4 sm:$0xff]  }
0x1007   : > { %5475 = vmatprep.mubr.bf16.mxu0 %v15838_v4  ;;  %5516 = vmatprep.mubr.bf16.mxu1 %v15838_v4  ;;  %15898 = vst [vmem:[#allocation71_spill] sm:$0xff] %v14668_v25 }
0x1008   : > { %5444 = vmatpush1.bf16.msra.mxu0 %v14578_v17  ;;  %5485 = vmatpush1.bf16.msra.mxu1 %v14580_v24 }
0x1009   : > { %5445 = vmatprep.subr.bf16.mxu0 %v14588_v9  ;;  %5486 = vmatprep.subr.bf16.mxu1 %v14592_v57 }
0x100c   : > { %5446 = vmatpush1.bf16.msra.mxu0 %v14586_v50  ;;  %5487 = vmatpush1.bf16.msra.mxu1 %v14590_v8 }
0x100d   : > { %5447 = vmatprep.subr.bf16.mxu0 %v14594_v2  ;;  %5488 = vmatprep.subr.bf16.mxu1 %v14597_v5 }
0x1010   : > { %5448 = vmatpush1.bf16.msra.mxu0 %v14602_v38  ;;  %5489 = vmatpush1.bf16.msra.mxu1 %v14604_v15 }
0x1011   : > { %5449 = vmatprep.subr.bf16.mxu0 %v14608_v48  ;;  %5490 = vmatprep.subr.bf16.mxu1 %v14610_v32 }
0x1014   : > { %5450 = vmatpush1.bf16.msra.mxu0 %v14614_v12  ;;  %5491 = vmatpush1.bf16.msra.mxu1 %v14616_v21 }
0x1015   : > { %5451 = vmatprep.subr.bf16.mxu0 %v14620_v28  ;;  %5492 = vmatprep.subr.bf16.mxu1 %v14622_v3  ;;  %v15901_v28 = vld [vmem:[#allocation61_spill] sm:$0xff] }
0x1016   : > { %v10335_v21 = vmul.f32 -1.442695, %v15901_v28 }
0x1018   : > { %5452 = vmatpush1.bf16.msra.mxu0 %v14626_v60  ;;  %5493 = vmatpush1.bf16.msra.mxu1 %v14628_v0 }
0x1019   : > { %5453 = vmatprep.subr.bf16.mxu0 %v14632_v16  ;;  %5494 = vmatprep.subr.bf16.mxu1 %v14634_v14 }
0x101c   : > { %5454 = vmatpush1.bf16.msra.mxu0 %v14638_v47  ;;  %5495 = vmatpush1.bf16.msra.mxu1 %v14640_v52 }
0x101d   : > { %5455 = vmatprep.subr.bf16.mxu0 %v14644_v55  ;;  %5496 = vmatprep.subr.bf16.mxu1 %v14646_v36 }
0x1020   : > { %5456 = vmatpush1.bf16.msra.mxu0 %v14650_v51  ;;  %5497 = vmatpush1.bf16.msra.mxu1 %v14652_v34  ;;  %v15899_v34 = vld [vmem:[#allocation58_spill] sm:$0xff] }
0x1021   : > { %5457 = vmatprep.subr.bf16.mxu0 %v14656_v58  ;;  %5498 = vmatprep.subr.bf16.mxu1 %v14658_v33  ;;  %v4005_v51 = vadd.f32 %v15899_v34, %v14209_v49 }
0x1024   : > { %5458 = vmatpush1.bf16.msra.mxu0 %v14662_v19  ;;  %5499 = vmatpush1.bf16.msra.mxu1 %v14664_v41  ;;  %v15900_v41 = vld [vmem:[#allocation59_spill] sm:$0xff] }
0x1025   : > { %5686 = vmatprep.subr.bf16.mxu0 %v14668_v25  ;;  %11431 = vmatprep.subr.bf16.mxu1 %v15839_v42  ;;  %v4007_v60 = vadd.f32 %v15900_v41, %v14225_v23 }
0x10c6   : > { %v5148_v36 = vpop.f32.mrf.mxu0  ;;  %v5189_v55 = vpop.f32.mrf.mxu1 }
0x10c7   : > { %v5195_v52 = vadd.f32 %v5148_v36, %v4005_v51 }
0x10c8   : > { %v5150_v47 = vpop.f32.mrf.mxu0  ;;  %v11429_v58 = vpop.f32.mrf.mxu1 }
0x10c9   : > { %v10333_v14 = vmul.f32 -1.442695, %v5195_v52  ;;  %v5196_v25 = vadd.f32 %v5150_v47, %v4007_v60 }
0x10ca   : > { %v5152_v33 = vpop.f32.mrf.mxu0  ;;  %v5192_v16 = vpop.f32.mrf.mxu1 }
0x10cb   : > { %12630 = vpow2.f32 %v10333_v14  ;;  %v10334_v3 = vmul.f32 -1.442695, %v5196_v25 }
0x10cc   : > { %v5153_v0 = vpop.f32.mrf.mxu0  ;;  %v11430_v19 = vpop.f32.mrf.mxu1 }
0x10cd   : > { %12632 = vpow2.f32 %v10334_v3  ;;  %v15902_v0 = vld [vmem:[#allocation60_spill] sm:$0xff] }
0x10ce   : > { %12634 = vpow2.f32 %v10335_v21  ;;  %v4080_v14 = vadd.f32 %v15902_v0, %v14232_v53  ;;  %v14712_v0 = vld [vmem:[#allocation14 + $0x60] ss:$12 sps:$4 sm:$0xff]  }
0x10cf   : > { %15910 = vst [vmem:[#allocation75_spill] sm:$0xff] %v14712_v0 }
0x10d8   : > { %v12631_v49 = vpop.eup %12630 }
0x10d9   : > { %v5203_v34 = vadd.f32 1.0, %v12631_v49  ;;  %v14684_v49 = vld [vmem:[#allocation14 + $0xa8] ss:$12 sps:$4 sm:$0xff]  }
0x10da   : > { %v12633_v36 = vpop.eup %12632  ;;  %15904 = vst [vmem:[#allocation59_spill] sm:$0xff] %v14684_v49 }
0x10db   : > { %12636 = vrcp.f32 %v5203_v34  ;;  %v12635_v51 = vpop.eup %12634  ;;  %v5204_v52 = vadd.f32 1.0, %v12633_v36  ;;  %v12055_v34 = vld [vmem:[#allocation14 + $0xb0] ss:$12 sps:$4 sm:$0xff]  }
0x10dc   : > { %v5213_v16 = vadd.f32 1.0, %v12635_v51  ;;  %v14695_v36 = vld [vmem:[#allocation14 + $0x90] ss:$12 sps:$4 sm:$0xff]  }
0x10dd   : > { %12638 = vrcp.f32 %v5204_v52  ;;  %15906 = vst [vmem:[#allocation60_spill] sm:$0xff] %v14695_v36  ;;  %v14699_v51 = vld [vmem:[#allocation14 + $0x7c] ss:$12 sps:$4 sm:$0xff]   ;;  %v14705_v52 = vld [vmem:[#allocation14 + $0x78] ss:$12 sps:$4 sm:$0xff]  }
0x10de   : > { %12640 = vrcp.f32 %v5213_v16  ;;  %15907 = vst [vmem:[#allocation72_spill] sm:$0xff] %v14699_v51  ;;  %15908 = vst [vmem:[#allocation73_spill] sm:$0xff] %v14705_v52  ;;  %v14709_v16 = vld [vmem:[#allocation14 + $0x64] ss:$12 sps:$4 sm:$0xff]  }
0x10df   : > { %15909 = vst [vmem:[#allocation74_spill] sm:$0xff] %v14709_v16 }
0x10e8   : > { %v12637_v58 = vpop.eup %12636 }
0x10e9   : > { %v5216_v33 = vmul.f32 %v12637_v58, %v5189_v55  ;;  %v14690_v55 = vld [vmem:[#allocation14 + $0x94] ss:$12 sps:$4 sm:$0xff]  }
0x10ea   : > { %v12639_v23 = vpop.eup %12638  ;;  %15905 = vst [vmem:[#allocation61_spill] sm:$0xff] %v14690_v55  ;;  %v12063_v58 = vld [vmem:[#allocation14 + $0x80] ss:$12 sps:$4 sm:$0xff]  }
0x10eb   : > { %v5217_v19 = vadd.f32 %v5216_v33, %v4080_v14  ;;  %v12641_v28 = vpop.eup %12640  ;;  %v5220_v21 = vsub.f32 1.0, %v12639_v23  ;;  %v5222_v41 = vmul.f32 %v12639_v23, %v14568_v59  ;;  %v12059_v59 = vld [vmem:[#allocation14 + $0x98] ss:$12 sps:$4 sm:$0xff]   ;;  %v12067_v14 = vld [vmem:[#allocation14 + $0x68] ss:$12 sps:$4 sm:$0xff]  }
0x10ec   : > { %v14716_v33 = vld [vmem:[#allocation14 + $0x4c] ss:$12 sps:$4 sm:$0xff]   ;;  %v12071_v23 = vld [vmem:[#allocation14 + $0x50] ss:$12 sps:$4 sm:$0xff]  }
0x10ed   : > { %12642 = vtanh.f32 %v5217_v19  ;;  %15911 = vst [vmem:[#allocation76_spill] sm:$0xff] %v14716_v33  ;;  %v14719_v19 = vld [vmem:[#allocation14 + $0x48] ss:$12 sps:$4 sm:$0xff]  }
0x10ee   : > { %15912 = vst [vmem:[#allocation77_spill] sm:$0xff] %v14719_v19 }
0x10fa   : > { %v12643_v3 = vpop.eup %12642 }
0x10fb   : > { %v5219_v60 = vmul.f32 %v12643_v3, %v12641_v28  ;;  %v14723_v28 = vld [vmem:[#allocation14 + $0x34] ss:$12 sps:$4 sm:$0xff]   ;;  %v14726_v3 = vld [vmem:[#allocation14 + $0x30] ss:$12 sps:$4 sm:$0xff]  }
0x10fc   : > { %15913 = vst [vmem:[#allocation78_spill] sm:$0xff] %v14723_v28  ;;  %15914 = vst [vmem:[#allocation79_spill] sm:$0xff] %v14726_v3 }
0x10fd   : > { %v5221_v47 = vmul.f32 %v5220_v21, %v5219_v60  ;;  %v12075_v60 = vld [vmem:[#allocation14 + $0x38] ss:$12 sps:$4 sm:$0xff]   ;;  %v14730_v21 = vld [vmem:[#allocation14 + $0x1c] ss:$12 sps:$4 sm:$0xff]  }
0x10fe   : > { %15915 = vst [vmem:[#allocation80_spill] sm:$0xff] %v14730_v21 }
0x10ff   : > { %v14682_v25 = vadd.f32 %v5222_v41, %v5221_v47  ;;  %v14733_v47 = vld [vmem:[#allocation14 + $0x18] ss:$12 sps:$4 sm:$0xff]   ;;  %v12079_v41 = vld [vmem:[#allocation14 + $0x20] ss:$12 sps:$4 sm:$0xff]  }
0x1100   : > { %15916 = vst [vmem:[#allocation81_spill] sm:$0xff] %v14733_v47 }
0x1101   : > { %15903 = vst [vmem:[#allocation58_spill] sm:$0xff] %v14682_v25  ;;  %v14688_v53 = vpack.c.bf16 %v14682_v25, %v14682_v25 }
0x1103   : > { %5476 = vmatmul.mubr.bf16.vlgmr.msra.gmra.mxu0 %v14688_v53  ;;  %5517 = vmatmul.mubr.bf16.vlgmr.msra.gmra.mxu1 %v14688_v53 }
0x1104   : > { %5687 = vmatpush1.bf16.msra.mxu0 %v14684_v49  ;;  %11432 = vmatpush3.bf16.msra.mxu1 %v12055_v34  ;;  %v14737_v34 = vld [vmem:[#allocation14 + $0x4] ss:$12 sps:$4 sm:$0xff]  }
0x1105   : > { %5688 = vmatprep.subr.bf16.mxu0 %v14690_v55  ;;  %11433 = vmatprep.subr.bf16.mxu1 %v15839_v42  ;;  %15917 = vst [vmem:[#allocation82_spill] sm:$0xff] %v14737_v34  ;;  %v15954_v49 = vld [vmem:[#allocation47_spill] sm:$0xff] }
0x1106   : > { %5718 = vmatprep.mubr.bf16.mxu0 %v15838_v4  ;;  %11447 = vmatprep.mubr.msk.bf16.mxu1 %vm13170_vm0, %v15839_v42 }
0x1108   : > { %5689 = vmatpush1.bf16.msra.mxu0 %v14695_v36  ;;  %11434 = vmatpush3.bf16.msra.mxu1 %v12059_v59  ;;  %v14740_v59 = vld [vmem:[#allocation14] ss:$12 sps:$4 sm:$0xff]  }
0x1109   : > { %5690 = vmatprep.subr.bf16.mxu0 %v14699_v51  ;;  %11435 = vmatprep.subr.bf16.mxu1 %v15839_v42  ;;  %15918 = vst [vmem:[#allocation83_spill] sm:$0xff] %v14740_v59 }
0x110c   : > { %5691 = vmatpush1.bf16.msra.mxu0 %v14705_v52  ;;  %11436 = vmatpush3.bf16.msra.mxu1 %v12063_v58  ;;  %v12083_v58 = vld [vmem:[#allocation14 + $0x8] ss:$12 sps:$4 sm:$0xff]  }
0x110d   : > { %5692 = vmatprep.subr.bf16.mxu0 %v14709_v16  ;;  %11437 = vmatprep.subr.bf16.mxu1 %v15839_v42 }
0x1110   : > { %5693 = vmatpush1.bf16.msra.mxu0 %v14712_v0  ;;  %11438 = vmatpush3.bf16.msra.mxu1 %v12067_v14  ;;  %v15919_v14 = vld [vmem:[#allocation50_spill] sm:$0xff] }
0x1111   : > { %5694 = vmatprep.subr.bf16.mxu0 %v14716_v33  ;;  %11439 = vmatprep.subr.bf16.mxu1 %v15839_v42 }
0x1114   : > { %5695 = vmatpush1.bf16.msra.mxu0 %v14719_v19  ;;  %11440 = vmatpush3.bf16.msra.mxu1 %v12071_v23  ;;  %v5525_v23 = vpack.c.bf16 %v15919_v14, %v15919_v14 }
0x1115   : > { %5696 = vmatprep.subr.bf16.mxu0 %v14723_v28  ;;  %11441 = vmatprep.subr.bf16.mxu1 %v15839_v42  ;;  %v14820_v28 = vld [vmem:[#allocation17 + $0x2c] ss:$16 sps:$4 sm:$0xff]  }
0x1116   : > { %15945 = vst [vmem:[#allocation108_spill] sm:$0xff] %v14820_v28 }
0x1118   : > { %5697 = vmatpush1.bf16.msra.mxu0 %v14726_v3  ;;  %11442 = vmatpush3.bf16.msra.mxu1 %v12075_v60  ;;  %v14749_v60 = vld [vmem:[#allocation17 + $0xe4] ss:$16 sps:$4 sm:$0xff]  }
0x1119   : > { %5698 = vmatprep.subr.bf16.mxu0 %v14730_v21  ;;  %11443 = vmatprep.subr.bf16.mxu1 %v15839_v42  ;;  %15920 = vst [vmem:[#allocation50_spill] sm:$0xff] %v14749_v60  ;;  %v14767_v21 = vld [vmem:[#allocation17 + $0xc8] ss:$16 sps:$4 sm:$0xff]   ;;  %v14807_v3 = vld [vmem:[#allocation17 + $0x44] ss:$16 sps:$4 sm:$0xff]  }
0x111a   : > { %15927 = vst [vmem:[#allocation90_spill] sm:$0xff] %v14767_v21  ;;  %15940 = vst [vmem:[#allocation103_spill] sm:$0xff] %v14807_v3 }
0x111c   : > { %5699 = vmatpush1.bf16.msra.mxu0 %v14733_v47  ;;  %11444 = vmatpush3.bf16.msra.mxu1 %v12079_v41  ;;  %v14751_v41 = vld [vmem:[#allocation17 + $0xec] ss:$16 sps:$4 sm:$0xff]   ;;  %v14753_v47 = vld [vmem:[#allocation17 + $0xe0] ss:$16 sps:$4 sm:$0xff]  }
0x111d   : > { %5700 = vmatprep.subr.bf16.mxu0 %v14737_v34  ;;  %11445 = vmatprep.subr.bf16.mxu1 %v15839_v42  ;;  %15921 = vst [vmem:[#allocation84_spill] sm:$0xff] %v14751_v41  ;;  %15922 = vst [vmem:[#allocation85_spill] sm:$0xff] %v14753_v47  ;;  %v14755_v34 = vld [vmem:[#allocation17 + $0xe8] ss:$16 sps:$4 sm:$0xff]  }
0x111e   : > { %15923 = vst [vmem:[#allocation86_spill] sm:$0xff] %v14755_v34 }
0x1120   : > { %5701 = vmatpush1.bf16.msra.mxu0 %v14740_v59  ;;  %11446 = vmatpush3.bf16.msra.mxu1 %v12083_v58  ;;  %v14761_v58 = vld [vmem:[#allocation17 + $0xc4] ss:$16 sps:$4 sm:$0xff]   ;;  %v14765_v59 = vld [vmem:[#allocation17 + $0xc0] ss:$16 sps:$4 sm:$0xff]  }
0x1121   : > { %6011 = vmatprep.subr.bf16.mxu0 %v14749_v60  ;;  %6052 = vmatprep.subr.bf16.mxu1 %v14751_v41  ;;  %15924 = vst [vmem:[#allocation87_spill] sm:$0xff] %v14761_v58  ;;  %15926 = vst [vmem:[#allocation89_spill] sm:$0xff] %v14765_v59  ;;  %v14773_v41 = vld [vmem:[#allocation17 + $0xa4] ss:$16 sps:$4 sm:$0xff]   ;;  %v14779_v60 = vld [vmem:[#allocation17 + $0xa8] ss:$16 sps:$4 sm:$0xff]  }
0x1122   : > { %15928 = vst [vmem:[#allocation91_spill] sm:$0xff] %v14773_v41  ;;  %15931 = vst [vmem:[#allocation94_spill] sm:$0xff] %v14779_v60 }
0x1123   : > { %5719 = vmatmul.mubr.bf16.vlgmr.msra.gmra.mxu0 %v5525_v23  ;;  %11448 = vmatmul.mubr.bf16.vlgmr.msra.gmra.mxu1 %v5525_v23  ;;  %v14763_v23 = vld [vmem:[#allocation17 + $0xcc] ss:$16 sps:$4 sm:$0xff]  }
0x1124   : > { %6043 = vmatprep.mubr.bf16.mxu0 %v15838_v4  ;;  %6084 = vmatprep.mubr.bf16.mxu1 %v15838_v4  ;;  %15925 = vst [vmem:[#allocation88_spill] sm:$0xff] %v14763_v23 }
0x1125   : > { %6012 = vmatpush1.bf16.msra.mxu0 %v14753_v47  ;;  %6053 = vmatpush1.bf16.msra.mxu1 %v14755_v34  ;;  %v14775_v47 = vld [vmem:[#allocation17 + $0xac] ss:$16 sps:$4 sm:$0xff]   ;;  %v14777_v34 = vld [vmem:[#allocation17 + $0xa0] ss:$16 sps:$4 sm:$0xff]  }
0x1126   : > { %6013 = vmatprep.subr.bf16.mxu0 %v14761_v58  ;;  %6054 = vmatprep.subr.bf16.mxu1 %v14763_v23  ;;  %15929 = vst [vmem:[#allocation92_spill] sm:$0xff] %v14775_v47  ;;  %15930 = vst [vmem:[#allocation93_spill] sm:$0xff] %v14777_v34  ;;  %v14785_v23 = vld [vmem:[#allocation17 + $0x84] ss:$16 sps:$4 sm:$0xff]   ;;  %v14791_v58 = vld [vmem:[#allocation17 + $0x88] ss:$16 sps:$4 sm:$0xff]  }
0x1127   : > { %15932 = vst [vmem:[#allocation95_spill] sm:$0xff] %v14785_v23  ;;  %15935 = vst [vmem:[#allocation98_spill] sm:$0xff] %v14791_v58 }
0x1129   : > { %6014 = vmatpush1.bf16.msra.mxu0 %v14765_v59  ;;  %6055 = vmatpush1.bf16.msra.mxu1 %v14767_v21  ;;  %v14787_v59 = vld [vmem:[#allocation17 + $0x8c] ss:$16 sps:$4 sm:$0xff]   ;;  %v14789_v21 = vld [vmem:[#allocation17 + $0x80] ss:$16 sps:$4 sm:$0xff]  }
0x112a   : > { %6015 = vmatprep.subr.bf16.mxu0 %v14773_v41  ;;  %6056 = vmatprep.subr.bf16.mxu1 %v14775_v47  ;;  %15933 = vst [vmem:[#allocation96_spill] sm:$0xff] %v14787_v59  ;;  %15934 = vst [vmem:[#allocation97_spill] sm:$0xff] %v14789_v21  ;;  %v14797_v47 = vld [vmem:[#allocation17 + $0x64] ss:$16 sps:$4 sm:$0xff]   ;;  %v14803_v41 = vld [vmem:[#allocation17 + $0x68] ss:$16 sps:$4 sm:$0xff]  }
0x112b   : > { %15936 = vst [vmem:[#allocation99_spill] sm:$0xff] %v14797_v47  ;;  %15939 = vst [vmem:[#allocation102_spill] sm:$0xff] %v14803_v41 }
0x112d   : > { %6016 = vmatpush1.bf16.msra.mxu0 %v14777_v34  ;;  %6057 = vmatpush1.bf16.msra.mxu1 %v14779_v60  ;;  %v14799_v34 = vld [vmem:[#allocation17 + $0x6c] ss:$16 sps:$4 sm:$0xff]   ;;  %v14801_v60 = vld [vmem:[#allocation17 + $0x60] ss:$16 sps:$4 sm:$0xff]  }
0x112e   : > { %6017 = vmatprep.subr.bf16.mxu0 %v14785_v23  ;;  %6058 = vmatprep.subr.bf16.mxu1 %v14787_v59  ;;  %15937 = vst [vmem:[#allocation100_spill] sm:$0xff] %v14799_v34  ;;  %15938 = vst [vmem:[#allocation101_spill] sm:$0xff] %v14801_v60  ;;  %v14815_v59 = vld [vmem:[#allocation17 + $0x4c] ss:$16 sps:$4 sm:$0xff]   ;;  %v14818_v23 = vld [vmem:[#allocation17 + $0x24] ss:$16 sps:$4 sm:$0xff]  }
0x112f   : > { %15943 = vst [vmem:[#allocation106_spill] sm:$0xff] %v14815_v59  ;;  %15944 = vst [vmem:[#allocation107_spill] sm:$0xff] %v14818_v23 }
0x1131   : > { %6018 = vmatpush1.bf16.msra.mxu0 %v14789_v21  ;;  %6059 = vmatpush1.bf16.msra.mxu1 %v14791_v58  ;;  %v14811_v21 = vld [vmem:[#allocation17 + $0x40] ss:$16 sps:$4 sm:$0xff]   ;;  %v14813_v58 = vld [vmem:[#allocation17 + $0x48] ss:$16 sps:$4 sm:$0xff]  }
0x1132   : > { %6019 = vmatprep.subr.bf16.mxu0 %v14797_v47  ;;  %6060 = vmatprep.subr.bf16.mxu1 %v14799_v34  ;;  %15941 = vst [vmem:[#allocation104_spill] sm:$0xff] %v14811_v21  ;;  %15942 = vst [vmem:[#allocation105_spill] sm:$0xff] %v14813_v58  ;;  %v14831_v34 = vld [vmem:[#allocation17 + $0x4] ss:$16 sps:$4 sm:$0xff]  }
0x1133   : > { %15948 = vst [vmem:[#allocation111_spill] sm:$0xff] %v14831_v34 }
0x1135   : > { %6020 = vmatpush1.bf16.msra.mxu0 %v14801_v60  ;;  %6061 = vmatpush1.bf16.msra.mxu1 %v14803_v41  ;;  %v14825_v60 = vld [vmem:[#allocation17 + $0x20] ss:$16 sps:$4 sm:$0xff]   ;;  %v14827_v41 = vld [vmem:[#allocation17 + $0x28] ss:$16 sps:$4 sm:$0xff]  }
0x1136   : > { %6021 = vmatprep.subr.bf16.mxu0 %v14807_v3  ;;  %6062 = vmatprep.subr.bf16.mxu1 %v14815_v59  ;;  %15946 = vst [vmem:[#allocation109_spill] sm:$0xff] %v14825_v60  ;;  %15947 = vst [vmem:[#allocation110_spill] sm:$0xff] %v14827_v41  ;;  %v14833_v3 = vld [vmem:[#allocation17 + $0xc] ss:$16 sps:$4 sm:$0xff]   ;;  %v14837_v59 = vld [vmem:[#allocation17] ss:$16 sps:$4 sm:$0xff]  }
0x1137   : > { %15949 = vst [vmem:[#allocation112_spill] sm:$0xff] %v14833_v3  ;;  %15950 = vst [vmem:[#allocation113_spill] sm:$0xff] %v14837_v59 }
0x1139   : > { %6022 = vmatpush1.bf16.msra.mxu0 %v14811_v21  ;;  %6063 = vmatpush1.bf16.msra.mxu1 %v14813_v58  ;;  %v14839_v21 = vld [vmem:[#allocation17 + $0x8] ss:$16 sps:$4 sm:$0xff]   ;;  %v15952_v58 = vld [vmem:[#allocation41_spill] sm:$0xff] }
0x113a   : > { %6023 = vmatprep.subr.bf16.mxu0 %v14818_v23  ;;  %6064 = vmatprep.subr.bf16.mxu1 %v14820_v28  ;;  %15951 = vst [vmem:[#allocation114_spill] sm:$0xff] %v14839_v21  ;;  %v9984_v47 = vmul.f32 -1.442695, %v15952_v58 }
0x113c   : > { %12644 = vpow2.f32 %v9984_v47 }
0x113d   : > { %6024 = vmatpush1.bf16.msra.mxu0 %v14825_v60  ;;  %6065 = vmatpush1.bf16.msra.mxu1 %v14827_v41 }
0x113e   : > { %6025 = vmatprep.subr.bf16.mxu0 %v14831_v34  ;;  %6066 = vmatprep.subr.bf16.mxu1 %v14833_v3 }
0x1141   : > { %6026 = vmatpush1.bf16.msra.mxu0 %v14837_v59  ;;  %6067 = vmatpush1.bf16.msra.mxu1 %v14839_v21  ;;  %v5261_v21 = vld [vmem:[%s15615_s3] sm:$0xf] }
0x1142   : > { %6093 = vmatprep.subr.bf16.mxu0 %v14416_v56  ;;  %11451 = vmatprep.subr.bf16.mxu1 %v15839_v42  ;;  %v15953_v56 = vld [vmem:[#allocation46_spill] sm:$0xff]  ;;  %v5274_v58 = vrot.slane %v5261_v21, %v15954_v49 }
0x1143   : > { %v5266_v59 = vrot.slane %v5261_v21, %v15953_v56 }
0x1149   : > { %v12645_v3 = vpop.eup %12644 }
0x114a   : > { %v784_v16 = vadd.f32 1.0, %v12645_v3 }
0x114c   : > { %12646 = vrcp.f32 %v784_v16 }
0x1159   : > { %v12647_v56 = vpop.eup %12646 }
0x11c3   : > { %v5477_v28 = vpop.f32.mrf.mxu0  ;;  %v5518_v60 = vpop.f32.mrf.mxu1 }
0x11c4   : > { %v5478_v52 = vadd.f32 %v5477_v28, %v5266_v59  ;;  %v5519_v12 = vadd.f32 %v5518_v60, %v5274_v58 }
0x11c5   : > { %v5479_v23 = vpop.f32.mrf.mxu0  ;;  %v5520_v41 = vpop.f32.mrf.mxu1 }
0x11c6   : > { %v5781_v28 = vadd.f32 %v12647_v56, %v5519_v12 }
0x11c7   : > { %v5481_v19 = vpop.f32.mrf.mxu0  ;;  %v5522_v33 = vpop.f32.mrf.mxu1 }
0x11c8   : > { %v10394_v38 = vmul.f32 -1.442695, %v5781_v28 }
0x11c9   : > { %v5482_v0 = vpop.f32.mrf.mxu0  ;;  %v5523_v34 = vpop.f32.mrf.mxu1 }
0x11ca   : > { %v15955_v0 = vld [vmem:[#allocation48_spill] sm:$0xff] }
0x11cb   : > { %v5270_v34 = vrot.slane %v5261_v21, %v15955_v0 }
0x11cd   : > { %v5480_v15 = vadd.f32 %v5479_v23, %v5270_v34 }
0x11e3   : > { %v5720_v51 = vpop.f32.mrf.mxu0  ;;  %v5761_v36 = vpop.f32.mrf.mxu1 }
0x11e4   : > { %v5767_v55 = vadd.f32 %v5720_v51, %v5478_v52 }
0x11e5   : > { %v5722_v19 = vpop.f32.mrf.mxu0  ;;  %v11449_v33 = vpop.f32.mrf.mxu1 }
0x11e6   : > { %v10392_v47 = vmul.f32 -1.442695, %v5767_v55  ;;  %v5768_v16 = vadd.f32 %v5722_v19, %v5480_v15 }
0x11e7   : > { %v5724_v25 = vpop.f32.mrf.mxu0  ;;  %v5764_v3 = vpop.f32.mrf.mxu1 }
0x11e8   : > { %12648 = vpow2.f32 %v10392_v47  ;;  %v10393_v59 = vmul.f32 -1.442695, %v5768_v16  ;;  %v5278_v25 = vrot.slane %v5261_v21, %v15863_v10 }
0x11e9   : > { %v5725_v32 = vpop.f32.mrf.mxu0  ;;  %v11450_v48 = vpop.f32.mrf.mxu1 }
0x11ea   : > { %12650 = vpow2.f32 %v10393_v59  ;;  %v5521_v32 = vadd.f32 %v5520_v41, %v5278_v25  ;;  %v15980_v41 = vld [vmem:[#allocation46_spill] sm:$0xff] }
0x11eb   : > { %12652 = vpow2.f32 %v10394_v38 }
0x11f5   : > { %v12649_v51 = vpop.eup %12648 }
0x11f6   : > { %v5775_v52 = vadd.f32 1.0, %v12649_v51 }
0x11f7   : > { %v12651_v33 = vpop.eup %12650 }
0x11f8   : > { %12654 = vrcp.f32 %v5775_v52  ;;  %v12653_v0 = vpop.eup %12652  ;;  %v5776_v55 = vadd.f32 1.0, %v12651_v33 }
0x11f9   : > { %v5785_v60 = vadd.f32 1.0, %v12653_v0 }
0x11fa   : > { %12656 = vrcp.f32 %v5776_v55  ;;  %v15981_v55 = vld [vmem:[#allocation48_spill] sm:$0xff] }
0x11fb   : > { %12658 = vrcp.f32 %v5785_v60 }
0x1205   : > { %v12655_v47 = vpop.eup %12654 }
0x1206   : > { %v5788_v48 = vmul.f32 %v12655_v47, %v5761_v36 }
0x1207   : > { %v12657_v15 = vpop.eup %12656 }
0x1208   : > { %v5789_v23 = vadd.f32 %v5788_v48, %v5521_v32  ;;  %v12659_v12 = vpop.eup %12658  ;;  %v5792_v38 = vsub.f32 1.0, %v12657_v15  ;;  %v5794_v34 = vmul.f32 %v12657_v15, %v15919_v14  ;;  %v5829_v14 = vld [vmem:[%s15619_s7] sm:$0xf] }
0x1209   : > { %v5834_v0 = vrot.slane %v5829_v14, %v15980_v41  ;;  %v5842_v52 = vrot.slane %v5829_v14, %v15954_v49  ;;  %v5838_v47 = vrot.slane %v5829_v14, %v15981_v55 }
0x120a   : > { %12660 = vtanh.f32 %v5789_v23 }
0x1217   : > { %v12661_v56 = vpop.eup %12660 }
0x1218   : > { %v5791_v58 = vmul.f32 %v12661_v56, %v12659_v12 }
0x121a   : > { %v5793_v19 = vmul.f32 %v5792_v38, %v5791_v58 }
0x121c   : > { %v14856_v3 = vadd.f32 %v5794_v34, %v5793_v19 }
0x121e   : > { %v14860_v21 = vpack.c.bf16 %v14856_v3, %v14856_v3 }
0x1220   : > { %6044 = vmatmul.mubr.bf16.vlgmr.msra.gmra.mxu0 %v14860_v21  ;;  %6085 = vmatmul.mubr.bf16.vlgmr.msra.gmra.mxu1 %v14860_v21 }
0x1221   : > { %6094 = vmatpush1.bf16.msra.mxu0 %v14432_v6  ;;  %11452 = vmatpush3.bf16.msra.mxu1 %v14435_v20  ;;  %v15956_v6 = vld [vmem:[#allocation49_spill] sm:$0xff]  ;;  %v15957_v20 = vld [vmem:[#allocation34_spill] sm:$0xff] }
0x1222   : > { %6095 = vmatprep.subr.bf16.mxu0 %v14438_v46  ;;  %11453 = vmatprep.subr.bf16.mxu1 %v15839_v42  ;;  %v15958_v46 = vld [vmem:[#allocation51_spill] sm:$0xff] }
0x1223   : > { %6125 = vmatprep.mubr.bf16.mxu0 %v15838_v4  ;;  %11467 = vmatprep.mubr.msk.bf16.mxu1 %vm13170_vm0, %v15839_v42 }
0x1225   : > { %6096 = vmatpush1.bf16.msra.mxu0 %v14445_v30  ;;  %11454 = vmatpush3.bf16.msra.mxu1 %v14448_v35  ;;  %v15959_v30 = vld [vmem:[#allocation35_spill] sm:$0xff]  ;;  %v15960_v35 = vld [vmem:[#allocation37_spill] sm:$0xff] }
0x1226   : > { %6097 = vmatprep.subr.bf16.mxu0 %v14451_v45  ;;  %11455 = vmatprep.subr.bf16.mxu1 %v15839_v42  ;;  %v15961_v45 = vld [vmem:[#allocation36_spill] sm:$0xff] }
0x1229   : > { %6098 = vmatpush1.bf16.msra.mxu0 %v14455_v37  ;;  %11456 = vmatpush3.bf16.msra.mxu1 %v14458_v11  ;;  %v15962_v37 = vld [vmem:[#allocation33_spill] sm:$0xff]  ;;  %v15963_v11 = vld [vmem:[#allocation52_spill] sm:$0xff] }
0x122a   : > { %6099 = vmatprep.subr.bf16.mxu0 %v14461_v43  ;;  %11457 = vmatprep.subr.bf16.mxu1 %v15839_v42  ;;  %v15964_v43 = vld [vmem:[#allocation53_spill] sm:$0xff] }
0x122d   : > { %6100 = vmatpush1.bf16.msra.mxu0 %v14465_v18  ;;  %11458 = vmatpush3.bf16.msra.mxu1 %v14468_v62  ;;  %v15965_v18 = vld [vmem:[#allocation54_spill] sm:$0xff]  ;;  %v15966_v62 = vld [vmem:[#allocation55_spill] sm:$0xff] }
0x122e   : > { %6101 = vmatprep.subr.bf16.mxu0 %v14471_v13  ;;  %11459 = vmatprep.subr.bf16.mxu1 %v15839_v42  ;;  %v15967_v13 = vld [vmem:[#allocation57_spill] sm:$0xff] }
0x1231   : > { %6102 = vmatpush1.bf16.msra.mxu0 %v14475_v39  ;;  %11460 = vmatpush3.bf16.msra.mxu1 %v14478_v7  ;;  %v15968_v39 = vld [vmem:[#allocation56_spill] sm:$0xff]  ;;  %v15969_v7 = vld [vmem:[#allocation62_spill] sm:$0xff] }
0x1232   : > { %6103 = vmatprep.subr.bf16.mxu0 %v14481_v40  ;;  %11461 = vmatprep.subr.bf16.mxu1 %v15839_v42  ;;  %v15970_v40 = vld [vmem:[#allocation63_spill] sm:$0xff] }
0x1235   : > { %6104 = vmatpush1.bf16.msra.mxu0 %v14485_v26  ;;  %11462 = vmatpush3.bf16.msra.mxu1 %v14488_v54  ;;  %v15971_v26 = vld [vmem:[#allocation64_spill] sm:$0xff]  ;;  %v15972_v54 = vld [vmem:[#allocation65_spill] sm:$0xff] }
0x1236   : > { %6105 = vmatprep.subr.bf16.mxu0 %v14491_v44  ;;  %11463 = vmatprep.subr.bf16.mxu1 %v15839_v42  ;;  %v15973_v44 = vld [vmem:[#allocation66_spill] sm:$0xff] }
0x1239   : > { %6106 = vmatpush1.bf16.msra.mxu0 %v14495_v27  ;;  %11464 = vmatpush3.bf16.msra.mxu1 %v14498_v31  ;;  %v15974_v27 = vld [vmem:[#allocation67_spill] sm:$0xff]  ;;  %v15975_v31 = vld [vmem:[#allocation68_spill] sm:$0xff] }
0x123a   : > { %6107 = vmatprep.subr.bf16.mxu0 %v14501_v61  ;;  %11465 = vmatprep.subr.bf16.mxu1 %v15839_v42  ;;  %v15976_v61 = vld [vmem:[#allocation69_spill] sm:$0xff] }
0x123d   : > { %6108 = vmatpush1.bf16.msra.mxu0 %v14505_v29  ;;  %11466 = vmatpush3.bf16.msra.mxu1 %v14508_v22  ;;  %v15977_v29 = vld [vmem:[#allocation70_spill] sm:$0xff]  ;;  %v15978_v22 = vld [vmem:[#allocation71_spill] sm:$0xff] }
0x123e   : > { %6423 = vmatprep.subr.bf16.mxu0 %v14574_v1  ;;  %6464 = vmatprep.subr.bf16.mxu1 %v14576_v63 }
0x1240   : > { %6126 = vmatmul.mubr.bf16.vlgmr.msra.gmra.mxu0 %v14688_v53  ;;  %11468 = vmatmul.mubr.bf16.vlgmr.msra.gmra.mxu1 %v14688_v53 }
0x1241   : > { %6424 = vmatpush1.bf16.msra.mxu0 %v14578_v17  ;;  %6465 = vmatpush1.bf16.msra.mxu1 %v14580_v24 }
0x1242   : > { %6425 = vmatprep.subr.bf16.mxu0 %v14588_v9  ;;  %6466 = vmatprep.subr.bf16.mxu1 %v14592_v57 }
0x1243   : > { %6455 = vmatprep.mubr.bf16.mxu0 %v15838_v4  ;;  %6496 = vmatprep.mubr.bf16.mxu1 %v15838_v4 }
0x1245   : > { %6426 = vmatpush1.bf16.msra.mxu0 %v14586_v50  ;;  %6467 = vmatpush1.bf16.msra.mxu1 %v14590_v8  ;;  %v15979_v50 = vld [vmem:[#allocation40_spill] sm:$0xff] }
0x1246   : > { %6427 = vmatprep.subr.bf16.mxu0 %v14594_v2  ;;  %6468 = vmatprep.subr.bf16.mxu1 %v14597_v5  ;;  %v10004_v9 = vmul.f32 -1.442695, %v15979_v50  ;;  %v12134_v50 = vld [vmem:[#allocation14 + $0x80] ss:$12 sps:$4 sm:$0xff]  }
0x1248   : > { %12662 = vpow2.f32 %v10004_v9  ;;  %v15987_v9 = vld [vmem:[#allocation72_spill] sm:$0xff] }
0x1249   : > { %6428 = vmatpush1.bf16.msra.mxu0 %v15956_v6  ;;  %6469 = vmatpush1.bf16.msra.mxu1 %v15957_v20 }
0x124a   : > { %6429 = vmatprep.subr.bf16.mxu0 %v15958_v46  ;;  %6470 = vmatprep.subr.bf16.mxu1 %v15959_v30 }
0x124d   : > { %6430 = vmatpush1.bf16.msra.mxu0 %v15960_v35  ;;  %6471 = vmatpush1.bf16.msra.mxu1 %v15961_v45  ;;  %v5846_v45 = vrot.slane %v5829_v14, %v15863_v10  ;;  %v15992_v14 = vld [vmem:[#allocation77_spill] sm:$0xff] }
0x124e   : > { %6431 = vmatprep.subr.bf16.mxu0 %v15962_v37  ;;  %6472 = vmatprep.subr.bf16.mxu1 %v15963_v11 }
0x1251   : > { %6432 = vmatpush1.bf16.msra.mxu0 %v15964_v43  ;;  %6473 = vmatpush1.bf16.msra.mxu1 %v15965_v18 }
0x1252   : > { %6433 = vmatprep.subr.bf16.mxu0 %v15966_v62  ;;  %6474 = vmatprep.subr.bf16.mxu1 %v15967_v13 }
0x1255   : > { %6434 = vmatpush1.bf16.msra.mxu0 %v15968_v39  ;;  %6475 = vmatpush1.bf16.msra.mxu1 %v15969_v7  ;;  %v12663_v53 = vpop.eup %12662 }
0x1256   : > { %6435 = vmatprep.subr.bf16.mxu0 %v15970_v40  ;;  %6476 = vmatprep.subr.bf16.mxu1 %v15971_v26  ;;  %v1013_v36 = vadd.f32 1.0, %v12663_v53  ;;  %v12136_v53 = vld [vmem:[#allocation14 + $0x50] ss:$12 sps:$4 sm:$0xff]  }
0x1258   : > { %12664 = vrcp.f32 %v1013_v36  ;;  %v15991_v36 = vld [vmem:[#allocation76_spill] sm:$0xff] }
0x1259   : > { %6436 = vmatpush1.bf16.msra.mxu0 %v15972_v54  ;;  %6477 = vmatpush1.bf16.msra.mxu1 %v15973_v44 }
0x125a   : > { %6437 = vmatprep.subr.bf16.mxu0 %v15974_v27  ;;  %6478 = vmatprep.subr.bf16.mxu1 %v15975_v31  ;;  %v15982_v27 = vld [vmem:[#allocation58_spill] sm:$0xff] }
0x125d   : > { %6438 = vmatpush1.bf16.msra.mxu0 %v15976_v61  ;;  %6479 = vmatpush1.bf16.msra.mxu1 %v15977_v29  ;;  %v12132_v29 = vld [vmem:[#allocation14 + $0xb0] ss:$12 sps:$4 sm:$0xff]  }
0x125e   : > { %6665 = vmatprep.subr.bf16.mxu0 %v15978_v22  ;;  %11471 = vmatprep.subr.bf16.mxu1 %v15839_v42 }
0x1265   : > { %v12665_v58 = vpop.eup %12664 }
0x12e0   : > { %v6045_v1 = vpop.f32.mrf.mxu0  ;;  %v6086_v63 = vpop.f32.mrf.mxu1 }
0x12e1   : > { %v6046_v16 = vadd.f32 %v6045_v1, %v5834_v0  ;;  %v6087_v23 = vadd.f32 %v6086_v63, %v5842_v52  ;;  %v15984_v1 = vld [vmem:[#allocation59_spill] sm:$0xff]  ;;  %v12133_v63 = vld [vmem:[#allocation14 + $0x98] ss:$12 sps:$4 sm:$0xff]  }
0x12e2   : > { %v6047_v17 = vpop.f32.mrf.mxu0  ;;  %v6088_v24 = vpop.f32.mrf.mxu1  ;;  %v12137_v0 = vld [vmem:[#allocation14 + $0x38] ss:$12 sps:$4 sm:$0xff]  }
0x12e3   : > { %v6048_v56 = vadd.f32 %v6047_v17, %v5838_v47  ;;  %v6188_v19 = vadd.f32 %v12665_v58, %v6087_v23  ;;  %v6089_v18 = vadd.f32 %v6088_v24, %v5846_v45  ;;  %v15985_v17 = vld [vmem:[#allocation61_spill] sm:$0xff]  ;;  %v15986_v24 = vld [vmem:[#allocation60_spill] sm:$0xff]  ;;  %v15998_v47 = vld [vmem:[#allocation83_spill] sm:$0xff] }
0x12e4   : > { %v6049_v8 = vpop.f32.mrf.mxu0  ;;  %v6090_v57 = vpop.f32.mrf.mxu1  ;;  %v15996_v52 = vld [vmem:[#allocation81_spill] sm:$0xff]  ;;  %v16002_v23 = vld [vmem:[#allocation86_spill] sm:$0xff]  ;;  %v16016_v45 = vld [vmem:[#allocation100_spill] sm:$0xff] }
0x12e5   : > { %v10429_v6 = vmul.f32 -1.442695, %v6188_v19  ;;  %v15988_v8 = vld [vmem:[#allocation73_spill] sm:$0xff]  ;;  %v12135_v57 = vld [vmem:[#allocation14 + $0x68] ss:$12 sps:$4 sm:$0xff]   ;;  %v16008_v19 = vld [vmem:[#allocation92_spill] sm:$0xff] }
0x12e6   : > { %v6050_v2 = vpop.f32.mrf.mxu0  ;;  %v6091_v5 = vpop.f32.mrf.mxu1  ;;  %v16006_v58 = vld [vmem:[#allocation90_spill] sm:$0xff] }
0x12e7   : > { %v15989_v2 = vld [vmem:[#allocation74_spill] sm:$0xff]  ;;  %v15990_v5 = vld [vmem:[#allocation75_spill] sm:$0xff] }
0x1300   : > { %v6127_v28 = vpop.f32.mrf.mxu0  ;;  %v6168_v59 = vpop.f32.mrf.mxu1 }
0x1301   : > { %v6174_v51 = vadd.f32 %v6127_v28, %v6046_v16  ;;  %v15993_v16 = vld [vmem:[#allocation78_spill] sm:$0xff]  ;;  %v15994_v28 = vld [vmem:[#allocation79_spill] sm:$0xff] }
0x1302   : > { %v6129_v33 = vpop.f32.mrf.mxu0  ;;  %v11469_v25 = vpop.f32.mrf.mxu1 }
0x1303   : > { %v10427_v60 = vmul.f32 -1.442695, %v6174_v51  ;;  %v6175_v38 = vadd.f32 %v6129_v33, %v6048_v56  ;;  %v15995_v51 = vld [vmem:[#allocation80_spill] sm:$0xff]  ;;  %v12139_v33 = vld [vmem:[#allocation14 + $0x8] ss:$12 sps:$4 sm:$0xff]   ;;  %v16005_v56 = vld [vmem:[#allocation89_spill] sm:$0xff] }
0x1304   : > { %v6131_v32 = vpop.f32.mrf.mxu0  ;;  %v6171_v48 = vpop.f32.mrf.mxu1  ;;  %v15997_v25 = vld [vmem:[#allocation82_spill] sm:$0xff] }
0x1305   : > { %12666 = vpow2.f32 %v10427_v60  ;;  %v10428_v34 = vmul.f32 -1.442695, %v6175_v38  ;;  %v15999_v60 = vld [vmem:[#allocation50_spill] sm:$0xff]  ;;  %v16000_v32 = vld [vmem:[#allocation84_spill] sm:$0xff]  ;;  %v16001_v48 = vld [vmem:[#allocation85_spill] sm:$0xff] }
0x1306   : > { %v6132_v15 = vpop.f32.mrf.mxu0  ;;  %v11470_v12 = vpop.f32.mrf.mxu1  ;;  %v16007_v38 = vld [vmem:[#allocation91_spill] sm:$0xff] }
0x1307   : > { %12668 = vpow2.f32 %v10428_v34  ;;  %v16003_v15 = vld [vmem:[#allocation87_spill] sm:$0xff]  ;;  %v16004_v12 = vld [vmem:[#allocation88_spill] sm:$0xff]  ;;  %v16010_v34 = vld [vmem:[#allocation94_spill] sm:$0xff] }
0x1308   : > { %12670 = vpow2.f32 %v10429_v6  ;;  %v16011_v6 = vld [vmem:[#allocation95_spill] sm:$0xff] }
0x1312   : > { %v12667_v20 = vpop.eup %12666 }
0x1313   : > { %v6182_v46 = vadd.f32 1.0, %v12667_v20  ;;  %v16012_v20 = vld [vmem:[#allocation96_spill] sm:$0xff] }
0x1314   : > { %v12669_v30 = vpop.eup %12668 }
0x1315   : > { %12672 = vrcp.f32 %v6182_v46  ;;  %v12671_v35 = vpop.eup %12670  ;;  %v6183_v37 = vadd.f32 1.0, %v12669_v30  ;;  %v16013_v46 = vld [vmem:[#allocation97_spill] sm:$0xff]  ;;  %v16014_v30 = vld [vmem:[#allocation98_spill] sm:$0xff] }
0x1316   : > { %v6192_v43 = vadd.f32 1.0, %v12671_v35  ;;  %v16015_v35 = vld [vmem:[#allocation99_spill] sm:$0xff] }
0x1317   : > { %12674 = vrcp.f32 %v6183_v37  ;;  %v16017_v37 = vld [vmem:[#allocation101_spill] sm:$0xff] }
0x1318   : > { %12676 = vrcp.f32 %v6192_v43  ;;  %v16019_v43 = vld [vmem:[#allocation103_spill] sm:$0xff] }
0x1322   : > { %v12673_v11 = vpop.eup %12672 }
0x1323   : > { %v6195_v62 = vmul.f32 %v12673_v11, %v6168_v59  ;;  %v12138_v59 = vld [vmem:[#allocation14 + $0x20] ss:$12 sps:$4 sm:$0xff]  }
0x1324   : > { %v12675_v39 = vpop.eup %12674  ;;  %v16018_v11 = vld [vmem:[#allocation102_spill] sm:$0xff] }
0x1325   : > { %v6196_v13 = vadd.f32 %v6195_v62, %v6089_v18  ;;  %v12677_v7 = vpop.eup %12676  ;;  %v6199_v54 = vsub.f32 1.0, %v12675_v39  ;;  %v6201_v31 = vmul.f32 %v12675_v39, %v15982_v27  ;;  %v16020_v18 = vld [vmem:[#allocation106_spill] sm:$0xff]  ;;  %v16021_v62 = vld [vmem:[#allocation104_spill] sm:$0xff]  ;;  %v16023_v39 = vld [vmem:[#allocation107_spill] sm:$0xff] }
0x1326   : > { %v16029_v27 = vld [vmem:[#allocation113_spill] sm:$0xff] }
0x1327   : > { %12678 = vtanh.f32 %v6196_v13  ;;  %v16022_v13 = vld [vmem:[#allocation105_spill] sm:$0xff] }
0x1334   : > { %v12679_v40 = vpop.eup %12678 }
0x1335   : > { %v6198_v26 = vmul.f32 %v12679_v40, %v12677_v7  ;;  %v16024_v7 = vld [vmem:[#allocation108_spill] sm:$0xff]  ;;  %v16025_v40 = vld [vmem:[#allocation109_spill] sm:$0xff] }
0x1337   : > { %v6200_v44 = vmul.f32 %v6199_v54, %v6198_v26  ;;  %v16026_v26 = vld [vmem:[#allocation110_spill] sm:$0xff]  ;;  %v16027_v54 = vld [vmem:[#allocation111_spill] sm:$0xff] }
0x1339   : > { %v14944_v61 = vadd.f32 %v6201_v31, %v6200_v44  ;;  %v16028_v44 = vld [vmem:[#allocation112_spill] sm:$0xff]  ;;  %v16030_v31 = vld [vmem:[#allocation114_spill] sm:$0xff] }
0x133b   : > { %15983 = vst [vmem:[#allocation41_spill] sm:$0xff] %v14944_v61  ;;  %v14948_v22 = vpack.c.bf16 %v14944_v61, %v14944_v61 }
0x133d   : > { %6456 = vmatmul.mubr.bf16.vlgmr.msra.gmra.mxu0 %v14948_v22  ;;  %6497 = vmatmul.mubr.bf16.vlgmr.msra.gmra.mxu1 %v14948_v22 }
0x133e   : > { %6666 = vmatpush1.bf16.msra.mxu0 %v15984_v1  ;;  %11472 = vmatpush3.bf16.msra.mxu1 %v12132_v29  ;;  %v15014_v29 = vld [vmem:[#allocation19 + $0xac] ss:$12 sps:$4 sm:$0xff]  }
0x133f   : > { %6667 = vmatprep.subr.bf16.mxu0 %v15985_v17  ;;  %11473 = vmatprep.subr.bf16.mxu1 %v15839_v42 }
0x1340   : > { %6697 = vmatprep.mubr.bf16.mxu0 %v15838_v4  ;;  %11487 = vmatprep.mubr.msk.bf16.mxu1 %vm13170_vm0, %v15839_v42 }
0x1342   : > { %6668 = vmatpush1.bf16.msra.mxu0 %v15986_v24  ;;  %11474 = vmatpush3.bf16.msra.mxu1 %v12133_v63 }
0x1343   : > { %6669 = vmatprep.subr.bf16.mxu0 %v15987_v9  ;;  %11475 = vmatprep.subr.bf16.mxu1 %v15839_v42 }
0x1346   : > { %6670 = vmatpush1.bf16.msra.mxu0 %v15988_v8  ;;  %11476 = vmatpush3.bf16.msra.mxu1 %v12134_v50  ;;  %v16031_v50 = vld [vmem:[#allocation45_spill] sm:$0xff] }
0x1347   : > { %6671 = vmatprep.subr.bf16.mxu0 %v15989_v2  ;;  %11477 = vmatprep.subr.bf16.mxu1 %v15839_v42  ;;  %v9985_v9 = vmul.f32 -1.442695, %v16031_v50  ;;  %v15043_v50 = vld [vmem:[#allocation19 + $0x7c] ss:$12 sps:$4 sm:$0xff]  }
0x1349   : > { %12680 = vpow2.f32 %v9985_v9  ;;  %v15049_v9 = vld [vmem:[#allocation19 + $0x78] ss:$12 sps:$4 sm:$0xff]  }
0x134a   : > { %6672 = vmatpush1.bf16.msra.mxu0 %v15990_v5  ;;  %11478 = vmatpush3.bf16.msra.mxu1 %v12135_v57 }
0x134b   : > { %6673 = vmatprep.subr.bf16.mxu0 %v15991_v36  ;;  %11479 = vmatprep.subr.bf16.mxu1 %v15839_v42 }
0x134e   : > { %6674 = vmatpush1.bf16.msra.mxu0 %v15992_v14  ;;  %11480 = vmatpush3.bf16.msra.mxu1 %v12136_v53  ;;  %v6241_v14 = vld [vmem:[%s15615_s3] sm:$0xf] }
0x134f   : > { %6675 = vmatprep.subr.bf16.mxu0 %v15993_v16  ;;  %11481 = vmatprep.subr.bf16.mxu1 %v15839_v42 }
0x1352   : > { %6676 = vmatpush1.bf16.msra.mxu0 %v15994_v28  ;;  %11482 = vmatpush3.bf16.msra.mxu1 %v12137_v0  ;;  %v6246_v0 = vrot.slane %v6241_v14, %v15980_v41 }
0x1353   : > { %6677 = vmatprep.subr.bf16.mxu0 %v15995_v51  ;;  %11483 = vmatprep.subr.bf16.mxu1 %v15839_v42 }
0x1356   : > { %6678 = vmatpush1.bf16.msra.mxu0 %v15996_v52  ;;  %11484 = vmatpush3.bf16.msra.mxu1 %v12138_v59  ;;  %v12681_v53 = vpop.eup %12680  ;;  %v6254_v52 = vrot.slane %v6241_v14, %v15954_v49 }
0x1357   : > { %6679 = vmatprep.subr.bf16.mxu0 %v15997_v25  ;;  %11485 = vmatprep.subr.bf16.mxu1 %v15839_v42  ;;  %v785_v36 = vadd.f32 1.0, %v12681_v53  ;;  %v15060_v53 = vld [vmem:[#allocation19 + $0x4c] ss:$12 sps:$4 sm:$0xff]  }
0x1359   : > { %12682 = vrcp.f32 %v785_v36  ;;  %v15063_v36 = vld [vmem:[#allocation19 + $0x48] ss:$12 sps:$4 sm:$0xff]  }
0x135a   : > { %6680 = vmatpush1.bf16.msra.mxu0 %v15998_v47  ;;  %11486 = vmatpush3.bf16.msra.mxu1 %v12139_v33  ;;  %v6250_v47 = vrot.slane %v6241_v14, %v15981_v55 }
0x135b   : > { %6990 = vmatprep.subr.bf16.mxu0 %v15999_v60  ;;  %7031 = vmatprep.subr.bf16.mxu1 %v16000_v32 }
0x135d   : > { %6698 = vmatmul.mubr.bf16.vlgmr.msra.gmra.mxu0 %v14860_v21  ;;  %11488 = vmatmul.mubr.bf16.vlgmr.msra.gmra.mxu1 %v14860_v21  ;;  %v16009_v21 = vld [vmem:[#allocation93_spill] sm:$0xff] }
0x135e   : > { %6991 = vmatpush1.bf16.msra.mxu0 %v16001_v48  ;;  %7032 = vmatpush1.bf16.msra.mxu1 %v16002_v23 }
0x135f   : > { %6992 = vmatprep.subr.bf16.mxu0 %v16003_v15  ;;  %7033 = vmatprep.subr.bf16.mxu1 %v16004_v12 }
0x1360   : > { %7022 = vmatprep.mubr.bf16.mxu0 %v15838_v4  ;;  %7063 = vmatprep.mubr.bf16.mxu1 %v15838_v4 }
0x1362   : > { %6993 = vmatpush1.bf16.msra.mxu0 %v16005_v56  ;;  %7034 = vmatpush1.bf16.msra.mxu1 %v16006_v58 }
0x1363   : > { %6994 = vmatprep.subr.bf16.mxu0 %v16007_v38  ;;  %7035 = vmatprep.subr.bf16.mxu1 %v16008_v19 }
0x1366   : > { %6995 = vmatpush1.bf16.msra.mxu0 %v16009_v21  ;;  %7036 = vmatpush1.bf16.msra.mxu1 %v16010_v34  ;;  %v12683_v58 = vpop.eup %12682 }
0x1367   : > { %6996 = vmatprep.subr.bf16.mxu0 %v16011_v6  ;;  %7037 = vmatprep.subr.bf16.mxu1 %v16012_v20 }
0x136a   : > { %6997 = vmatpush1.bf16.msra.mxu0 %v16013_v46  ;;  %7038 = vmatpush1.bf16.msra.mxu1 %v16014_v30 }
0x136b   : > { %6998 = vmatprep.subr.bf16.mxu0 %v16015_v35  ;;  %7039 = vmatprep.subr.bf16.mxu1 %v16016_v45  ;;  %v6258_v35 = vrot.slane %v6241_v14, %v15863_v10  ;;  %v12159_v14 = vld [vmem:[#allocation19 + $0x50] ss:$12 sps:$4 sm:$0xff]  }
0x136e   : > { %6999 = vmatpush1.bf16.msra.mxu0 %v16017_v37  ;;  %7040 = vmatpush1.bf16.msra.mxu1 %v16018_v11 }
0x136f   : > { %7000 = vmatprep.subr.bf16.mxu0 %v16019_v43  ;;  %7041 = vmatprep.subr.bf16.mxu1 %v16020_v18 }
0x1372   : > { %7001 = vmatpush1.bf16.msra.mxu0 %v16021_v62  ;;  %7042 = vmatpush1.bf16.msra.mxu1 %v16022_v13 }
0x1373   : > { %7002 = vmatprep.subr.bf16.mxu0 %v16023_v39  ;;  %7043 = vmatprep.subr.bf16.mxu1 %v16024_v7 }
0x1376   : > { %7003 = vmatpush1.bf16.msra.mxu0 %v16025_v40  ;;  %7044 = vmatpush1.bf16.msra.mxu1 %v16026_v26 }
0x1377   : > { %7004 = vmatprep.subr.bf16.mxu0 %v16027_v54  ;;  %7045 = vmatprep.subr.bf16.mxu1 %v16028_v44 }
0x137a   : > { %7005 = vmatpush1.bf16.msra.mxu0 %v16029_v27  ;;  %7046 = vmatpush1.bf16.msra.mxu1 %v16030_v31  ;;  %v15028_v31 = vld [vmem:[#allocation19 + $0xa8] ss:$12 sps:$4 sm:$0xff]  }
0x137b   : > { %11491 = vmatprep.subr.bf16.mxu1 %v15839_v42  ;;  %7232 = vmatprep.subr.bf16.mxu0 %v15014_v29 }
0x13fd   : > { %v6457_v1 = vpop.f32.mrf.mxu0  ;;  %v6498_v63 = vpop.f32.mrf.mxu1 }
0x13fe   : > { %v6458_v16 = vadd.f32 %v6457_v1, %v6246_v0  ;;  %v6499_v23 = vadd.f32 %v6498_v63, %v6254_v52  ;;  %v12143_v1 = vld [vmem:[#allocation19 + $0xb0] ss:$12 sps:$4 sm:$0xff]   ;;  %v15067_v0 = vld [vmem:[#allocation19 + $0x34] ss:$12 sps:$4 sm:$0xff]  }
0x13ff   : > { %v6459_v17 = vpop.f32.mrf.mxu0  ;;  %v6500_v24 = vpop.f32.mrf.mxu1  ;;  %v12167_v52 = vld [vmem:[#allocation19 + $0x20] ss:$12 sps:$4 sm:$0xff]  }
0x1400   : > { %v6460_v56 = vadd.f32 %v6459_v17, %v6250_v47  ;;  %v6760_v19 = vadd.f32 %v12683_v58, %v6499_v23  ;;  %v6501_v43 = vadd.f32 %v6500_v24, %v6258_v35  ;;  %v15034_v17 = vld [vmem:[#allocation19 + $0x94] ss:$12 sps:$4 sm:$0xff]   ;;  %v15039_v24 = vld [vmem:[#allocation19 + $0x90] ss:$12 sps:$4 sm:$0xff]   ;;  %v15099_v23 = vld [vmem:[#allocation13 + $0xe8] ss:$16 sps:$4 sm:$0xff]  }
0x1401   : > { %v6461_v8 = vpop.f32.mrf.mxu0  ;;  %v6502_v57 = vpop.f32.mrf.mxu1  ;;  %v12171_v47 = vld [vmem:[#allocation19 + $0x8] ss:$12 sps:$4 sm:$0xff]   ;;  %v15143_v35 = vld [vmem:[#allocation13 + $0x6c] ss:$16 sps:$4 sm:$0xff]  }
0x1402   : > { %v10488_v34 = vmul.f32 -1.442695, %v6760_v19  ;;  %v12151_v8 = vld [vmem:[#allocation19 + $0x80] ss:$12 sps:$4 sm:$0xff]   ;;  %v15053_v57 = vld [vmem:[#allocation19 + $0x64] ss:$12 sps:$4 sm:$0xff]  }
0x1403   : > { %v6462_v2 = vpop.f32.mrf.mxu0  ;;  %v6503_v5 = vpop.f32.mrf.mxu1  ;;  %v15117_v58 = vld [vmem:[#allocation13 + $0xa4] ss:$16 sps:$4 sm:$0xff]   ;;  %v15121_v19 = vld [vmem:[#allocation13 + $0xa0] ss:$16 sps:$4 sm:$0xff]   ;;  %16035 = vst [vmem:[#allocation51_spill] sm:$0xff] %v15143_v35 }
0x1404   : > { %v15056_v2 = vld [vmem:[#allocation19 + $0x60] ss:$12 sps:$4 sm:$0xff]   ;;  %v12155_v5 = vld [vmem:[#allocation19 + $0x68] ss:$12 sps:$4 sm:$0xff]  }
0x141d   : > { %v6699_v28 = vpop.f32.mrf.mxu0  ;;  %v6740_v59 = vpop.f32.mrf.mxu1 }
0x141e   : > { %v6746_v51 = vadd.f32 %v6699_v28, %v6458_v16  ;;  %v15070_v16 = vld [vmem:[#allocation19 + $0x30] ss:$12 sps:$4 sm:$0xff]   ;;  %v12163_v28 = vld [vmem:[#allocation19 + $0x38] ss:$12 sps:$4 sm:$0xff]  }
0x141f   : > { %v6701_v33 = vpop.f32.mrf.mxu0  ;;  %v11489_v25 = vpop.f32.mrf.mxu1 }
0x1420   : > { %v10486_v60 = vmul.f32 -1.442695, %v6746_v51  ;;  %v6747_v38 = vadd.f32 %v6701_v33, %v6460_v56  ;;  %v15077_v51 = vld [vmem:[#allocation19 + $0x18] ss:$12 sps:$4 sm:$0xff]   ;;  %v15084_v25 = vld [vmem:[#allocation19] ss:$12 sps:$4 sm:$0xff]  }
0x1421   : > { %v6703_v32 = vpop.f32.mrf.mxu0  ;;  %v6743_v48 = vpop.f32.mrf.mxu1  ;;  %v15081_v33 = vld [vmem:[#allocation19 + $0x4] ss:$12 sps:$4 sm:$0xff]   ;;  %v15111_v56 = vld [vmem:[#allocation13 + $0xc8] ss:$16 sps:$4 sm:$0xff]  }
0x1422   : > { %12684 = vpow2.f32 %v10486_v60  ;;  %v10487_v21 = vmul.f32 -1.442695, %v6747_v38  ;;  %v15093_v60 = vld [vmem:[#allocation13 + $0xe4] ss:$16 sps:$4 sm:$0xff]   ;;  %v15095_v32 = vld [vmem:[#allocation13 + $0xec] ss:$16 sps:$4 sm:$0xff]  }
0x1423   : > { %v6704_v15 = vpop.f32.mrf.mxu0  ;;  %v11490_v12 = vpop.f32.mrf.mxu1  ;;  %v15097_v48 = vld [vmem:[#allocation13 + $0xe0] ss:$16 sps:$4 sm:$0xff]   ;;  %v15119_v38 = vld [vmem:[#allocation13 + $0xac] ss:$16 sps:$4 sm:$0xff]  }
0x1424   : > { %12686 = vpow2.f32 %v10487_v21  ;;  %v15107_v15 = vld [vmem:[#allocation13 + $0xcc] ss:$16 sps:$4 sm:$0xff]   ;;  %v15109_v12 = vld [vmem:[#allocation13 + $0xc0] ss:$16 sps:$4 sm:$0xff]   ;;  %v15123_v21 = vld [vmem:[#allocation13 + $0xa8] ss:$16 sps:$4 sm:$0xff]  }
0x1425   : > { %12688 = vpow2.f32 %v10488_v34  ;;  %v15129_v34 = vld [vmem:[#allocation13 + $0x84] ss:$16 sps:$4 sm:$0xff]  }
0x142f   : > { %v12685_v6 = vpop.eup %12684 }
0x1430   : > { %v6754_v20 = vadd.f32 1.0, %v12685_v6  ;;  %v15131_v6 = vld [vmem:[#allocation13 + $0x8c] ss:$16 sps:$4 sm:$0xff]  }
0x1431   : > { %v12687_v46 = vpop.eup %12686 }
0x1432   : > { %12690 = vrcp.f32 %v6754_v20  ;;  %v12689_v30 = vpop.eup %12688  ;;  %v6755_v45 = vadd.f32 1.0, %v12687_v46  ;;  %v15133_v20 = vld [vmem:[#allocation13 + $0x80] ss:$16 sps:$4 sm:$0xff]   ;;  %v15135_v46 = vld [vmem:[#allocation13 + $0x88] ss:$16 sps:$4 sm:$0xff]  }
0x1433   : > { %v6764_v11 = vadd.f32 1.0, %v12689_v30  ;;  %16032 = vst [vmem:[#allocation47_spill] sm:$0xff] %v15133_v20  ;;  %16033 = vst [vmem:[#allocation49_spill] sm:$0xff] %v15135_v46  ;;  %v15141_v30 = vld [vmem:[#allocation13 + $0x64] ss:$16 sps:$4 sm:$0xff]  }
0x1434   : > { %12692 = vrcp.f32 %v6755_v45  ;;  %16034 = vst [vmem:[#allocation34_spill] sm:$0xff] %v15141_v30  ;;  %v15145_v45 = vld [vmem:[#allocation13 + $0x60] ss:$16 sps:$4 sm:$0xff]  }
0x1435   : > { %12694 = vrcp.f32 %v6764_v11  ;;  %16036 = vst [vmem:[#allocation35_spill] sm:$0xff] %v15145_v45  ;;  %v15153_v11 = vld [vmem:[#allocation13 + $0x44] ss:$16 sps:$4 sm:$0xff]  }
0x1436   : > { %16038 = vst [vmem:[#allocation36_spill] sm:$0xff] %v15153_v11 }
0x143f   : > { %v12691_v37 = vpop.eup %12690 }
0x1440   : > { %v6767_v18 = vmul.f32 %v12691_v37, %v6740_v59  ;;  %v15074_v59 = vld [vmem:[#allocation19 + $0x1c] ss:$12 sps:$4 sm:$0xff]  }
0x1441   : > { %v12693_v13 = vpop.eup %12692  ;;  %v15147_v37 = vld [vmem:[#allocation13 + $0x68] ss:$16 sps:$4 sm:$0xff]  }
0x1442   : > { %v6768_v62 = vadd.f32 %v6767_v18, %v6501_v43  ;;  %v12695_v39 = vpop.eup %12694  ;;  %v6771_v26 = vsub.f32 1.0, %v12693_v13  ;;  %v6773_v44 = vmul.f32 %v12693_v13, %v14856_v3  ;;  %v12147_v3 = vld [vmem:[#allocation19 + $0x98] ss:$12 sps:$4 sm:$0xff]   ;;  %16037 = vst [vmem:[#allocation37_spill] sm:$0xff] %v15147_v37  ;;  %v15155_v43 = vld [vmem:[#allocation13 + $0x4c] ss:$16 sps:$4 sm:$0xff]  }
0x1443   : > { %16039 = vst [vmem:[#allocation33_spill] sm:$0xff] %v15155_v43  ;;  %v15157_v18 = vld [vmem:[#allocation13 + $0x40] ss:$16 sps:$4 sm:$0xff]   ;;  %v15163_v13 = vld [vmem:[#allocation13 + $0x24] ss:$16 sps:$4 sm:$0xff]  }
0x1444   : > { %12696 = vtanh.f32 %v6768_v62  ;;  %16040 = vst [vmem:[#allocation52_spill] sm:$0xff] %v15157_v18  ;;  %v15159_v62 = vld [vmem:[#allocation13 + $0x48] ss:$16 sps:$4 sm:$0xff]   ;;  %16042 = vst [vmem:[#allocation54_spill] sm:$0xff] %v15163_v13 }
0x1445   : > { %16041 = vst [vmem:[#allocation53_spill] sm:$0xff] %v15159_v62 }
0x1451   : > { %v12697_v7 = vpop.eup %12696 }
0x1452   : > { %v6770_v40 = vmul.f32 %v12697_v7, %v12695_v39  ;;  %v15165_v39 = vld [vmem:[#allocation13 + $0x2c] ss:$16 sps:$4 sm:$0xff]   ;;  %v15169_v7 = vld [vmem:[#allocation13 + $0x20] ss:$16 sps:$4 sm:$0xff]  }
0x1453   : > { %16043 = vst [vmem:[#allocation55_spill] sm:$0xff] %v15165_v39  ;;  %16044 = vst [vmem:[#allocation57_spill] sm:$0xff] %v15169_v7 }
0x1454   : > { %v6772_v54 = vmul.f32 %v6771_v26, %v6770_v40  ;;  %v15171_v40 = vld [vmem:[#allocation13 + $0x28] ss:$16 sps:$4 sm:$0xff]   ;;  %v15175_v26 = vld [vmem:[#allocation13 + $0x4] ss:$16 sps:$4 sm:$0xff]  }
0x1455   : > { %16045 = vst [vmem:[#allocation56_spill] sm:$0xff] %v15171_v40  ;;  %16046 = vst [vmem:[#allocation62_spill] sm:$0xff] %v15175_v26 }
0x1456   : > { %v15026_v27 = vadd.f32 %v6773_v44, %v6772_v54  ;;  %v15177_v54 = vld [vmem:[#allocation13 + $0xc] ss:$16 sps:$4 sm:$0xff]   ;;  %v15181_v44 = vld [vmem:[#allocation13] ss:$16 sps:$4 sm:$0xff]  }
0x1457   : > { %16047 = vst [vmem:[#allocation63_spill] sm:$0xff] %v15177_v54  ;;  %16048 = vst [vmem:[#allocation64_spill] sm:$0xff] %v15181_v44 }
0x1458   : > { %v15032_v63 = vpack.c.bf16 %v15026_v27, %v15026_v27 }
0x145a   : > { %7023 = vmatmul.mubr.bf16.vlgmr.msra.gmra.mxu0 %v15032_v63  ;;  %7064 = vmatmul.mubr.bf16.vlgmr.msra.gmra.mxu1 %v15032_v63 }
0x145b   : > { %7233 = vmatpush1.bf16.msra.mxu0 %v15028_v31  ;;  %11492 = vmatpush3.bf16.msra.mxu1 %v12143_v1  ;;  %v15183_v1 = vld [vmem:[#allocation13 + $0x8] ss:$16 sps:$4 sm:$0xff]  }
0x145c   : > { %7234 = vmatprep.subr.bf16.mxu0 %v15034_v17  ;;  %11493 = vmatprep.subr.bf16.mxu1 %v15839_v42  ;;  %16049 = vst [vmem:[#allocation65_spill] sm:$0xff] %v15183_v1 }
0x145d   : > { %7264 = vmatprep.mubr.bf16.mxu0 %v15838_v4  ;;  %11507 = vmatprep.mubr.msk.bf16.mxu1 %vm13170_vm0, %v15839_v42 }
0x145f   : > { %7235 = vmatpush1.bf16.msra.mxu0 %v15039_v24  ;;  %11494 = vmatpush3.bf16.msra.mxu1 %v12147_v3  ;;  %v15187_v3 = vld [vmem:[#allocation14 + $0xac] ss:$12 sps:$4 sm:$0xff]  }
0x1460   : > { %7236 = vmatprep.subr.bf16.mxu0 %v15043_v50  ;;  %11495 = vmatprep.subr.bf16.mxu1 %v15839_v42  ;;  %16050 = vst [vmem:[#allocation66_spill] sm:$0xff] %v15187_v3 }
0x1463   : > { %7237 = vmatpush1.bf16.msra.mxu0 %v15049_v9  ;;  %11496 = vmatpush3.bf16.msra.mxu1 %v12151_v8 }
0x1464   : > { %7238 = vmatprep.subr.bf16.mxu0 %v15053_v57  ;;  %11497 = vmatprep.subr.bf16.mxu1 %v15839_v42 }
0x1467   : > { %7239 = vmatpush1.bf16.msra.mxu0 %v15056_v2  ;;  %11498 = vmatpush3.bf16.msra.mxu1 %v12155_v5 }
0x1468   : > { %7240 = vmatprep.subr.bf16.mxu0 %v15060_v53  ;;  %11499 = vmatprep.subr.bf16.mxu1 %v15839_v42 }
0x146b   : > { %7241 = vmatpush1.bf16.msra.mxu0 %v15063_v36  ;;  %11500 = vmatpush3.bf16.msra.mxu1 %v12159_v14 }
0x146c   : > { %7242 = vmatprep.subr.bf16.mxu0 %v15067_v0  ;;  %11501 = vmatprep.subr.bf16.mxu1 %v15839_v42 }
0x146f   : > { %7243 = vmatpush1.bf16.msra.mxu0 %v15070_v16  ;;  %11502 = vmatpush3.bf16.msra.mxu1 %v12163_v28 }
0x1470   : > { %7244 = vmatprep.subr.bf16.mxu0 %v15074_v59  ;;  %11503 = vmatprep.subr.bf16.mxu1 %v15839_v42 }
0x1473   : > { %7245 = vmatpush1.bf16.msra.mxu0 %v15077_v51  ;;  %11504 = vmatpush3.bf16.msra.mxu1 %v12167_v52  ;;  %v16051_v52 = vld [vmem:[#allocation44_spill] sm:$0xff] }
0x1474   : > { %7246 = vmatprep.subr.bf16.mxu0 %v15081_v33  ;;  %11505 = vmatprep.subr.bf16.mxu1 %v15839_v42 }
0x1477   : > { %7247 = vmatpush1.bf16.msra.mxu0 %v15084_v25  ;;  %11506 = vmatpush3.bf16.msra.mxu1 %v12171_v47  ;;  %v10005_v47 = vmul.f32 -1.442695, %v16051_v52 }
0x1478   : > { %7563 = vmatprep.subr.bf16.mxu0 %v15093_v60  ;;  %7604 = vmatprep.subr.bf16.mxu1 %v15095_v32 }
0x1479   : > { %12698 = vpow2.f32 %v10005_v47 }
0x147a   : > { %7265 = vmatmul.mubr.bf16.vlgmr.msra.gmra.mxu0 %v14948_v22  ;;  %11508 = vmatmul.mubr.bf16.vlgmr.msra.gmra.mxu1 %v14948_v22  ;;  %v15105_v22 = vld [vmem:[#allocation13 + $0xc4] ss:$16 sps:$4 sm:$0xff]  }
0x147b   : > { %7595 = vmatprep.mubr.bf16.mxu0 %v15838_v4  ;;  %7636 = vmatprep.mubr.bf16.mxu1 %v15838_v4 }
0x147c   : > { %7564 = vmatpush1.bf16.msra.mxu0 %v15097_v48  ;;  %7605 = vmatpush1.bf16.msra.mxu1 %v15099_v23 }
0x147d   : > { %7565 = vmatprep.subr.bf16.mxu0 %v15105_v22  ;;  %7606 = vmatprep.subr.bf16.mxu1 %v15107_v15 }
0x1480   : > { %7566 = vmatpush1.bf16.msra.mxu0 %v15109_v12  ;;  %7607 = vmatpush1.bf16.msra.mxu1 %v15111_v56 }
0x1481   : > { %7567 = vmatprep.subr.bf16.mxu0 %v15117_v58  ;;  %7608 = vmatprep.subr.bf16.mxu1 %v15119_v38 }
0x1484   : > { %7568 = vmatpush1.bf16.msra.mxu0 %v15121_v19  ;;  %7609 = vmatpush1.bf16.msra.mxu1 %v15123_v21 }
0x1485   : > { %7569 = vmatprep.subr.bf16.mxu0 %v15129_v34  ;;  %7610 = vmatprep.subr.bf16.mxu1 %v15131_v6 }
0x1488   : > { %7570 = vmatpush1.bf16.msra.mxu0 %v15133_v20  ;;  %7611 = vmatpush1.bf16.msra.mxu1 %v15135_v46 }
0x1489   : > { %7571 = vmatprep.subr.bf16.mxu0 %v15141_v30  ;;  %7612 = vmatprep.subr.bf16.mxu1 %v15143_v35 }
0x148c   : > { %7572 = vmatpush1.bf16.msra.mxu0 %v15145_v45  ;;  %7613 = vmatpush1.bf16.msra.mxu1 %v15147_v37 }
0x148d   : > { %7573 = vmatprep.subr.bf16.mxu0 %v15153_v11  ;;  %7614 = vmatprep.subr.bf16.mxu1 %v15155_v43 }
0x1490   : > { %7574 = vmatpush1.bf16.msra.mxu0 %v15157_v18  ;;  %7615 = vmatpush1.bf16.msra.mxu1 %v15159_v62 }
0x1491   : > { %7575 = vmatprep.subr.bf16.mxu0 %v15163_v13  ;;  %7616 = vmatprep.subr.bf16.mxu1 %v15165_v39  ;;  %v12699_v39 = vpop.eup %12698 }
0x1492   : > { %v1014_v13 = vadd.f32 1.0, %v12699_v39 }
0x1494   : > { %7576 = vmatpush1.bf16.msra.mxu0 %v15169_v7  ;;  %7617 = vmatpush1.bf16.msra.mxu1 %v15171_v40  ;;  %12700 = vrcp.f32 %v1014_v13 }
0x1495   : > { %7577 = vmatprep.subr.bf16.mxu0 %v15175_v26  ;;  %7618 = vmatprep.subr.bf16.mxu1 %v15177_v54 }
0x1498   : > { %7578 = vmatpush1.bf16.msra.mxu0 %v15181_v44  ;;  %7619 = vmatpush1.bf16.msra.mxu1 %v15183_v1  ;;  %v6808_v1 = vld [vmem:[%s15619_s7] sm:$0xf] }
0x1499   : > { %7805 = vmatprep.subr.bf16.mxu0 %v15187_v3  ;;  %11511 = vmatprep.subr.bf16.mxu1 %v15839_v42  ;;  %v6813_v3 = vrot.slane %v6808_v1, %v15980_v41  ;;  %v6821_v52 = vrot.slane %v6808_v1, %v15954_v49 }
0x14a1   : > { %v12701_v30 = vpop.eup %12700 }
0x151a   : > { %v7024_v8 = vpop.f32.mrf.mxu0  ;;  %v7065_v5 = vpop.f32.mrf.mxu1 }
0x151b   : > { %v7025_v44 = vadd.f32 %v7024_v8, %v6813_v3  ;;  %v7066_v11 = vadd.f32 %v7065_v5, %v6821_v52 }
0x151c   : > { %v7026_v14 = vpop.f32.mrf.mxu0  ;;  %v7067_v28 = vpop.f32.mrf.mxu1 }
0x151d   : > { %v7327_v3 = vadd.f32 %v12701_v30, %v7066_v11 }
0x151e   : > { %v7028_v40 = vpop.f32.mrf.mxu0  ;;  %v7069_v26 = vpop.f32.mrf.mxu1 }
0x151f   : > { %v10547_v46 = vmul.f32 -1.442695, %v7327_v3  ;;  %v12227_v3 = vld [vmem:[#allocation14 + $0x98] ss:$12 sps:$4 sm:$0xff]  }
0x1520   : > { %v7029_v7 = vpop.f32.mrf.mxu0  ;;  %v7070_v54 = vpop.f32.mrf.mxu1 }
0x1521   : > { %v6817_v7 = vrot.slane %v6808_v1, %v15981_v55 }
0x1523   : > { %v7027_v35 = vadd.f32 %v7026_v14, %v6817_v7 }
0x153a   : > { %v7266_v62 = vpop.f32.mrf.mxu0  ;;  %v7307_v18 = vpop.f32.mrf.mxu1 }
0x153b   : > { %v7313_v43 = vadd.f32 %v7266_v62, %v7025_v44 }
0x153c   : > { %v7268_v40 = vpop.f32.mrf.mxu0  ;;  %v11509_v26 = vpop.f32.mrf.mxu1 }
0x153d   : > { %v10545_v54 = vmul.f32 -1.442695, %v7313_v43  ;;  %v7314_v13 = vadd.f32 %v7268_v40, %v7027_v35  ;;  %v6825_v43 = vrot.slane %v6808_v1, %v15863_v10  ;;  %v15204_v1 = vld [vmem:[#allocation14 + $0xa8] ss:$12 sps:$4 sm:$0xff]  }
0x153e   : > { %v7270_v47 = vpop.f32.mrf.mxu0  ;;  %v7310_v39 = vpop.f32.mrf.mxu1 }
0x153f   : > { %12702 = vpow2.f32 %v10545_v54  ;;  %v10546_v8 = vmul.f32 -1.442695, %v7314_v13  ;;  %v12223_v13 = vld [vmem:[#allocation14 + $0xb0] ss:$12 sps:$4 sm:$0xff]  }
0x1540   : > { %v7271_v37 = vpop.f32.mrf.mxu0  ;;  %v11510_v45 = vpop.f32.mrf.mxu1 }
0x1541   : > { %12704 = vpow2.f32 %v10546_v8  ;;  %v7068_v37 = vadd.f32 %v7067_v28, %v6825_v43  ;;  %v15215_v28 = vld [vmem:[#allocation14 + $0x90] ss:$12 sps:$4 sm:$0xff]   ;;  %v15232_v43 = vld [vmem:[#allocation14 + $0x60] ss:$12 sps:$4 sm:$0xff]  }
0x1542   : > { %12706 = vpow2.f32 %v10547_v46  ;;  %16053 = vst [vmem:[#allocation68_spill] sm:$0xff] %v15215_v28  ;;  %v15219_v8 = vld [vmem:[#allocation14 + $0x7c] ss:$12 sps:$4 sm:$0xff]   ;;  %16057 = vst [vmem:[#allocation40_spill] sm:$0xff] %v15232_v43 }
0x1543   : > { %16054 = vst [vmem:[#allocation69_spill] sm:$0xff] %v15219_v8 }
0x154c   : > { %v12703_v62 = vpop.eup %12702 }
0x154d   : > { %v7321_v44 = vadd.f32 1.0, %v12703_v62  ;;  %v15225_v62 = vld [vmem:[#allocation14 + $0x78] ss:$12 sps:$4 sm:$0xff]  }
0x154e   : > { %v12705_v26 = vpop.eup %12704  ;;  %16055 = vst [vmem:[#allocation70_spill] sm:$0xff] %v15225_v62 }
0x154f   : > { %12708 = vrcp.f32 %v7321_v44  ;;  %v12707_v20 = vpop.eup %12706  ;;  %v7322_v47 = vadd.f32 1.0, %v12705_v26  ;;  %v12231_v44 = vld [vmem:[#allocation14 + $0x80] ss:$12 sps:$4 sm:$0xff]   ;;  %v15229_v26 = vld [vmem:[#allocation14 + $0x64] ss:$12 sps:$4 sm:$0xff]  }
0x1550   : > { %v7331_v5 = vadd.f32 1.0, %v12707_v20  ;;  %16056 = vst [vmem:[#allocation71_spill] sm:$0xff] %v15229_v26 }
0x1551   : > { %12710 = vrcp.f32 %v7322_v47  ;;  %v12235_v47 = vld [vmem:[#allocation14 + $0x68] ss:$12 sps:$4 sm:$0xff]  }
0x1552   : > { %12712 = vrcp.f32 %v7331_v5  ;;  %v15239_v5 = vld [vmem:[#allocation14 + $0x48] ss:$12 sps:$4 sm:$0xff]  }
0x1553   : > { %16059 = vst [vmem:[#allocation48_spill] sm:$0xff] %v15239_v5 }
0x155c   : > { %v12709_v54 = vpop.eup %12708 }
0x155d   : > { %v7334_v45 = vmul.f32 %v12709_v54, %v7307_v18  ;;  %v15210_v18 = vld [vmem:[#allocation14 + $0x94] ss:$12 sps:$4 sm:$0xff]   ;;  %v15236_v54 = vld [vmem:[#allocation14 + $0x4c] ss:$12 sps:$4 sm:$0xff]  }
0x155e   : > { %v12711_v30 = vpop.eup %12710  ;;  %16052 = vst [vmem:[#allocation67_spill] sm:$0xff] %v15210_v18  ;;  %16058 = vst [vmem:[#allocation46_spill] sm:$0xff] %v15236_v54 }
0x155f   : > { %v7335_v14 = vadd.f32 %v7334_v45, %v7068_v37  ;;  %v12713_v35 = vpop.eup %12712  ;;  %v7338_v46 = vsub.f32 1.0, %v12711_v30  ;;  %v7340_v7 = vmul.f32 %v12711_v30, %v14944_v61  ;;  %v12239_v37 = vld [vmem:[#allocation14 + $0x50] ss:$12 sps:$4 sm:$0xff]   ;;  %v15243_v45 = vld [vmem:[#allocation14 + $0x34] ss:$12 sps:$4 sm:$0xff]  }
0x1560   : > { %16060 = vst [vmem:[#allocation58_spill] sm:$0xff] %v15243_v45  ;;  %v12243_v30 = vld [vmem:[#allocation14 + $0x38] ss:$12 sps:$4 sm:$0xff]   ;;  %v15295_v61 = vld [vmem:[#allocation17 + $0xac] ss:$16 sps:$4 sm:$0xff]  }
0x1561   : > { %12714 = vtanh.f32 %v7335_v14  ;;  %v15246_v14 = vld [vmem:[#allocation14 + $0x30] ss:$12 sps:$4 sm:$0xff]   ;;  %16075 = vst [vmem:[#allocation83_spill] sm:$0xff] %v15295_v61 }
0x1562   : > { %16061 = vst [vmem:[#allocation59_spill] sm:$0xff] %v15246_v14 }
0x156e   : > { %v12715_v11 = vpop.eup %12714 }
0x156f   : > { %v7337_v52 = vmul.f32 %v12715_v11, %v12713_v35  ;;  %v15250_v35 = vld [vmem:[#allocation14 + $0x1c] ss:$12 sps:$4 sm:$0xff]   ;;  %v15253_v11 = vld [vmem:[#allocation14 + $0x18] ss:$12 sps:$4 sm:$0xff]  }
0x1570   : > { %16062 = vst [vmem:[#allocation61_spill] sm:$0xff] %v15250_v35  ;;  %16063 = vst [vmem:[#allocation60_spill] sm:$0xff] %v15253_v11 }
0x1571   : > { %v7339_v40 = vmul.f32 %v7338_v46, %v7337_v52  ;;  %v12247_v52 = vld [vmem:[#allocation14 + $0x20] ss:$12 sps:$4 sm:$0xff]   ;;  %v15257_v46 = vld [vmem:[#allocation14 + $0x4] ss:$12 sps:$4 sm:$0xff]  }
0x1572   : > { %16064 = vst [vmem:[#allocation72_spill] sm:$0xff] %v15257_v46 }
0x1573   : > { %v15202_v39 = vadd.f32 %v7340_v7, %v7339_v40  ;;  %v15260_v40 = vld [vmem:[#allocation14] ss:$12 sps:$4 sm:$0xff]   ;;  %v12251_v7 = vld [vmem:[#allocation14 + $0x8] ss:$12 sps:$4 sm:$0xff]  }
0x1574   : > { %16065 = vst [vmem:[#allocation73_spill] sm:$0xff] %v15260_v40 }
0x1575   : > { %v15208_v20 = vpack.c.bf16 %v15202_v39, %v15202_v39 }
0x1577   : > { %7596 = vmatmul.mubr.bf16.vlgmr.msra.gmra.mxu0 %v15208_v20  ;;  %7637 = vmatmul.mubr.bf16.vlgmr.msra.gmra.mxu1 %v15208_v20 }
0x1578   : > { %7806 = vmatpush1.bf16.msra.mxu0 %v15204_v1  ;;  %11512 = vmatpush3.bf16.msra.mxu1 %v12223_v13  ;;  %v15269_v13 = vld [vmem:[#allocation17 + $0xe4] ss:$16 sps:$4 sm:$0xff]  }
0x1579   : > { %7807 = vmatprep.subr.bf16.mxu0 %v15210_v18  ;;  %11513 = vmatprep.subr.bf16.mxu1 %v15839_v42  ;;  %16066 = vst [vmem:[#allocation74_spill] sm:$0xff] %v15269_v13 }
0x157a   : > { %7837 = vmatprep.mubr.bf16.mxu0 %v15838_v4  ;;  %11527 = vmatprep.mubr.msk.bf16.mxu1 %vm13170_vm0, %v15839_v42 }
0x157c   : > { %7808 = vmatpush1.bf16.msra.mxu0 %v15215_v28  ;;  %11514 = vmatpush3.bf16.msra.mxu1 %v12227_v3  ;;  %v15271_v3 = vld [vmem:[#allocation17 + $0xec] ss:$16 sps:$4 sm:$0xff]  }
0x157d   : > { %7809 = vmatprep.subr.bf16.mxu0 %v15219_v8  ;;  %11515 = vmatprep.subr.bf16.mxu1 %v15839_v42  ;;  %16067 = vst [vmem:[#allocation75_spill] sm:$0xff] %v15271_v3 }
0x1580   : > { %7810 = vmatpush1.bf16.msra.mxu0 %v15225_v62  ;;  %11516 = vmatpush3.bf16.msra.mxu1 %v12231_v44  ;;  %v15273_v44 = vld [vmem:[#allocation17 + $0xe0] ss:$16 sps:$4 sm:$0xff]  }
0x1581   : > { %7811 = vmatprep.subr.bf16.mxu0 %v15229_v26  ;;  %11517 = vmatprep.subr.bf16.mxu1 %v15839_v42  ;;  %16068 = vst [vmem:[#allocation76_spill] sm:$0xff] %v15273_v44 }
0x1584   : > { %7812 = vmatpush1.bf16.msra.mxu0 %v15232_v43  ;;  %11518 = vmatpush3.bf16.msra.mxu1 %v12235_v47  ;;  %v15275_v47 = vld [vmem:[#allocation17 + $0xe8] ss:$16 sps:$4 sm:$0xff]  }
0x1585   : > { %7813 = vmatprep.subr.bf16.mxu0 %v15236_v54  ;;  %11519 = vmatprep.subr.bf16.mxu1 %v15839_v42  ;;  %16069 = vst [vmem:[#allocation77_spill] sm:$0xff] %v15275_v47 }
0x1588   : > { %7814 = vmatpush1.bf16.msra.mxu0 %v15239_v5  ;;  %11520 = vmatpush3.bf16.msra.mxu1 %v12239_v37  ;;  %v15283_v37 = vld [vmem:[#allocation17 + $0xcc] ss:$16 sps:$4 sm:$0xff]  }
0x1589   : > { %7815 = vmatprep.subr.bf16.mxu0 %v15243_v45  ;;  %11521 = vmatprep.subr.bf16.mxu1 %v15839_v42  ;;  %16071 = vst [vmem:[#allocation79_spill] sm:$0xff] %v15283_v37 }
0x158c   : > { %7816 = vmatpush1.bf16.msra.mxu0 %v15246_v14  ;;  %11522 = vmatpush3.bf16.msra.mxu1 %v12243_v30  ;;  %v15285_v30 = vld [vmem:[#allocation17 + $0xc0] ss:$16 sps:$4 sm:$0xff]  }
0x158d   : > { %7817 = vmatprep.subr.bf16.mxu0 %v15250_v35  ;;  %11523 = vmatprep.subr.bf16.mxu1 %v15839_v42  ;;  %16072 = vst [vmem:[#allocation80_spill] sm:$0xff] %v15285_v30 }
0x1590   : > { %7818 = vmatpush1.bf16.msra.mxu0 %v15253_v11  ;;  %11524 = vmatpush3.bf16.msra.mxu1 %v12247_v52  ;;  %v15287_v52 = vld [vmem:[#allocation17 + $0xc8] ss:$16 sps:$4 sm:$0xff]  }
0x1591   : > { %7819 = vmatprep.subr.bf16.mxu0 %v15257_v46  ;;  %11525 = vmatprep.subr.bf16.mxu1 %v15839_v42  ;;  %16073 = vst [vmem:[#allocation81_spill] sm:$0xff] %v15287_v52 }
0x1594   : > { %7820 = vmatpush1.bf16.msra.mxu0 %v15260_v40  ;;  %11526 = vmatpush3.bf16.msra.mxu1 %v12251_v7  ;;  %v15293_v7 = vld [vmem:[#allocation17 + $0xa4] ss:$16 sps:$4 sm:$0xff]  }
0x1595   : > { %8130 = vmatprep.subr.bf16.mxu0 %v15269_v13  ;;  %8171 = vmatprep.subr.bf16.mxu1 %v15271_v3  ;;  %16074 = vst [vmem:[#allocation82_spill] sm:$0xff] %v15293_v7  ;;  %v15339_v3 = vld [vmem:[#allocation17 + $0x24] ss:$16 sps:$4 sm:$0xff]   ;;  %v15352_v13 = vld [vmem:[#allocation17 + $0xc] ss:$16 sps:$4 sm:$0xff]  }
0x1596   : > { %16090 = vst [vmem:[#allocation97_spill] sm:$0xff] %v15339_v3  ;;  %16095 = vst [vmem:[#allocation102_spill] sm:$0xff] %v15352_v13 }
0x1597   : > { %7838 = vmatmul.mubr.bf16.vlgmr.msra.gmra.mxu0 %v15032_v63  ;;  %11528 = vmatmul.mubr.bf16.vlgmr.msra.gmra.mxu1 %v15032_v63  ;;  %v15281_v63 = vld [vmem:[#allocation17 + $0xc4] ss:$16 sps:$4 sm:$0xff]  }
0x1598   : > { %8162 = vmatprep.mubr.bf16.mxu0 %v15838_v4  ;;  %8203 = vmatprep.mubr.bf16.mxu1 %v15838_v4  ;;  %16070 = vst [vmem:[#allocation78_spill] sm:$0xff] %v15281_v63 }
0x1599   : > { %8131 = vmatpush1.bf16.msra.mxu0 %v15273_v44  ;;  %8172 = vmatpush1.bf16.msra.mxu1 %v15275_v47  ;;  %v15297_v47 = vld [vmem:[#allocation17 + $0xa0] ss:$16 sps:$4 sm:$0xff]   ;;  %v15299_v44 = vld [vmem:[#allocation17 + $0xa8] ss:$16 sps:$4 sm:$0xff]  }
0x159a   : > { %8132 = vmatprep.subr.bf16.mxu0 %v15281_v63  ;;  %8173 = vmatprep.subr.bf16.mxu1 %v15283_v37  ;;  %16076 = vst [vmem:[#allocation50_spill] sm:$0xff] %v15297_v47  ;;  %16077 = vst [vmem:[#allocation84_spill] sm:$0xff] %v15299_v44  ;;  %v15305_v37 = vld [vmem:[#allocation17 + $0x84] ss:$16 sps:$4 sm:$0xff]   ;;  %v15311_v63 = vld [vmem:[#allocation17 + $0x88] ss:$16 sps:$4 sm:$0xff]  }
0x159b   : > { %16078 = vst [vmem:[#allocation85_spill] sm:$0xff] %v15305_v37  ;;  %16081 = vst [vmem:[#allocation88_spill] sm:$0xff] %v15311_v63 }
0x159d   : > { %8133 = vmatpush1.bf16.msra.mxu0 %v15285_v30  ;;  %8174 = vmatpush1.bf16.msra.mxu1 %v15287_v52  ;;  %v15307_v30 = vld [vmem:[#allocation17 + $0x8c] ss:$16 sps:$4 sm:$0xff]   ;;  %v15309_v52 = vld [vmem:[#allocation17 + $0x80] ss:$16 sps:$4 sm:$0xff]  }
0x159e   : > { %8134 = vmatprep.subr.bf16.mxu0 %v15293_v7  ;;  %8175 = vmatprep.subr.bf16.mxu1 %v15295_v61  ;;  %16079 = vst [vmem:[#allocation86_spill] sm:$0xff] %v15307_v30  ;;  %16080 = vst [vmem:[#allocation87_spill] sm:$0xff] %v15309_v52  ;;  %v15317_v61 = vld [vmem:[#allocation17 + $0x64] ss:$16 sps:$4 sm:$0xff]   ;;  %v15323_v7 = vld [vmem:[#allocation17 + $0x68] ss:$16 sps:$4 sm:$0xff]  }
0x159f   : > { %16082 = vst [vmem:[#allocation89_spill] sm:$0xff] %v15317_v61  ;;  %16085 = vst [vmem:[#allocation92_spill] sm:$0xff] %v15323_v7 }
0x15a1   : > { %8135 = vmatpush1.bf16.msra.mxu0 %v15297_v47  ;;  %8176 = vmatpush1.bf16.msra.mxu1 %v15299_v44  ;;  %v15319_v47 = vld [vmem:[#allocation17 + $0x6c] ss:$16 sps:$4 sm:$0xff]   ;;  %v15321_v44 = vld [vmem:[#allocation17 + $0x60] ss:$16 sps:$4 sm:$0xff]  }
0x15a2   : > { %8136 = vmatprep.subr.bf16.mxu0 %v15305_v37  ;;  %8177 = vmatprep.subr.bf16.mxu1 %v15307_v30  ;;  %16083 = vst [vmem:[#allocation90_spill] sm:$0xff] %v15319_v47  ;;  %16084 = vst [vmem:[#allocation91_spill] sm:$0xff] %v15321_v44  ;;  %v15329_v30 = vld [vmem:[#allocation17 + $0x44] ss:$16 sps:$4 sm:$0xff]   ;;  %v15335_v37 = vld [vmem:[#allocation17 + $0x48] ss:$16 sps:$4 sm:$0xff]  }
0x15a3   : > { %16086 = vst [vmem:[#allocation93_spill] sm:$0xff] %v15329_v30  ;;  %16089 = vst [vmem:[#allocation96_spill] sm:$0xff] %v15335_v37 }
0x15a5   : > { %8137 = vmatpush1.bf16.msra.mxu0 %v15309_v52  ;;  %8178 = vmatpush1.bf16.msra.mxu1 %v15311_v63  ;;  %v15331_v52 = vld [vmem:[#allocation17 + $0x4c] ss:$16 sps:$4 sm:$0xff]   ;;  %v15333_v63 = vld [vmem:[#allocation17 + $0x40] ss:$16 sps:$4 sm:$0xff]  }
0x15a6   : > { %8138 = vmatprep.subr.bf16.mxu0 %v15317_v61  ;;  %8179 = vmatprep.subr.bf16.mxu1 %v15319_v47  ;;  %16087 = vst [vmem:[#allocation94_spill] sm:$0xff] %v15331_v52  ;;  %16088 = vst [vmem:[#allocation95_spill] sm:$0xff] %v15333_v63  ;;  %v15347_v47 = vld [vmem:[#allocation17 + $0x2c] ss:$16 sps:$4 sm:$0xff]   ;;  %v15350_v61 = vld [vmem:[#allocation17 + $0x4] ss:$16 sps:$4 sm:$0xff]  }
0x15a7   : > { %16093 = vst [vmem:[#allocation100_spill] sm:$0xff] %v15347_v47  ;;  %16094 = vst [vmem:[#allocation101_spill] sm:$0xff] %v15350_v61 }
0x15a9   : > { %8139 = vmatpush1.bf16.msra.mxu0 %v15321_v44  ;;  %8180 = vmatpush1.bf16.msra.mxu1 %v15323_v7  ;;  %v15343_v44 = vld [vmem:[#allocation17 + $0x20] ss:$16 sps:$4 sm:$0xff]   ;;  %v15345_v7 = vld [vmem:[#allocation17 + $0x28] ss:$16 sps:$4 sm:$0xff]  }
0x15aa   : > { %8140 = vmatprep.subr.bf16.mxu0 %v15329_v30  ;;  %8181 = vmatprep.subr.bf16.mxu1 %v15331_v52  ;;  %16091 = vst [vmem:[#allocation98_spill] sm:$0xff] %v15343_v44  ;;  %16092 = vst [vmem:[#allocation99_spill] sm:$0xff] %v15345_v7  ;;  %v16098_v52 = vld [vmem:[#allocation39_spill] sm:$0xff] }
0x15ab   : > { %v9986_v30 = vmul.f32 -1.442695, %v16098_v52 }
0x15ad   : > { %8141 = vmatpush1.bf16.msra.mxu0 %v15333_v63  ;;  %8182 = vmatpush1.bf16.msra.mxu1 %v15335_v37  ;;  %v15357_v63 = vld [vmem:[#allocation17] ss:$16 sps:$4 sm:$0xff]   ;;  %v15359_v37 = vld [vmem:[#allocation17 + $0x8] ss:$16 sps:$4 sm:$0xff]   ;;  %12716 = vpow2.f32 %v9986_v30 }
0x15ae   : > { %8142 = vmatprep.subr.bf16.mxu0 %v15339_v3  ;;  %8183 = vmatprep.subr.bf16.mxu1 %v15347_v47  ;;  %16096 = vst [vmem:[#allocation103_spill] sm:$0xff] %v15357_v63  ;;  %16097 = vst [vmem:[#allocation106_spill] sm:$0xff] %v15359_v37 }
0x15b1   : > { %8143 = vmatpush1.bf16.msra.mxu0 %v15343_v44  ;;  %8184 = vmatpush1.bf16.msra.mxu1 %v15345_v7 }
0x15b2   : > { %8144 = vmatprep.subr.bf16.mxu0 %v15350_v61  ;;  %8185 = vmatprep.subr.bf16.mxu1 %v15352_v13 }
0x15b5   : > { %8145 = vmatpush1.bf16.msra.mxu0 %v15357_v63  ;;  %8186 = vmatpush1.bf16.msra.mxu1 %v15359_v37  ;;  %v7381_v37 = vld [vmem:[%s15615_s3] sm:$0xf] }
0x15b6   : > { %8372 = vmatprep.subr.bf16.mxu0 %v15014_v29  ;;  %11531 = vmatprep.subr.bf16.mxu1 %v15839_v42  ;;  %v7386_v29 = vrot.slane %v7381_v37, %v15980_v41  ;;  %v7394_v52 = vrot.slane %v7381_v37, %v15954_v49 }
0x15ba   : > { %v12717_v13 = vpop.eup %12716 }
0x15bb   : > { %v786_v35 = vadd.f32 1.0, %v12717_v13 }
0x15bd   : > { %12718 = vrcp.f32 %v786_v35 }
0x15ca   : > { %v12719_v8 = vpop.eup %12718 }
0x1637   : > { %v7597_v47 = vpop.f32.mrf.mxu0  ;;  %v7638_v44 = vpop.f32.mrf.mxu1 }
0x1638   : > { %v7598_v63 = vadd.f32 %v7597_v47, %v7386_v29  ;;  %v7639_v54 = vadd.f32 %v7638_v44, %v7394_v52 }
0x1639   : > { %v7599_v3 = vpop.f32.mrf.mxu0  ;;  %v7640_v7 = vpop.f32.mrf.mxu1 }
0x163a   : > { %v7900_v47 = vadd.f32 %v12719_v8, %v7639_v54 }
0x163b   : > { %v7601_v40 = vpop.f32.mrf.mxu0  ;;  %v7642_v46 = vpop.f32.mrf.mxu1 }
0x163c   : > { %v10606_v28 = vmul.f32 -1.442695, %v7900_v47 }
0x163d   : > { %v7602_v11 = vpop.f32.mrf.mxu0  ;;  %v7643_v61 = vpop.f32.mrf.mxu1 }
0x163e   : > { %v7390_v61 = vrot.slane %v7381_v37, %v15981_v55 }
0x1640   : > { %v7600_v62 = vadd.f32 %v7599_v3, %v7390_v61 }
0x1657   : > { %v7839_v14 = vpop.f32.mrf.mxu0  ;;  %v7880_v45 = vpop.f32.mrf.mxu1 }
0x1658   : > { %v7886_v5 = vadd.f32 %v7839_v14, %v7598_v63 }
0x1659   : > { %v7841_v40 = vpop.f32.mrf.mxu0  ;;  %v11529_v46 = vpop.f32.mrf.mxu1 }
0x165a   : > { %v10604_v11 = vmul.f32 -1.442695, %v7886_v5  ;;  %v7887_v35 = vadd.f32 %v7841_v40, %v7600_v62  ;;  %v7398_v5 = vrot.slane %v7381_v37, %v15863_v10  ;;  %v12300_v37 = vld [vmem:[#allocation19 + $0xb0] ss:$12 sps:$4 sm:$0xff]  }
0x165b   : > { %v7843_v30 = vpop.f32.mrf.mxu0  ;;  %v7883_v13 = vpop.f32.mrf.mxu1 }
0x165c   : > { %12720 = vpow2.f32 %v10604_v11  ;;  %v10605_v29 = vmul.f32 -1.442695, %v7887_v35 }
0x165d   : > { %v7844_v43 = vpop.f32.mrf.mxu0  ;;  %v11530_v26 = vpop.f32.mrf.mxu1 }
0x165e   : > { %12722 = vpow2.f32 %v10605_v29  ;;  %v7641_v43 = vadd.f32 %v7640_v7, %v7398_v5 }
0x165f   : > { %12724 = vpow2.f32 %v10606_v28 }
0x1669   : > { %v12721_v14 = vpop.eup %12720 }
0x166a   : > { %v7894_v63 = vadd.f32 1.0, %v12721_v14 }
0x166b   : > { %v12723_v46 = vpop.eup %12722 }
0x166c   : > { %12726 = vrcp.f32 %v7894_v63  ;;  %v12725_v18 = vpop.eup %12724  ;;  %v7895_v30 = vadd.f32 1.0, %v12723_v46  ;;  %v7948_v46 = vld [vmem:[%s15619_s7] sm:$0xf] }
0x166d   : > { %v7904_v44 = vadd.f32 1.0, %v12725_v18  ;;  %v7953_v5 = vrot.slane %v7948_v46, %v15980_v41 }
0x166e   : > { %12728 = vrcp.f32 %v7895_v30 }
0x166f   : > { %12730 = vrcp.f32 %v7904_v44 }
0x1679   : > { %v12727_v11 = vpop.eup %12726 }
0x167a   : > { %v7907_v26 = vmul.f32 %v12727_v11, %v7880_v45  ;;  %v12301_v45 = vld [vmem:[#allocation19 + $0x98] ss:$12 sps:$4 sm:$0xff]  }
0x167b   : > { %v12729_v8 = vpop.eup %12728 }
0x167c   : > { %v7908_v3 = vadd.f32 %v7907_v26, %v7641_v43  ;;  %v12731_v62 = vpop.eup %12730  ;;  %v7911_v28 = vsub.f32 1.0, %v12729_v8  ;;  %v7913_v61 = vmul.f32 %v12729_v8, %v15026_v27  ;;  %v12302_v27 = vld [vmem:[#allocation19 + $0x80] ss:$12 sps:$4 sm:$0xff]   ;;  %v7961_v26 = vrot.slane %v7948_v46, %v15954_v49 }
0x167e   : > { %12732 = vtanh.f32 %v7908_v3 }
0x168b   : > { %v12733_v54 = vpop.eup %12732 }
0x168c   : > { %v7910_v52 = vmul.f32 %v12733_v54, %v12731_v62  ;;  %v7957_v62 = vrot.slane %v7948_v46, %v15981_v55 }
0x168e   : > { %v7912_v40 = vmul.f32 %v7911_v28, %v7910_v52 }
0x1690   : > { %v15376_v13 = vadd.f32 %v7913_v61, %v7912_v40 }
0x1692   : > { %v15380_v18 = vpack.c.bf16 %v15376_v13, %v15376_v13 }
0x1694   : > { %8163 = vmatmul.mubr.bf16.vlgmr.msra.gmra.mxu0 %v15380_v18  ;;  %8204 = vmatmul.mubr.bf16.vlgmr.msra.gmra.mxu1 %v15380_v18 }
0x1695   : > { %8373 = vmatpush1.bf16.msra.mxu0 %v15028_v31  ;;  %11532 = vmatpush3.bf16.msra.mxu1 %v12300_v37  ;;  %v12303_v31 = vld [vmem:[#allocation19 + $0x68] ss:$12 sps:$4 sm:$0xff]  }
0x1696   : > { %8374 = vmatprep.subr.bf16.mxu0 %v15034_v17  ;;  %11533 = vmatprep.subr.bf16.mxu1 %v15839_v42  ;;  %v12304_v17 = vld [vmem:[#allocation19 + $0x50] ss:$12 sps:$4 sm:$0xff]  }
0x1697   : > { %8404 = vmatprep.mubr.bf16.mxu0 %v15838_v4  ;;  %11547 = vmatprep.mubr.msk.bf16.mxu1 %vm13170_vm0, %v15839_v42 }
0x1699   : > { %8375 = vmatpush1.bf16.msra.mxu0 %v15039_v24  ;;  %11534 = vmatpush3.bf16.msra.mxu1 %v12301_v45  ;;  %v12305_v24 = vld [vmem:[#allocation19 + $0x38] ss:$12 sps:$4 sm:$0xff]  }
0x169a   : > { %8376 = vmatprep.subr.bf16.mxu0 %v15043_v50  ;;  %11535 = vmatprep.subr.bf16.mxu1 %v15839_v42  ;;  %v12306_v50 = vld [vmem:[#allocation19 + $0x20] ss:$12 sps:$4 sm:$0xff]  }
0x169d   : > { %8377 = vmatpush1.bf16.msra.mxu0 %v15049_v9  ;;  %11536 = vmatpush3.bf16.msra.mxu1 %v12302_v27  ;;  %v12307_v9 = vld [vmem:[#allocation19 + $0x8] ss:$12 sps:$4 sm:$0xff]  }
0x169e   : > { %8378 = vmatprep.subr.bf16.mxu0 %v15053_v57  ;;  %11537 = vmatprep.subr.bf16.mxu1 %v15839_v42  ;;  %v16099_v57 = vld [vmem:[#allocation47_spill] sm:$0xff] }
0x16a1   : > { %8379 = vmatpush1.bf16.msra.mxu0 %v15056_v2  ;;  %11538 = vmatpush3.bf16.msra.mxu1 %v12303_v31  ;;  %v16100_v2 = vld [vmem:[#allocation49_spill] sm:$0xff] }
0x16a2   : > { %8380 = vmatprep.subr.bf16.mxu0 %v15060_v53  ;;  %11539 = vmatprep.subr.bf16.mxu1 %v15839_v42  ;;  %v16101_v53 = vld [vmem:[#allocation34_spill] sm:$0xff] }
0x16a5   : > { %8381 = vmatpush1.bf16.msra.mxu0 %v15063_v36  ;;  %11540 = vmatpush3.bf16.msra.mxu1 %v12304_v17  ;;  %v16102_v36 = vld [vmem:[#allocation51_spill] sm:$0xff] }
0x16a6   : > { %8382 = vmatprep.subr.bf16.mxu0 %v15067_v0  ;;  %11541 = vmatprep.subr.bf16.mxu1 %v15839_v42  ;;  %v16103_v0 = vld [vmem:[#allocation35_spill] sm:$0xff] }
0x16a9   : > { %8383 = vmatpush1.bf16.msra.mxu0 %v15070_v16  ;;  %11542 = vmatpush3.bf16.msra.mxu1 %v12305_v24  ;;  %v16104_v16 = vld [vmem:[#allocation37_spill] sm:$0xff] }
0x16aa   : > { %8384 = vmatprep.subr.bf16.mxu0 %v15074_v59  ;;  %11543 = vmatprep.subr.bf16.mxu1 %v15839_v42  ;;  %v16105_v59 = vld [vmem:[#allocation36_spill] sm:$0xff] }
0x16ad   : > { %8385 = vmatpush1.bf16.msra.mxu0 %v15077_v51  ;;  %11544 = vmatpush3.bf16.msra.mxu1 %v12306_v50  ;;  %v16106_v51 = vld [vmem:[#allocation33_spill] sm:$0xff] }
0x16ae   : > { %8386 = vmatprep.subr.bf16.mxu0 %v15081_v33  ;;  %11545 = vmatprep.subr.bf16.mxu1 %v15839_v42  ;;  %v16107_v33 = vld [vmem:[#allocation52_spill] sm:$0xff] }
0x16b1   : > { %8387 = vmatpush1.bf16.msra.mxu0 %v15084_v25  ;;  %11546 = vmatpush3.bf16.msra.mxu1 %v12307_v9  ;;  %v16108_v25 = vld [vmem:[#allocation53_spill] sm:$0xff] }
0x16b2   : > { %8703 = vmatprep.subr.bf16.mxu0 %v15093_v60  ;;  %8744 = vmatprep.subr.bf16.mxu1 %v15095_v32  ;;  %v16109_v60 = vld [vmem:[#allocation54_spill] sm:$0xff]  ;;  %v16110_v32 = vld [vmem:[#allocation55_spill] sm:$0xff] }
0x16b4   : > { %8405 = vmatmul.mubr.bf16.vlgmr.msra.gmra.mxu0 %v15208_v20  ;;  %11548 = vmatmul.mubr.bf16.vlgmr.msra.gmra.mxu1 %v15208_v20 }
0x16b5   : > { %8704 = vmatpush1.bf16.msra.mxu0 %v15097_v48  ;;  %8745 = vmatpush1.bf16.msra.mxu1 %v15099_v23  ;;  %v16111_v48 = vld [vmem:[#allocation57_spill] sm:$0xff]  ;;  %v16112_v23 = vld [vmem:[#allocation56_spill] sm:$0xff] }
0x16b6   : > { %8705 = vmatprep.subr.bf16.mxu0 %v15105_v22  ;;  %8746 = vmatprep.subr.bf16.mxu1 %v15107_v15  ;;  %v16113_v22 = vld [vmem:[#allocation62_spill] sm:$0xff]  ;;  %v16114_v15 = vld [vmem:[#allocation63_spill] sm:$0xff] }
0x16b7   : > { %8735 = vmatprep.mubr.bf16.mxu0 %v15838_v4  ;;  %8776 = vmatprep.mubr.bf16.mxu1 %v15838_v4 }
0x16b9   : > { %8706 = vmatpush1.bf16.msra.mxu0 %v15109_v12  ;;  %8747 = vmatpush1.bf16.msra.mxu1 %v15111_v56  ;;  %v16115_v12 = vld [vmem:[#allocation64_spill] sm:$0xff]  ;;  %v16116_v56 = vld [vmem:[#allocation65_spill] sm:$0xff] }
0x16ba   : > { %8707 = vmatprep.subr.bf16.mxu0 %v15117_v58  ;;  %8748 = vmatprep.subr.bf16.mxu1 %v15119_v38  ;;  %v16117_v58 = vld [vmem:[#allocation66_spill] sm:$0xff] }
0x16bd   : > { %8708 = vmatpush1.bf16.msra.mxu0 %v15121_v19  ;;  %8749 = vmatpush1.bf16.msra.mxu1 %v15123_v21 }
0x16be   : > { %8709 = vmatprep.subr.bf16.mxu0 %v15129_v34  ;;  %8750 = vmatprep.subr.bf16.mxu1 %v15131_v6  ;;  %v16118_v6 = vld [vmem:[#allocation38_spill] sm:$0xff] }
0x16bf   : > { %v10006_v20 = vmul.f32 -1.442695, %v16118_v6  ;;  %v12310_v6 = vld [vmem:[#allocation14 + $0x80] ss:$12 sps:$4 sm:$0xff]  }
0x16c1   : > { %8710 = vmatpush1.bf16.msra.mxu0 %v16099_v57  ;;  %8751 = vmatpush1.bf16.msra.mxu1 %v16100_v2  ;;  %12734 = vpow2.f32 %v10006_v20  ;;  %v16121_v20 = vld [vmem:[#allocation69_spill] sm:$0xff] }
0x16c2   : > { %8711 = vmatprep.subr.bf16.mxu0 %v16101_v53  ;;  %8752 = vmatprep.subr.bf16.mxu1 %v16102_v36  ;;  %v7965_v36 = vrot.slane %v7948_v46, %v15863_v10  ;;  %v12313_v46 = vld [vmem:[#allocation14 + $0x38] ss:$12 sps:$4 sm:$0xff]  }
0x16c5   : > { %8712 = vmatpush1.bf16.msra.mxu0 %v16103_v0  ;;  %8753 = vmatpush1.bf16.msra.mxu1 %v16104_v16 }
0x16c6   : > { %8713 = vmatprep.subr.bf16.mxu0 %v16105_v59  ;;  %8754 = vmatprep.subr.bf16.mxu1 %v16106_v51 }
0x16c9   : > { %8714 = vmatpush1.bf16.msra.mxu0 %v16107_v33  ;;  %8755 = vmatpush1.bf16.msra.mxu1 %v16108_v25 }
0x16ca   : > { %8715 = vmatprep.subr.bf16.mxu0 %v16109_v60  ;;  %8756 = vmatprep.subr.bf16.mxu1 %v16110_v32 }
0x16cd   : > { %8716 = vmatpush1.bf16.msra.mxu0 %v16111_v48  ;;  %8757 = vmatpush1.bf16.msra.mxu1 %v16112_v23 }
0x16ce   : > { %8717 = vmatprep.subr.bf16.mxu0 %v16113_v22  ;;  %8758 = vmatprep.subr.bf16.mxu1 %v16114_v15  ;;  %v12735_v14 = vpop.eup %12734 }
0x16cf   : > { %v1015_v63 = vadd.f32 1.0, %v12735_v14  ;;  %v16125_v14 = vld [vmem:[#allocation46_spill] sm:$0xff] }
0x16d1   : > { %8718 = vmatpush1.bf16.msra.mxu0 %v16115_v12  ;;  %8759 = vmatpush1.bf16.msra.mxu1 %v16116_v56  ;;  %12736 = vrcp.f32 %v1015_v63  ;;  %v16126_v63 = vld [vmem:[#allocation48_spill] sm:$0xff] }
0x16d2   : > { %8945 = vmatprep.subr.bf16.mxu0 %v16117_v58  ;;  %11551 = vmatprep.subr.bf16.mxu1 %v15839_v42  ;;  %v12308_v58 = vld [vmem:[#allocation14 + $0xb0] ss:$12 sps:$4 sm:$0xff]  }
0x16de   : > { %v12737_v27 = vpop.eup %12736 }
0x1754   : > { %v8164_v38 = vpop.f32.mrf.mxu0  ;;  %v8205_v19 = vpop.f32.mrf.mxu1 }
0x1755   : > { %v8165_v30 = vadd.f32 %v8164_v38, %v7953_v5  ;;  %v8206_v40 = vadd.f32 %v8205_v19, %v7961_v26  ;;  %v12309_v19 = vld [vmem:[#allocation14 + $0x98] ss:$12 sps:$4 sm:$0xff]   ;;  %v16127_v5 = vld [vmem:[#allocation58_spill] sm:$0xff] }
0x1756   : > { %v8166_v21 = vpop.f32.mrf.mxu0  ;;  %v8207_v34 = vpop.f32.mrf.mxu1  ;;  %v12315_v26 = vld [vmem:[#allocation14 + $0x8] ss:$12 sps:$4 sm:$0xff]  }
0x1757   : > { %v8167_v45 = vadd.f32 %v8166_v21, %v7957_v62  ;;  %v8467_v17 = vadd.f32 %v12737_v27, %v8206_v40  ;;  %v8208_v51 = vadd.f32 %v8207_v34, %v7965_v36  ;;  %v16119_v21 = vld [vmem:[#allocation67_spill] sm:$0xff]  ;;  %v16120_v34 = vld [vmem:[#allocation68_spill] sm:$0xff]  ;;  %v16133_v62 = vld [vmem:[#allocation74_spill] sm:$0xff] }
0x1758   : > { %v8168_v7 = vpop.f32.mrf.mxu0  ;;  %v8209_v35 = vpop.f32.mrf.mxu1  ;;  %v16137_v40 = vld [vmem:[#allocation78_spill] sm:$0xff]  ;;  %v16151_v36 = vld [vmem:[#allocation91_spill] sm:$0xff] }
0x1759   : > { %v10665_v50 = vmul.f32 -1.442695, %v8467_v17  ;;  %v12311_v7 = vld [vmem:[#allocation14 + $0x68] ss:$12 sps:$4 sm:$0xff]   ;;  %v16144_v17 = vld [vmem:[#allocation84_spill] sm:$0xff] }
0x175a   : > { %v8169_v47 = vpop.f32.mrf.mxu0  ;;  %v8210_v29 = vpop.f32.mrf.mxu1  ;;  %v16123_v35 = vld [vmem:[#allocation71_spill] sm:$0xff]  ;;  %v16141_v27 = vld [vmem:[#allocation82_spill] sm:$0xff] }
0x175b   : > { %v16124_v47 = vld [vmem:[#allocation40_spill] sm:$0xff] }
0x175c   : > { %v12312_v29 = vld [vmem:[#allocation14 + $0x50] ss:$12 sps:$4 sm:$0xff]  }
0x1774   : > { %v8406_v11 = vpop.f32.mrf.mxu0  ;;  %v8447_v44 = vpop.f32.mrf.mxu1 }
0x1775   : > { %v8453_v43 = vadd.f32 %v8406_v11, %v8165_v30  ;;  %v16128_v30 = vld [vmem:[#allocation59_spill] sm:$0xff]  ;;  %v12314_v11 = vld [vmem:[#allocation14 + $0x20] ss:$12 sps:$4 sm:$0xff]  }
0x1776   : > { %v8408_v3 = vpop.f32.mrf.mxu0  ;;  %v11549_v8 = vpop.f32.mrf.mxu1 }
0x1777   : > { %v10663_v54 = vmul.f32 -1.442695, %v8453_v43  ;;  %v8454_v31 = vadd.f32 %v8408_v3, %v8167_v45  ;;  %v16130_v43 = vld [vmem:[#allocation60_spill] sm:$0xff]  ;;  %v16132_v8 = vld [vmem:[#allocation73_spill] sm:$0xff] }
0x1778   : > { %v8410_v52 = vpop.f32.mrf.mxu0  ;;  %v8450_v28 = vpop.f32.mrf.mxu1  ;;  %v16131_v3 = vld [vmem:[#allocation72_spill] sm:$0xff]  ;;  %v16140_v45 = vld [vmem:[#allocation81_spill] sm:$0xff] }
0x1779   : > { %12738 = vpow2.f32 %v10663_v54  ;;  %v10664_v24 = vmul.f32 -1.442695, %v8454_v31  ;;  %v16134_v54 = vld [vmem:[#allocation75_spill] sm:$0xff]  ;;  %v16135_v52 = vld [vmem:[#allocation76_spill] sm:$0xff]  ;;  %v16136_v28 = vld [vmem:[#allocation77_spill] sm:$0xff] }
0x177a   : > { %v8411_v61 = vpop.f32.mrf.mxu0  ;;  %v11550_v37 = vpop.f32.mrf.mxu1  ;;  %v16142_v31 = vld [vmem:[#allocation83_spill] sm:$0xff] }
0x177b   : > { %12740 = vpow2.f32 %v10664_v24  ;;  %v16138_v61 = vld [vmem:[#allocation79_spill] sm:$0xff]  ;;  %v16139_v37 = vld [vmem:[#allocation80_spill] sm:$0xff]  ;;  %v16145_v24 = vld [vmem:[#allocation85_spill] sm:$0xff] }
0x177c   : > { %12742 = vpow2.f32 %v10665_v50  ;;  %v16146_v50 = vld [vmem:[#allocation86_spill] sm:$0xff] }
0x1786   : > { %v12739_v9 = vpop.eup %12738 }
0x1787   : > { %v8461_v57 = vadd.f32 1.0, %v12739_v9  ;;  %v16147_v9 = vld [vmem:[#allocation87_spill] sm:$0xff] }
0x1788   : > { %v12741_v2 = vpop.eup %12740 }
0x1789   : > { %12744 = vrcp.f32 %v8461_v57  ;;  %v12743_v53 = vpop.eup %12742  ;;  %v8462_v0 = vadd.f32 1.0, %v12741_v2  ;;  %v16148_v57 = vld [vmem:[#allocation88_spill] sm:$0xff]  ;;  %v16149_v2 = vld [vmem:[#allocation89_spill] sm:$0xff] }
0x178a   : > { %v8471_v59 = vadd.f32 1.0, %v12743_v53  ;;  %v16150_v53 = vld [vmem:[#allocation90_spill] sm:$0xff] }
0x178b   : > { %12746 = vrcp.f32 %v8462_v0  ;;  %v16152_v0 = vld [vmem:[#allocation92_spill] sm:$0xff] }
0x178c   : > { %12748 = vrcp.f32 %v8471_v59  ;;  %v16154_v59 = vld [vmem:[#allocation94_spill] sm:$0xff] }
0x1796   : > { %v12745_v16 = vpop.eup %12744 }
0x1797   : > { %v8474_v33 = vmul.f32 %v12745_v16, %v8447_v44  ;;  %v16129_v44 = vld [vmem:[#allocation61_spill] sm:$0xff] }
0x1798   : > { %v12747_v60 = vpop.eup %12746  ;;  %v16153_v16 = vld [vmem:[#allocation93_spill] sm:$0xff] }
0x1799   : > { %v8475_v25 = vadd.f32 %v8474_v33, %v8208_v51  ;;  %v12749_v32 = vpop.eup %12748  ;;  %v8478_v22 = vsub.f32 1.0, %v12747_v60  ;;  %v8480_v12 = vmul.f32 %v12747_v60, %v15202_v39  ;;  %v16155_v51 = vld [vmem:[#allocation95_spill] sm:$0xff]  ;;  %v16156_v33 = vld [vmem:[#allocation96_spill] sm:$0xff] }
0x179a   : > { %v16158_v60 = vld [vmem:[#allocation100_spill] sm:$0xff] }
0x179b   : > { %12750 = vtanh.f32 %v8475_v25  ;;  %v16157_v25 = vld [vmem:[#allocation97_spill] sm:$0xff] }
0x17a8   : > { %v12751_v48 = vpop.eup %12750 }
0x17a9   : > { %v8477_v23 = vmul.f32 %v12751_v48, %v12749_v32  ;;  %v16159_v32 = vld [vmem:[#allocation98_spill] sm:$0xff]  ;;  %v16160_v48 = vld [vmem:[#allocation99_spill] sm:$0xff] }
0x17ab   : > { %v8479_v15 = vmul.f32 %v8478_v22, %v8477_v23  ;;  %v16161_v23 = vld [vmem:[#allocation101_spill] sm:$0xff]  ;;  %v16162_v22 = vld [vmem:[#allocation102_spill] sm:$0xff] }
0x17ad   : > { %v15456_v56 = vadd.f32 %v8480_v12, %v8479_v15  ;;  %v16163_v15 = vld [vmem:[#allocation103_spill] sm:$0xff]  ;;  %v16164_v12 = vld [vmem:[#allocation106_spill] sm:$0xff] }
0x17af   : > { %v15460_v38 = vpack.c.bf16 %v15456_v56, %v15456_v56 }
0x17b1   : > { %8736 = vmatmul.mubr.bf16.vlgmr.msra.gmra.mxu0 %v15460_v38  ;;  %8777 = vmatmul.mubr.bf16.vlgmr.msra.gmra.mxu1 %v15460_v38 }
0x17b2   : > { %8946 = vmatpush1.bf16.msra.mxu0 %v15204_v1  ;;  %11552 = vmatpush3.bf16.msra.mxu1 %v12308_v58  ;;  %v16122_v1 = vld [vmem:[#allocation70_spill] sm:$0xff] }
0x17b3   : > { %8947 = vmatprep.subr.bf16.mxu0 %v16119_v21  ;;  %11553 = vmatprep.subr.bf16.mxu1 %v15839_v42  ;;  %v12318_v58 = vld [vmem:[#allocation19 + $0xac] ss:$12 sps:$4 sm:$0xff]  }
0x17b4   : > { %8977 = vmatprep.mubr.bf16.mxu0 %v15838_v4  ;;  %11567 = vmatprep.mubr.msk.bf16.mxu1 %vm13170_vm0, %v15839_v42 }
0x17b6   : > { %8948 = vmatpush1.bf16.msra.mxu0 %v16120_v34  ;;  %11554 = vmatpush3.bf16.msra.mxu1 %v12309_v19 }
0x17b7   : > { %8949 = vmatprep.subr.bf16.mxu0 %v16121_v20  ;;  %11555 = vmatprep.subr.bf16.mxu1 %v15839_v42  ;;  %v16165_v20 = vld [vmem:[#allocation43_spill] sm:$0xff] }
0x17ba   : > { %8950 = vmatpush1.bf16.msra.mxu0 %v16122_v1  ;;  %11556 = vmatpush3.bf16.msra.mxu1 %v12310_v6  ;;  %v9987_v1 = vmul.f32 -1.442695, %v16165_v20  ;;  %v12323_v20 = vld [vmem:[#allocation19 + $0x98] ss:$12 sps:$4 sm:$0xff]  }
0x17bb   : > { %8951 = vmatprep.subr.bf16.mxu0 %v16123_v35  ;;  %11557 = vmatprep.subr.bf16.mxu1 %v15839_v42 }
0x17bc   : > { %12752 = vpow2.f32 %v9987_v1  ;;  %v12326_v1 = vld [vmem:[#allocation19 + $0x7c] ss:$12 sps:$4 sm:$0xff]  }
0x17be   : > { %8952 = vmatpush1.bf16.msra.mxu0 %v16124_v47  ;;  %11558 = vmatpush3.bf16.msra.mxu1 %v12311_v7 }
0x17bf   : > { %8953 = vmatprep.subr.bf16.mxu0 %v16125_v14  ;;  %11559 = vmatprep.subr.bf16.mxu1 %v15839_v42 }
0x17c2   : > { %8954 = vmatpush1.bf16.msra.mxu0 %v16126_v63  ;;  %11560 = vmatpush3.bf16.msra.mxu1 %v12312_v29 }
0x17c3   : > { %8955 = vmatprep.subr.bf16.mxu0 %v16127_v5  ;;  %11561 = vmatprep.subr.bf16.mxu1 %v15839_v42 }
0x17c6   : > { %8956 = vmatpush1.bf16.msra.mxu0 %v16128_v30  ;;  %11562 = vmatpush3.bf16.msra.mxu1 %v12313_v46  ;;  %v8521_v46 = vld [vmem:[%s15615_s3] sm:$0xf] }
0x17c7   : > { %8957 = vmatprep.subr.bf16.mxu0 %v16129_v44  ;;  %11563 = vmatprep.subr.bf16.mxu1 %v15839_v42  ;;  %v8526_v5 = vrot.slane %v8521_v46, %v15980_v41 }
0x17c9   : > { %v12753_v14 = vpop.eup %12752 }
0x17ca   : > { %8958 = vmatpush1.bf16.msra.mxu0 %v16130_v43  ;;  %11564 = vmatpush3.bf16.msra.mxu1 %v12314_v11  ;;  %v787_v63 = vadd.f32 1.0, %v12753_v14  ;;  %v12334_v14 = vld [vmem:[#allocation19 + $0x4c] ss:$12 sps:$4 sm:$0xff]  }
0x17cb   : > { %8959 = vmatprep.subr.bf16.mxu0 %v16131_v3  ;;  %11565 = vmatprep.subr.bf16.mxu1 %v15839_v42 }
0x17cc   : > { %12754 = vrcp.f32 %v787_v63  ;;  %v12335_v63 = vld [vmem:[#allocation19 + $0x50] ss:$12 sps:$4 sm:$0xff]  }
0x17ce   : > { %8960 = vmatpush1.bf16.msra.mxu0 %v16132_v8  ;;  %11566 = vmatpush3.bf16.msra.mxu1 %v12315_v26  ;;  %v8534_v26 = vrot.slane %v8521_v46, %v15954_v49 }
0x17cf   : > { %9270 = vmatprep.subr.bf16.mxu0 %v16133_v62  ;;  %9311 = vmatprep.subr.bf16.mxu1 %v16134_v54  ;;  %v8530_v62 = vrot.slane %v8521_v46, %v15981_v55 }
0x17d1   : > { %8978 = vmatmul.mubr.bf16.vlgmr.msra.gmra.mxu0 %v15380_v18  ;;  %11568 = vmatmul.mubr.bf16.vlgmr.msra.gmra.mxu1 %v15380_v18  ;;  %v16143_v18 = vld [vmem:[#allocation50_spill] sm:$0xff] }
0x17d2   : > { %9271 = vmatpush1.bf16.msra.mxu0 %v16135_v52  ;;  %9312 = vmatpush1.bf16.msra.mxu1 %v16136_v28 }
0x17d3   : > { %9272 = vmatprep.subr.bf16.mxu0 %v16137_v40  ;;  %9313 = vmatprep.subr.bf16.mxu1 %v16138_v61 }
0x17d4   : > { %9302 = vmatprep.mubr.bf16.mxu0 %v15838_v4  ;;  %9343 = vmatprep.mubr.bf16.mxu1 %v15838_v4 }
0x17d6   : > { %9273 = vmatpush1.bf16.msra.mxu0 %v16139_v37  ;;  %9314 = vmatpush1.bf16.msra.mxu1 %v16140_v45 }
0x17d7   : > { %9274 = vmatprep.subr.bf16.mxu0 %v16141_v27  ;;  %9315 = vmatprep.subr.bf16.mxu1 %v16142_v31 }
0x17d9   : > { %v12755_v27 = vpop.eup %12754 }
0x17da   : > { %9275 = vmatpush1.bf16.msra.mxu0 %v16143_v18  ;;  %9316 = vmatpush1.bf16.msra.mxu1 %v16144_v17 }
0x17db   : > { %9276 = vmatprep.subr.bf16.mxu0 %v16145_v24  ;;  %9317 = vmatprep.subr.bf16.mxu1 %v16146_v50 }
0x17de   : > { %9277 = vmatpush1.bf16.msra.mxu0 %v16147_v9  ;;  %9318 = vmatpush1.bf16.msra.mxu1 %v16148_v57 }
0x17df   : > { %9278 = vmatprep.subr.bf16.mxu0 %v16149_v2  ;;  %9319 = vmatprep.subr.bf16.mxu1 %v16150_v53  ;;  %v8538_v53 = vrot.slane %v8521_v46, %v15863_v10  ;;  %v12338_v46 = vld [vmem:[#allocation19 + $0x34] ss:$12 sps:$4 sm:$0xff]  }
0x17e2   : > { %9279 = vmatpush1.bf16.msra.mxu0 %v16151_v36  ;;  %9320 = vmatpush1.bf16.msra.mxu1 %v16152_v0 }
0x17e3   : > { %9280 = vmatprep.subr.bf16.mxu0 %v16153_v16  ;;  %9321 = vmatprep.subr.bf16.mxu1 %v16154_v59 }
0x17e6   : > { %9281 = vmatpush1.bf16.msra.mxu0 %v16155_v51  ;;  %9322 = vmatpush1.bf16.msra.mxu1 %v16156_v33 }
0x17e7   : > { %9282 = vmatprep.subr.bf16.mxu0 %v16157_v25  ;;  %9323 = vmatprep.subr.bf16.mxu1 %v16158_v60 }
0x17ea   : > { %9283 = vmatpush1.bf16.msra.mxu0 %v16159_v32  ;;  %9324 = vmatpush1.bf16.msra.mxu1 %v16160_v48 }
0x17eb   : > { %9284 = vmatprep.subr.bf16.mxu0 %v16161_v23  ;;  %9325 = vmatprep.subr.bf16.mxu1 %v16162_v22 }
0x17ee   : > { %9285 = vmatpush1.bf16.msra.mxu0 %v16163_v15  ;;  %9326 = vmatpush1.bf16.msra.mxu1 %v16164_v12 }
0x17ef   : > { %11571 = vmatprep.subr.bf16.mxu1 %v15839_v42  ;;  %9512 = vmatprep.subr.bf16.mxu0 %v12318_v58  ;;  %v12316_v58 = vld [vmem:[#allocation19 + $0xa8] ss:$12 sps:$4 sm:$0xff]  }
0x1871   : > { %v8737_v19 = vpop.f32.mrf.mxu0  ;;  %v8778_v21 = vpop.f32.mrf.mxu1 }
0x1872   : > { %v8738_v30 = vadd.f32 %v8737_v19, %v8526_v5  ;;  %v8779_v40 = vadd.f32 %v8778_v21, %v8534_v26  ;;  %v12319_v19 = vld [vmem:[#allocation19 + $0xb0] ss:$12 sps:$4 sm:$0xff]  }
0x1873   : > { %v8739_v34 = vpop.f32.mrf.mxu0  ;;  %v8780_v6 = vpop.f32.mrf.mxu1  ;;  %v12336_v5 = vld [vmem:[#allocation19 + $0x30] ss:$12 sps:$4 sm:$0xff]  }
0x1874   : > { %v8740_v45 = vadd.f32 %v8739_v34, %v8530_v62  ;;  %v9040_v18 = vadd.f32 %v12755_v27, %v8779_v40  ;;  %v8781_v59 = vadd.f32 %v8780_v6, %v8538_v53  ;;  %v12322_v34 = vld [vmem:[#allocation19 + $0x94] ss:$12 sps:$4 sm:$0xff]   ;;  %v12320_v6 = vld [vmem:[#allocation19 + $0x90] ss:$12 sps:$4 sm:$0xff]   ;;  %v12350_v40 = vld [vmem:[#allocation22 + $0x28] sm:$0xff]  }
0x1875   : > { %v8741_v7 = vpop.f32.mrf.mxu0  ;;  %v8782_v35 = vpop.f32.mrf.mxu1  ;;  %v12346_v26 = vld [vmem:[#allocation19 + $0x4] ss:$12 sps:$4 sm:$0xff]  }
0x1876   : > { %v10724_v24 = vmul.f32 -1.442695, %v9040_v18  ;;  %v12327_v7 = vld [vmem:[#allocation19 + $0x80] ss:$12 sps:$4 sm:$0xff]   ;;  %v12330_v35 = vld [vmem:[#allocation19 + $0x64] ss:$12 sps:$4 sm:$0xff]  }
0x1877   : > { %v8742_v47 = vpop.f32.mrf.mxu0  ;;  %v8783_v29 = vpop.f32.mrf.mxu1  ;;  %v16166_v62 = vld [vmem:[#allocation41_spill] sm:$0xff] }
0x1878   : > { %v12328_v47 = vld [vmem:[#allocation19 + $0x60] ss:$12 sps:$4 sm:$0xff]   ;;  %v12331_v29 = vld [vmem:[#allocation19 + $0x68] ss:$12 sps:$4 sm:$0xff]  }
0x1891   : > { %v8979_v11 = vpop.f32.mrf.mxu0  ;;  %v9020_v44 = vpop.f32.mrf.mxu1 }
0x1892   : > { %v9026_v43 = vadd.f32 %v8979_v11, %v8738_v30  ;;  %v12339_v30 = vld [vmem:[#allocation19 + $0x38] ss:$12 sps:$4 sm:$0xff]   ;;  %v12342_v11 = vld [vmem:[#allocation19 + $0x1c] ss:$12 sps:$4 sm:$0xff]  }
0x1893   : > { %v8981_v3 = vpop.f32.mrf.mxu0  ;;  %v11569_v8 = vpop.f32.mrf.mxu1 }
0x1894   : > { %v10722_v54 = vmul.f32 -1.442695, %v9026_v43  ;;  %v9027_v31 = vadd.f32 %v8981_v3, %v8740_v45  ;;  %v12343_v43 = vld [vmem:[#allocation19 + $0x20] ss:$12 sps:$4 sm:$0xff]   ;;  %v12347_v8 = vld [vmem:[#allocation19 + $0x8] ss:$12 sps:$4 sm:$0xff]  }
0x1895   : > { %v8983_v52 = vpop.f32.mrf.mxu0  ;;  %v9023_v28 = vpop.f32.mrf.mxu1  ;;  %v12344_v3 = vld [vmem:[#allocation19] ss:$12 sps:$4 sm:$0xff]  }
0x1896   : > { %12756 = vpow2.f32 %v10722_v54  ;;  %v10723_v17 = vmul.f32 -1.442695, %v9027_v31  ;;  %v9628_v54 = vpack.c.bf16 %v15202_v39, %v16166_v62  ;;  %v12348_v52 = vld [vmem:[#allocation22 + $0x38] sm:$0xff]   ;;  %v12349_v28 = vld [vmem:[#allocation22 + $0x30] sm:$0xff]  }
0x1897   : > { %v8984_v61 = vpop.f32.mrf.mxu0  ;;  %v11570_v37 = vpop.f32.mrf.mxu1  ;;  %v12353_v39 = vld [vmem:[#allocation22 + $0x10] sm:$0xff]  }
0x1898   : > { %12758 = vpow2.f32 %v10723_v17  ;;  %v12352_v61 = vld [vmem:[#allocation22 + $0x18] sm:$0xff]   ;;  %v12355_v37 = vld [vmem:[#allocation22] sm:$0xff]   ;;  %v16167_v17 = vld [vmem:[#allocation42_spill] sm:$0xff] }
0x1899   : > { %12760 = vpow2.f32 %v10724_v24  ;;  %v10007_v24 = vmul.f32 -1.442695, %v16167_v17 }
0x18a3   : > { %v12757_v50 = vpop.eup %12756 }
0x18a4   : > { %v9034_v9 = vadd.f32 1.0, %v12757_v50 }
0x18a5   : > { %v12759_v57 = vpop.eup %12758 }
0x18a6   : > { %12762 = vrcp.f32 %v9034_v9  ;;  %v12761_v2 = vpop.eup %12760  ;;  %v9035_v36 = vadd.f32 1.0, %v12759_v57 }
0x18a7   : > { %v9044_v16 = vadd.f32 1.0, %v12761_v2 }
0x18a8   : > { %12764 = vrcp.f32 %v9035_v36 }
0x18a9   : > { %12766 = vrcp.f32 %v9044_v16 }
0x18b3   : > { %v12763_v0 = vpop.eup %12762 }
0x18b4   : > { %v9047_v51 = vmul.f32 %v12763_v0, %v9020_v44  ;;  %v12340_v44 = vld [vmem:[#allocation19 + $0x18] ss:$12 sps:$4 sm:$0xff]   ;;  %v9088_v0 = vld [vmem:[%s15619_s7] sm:$0xf] }
0x18b5   : > { %v12765_v25 = vpop.eup %12764  ;;  %v9093_v16 = vrot.slane %v9088_v0, %v15980_v41 }
0x18b6   : > { %v9048_v33 = vadd.f32 %v9047_v51, %v8781_v59  ;;  %v12767_v60 = vpop.eup %12766  ;;  %v9051_v23 = vsub.f32 1.0, %v12765_v25  ;;  %v9053_v15 = vmul.f32 %v12765_v25, %v15376_v13  ;;  %v12324_v13 = vld [vmem:[#allocation19 + $0x78] ss:$12 sps:$4 sm:$0xff]  }
0x18b8   : > { %12768 = vtanh.f32 %v9048_v33 }
0x18b9   : > { %12770 = vpow2.f32 %v10007_v24 }
0x18c5   : > { %v12769_v32 = vpop.eup %12768 }
0x18c6   : > { %v9050_v48 = vmul.f32 %v12769_v32, %v12767_v60  ;;  %v12771_v53 = vpop.eup %12770  ;;  %v9101_v60 = vrot.slane %v9088_v0, %v15954_v49 }
0x18c7   : > { %v1016_v36 = vadd.f32 1.0, %v12771_v53 }
0x18c8   : > { %v9052_v22 = vmul.f32 %v9051_v23, %v9050_v48  ;;  %v9097_v23 = vrot.slane %v9088_v0, %v15981_v55 }
0x18c9   : > { %12772 = vrcp.f32 %v1016_v36 }
0x18ca   : > { %v9054_v12 = vadd.f32 %v9053_v15, %v9052_v22 }
0x18cc   : > { %v9055_v21 = vpack.c.bf16 %v9054_v12, %v9054_v12 }
0x18ce   : > { %9303 = vmatmul.mubr.bf16.vlgmr.msra.gmra.mxu0 %v9055_v21  ;;  %9344 = vmatmul.mubr.bf16.vlgmr.msra.gmra.mxu1 %v9055_v21 }
0x18cf   : > { %9513 = vmatpush1.bf16.msra.mxu0 %v12316_v58  ;;  %11572 = vmatpush3.bf16.msra.mxu1 %v12319_v19 }
0x18d0   : > { %9514 = vmatprep.subr.bf16.mxu0 %v12322_v34  ;;  %11573 = vmatprep.subr.bf16.mxu1 %v15839_v42 }
0x18d1   : > { %9544 = vmatprep.mubr.bf16.mxu0 %v15838_v4  ;;  %11587 = vmatprep.mubr.msk.bf16.mxu1 %vm13170_vm0, %v15839_v42  ;;  %v12332_v4 = vld [vmem:[#allocation19 + $0x48] ss:$12 sps:$4 sm:$0xff]  }
0x18d3   : > { %9515 = vmatpush1.bf16.msra.mxu0 %v12320_v6  ;;  %11574 = vmatpush3.bf16.msra.mxu1 %v12323_v20 }
0x18d4   : > { %9516 = vmatprep.subr.bf16.mxu0 %v12326_v1  ;;  %11575 = vmatprep.subr.bf16.mxu1 %v15839_v42 }
0x18d6   : > { %v12773_v41 = vpop.eup %12772 }
0x18d7   : > { %9517 = vmatpush1.bf16.msra.mxu0 %v12324_v13  ;;  %11576 = vmatpush3.bf16.msra.mxu1 %v12327_v7 }
0x18d8   : > { %9518 = vmatprep.subr.bf16.mxu0 %v12330_v35  ;;  %11577 = vmatprep.subr.bf16.mxu1 %v15839_v42 }
0x18db   : > { %9519 = vmatpush1.bf16.msra.mxu0 %v12328_v47  ;;  %11578 = vmatpush3.bf16.msra.mxu1 %v12331_v29  ;;  %v9105_v47 = vrot.slane %v9088_v0, %v15863_v10 }
0x18dc   : > { %9520 = vmatprep.subr.bf16.mxu0 %v12334_v14  ;;  %11579 = vmatprep.subr.bf16.mxu1 %v15839_v42 }
0x18df   : > { %9521 = vmatpush1.bf16.msra.mxu0 %v12332_v4  ;;  %11580 = vmatpush3.bf16.msra.mxu1 %v12335_v63 }
0x18e0   : > { %9522 = vmatprep.subr.bf16.mxu0 %v12338_v46  ;;  %11581 = vmatprep.subr.bf16.mxu1 %v15839_v42 }
0x18e3   : > { %9523 = vmatpush1.bf16.msra.mxu0 %v12336_v5  ;;  %11582 = vmatpush3.bf16.msra.mxu1 %v12339_v30 }
0x18e4   : > { %9524 = vmatprep.subr.bf16.mxu0 %v12342_v11  ;;  %11583 = vmatprep.subr.bf16.mxu1 %v15839_v42 }
0x18e7   : > { %9525 = vmatpush1.bf16.msra.mxu0 %v12340_v44  ;;  %11584 = vmatpush3.bf16.msra.mxu1 %v12343_v43 }
0x18e8   : > { %9526 = vmatprep.subr.bf16.mxu0 %v12346_v26  ;;  %11585 = vmatprep.subr.bf16.mxu1 %v15839_v42  ;;  %v12351_v42 = vld [vmem:[#allocation22 + $0x20] sm:$0xff]  }
0x18eb   : > { %9527 = vmatpush1.bf16.msra.mxu0 %v12344_v3  ;;  %11586 = vmatpush3.bf16.msra.mxu1 %v12347_v8 }
0x18ec   : > { %11591 = vmatprep.subr.bf16.mxu0 %v12348_v52 }
0x18ee   : > { %9545 = vmatmul.mubr.bf16.vlgmr.msra.gmra.mxu0 %v15460_v38  ;;  %11588 = vmatmul.mubr.bf16.vlgmr.msra.gmra.mxu1 %v15460_v38  ;;  %v12354_v38 = vld [vmem:[#allocation22 + $0x8] sm:$0xff]  }
0x18ef   : > { %11607 = vmatprep.mubr.bf16.mxu0 %v9628_v54  ;;  %11592 = vmatpush3.bf16.msra.mxu0 %v12348_v52  ;;  %v10784_v54 = vld [vmem:[%s15623_s11] ss:$0 sm:$0xff] }
0x18f0   : > { %11593 = vmatprep.subr.bf16.mxu0 %v12349_v28 }
0x18f3   : > { %11594 = vmatpush3.bf16.msra.mxu0 %v12349_v28 }
0x18f4   : > { %11595 = vmatprep.subr.bf16.mxu0 %v12350_v40 }
0x18f7   : > { %11596 = vmatpush3.bf16.msra.mxu0 %v12350_v40 }
0x18f8   : > { %11597 = vmatprep.subr.bf16.mxu0 %v12351_v42 }
0x18fb   : > { %11598 = vmatpush3.bf16.msra.mxu0 %v12351_v42 }
0x18fc   : > { %11599 = vmatprep.subr.bf16.mxu0 %v12352_v61 }
0x18ff   : > { %11600 = vmatpush3.bf16.msra.mxu0 %v12352_v61 }
0x1900   : > { %11601 = vmatprep.subr.bf16.mxu0 %v12353_v39 }
0x1903   : > { %11602 = vmatpush3.bf16.msra.mxu0 %v12353_v39 }
0x1904   : > { %11603 = vmatprep.subr.bf16.mxu0 %v12354_v38 }
0x1907   : > { %11604 = vmatpush3.bf16.msra.mxu0 %v12354_v38 }
0x1908   : > { %11605 = vmatprep.subr.bf16.mxu0 %v12355_v37 }
0x190b   : > { %11606 = vmatpush3.bf16.msra.mxu0 %v12355_v37 }
0x198e   : > { %v9304_v45 = vpop.f32.mrf.mxu0  ;;  %v9345_v27 = vpop.f32.mrf.mxu1 }
0x198f   : > { %v9305_v59 = vadd.f32 %v9304_v45, %v9093_v16  ;;  %v9346_v58 = vadd.f32 %v9345_v27, %v9101_v60 }
0x1990   : > { %v9306_v31 = vpop.f32.mrf.mxu0  ;;  %v9347_v18 = vpop.f32.mrf.mxu1 }
0x1991   : > { %v9307_v34 = vadd.f32 %v9306_v31, %v9097_v23  ;;  %v9607_v20 = vadd.f32 %v12773_v41, %v9346_v58  ;;  %v9348_v63 = vadd.f32 %v9347_v18, %v9105_v47 }
0x1992   : > { %v9308_v50 = vpop.f32.mrf.mxu0  ;;  %v9349_v9 = vpop.f32.mrf.mxu1 }
0x1993   : > { %v10783_v13 = vmul.f32 -1.442695, %v9607_v20 }
0x1994   : > { %v9309_v57 = vpop.f32.mrf.mxu0  ;;  %v9350_v2 = vpop.f32.mrf.mxu1 }
0x19ae   : > { %v9546_v51 = vpop.f32.mrf.mxu0  ;;  %v9587_v33 = vpop.f32.mrf.mxu1 }
0x19af   : > { %v9593_v25 = vadd.f32 %v9546_v51, %v9305_v59 }
0x19b0   : > { %v9548_v32 = vpop.f32.mrf.mxu0  ;;  %v11589_v48 = vpop.f32.mrf.mxu1 }
0x19b1   : > { %v10781_v22 = vmul.f32 -1.442695, %v9593_v25  ;;  %v9594_v6 = vadd.f32 %v9548_v32, %v9307_v34 }
0x19b2   : > { %v9550_v15 = vpop.f32.mrf.mxu0  ;;  %v9590_v12 = vpop.f32.mrf.mxu1 }
0x19b3   : > { %12774 = vpow2.f32 %v10781_v22  ;;  %v10782_v1 = vmul.f32 -1.442695, %v9594_v6 }
0x19b4   : > { %v9551_v19 = vpop.f32.mrf.mxu0  ;;  %v11590_v21 = vpop.f32.mrf.mxu1 }
0x19b5   : > { %12776 = vpow2.f32 %v10782_v1 }
0x19b6   : > { %12778 = vpow2.f32 %v10783_v13 }
0x19c0   : > { %v12775_v7 = vpop.eup %12774 }
0x19c1   : > { %v9601_v49 = vadd.f32 1.0, %v12775_v7 }
0x19c2   : > { %v12777_v35 = vpop.eup %12776 }
0x19c3   : > { %12780 = vrcp.f32 %v9601_v49  ;;  %v12779_v55 = vpop.eup %12778  ;;  %v9602_v29 = vadd.f32 1.0, %v12777_v35 }
0x19c4   : > { %v9611_v4 = vadd.f32 1.0, %v12779_v55 }
0x19c5   : > { %12782 = vrcp.f32 %v9602_v29 }
0x19c6   : > { %12784 = vrcp.f32 %v9611_v4 }
0x19d0   : > { %v12781_v14 = vpop.eup %12780 }
0x19d1   : > { %v9614_v46 = vmul.f32 %v12781_v14, %v9587_v33 }
0x19d2   : > { %v12783_v30 = vpop.eup %12782 }
0x19d3   : > { %v9615_v5 = vadd.f32 %v9614_v46, %v9348_v63  ;;  %v12785_v11 = vpop.eup %12784  ;;  %v9618_v26 = vsub.f32 1.0, %v12783_v30  ;;  %v9620_v8 = vmul.f32 %v12783_v30, %v15456_v56 }
0x19d5   : > { %12786 = vtanh.f32 %v9615_v5 }
0x19e2   : > { %v12787_v44 = vpop.eup %12786 }
0x19e3   : > { %v9617_v43 = vmul.f32 %v12787_v44, %v12785_v11 }
0x19e5   : > { %v9619_v3 = vmul.f32 %v9618_v26, %v9617_v43 }
0x19e7   : > { %v9621_v10 = vadd.f32 %v9620_v8, %v9619_v3 }
0x19e9   : > { %v9629_v62 = vpack.c.bf16 %v9621_v10, %v15456_v56 }
0x19eb   : > { %11608 = vmatmul.mubr.bf16.vlgmr.msra.gmra.mxu0 %v9629_v62 }
0x1aab   : > { %v11609_v52 = vpop.f32.mrf.mxu0 }
0x1aac   : > { %v9744_v28 = vadd.f32 %v11609_v52, %v10784_v54 }
0x1aad   : > { %v9735_v40 = vpop.f32.mrf.mxu0 }
0x1aae   : > { %9752 = vst [vmem:[%s572_s18 + $0x10] sm:$0xff] %v9744_v28  ;;  %v9736_v42 = vadd.f32 %v10784_v54, %v9735_v40 }
0x1aaf   : > { %v11610_v61 = vpop.f32.mrf.mxu0 }
0x1ab0   : > { %9750 = vst [vmem:[%s572_s18] sm:$0xff] %v9736_v42  ;;  %v9747_v56 = vadd.f32 %v11610_v61, %v10784_v54 }
0x1ab1   : > { %v9738_v39 = vpop.f32.mrf.mxu0 }
0x1ab2   : > { %9753 = vst [vmem:[%s572_s18 + $0x18] sm:$0xff] %v9747_v56  ;;  %v9739_v38 = vadd.f32 %v10784_v54, %v9738_v39 }
0x1ab4   : > { %9751 = vst [vmem:[%s572_s18 + $0x8] sm:$0xff] %v9739_v38 }
0x1ab5   : > { %13078 = shalt.err (!%p13075_p7)
}
0x1ab6   : > { %s13079_s4 = scalar_lea.hbm %s15569_s26, 512  ;;  %s13083_s17 = scalar_lea.hbm %s15624_s12, 1024 }
0x1ab7   : > { %p13080_p8 = scmp.ne.s32.totalorder %s15569_s26, %s13079_s4  ;;  %p13084_p10 = scmp.lt.s32.totalorder %s15569_s26, %s15624_s12 }
0x1ab8   : > { %p13085_p9 = scmp.lt.s32.totalorder %s13083_s17, %s13079_s4 }
0x1ab9   : > { %p13081_p11 = pnand %p13080_p8, %p16168_p5 }
0x1aba   : > { %p13086_p12 = por %p13085_p9, %p13084_p10 }
0x1abb   : > { %p13082_p2 = pneg %p13081_p11 }
0x1abd   : > { %p13087_p0 = pnand %p13086_p12, %p13082_p2 }
0x1abf   : > { %13090 = shalt.err (!%p13087_p0)
}
0x1ac0   : > { %s13172_s20 = smov 128   ;;  %s13173_s19 = smov 8  }
0x1ac1   : > { %11645 = dma.vmem_to_hbm [thread:$0]  (%p16168_p5), %s15564_s13, 512, %s15569_s26, %s9755_s29, %s13172_s20, %s13172_s20, %s13173_s19  }
0x1ac2 PF: > { %s9783_s18 = sand.u32 1, %s13137_s21   ;;  %p16169_p1 = scmp.ne.s32.totalorder %s15806_s15, 0 }
0x1ac3   : > { %p16170_p4 = scmp.ge.s32.totalorder %s13149_s24, 2  ;;  %s9784_s9 = scalar_lea.sflag [#allocation10], %s9783_s18 }
0x1ac5   : > { %p11677_p6 = pnand %p16170_p4, %p16169_p1 }
0x1ac7   : > { %p11678_p13 = pneg %p11677_p6 }
0x1ac9   : > { %13132 = dma.done.wait (%p11678_p13), %s9784_s9, 512  }
0x1aca   : > { %13134 = vsyncadd (%p11678_p13), %s9784_s9, 4294966784  ;;  %s16171_s5 = sld [smem:[#allocation31_spill]]  ;;  %p31_p3 = scmp.ge.s32.totalorder %s13360_s16, 4  }
0x1acb   : > { %s16172_s23 = sld [smem:[#allocation32_spill]]  ;;  %s16173_s21 = smov %s13141_s22 }
0x1acc   : > { %s16175_s24 = smov %s13360_s16  ;;  %33 = sbr.rel (!%p31_p3) target bundleno = 19 (0x13), region = 202 }
0x1ad0   : > { %s16174_s22 = smov %s16171_s5 }
0x1ad1   :  { %9789 = vsyncpa [#allocation9], 1 }
0x1ad2   :  { %9791 = vsyncpa [#allocation9 + $0x1], 1 }
0x1ad3   :  { %9792 = vsyncpa [#allocation12], 1 }
0x1ad4   :  { %9794 = vsyncpa [#allocation12 + $0x1], 1 }
0x1ad5   :  { %9795 = vsyncpa [#allocation15], 1 }
0x1ad6   :  { %9796 = vsyncpa [#allocation18], 1 }
0x1ad7   :  { %9797 = vsyncpa [#allocation21], 1 }
0x1ad8   :  { %9798 = vsyncpa [#allocation10], 1 }
0x1ad9   :  { %9800 = vsyncpa [#allocation10 + $0x1], 1 }

</bundles_post_ra>
